<compile_context>
chip_gen: v6e
topology: v6e:2x2x1
jax: 0.10.0
libtpu: 0.0.40
codegen_flags: <defaults>
</compile_context>

<pallas_src>
import functools

import jax
import jax.numpy as jnp
from jax.experimental import pallas as pl
from jax.experimental.pallas import tpu as pltpu

_EPS = 1e-5


# ---------------------------------------------------------------------------
# in-kernel helpers
# ---------------------------------------------------------------------------
def _edge_masks(nb, H, W):
    """(bandM, 1) bool masks: True where the (h+dh, w+dw) source pixel of a 3x3 tap lies
    inside its own image (handles both the image borders and cross-image contamination
    inside a multi-image band).  Two iotas + a few compares: cheap VPU work."""
    bandM = nb * H * W
    hh = jax.lax.broadcasted_iota(jnp.int32, (nb, H, W, 1), 1).reshape(bandM, 1)
    ww = jax.lax.broadcasted_iota(jnp.int32, (nb, H, W, 1), 2).reshape(bandM, 1)
    masks = {}
    for dh in (-1, 0, 1):
        for dw in (-1, 0, 1):
            if dh == 0 and dw == 0:
                continue
            masks[(dh, dw)] = ((hh + dh >= 0) & (hh + dh < H) &
                               (ww + dw >= 0) & (ww + dw < W))
    return masks


def _conv3x3_accum(slab_ref, w_ref, out_ref, masks, pad, bandM, W):
    """3x3 / stride-1 / pad-1 conv of the band as 9 per-tap MXU matmuls accumulated in
    place into the f32 output block (no im2col slab, no concatenate, no rolls).

    slab_ref : VMEM scratch (pad + bandM + pad, Cin), compute dtype, centre rows = band.
    w_ref    : VMEM resident (9, Cin, Cout), compute dtype.
    A spatial (dh, dw) tap is a statically-offset sublane load from the padded slab;
    out-of-image contributions are zeroed with the precomputed masks.
    """
    t = 0
    for dh in (-1, 0, 1):
        for dw in (-1, 0, 1):
            off = dh * W + dw
            tap = slab_ref[pad + off: pad + off + bandM, :]
            if not (dh == 0 and dw == 0):
                tap = jnp.where(masks[(dh, dw)], tap, jnp.zeros_like(tap))
            contrib = jnp.dot(tap, w_ref[t], preferred_element_type=jnp.float32)
            if t == 0:
                out_ref[...] = contrib
            else:
                out_ref[...] += contrib
            t += 1


def _band_stats(y, s_ref, bandM):
    """Per-band BN partials: row 0 = sum over the band, row 1 = SSD around the band mean.
    Combined exactly across bands outside the kernel (Chan's parallel-variance formula)."""
    bm = jnp.mean(y, axis=0, keepdims=True)                       # (1, C)
    ssd = jnp.sum(jnp.square(y - bm), axis=0, keepdims=True)      # (1, C)
    s_ref[0, :, :] = jnp.concatenate([bm * bandM, ssd], axis=0)   # (2, C)


def _fill_slab(slab_ref, band_vals, pad, bandM):
    """Write the band (cast to the slab compute dtype) into the centre of the padded slab
    and zero the top/bottom pads."""
    C = band_vals.shape[-1]
    slab_ref[0:pad, :] = jnp.zeros((pad, C), slab_ref.dtype)
    slab_ref[pad + bandM: pad + bandM + pad, :] = jnp.zeros((pad, C), slab_ref.dtype)
    slab_ref[pad: pad + bandM, :] = band_vals.astype(slab_ref.dtype)


# ---------------------------------------------------------------------------
# kernels
# ---------------------------------------------------------------------------
def _conv1_kernel(nb, H, W, Cin, Cout, has_ds, *refs):
    if has_ds:
        x_ref, w1_ref, wd_ref, y1_ref, s1_ref, yd_ref, sd_ref, slab = refs
    else:
        x_ref, w1_ref, y1_ref, s1_ref, slab = refs
    bandM = nb * H * W
    pad = ((W + 1 + 7) // 8) * 8
    masks = _edge_masks(nb, H, W)

    xb = x_ref[...]                                               # (bandM, Cin) f32
    _fill_slab(slab, xb, pad, bandM)                              # cast to compute dtype here

    _conv3x3_accum(slab, w1_ref, y1_ref, masks, pad, bandM, W)    # conv1 -> y1 (f32)
    _band_stats(y1_ref[...], s1_ref, bandM)                       # BN1 partials

    if has_ds:                                                    # 1x1 downsample conv
        yd_ref[...] = jnp.dot(xb.astype(wd_ref.dtype), wd_ref[...],
                              preferred_element_type=jnp.float32)
        _band_stats(yd_ref[...], sd_ref, bandM)                   # BNd partials


def _conv2_kernel(nb, H, W, C, *refs):
    y1_ref, sc1_ref, sh1_ref, w2_ref, y2_ref, s2_ref, slab = refs
    bandM = nb * H * W
    pad = ((W + 1 + 7) // 8) * 8
    masks = _edge_masks(nb, H, W)

    # BN1-apply (global scale/shift) + ReLU, fused into the conv2 input slab build.
    a1 = jnp.maximum(y1_ref[...] * sc1_ref[...] + sh1_ref[...], 0.0)
    _fill_slab(slab, a1, pad, bandM)

    _conv3x3_accum(slab, w2_ref, y2_ref, masks, pad, bandM, W)    # conv2 -> y2 (f32)
    _band_stats(y2_ref[...], s2_ref, bandM)                       # BN2 partials


def _epilogue_kernel(nb, H, W, Cout, has_ds, fold_w, *refs):
    if has_ds:
        y2_ref, sc2_ref, sh2_ref, yd_ref, scd_ref, shd_ref, out_ref = refs
    else:
        y2_ref, sc2_ref, sh2_ref, id_ref, out_ref = refs
    bandM = nb * H * W

    y = y2_ref[...] * sc2_ref[...] + sh2_ref[...]                 # BN2-apply
    if has_ds:
        idt = yd_ref[...] * scd_ref[...] + shd_ref[...]           # BNd-apply on 1x1 conv
    else:
        idt = id_ref[...]                                         # raw identity (Cin == Cout)
    out = jnp.maximum(y + idt, 0.0)
    if fold_w:                                                    # toy Cout<128: lane-dense fold
        out_ref[...] = out.reshape(nb * H, W * Cout).astype(out_ref.dtype)
    else:
        out_ref[...] = out.astype(out_ref.dtype)


# ---------------------------------------------------------------------------
# XLA glue: exact global BN parameters from per-band partials
# ---------------------------------------------------------------------------
def _bn_fold(stats, gamma, beta, band_count, M):
    s = stats[:, 0, :].astype(jnp.float32)          # per-band sums        (G, C)
    ssd = stats[:, 1, :].astype(jnp.float32)        # per-band centred SSD (G, C)
    mean = jnp.sum(s, axis=0) / M
    band_mean = s / band_count
    var = (jnp.sum(ssd, axis=0) +
           band_count * jnp.sum(jnp.square(band_mean - mean[None, :]), axis=0)) / M
    scale = gamma * jax.lax.rsqrt(var + _EPS)
    shift = beta - mean * scale
    return scale.reshape(1, -1), shift.reshape(1, -1)


# ---------------------------------------------------------------------------
# wrapper
# ---------------------------------------------------------------------------
def residual_block(x_nhwc, params, *, compute_dtype=jnp.bfloat16,
                   band_images=None, vmem_budget_bytes=16 * 1024 * 1024):
    """x_nhwc: (N, H, W, Cin) f32.  Returns (N, H, W, Cout) f32.  stride == 1 only."""
    N, H, W, Cin = x_nhwc.shape
    Cout = params["w1"].shape[-1]
    has_ds = "wd" in params
    if not has_ds:
        assert Cin == Cout, "identity shortcut requires inplanes == planes"
    M = N * H * W
    cd_bytes = jnp.dtype(compute_dtype).itemsize

    # ---- band sizing: largest divisor of N whose working set fits the VMEM budget ----
    if band_images is None:
        per_img = H * W * (Cout * (16 + cd_bytes) + 2 * max(Cin, Cout) * 4)
        band_images = 1
        for cand in range(1, N + 1):
            if N % cand == 0 and cand * per_img <= vmem_budget_bytes:
                band_images = cand
    assert N % band_images == 0
    nb = band_images
    G = N // nb
    bandM = nb * H * W
    pad = ((W + 1 + 7) // 8) * 8

    # ---- layout plumbing only (free reshapes, no jnp.pad, no extra HBM pass) ----
    x2d = x_nhwc.reshape(M, Cin).astype(jnp.float32)
    w1 = params["w1"].reshape(9, Cin, Cout).astype(compute_dtype)    # (3,3,Cin,Cout)->(9,Cin,Cout)
    w2 = params["w2"].reshape(9, Cout, Cout).astype(compute_dtype)
    g1 = params["g1"].astype(jnp.float32); b1 = params["b1"].astype(jnp.float32)
    g2 = params["g2"].astype(jnp.float32); b2 = params["b2"].astype(jnp.float32)

    # ---- VMEM limit sized from the actual band working set (safe for v7x 64 MiB) ----
    f32b = 4
    slab_bytes = (bandM + 2 * pad) * max(Cin, Cout) * cd_bytes
    band_io = 2 * bandM * (max(Cin, Cout) + 3 * Cout) * f32b
    w_bytes = (9 * Cin * Cout + 9 * Cout * Cout + Cin * Cout) * cd_bytes
    vmem_limit = int(min(max(band_io + slab_bytes + w_bytes + (4 << 20), 16 << 20), 64 << 20))
    cp = pltpu.CompilerParams(dimension_semantics=("parallel",),
                              vmem_limit_bytes=vmem_limit)

    band_spec = lambda C: pl.BlockSpec((bandM, C), lambda i: (i, 0))
    full_spec = lambda a: pl.BlockSpec(a.shape, lambda i, _nd=a.ndim: (0,) * _nd)
    stats_spec = pl.BlockSpec((1, 2, Cout), lambda i: (i, 0, 0))
    stats_shape = jax.ShapeDtypeStruct((G, 2, Cout), jnp.float32)
    yband_shape = jax.ShapeDtypeStruct((M, Cout), jnp.float32)
    slab_of = lambda C: pltpu.VMEM((bandM + 2 * pad, C), compute_dtype)

    # ---- pass 1: conv1 (+ optional 1x1 downsample conv) + per-band BN partials ----
    k1 = functools.partial(_conv1_kernel, nb, H, W, Cin, Cout, has_ds)
    in_specs1 = [band_spec(Cin), full_spec(w1)]
    args1 = [x2d, w1]
    out_shapes1 = [yband_shape, stats_shape]
    out_specs1 = [band_spec(Cout), stats_spec]
    if has_ds:
        wd = params["wd"].astype(compute_dtype)
        in_specs1.append(full_spec(wd)); args1.append(wd)
        out_shapes1 += [yband_shape, stats_shape]
        out_specs1 += [band_spec(Cout), stats_spec]
    res1 = pl.pallas_call(
        k1, grid=(G,), in_specs=in_specs1,
        out_shape=tuple(out_shapes1), out_specs=tuple(out_specs1),
        scratch_shapes=[slab_of(Cin)], compiler_params=cp)(*args1)
    if has_ds:
        y1, s1, yd, sd = res1
    else:
        y1, s1 = res1

    sc1, sh1 = _bn_fold(s1, g1, b1, bandM, M)
    if has_ds:
        scd, shd = _bn_fold(sd, params["gd"].astype(jnp.float32),
                            params["bd"].astype(jnp.float32), bandM, M)

    # ---- pass 2: BN1-apply + ReLU + conv2 + per-band BN2 partials ----
    k2 = functools.partial(_conv2_kernel, nb, H, W, Cout)
    y2, s2 = pl.pallas_call(
        k2, grid=(G,),
        in_specs=[band_spec(Cout), full_spec(sc1), full_spec(sh1), full_spec(w2)],
        out_shape=(yband_shape, stats_shape),
        out_specs=(band_spec(Cout), stats_spec),
        scratch_shapes=[slab_of(Cout)], compiler_params=cp)(y1, sc1, sh1, w2)

    sc2, sh2 = _bn_fold(s2, g2, b2, bandM, M)

    # ---- pass 3: BN2-apply + identity add (+ BNd-apply) + final ReLU ----
    fold_w = (Cout % 128 != 0) and ((nb * H) % 8 == 0 or G == 1)
    if fold_w:
        out_shape = jax.ShapeDtypeStruct((N * H, W * Cout), jnp.float32)
        out_spec = pl.BlockSpec((nb * H, W * Cout), lambda i: (i, 0))
    else:
        out_shape = jax.ShapeDtypeStruct((M, Cout), jnp.float32)
        out_spec = band_spec(Cout)
    k3 = functools.partial(_epilogue_kernel, nb, H, W, Cout, has_ds, fold_w)
    in_specs3 = [band_spec(Cout), full_spec(sc2), full_spec(sh2)]
    args3 = [y2, sc2, sh2]
    if has_ds:
        in_specs3 += [band_spec(Cout), full_spec(scd), full_spec(shd)]
        args3 += [yd, scd, shd]
    else:
        in_specs3 += [band_spec(Cin)]
        args3 += [x2d]
    out = pl.pallas_call(
        k3, grid=(G,), in_specs=in_specs3,
        out_shape=out_shape, out_specs=out_spec, compiler_params=cp)(*args3)
    return out.reshape(N, H, W, Cout)


# ---------------- pure-JAX reference (mirrors the PyTorch forward) ----------------
def _ref_block(x_nhwc, params):
    def conv3x3(x, w):
        return jax.lax.conv_general_dilated(
            x, w, (1, 1), ((1, 1), (1, 1)),
            dimension_numbers=("NHWC", "HWIO", "NHWC"))

    def bn(x, g, b):
        m = jnp.mean(x, axis=(0, 1, 2), keepdims=True)
        v = jnp.mean((x - m) ** 2, axis=(0, 1, 2), keepdims=True)
        return (x - m) * jax.lax.rsqrt(v + _EPS) * g + b

    out = jax.nn.relu(bn(conv3x3(x_nhwc, params["w1"]), params["g1"], params["b1"]))
    out = bn(conv3x3(out, params["w2"]), params["g2"], params["b2"])
    if "wd" in params:
        idt = bn(jnp.einsum("nhwc,cd->nhwd", x_nhwc, params["wd"]), params["gd"], params["bd"])
    else:
        idt = x_nhwc
    return jax.nn.relu(out + idt)


if __name__ == "__main__":
    key = jax.random.PRNGKey(0)
    N, H, W = 2, 16, 16
    inplanes, planes = 4, 8                  # inplanes != planes -> downsample path active
    k_x, k_w1, k_w2, k_wd, k_x2, k_w1b, k_w2b = jax.random.split(key, 7)

    # PyTorch-style NCHW input; transpose to NHWC for the kernel (layout glue).
    x_nchw = jax.random.normal(k_x, (N, inplanes, H, W), jnp.float32)
    x_nhwc = jnp.transpose(x_nchw, (0, 2, 3, 1))

    params = {
        "w1": 0.1 * jax.random.normal(k_w1, (3, 3, inplanes, planes), jnp.float32),   # HWIO
        "w2": 0.1 * jax.random.normal(k_w2, (3, 3, planes, planes), jnp.float32),
        "g1": jnp.ones((planes,), jnp.float32), "b1": jnp.zeros((planes,), jnp.float32),
        "g2": jnp.ones((planes,), jnp.float32), "b2": jnp.zeros((planes,), jnp.float32),
        "wd": 0.1 * jax.random.normal(k_wd, (inplanes, planes), jnp.float32),          # 1x1 conv
        "gd": jnp.ones((planes,), jnp.float32), "bd": jnp.zeros((planes,), jnp.float32),
    }
    ref = jax.block_until_ready(_ref_block(x_nhwc, params))

    # --- case 1: downsample path, f32 compute, auto band (single band) ---
    out = jax.block_until_ready(residual_block(x_nhwc, params, compute_dtype=jnp.float32))
    assert out.shape == (N, H, W, planes)
    assert bool(jnp.all(jnp.isfinite(out)))
    assert bool(jnp.allclose(out, ref, atol=1e-4, rtol=1e-4)), (
        f"f32 max abs diff = {float(jnp.max(jnp.abs(out - ref)))}")

    # --- case 1b: same, but force the multi-band grid (per-band BN partials + combine) ---
    out_mb = jax.block_until_ready(
        residual_block(x_nhwc, params, compute_dtype=jnp.float32, band_images=1))
    assert bool(jnp.allclose(out_mb, ref, atol=1e-4, rtol=1e-4)), (
        f"multi-band f32 max abs diff = {float(jnp.max(jnp.abs(out_mb - ref)))}")

    # --- case 2: downsample path, bf16 MXU operands (default; recommended on v6e/v7x) ---
    out_bf = jax.block_until_ready(residual_block(x_nhwc, params))
    rnd = lambda a: a.astype(jnp.bfloat16).astype(jnp.float32)
    params_r = {k: (rnd(v) if k in ("w1", "w2", "wd") else v) for k, v in params.items()}
    ref_bf = jax.block_until_ready(_ref_block(rnd(x_nhwc), params_r))
    assert bool(jnp.all(jnp.isfinite(out_bf)))
    assert bool(jnp.allclose(out_bf, ref_bf, atol=7.5e-2, rtol=5e-2)), (
        f"bf16 max abs diff = {float(jnp.max(jnp.abs(out_bf - ref_bf)))}")

    # --- case 3: identity shortcut (inplanes == planes), f32, multi-band ---
    x2_nhwc = jnp.transpose(
        jax.random.normal(k_x2, (N, planes, H, W), jnp.float32), (0, 2, 3, 1))
    params_id = {
        "w1": 0.1 * jax.random.normal(k_w1b, (3, 3, planes, planes), jnp.float32),
        "w2": 0.1 * jax.random.normal(k_w2b, (3, 3, planes, planes), jnp.float32),
        "g1": jnp.ones((planes,), jnp.float32), "b1": jnp.zeros((planes,), jnp.float32),
        "g2": jnp.ones((planes,), jnp.float32), "b2": jnp.zeros((planes,), jnp.float32),
    }
    out_id = jax.block_until_ready(
        residual_block(x2_nhwc, params_id, compute_dtype=jnp.float32, band_images=1))
    ref_id = jax.block_until_ready(_ref_block(x2_nhwc, params_id))
    assert bool(jnp.allclose(out_id, ref_id, atol=1e-4, rtol=1e-4)), (
        f"identity-path max abs diff = {float(jnp.max(jnp.abs(out_id - ref_id)))}")

    print("KERNEL_OK")
</pallas_src>

<mosaic_0001>
module attributes {stable_mosaic.version = 11 : i64} {
  func.func @_conv1_kernel(%arg0: i32, %arg1: memref<512x4xf32, #tpu.memory_space<vmem>>, %arg2: memref<9x4x8xf32, #tpu.memory_space<vmem>>, %arg3: memref<4x8xf32, #tpu.memory_space<vmem>>, %arg4: memref<512x8xf32, #tpu.memory_space<vmem>>, %arg5: memref<1x2x8xf32, #tpu.memory_space<vmem>>, %arg6: memref<512x8xf32, #tpu.memory_space<vmem>>, %arg7: memref<1x2x8xf32, #tpu.memory_space<vmem>>, %arg8: memref<560x4xf32, #tpu.memory_space<vmem>>) attributes {dimension_semantics = [#tpu.dimension_semantics<parallel>], iteration_bounds = array<i64: 1>, scalar_prefetch = 0 : i64, scratch_operands = 1 : i64, tpu.core_type = #tpu.core_type<tc>, window_params = [{transform_indices = @transform_0, window_bounds = array<i64: 512, 4>}, {pipeline_mode = #tpu.pipeline_mode<synchronous>, transform_indices = @transform_1, window_bounds = array<i64: 9, 4, 8>}, {pipeline_mode = #tpu.pipeline_mode<synchronous>, transform_indices = @transform_2, window_bounds = array<i64: 4, 8>}, {transform_indices = @transform_3, window_bounds = array<i64: 512, 8>}, {transform_indices = @transform_4, window_bounds = array<i64: 1, 2, 8>}, {transform_indices = @transform_5, window_bounds = array<i64: 512, 8>}, {transform_indices = @transform_6, window_bounds = array<i64: 1, 2, 8>}]} {
    %0 = tpu.iota {dimensions = array<i32: 1>} : vector<2x16x16x1xi32>
    %1 = vector.shape_cast %0 : vector<2x16x16x1xi32> to vector<512x1xi32>
    %2 = tpu.iota {dimensions = array<i32: 2>} : vector<2x16x16x1xi32>
    %3 = vector.shape_cast %2 : vector<2x16x16x1xi32> to vector<512x1xi32>
    %c-1_i32 = arith.constant -1 : i32
    %4 = vector.broadcast %c-1_i32 : i32 to vector<512x1xi32>
    %5 = arith.addi %1, %4 : vector<512x1xi32>
    %c0_i32 = arith.constant 0 : i32
    %6 = vector.broadcast %c0_i32 : i32 to vector<512x1xi32>
    %7 = arith.cmpi sge, %5, %6 : vector<512x1xi32>
    %c-1_i32_0 = arith.constant -1 : i32
    %8 = vector.broadcast %c-1_i32_0 : i32 to vector<512x1xi32>
    %9 = arith.addi %1, %8 : vector<512x1xi32>
    %c16_i32 = arith.constant 16 : i32
    %10 = vector.broadcast %c16_i32 : i32 to vector<512x1xi32>
    %11 = arith.cmpi slt, %9, %10 : vector<512x1xi32>
    %12 = arith.andi %7, %11 : vector<512x1xi1>
    %c-1_i32_1 = arith.constant -1 : i32
    %13 = vector.broadcast %c-1_i32_1 : i32 to vector<512x1xi32>
    %14 = arith.addi %3, %13 : vector<512x1xi32>
    %c0_i32_2 = arith.constant 0 : i32
    %15 = vector.broadcast %c0_i32_2 : i32 to vector<512x1xi32>
    %16 = arith.cmpi sge, %14, %15 : vector<512x1xi32>
    %17 = arith.andi %12, %16 : vector<512x1xi1>
    %c-1_i32_3 = arith.constant -1 : i32
    %18 = vector.broadcast %c-1_i32_3 : i32 to vector<512x1xi32>
    %19 = arith.addi %3, %18 : vector<512x1xi32>
    %c16_i32_4 = arith.constant 16 : i32
    %20 = vector.broadcast %c16_i32_4 : i32 to vector<512x1xi32>
    %21 = arith.cmpi slt, %19, %20 : vector<512x1xi32>
    %22 = arith.andi %17, %21 : vector<512x1xi1>
    %c-1_i32_5 = arith.constant -1 : i32
    %23 = vector.broadcast %c-1_i32_5 : i32 to vector<512x1xi32>
    %24 = arith.addi %1, %23 : vector<512x1xi32>
    %c0_i32_6 = arith.constant 0 : i32
    %25 = vector.broadcast %c0_i32_6 : i32 to vector<512x1xi32>
    %26 = arith.cmpi sge, %24, %25 : vector<512x1xi32>
    %c-1_i32_7 = arith.constant -1 : i32
    %27 = vector.broadcast %c-1_i32_7 : i32 to vector<512x1xi32>
    %28 = arith.addi %1, %27 : vector<512x1xi32>
    %c16_i32_8 = arith.constant 16 : i32
    %29 = vector.broadcast %c16_i32_8 : i32 to vector<512x1xi32>
    %30 = arith.cmpi slt, %28, %29 : vector<512x1xi32>
    %31 = arith.andi %26, %30 : vector<512x1xi1>
    %c0_i32_9 = arith.constant 0 : i32
    %32 = vector.broadcast %c0_i32_9 : i32 to vector<512x1xi32>
    %33 = arith.addi %3, %32 : vector<512x1xi32>
    %c0_i32_10 = arith.constant 0 : i32
    %34 = vector.broadcast %c0_i32_10 : i32 to vector<512x1xi32>
    %35 = arith.cmpi sge, %33, %34 : vector<512x1xi32>
    %36 = arith.andi %31, %35 : vector<512x1xi1>
    %c0_i32_11 = arith.constant 0 : i32
    %37 = vector.broadcast %c0_i32_11 : i32 to vector<512x1xi32>
    %38 = arith.addi %3, %37 : vector<512x1xi32>
    %c16_i32_12 = arith.constant 16 : i32
    %39 = vector.broadcast %c16_i32_12 : i32 to vector<512x1xi32>
    %40 = arith.cmpi slt, %38, %39 : vector<512x1xi32>
    %41 = arith.andi %36, %40 : vector<512x1xi1>
    %c-1_i32_13 = arith.constant -1 : i32
    %42 = vector.broadcast %c-1_i32_13 : i32 to vector<512x1xi32>
    %43 = arith.addi %1, %42 : vector<512x1xi32>
    %c0_i32_14 = arith.constant 0 : i32
    %44 = vector.broadcast %c0_i32_14 : i32 to vector<512x1xi32>
    %45 = arith.cmpi sge, %43, %44 : vector<512x1xi32>
    %c-1_i32_15 = arith.constant -1 : i32
    %46 = vector.broadcast %c-1_i32_15 : i32 to vector<512x1xi32>
    %47 = arith.addi %1, %46 : vector<512x1xi32>
    %c16_i32_16 = arith.constant 16 : i32
    %48 = vector.broadcast %c16_i32_16 : i32 to vector<512x1xi32>
    %49 = arith.cmpi slt, %47, %48 : vector<512x1xi32>
    %50 = arith.andi %45, %49 : vector<512x1xi1>
    %c1_i32 = arith.constant 1 : i32
    %51 = vector.broadcast %c1_i32 : i32 to vector<512x1xi32>
    %52 = arith.addi %3, %51 : vector<512x1xi32>
    %c0_i32_17 = arith.constant 0 : i32
    %53 = vector.broadcast %c0_i32_17 : i32 to vector<512x1xi32>
    %54 = arith.cmpi sge, %52, %53 : vector<512x1xi32>
    %55 = arith.andi %50, %54 : vector<512x1xi1>
    %c1_i32_18 = arith.constant 1 : i32
    %56 = vector.broadcast %c1_i32_18 : i32 to vector<512x1xi32>
    %57 = arith.addi %3, %56 : vector<512x1xi32>
    %c16_i32_19 = arith.constant 16 : i32
    %58 = vector.broadcast %c16_i32_19 : i32 to vector<512x1xi32>
    %59 = arith.cmpi slt, %57, %58 : vector<512x1xi32>
    %60 = arith.andi %55, %59 : vector<512x1xi1>
    %c0_i32_20 = arith.constant 0 : i32
    %61 = vector.broadcast %c0_i32_20 : i32 to vector<512x1xi32>
    %62 = arith.addi %1, %61 : vector<512x1xi32>
    %c0_i32_21 = arith.constant 0 : i32
    %63 = vector.broadcast %c0_i32_21 : i32 to vector<512x1xi32>
    %64 = arith.cmpi sge, %62, %63 : vector<512x1xi32>
    %c0_i32_22 = arith.constant 0 : i32
    %65 = vector.broadcast %c0_i32_22 : i32 to vector<512x1xi32>
    %66 = arith.addi %1, %65 : vector<512x1xi32>
    %c16_i32_23 = arith.constant 16 : i32
    %67 = vector.broadcast %c16_i32_23 : i32 to vector<512x1xi32>
    %68 = arith.cmpi slt, %66, %67 : vector<512x1xi32>
    %69 = arith.andi %64, %68 : vector<512x1xi1>
    %c-1_i32_24 = arith.constant -1 : i32
    %70 = vector.broadcast %c-1_i32_24 : i32 to vector<512x1xi32>
    %71 = arith.addi %3, %70 : vector<512x1xi32>
    %c0_i32_25 = arith.constant 0 : i32
    %72 = vector.broadcast %c0_i32_25 : i32 to vector<512x1xi32>
    %73 = arith.cmpi sge, %71, %72 : vector<512x1xi32>
    %74 = arith.andi %69, %73 : vector<512x1xi1>
    %c-1_i32_26 = arith.constant -1 : i32
    %75 = vector.broadcast %c-1_i32_26 : i32 to vector<512x1xi32>
    %76 = arith.addi %3, %75 : vector<512x1xi32>
    %c16_i32_27 = arith.constant 16 : i32
    %77 = vector.broadcast %c16_i32_27 : i32 to vector<512x1xi32>
    %78 = arith.cmpi slt, %76, %77 : vector<512x1xi32>
    %79 = arith.andi %74, %78 : vector<512x1xi1>
    %c0_i32_28 = arith.constant 0 : i32
    %80 = vector.broadcast %c0_i32_28 : i32 to vector<512x1xi32>
    %81 = arith.addi %1, %80 : vector<512x1xi32>
    %c0_i32_29 = arith.constant 0 : i32
    %82 = vector.broadcast %c0_i32_29 : i32 to vector<512x1xi32>
    %83 = arith.cmpi sge, %81, %82 : vector<512x1xi32>
    %c0_i32_30 = arith.constant 0 : i32
    %84 = vector.broadcast %c0_i32_30 : i32 to vector<512x1xi32>
    %85 = arith.addi %1, %84 : vector<512x1xi32>
    %c16_i32_31 = arith.constant 16 : i32
    %86 = vector.broadcast %c16_i32_31 : i32 to vector<512x1xi32>
    %87 = arith.cmpi slt, %85, %86 : vector<512x1xi32>
    %88 = arith.andi %83, %87 : vector<512x1xi1>
    %c1_i32_32 = arith.constant 1 : i32
    %89 = vector.broadcast %c1_i32_32 : i32 to vector<512x1xi32>
    %90 = arith.addi %3, %89 : vector<512x1xi32>
    %c0_i32_33 = arith.constant 0 : i32
    %91 = vector.broadcast %c0_i32_33 : i32 to vector<512x1xi32>
    %92 = arith.cmpi sge, %90, %91 : vector<512x1xi32>
    %93 = arith.andi %88, %92 : vector<512x1xi1>
    %c1_i32_34 = arith.constant 1 : i32
    %94 = vector.broadcast %c1_i32_34 : i32 to vector<512x1xi32>
    %95 = arith.addi %3, %94 : vector<512x1xi32>
    %c16_i32_35 = arith.constant 16 : i32
    %96 = vector.broadcast %c16_i32_35 : i32 to vector<512x1xi32>
    %97 = arith.cmpi slt, %95, %96 : vector<512x1xi32>
    %98 = arith.andi %93, %97 : vector<512x1xi1>
    %c1_i32_36 = arith.constant 1 : i32
    %99 = vector.broadcast %c1_i32_36 : i32 to vector<512x1xi32>
    %100 = arith.addi %1, %99 : vector<512x1xi32>
    %c0_i32_37 = arith.constant 0 : i32
    %101 = vector.broadcast %c0_i32_37 : i32 to vector<512x1xi32>
    %102 = arith.cmpi sge, %100, %101 : vector<512x1xi32>
    %c1_i32_38 = arith.constant 1 : i32
    %103 = vector.broadcast %c1_i32_38 : i32 to vector<512x1xi32>
    %104 = arith.addi %1, %103 : vector<512x1xi32>
    %c16_i32_39 = arith.constant 16 : i32
    %105 = vector.broadcast %c16_i32_39 : i32 to vector<512x1xi32>
    %106 = arith.cmpi slt, %104, %105 : vector<512x1xi32>
    %107 = arith.andi %102, %106 : vector<512x1xi1>
    %c-1_i32_40 = arith.constant -1 : i32
    %108 = vector.broadcast %c-1_i32_40 : i32 to vector<512x1xi32>
    %109 = arith.addi %3, %108 : vector<512x1xi32>
    %c0_i32_41 = arith.constant 0 : i32
    %110 = vector.broadcast %c0_i32_41 : i32 to vector<512x1xi32>
    %111 = arith.cmpi sge, %109, %110 : vector<512x1xi32>
    %112 = arith.andi %107, %111 : vector<512x1xi1>
    %c-1_i32_42 = arith.constant -1 : i32
    %113 = vector.broadcast %c-1_i32_42 : i32 to vector<512x1xi32>
    %114 = arith.addi %3, %113 : vector<512x1xi32>
    %c16_i32_43 = arith.constant 16 : i32
    %115 = vector.broadcast %c16_i32_43 : i32 to vector<512x1xi32>
    %116 = arith.cmpi slt, %114, %115 : vector<512x1xi32>
    %117 = arith.andi %112, %116 : vector<512x1xi1>
    %c1_i32_44 = arith.constant 1 : i32
    %118 = vector.broadcast %c1_i32_44 : i32 to vector<512x1xi32>
    %119 = arith.addi %1, %118 : vector<512x1xi32>
    %c0_i32_45 = arith.constant 0 : i32
    %120 = vector.broadcast %c0_i32_45 : i32 to vector<512x1xi32>
    %121 = arith.cmpi sge, %119, %120 : vector<512x1xi32>
    %c1_i32_46 = arith.constant 1 : i32
    %122 = vector.broadcast %c1_i32_46 : i32 to vector<512x1xi32>
    %123 = arith.addi %1, %122 : vector<512x1xi32>
    %c16_i32_47 = arith.constant 16 : i32
    %124 = vector.broadcast %c16_i32_47 : i32 to vector<512x1xi32>
    %125 = arith.cmpi slt, %123, %124 : vector<512x1xi32>
    %126 = arith.andi %121, %125 : vector<512x1xi1>
    %c0_i32_48 = arith.constant 0 : i32
    %127 = vector.broadcast %c0_i32_48 : i32 to vector<512x1xi32>
    %128 = arith.addi %3, %127 : vector<512x1xi32>
    %c0_i32_49 = arith.constant 0 : i32
    %129 = vector.broadcast %c0_i32_49 : i32 to vector<512x1xi32>
    %130 = arith.cmpi sge, %128, %129 : vector<512x1xi32>
    %131 = arith.andi %126, %130 : vector<512x1xi1>
    %c0_i32_50 = arith.constant 0 : i32
    %132 = vector.broadcast %c0_i32_50 : i32 to vector<512x1xi32>
    %133 = arith.addi %3, %132 : vector<512x1xi32>
    %c16_i32_51 = arith.constant 16 : i32
    %134 = vector.broadcast %c16_i32_51 : i32 to vector<512x1xi32>
    %135 = arith.cmpi slt, %133, %134 : vector<512x1xi32>
    %136 = arith.andi %131, %135 : vector<512x1xi1>
    %c1_i32_52 = arith.constant 1 : i32
    %137 = vector.broadcast %c1_i32_52 : i32 to vector<512x1xi32>
    %138 = arith.addi %1, %137 : vector<512x1xi32>
    %c0_i32_53 = arith.constant 0 : i32
    %139 = vector.broadcast %c0_i32_53 : i32 to vector<512x1xi32>
    %140 = arith.cmpi sge, %138, %139 : vector<512x1xi32>
    %c1_i32_54 = arith.constant 1 : i32
    %141 = vector.broadcast %c1_i32_54 : i32 to vector<512x1xi32>
    %142 = arith.addi %1, %141 : vector<512x1xi32>
    %c16_i32_55 = arith.constant 16 : i32
    %143 = vector.broadcast %c16_i32_55 : i32 to vector<512x1xi32>
    %144 = arith.cmpi slt, %142, %143 : vector<512x1xi32>
    %145 = arith.andi %140, %144 : vector<512x1xi1>
    %c1_i32_56 = arith.constant 1 : i32
    %146 = vector.broadcast %c1_i32_56 : i32 to vector<512x1xi32>
    %147 = arith.addi %3, %146 : vector<512x1xi32>
    %c0_i32_57 = arith.constant 0 : i32
    %148 = vector.broadcast %c0_i32_57 : i32 to vector<512x1xi32>
    %149 = arith.cmpi sge, %147, %148 : vector<512x1xi32>
    %150 = arith.andi %145, %149 : vector<512x1xi1>
    %c1_i32_58 = arith.constant 1 : i32
    %151 = vector.broadcast %c1_i32_58 : i32 to vector<512x1xi32>
    %152 = arith.addi %3, %151 : vector<512x1xi32>
    %c16_i32_59 = arith.constant 16 : i32
    %153 = vector.broadcast %c16_i32_59 : i32 to vector<512x1xi32>
    %154 = arith.cmpi slt, %152, %153 : vector<512x1xi32>
    %155 = arith.andi %150, %154 : vector<512x1xi1>
    %c0 = arith.constant 0 : index
    %c0_60 = arith.constant 0 : index
    %156 = vector.load %arg1[%c0, %c0_60] : memref<512x4xf32, #tpu.memory_space<vmem>>, vector<512x4xf32>
    %cst = arith.constant 0.000000e+00 : f32
    %157 = vector.broadcast %cst : f32 to vector<24x4xf32>
    %c0_61 = arith.constant 0 : index
    %c0_62 = arith.constant 0 : index
    %158 = vector.load %arg8[%c0_61, %c0_62] : memref<560x4xf32, #tpu.memory_space<vmem>>, vector<24x4xf32>
    tpu.vector_store %arg8[%c0_61, %c0_62], %157 {strides = array<i32>} : memref<560x4xf32, #tpu.memory_space<vmem>>, vector<24x4xf32>,
    %cst_63 = arith.constant 0.000000e+00 : f32
    %159 = vector.broadcast %cst_63 : f32 to vector<24x4xf32>
    %c536 = arith.constant 536 : index
    %c0_64 = arith.constant 0 : index
    %160 = vector.load %arg8[%c536, %c0_64] : memref<560x4xf32, #tpu.memory_space<vmem>>, vector<24x4xf32>
    tpu.vector_store %arg8[%c536, %c0_64], %159 {strides = array<i32>} : memref<560x4xf32, #tpu.memory_space<vmem>>, vector<24x4xf32>,
    %c24 = arith.constant 24 : index
    %c0_65 = arith.constant 0 : index
    %161 = vector.load %arg8[%c24, %c0_65] : memref<560x4xf32, #tpu.memory_space<vmem>>, vector<512x4xf32>
    tpu.vector_store %arg8[%c24, %c0_65], %156 {strides = array<i32>} : memref<560x4xf32, #tpu.memory_space<vmem>>, vector<512x4xf32>,
    %c7 = arith.constant 7 : index
    %c0_66 = arith.constant 0 : index
    %162 = vector.load %arg8[%c7, %c0_66] : memref<560x4xf32, #tpu.memory_space<vmem>>, vector<512x4xf32>
    %cst_67 = arith.constant 0.000000e+00 : f32
    %163 = vector.broadcast %cst_67 : f32 to vector<512x4xf32>
    %164 = vector.shape_cast %22 : vector<512x1xi1> to vector<512x1xi1>
    %165 = vector.broadcast %164 : vector<512x1xi1> to vector<512x4xi1>
    %166 = arith.select %165, %162, %163 : vector<512x4xi1>, vector<512x4xf32>
    %c0_68 = arith.constant 0 : index
    %c0_69 = arith.constant 0 : index
    %c0_70 = arith.constant 0 : index
    %167 = vector.load %arg2[%c0_68, %c0_69, %c0_70] : memref<9x4x8xf32, #tpu.memory_space<vmem>>, vector<1x4x8xf32>
    %168 = vector.shape_cast %167 : vector<1x4x8xf32> to vector<4x8xf32>
    %cst_71 = arith.constant dense<0.000000e+00> : vector<512x8xf32>
    %169 = tpu.matmul %166, %168, %cst_71 {dimension_numbers = #tpu.dot_dimension_numbers<[1], [0], [0], [1], [0, 0, 1, 1], [], []>} : vector<512x4xf32>, vector<4x8xf32>, vector<512x8xf32> -> vector<512x8xf32>
    %c0_72 = arith.constant 0 : index
    %c0_73 = arith.constant 0 : index
    %170 = vector.load %arg4[%c0_72, %c0_73] : memref<512x8xf32, #tpu.memory_space<vmem>>, vector<512x8xf32>
    tpu.vector_store %arg4[%c0_72, %c0_73], %169 {strides = array<i32>} : memref<512x8xf32, #tpu.memory_space<vmem>>, vector<512x8xf32>,
    %c8 = arith.constant 8 : index
    %c0_74 = arith.constant 0 : index
    %171 = vector.load %arg8[%c8, %c0_74] : memref<560x4xf32, #tpu.memory_space<vmem>>, vector<512x4xf32>
    %cst_75 = arith.constant 0.000000e+00 : f32
    %172 = vector.broadcast %cst_75 : f32 to vector<512x4xf32>
    %173 = vector.shape_cast %41 : vector<512x1xi1> to vector<512x1xi1>
    %174 = vector.broadcast %173 : vector<512x1xi1> to vector<512x4xi1>
    %175 = arith.select %174, %171, %172 : vector<512x4xi1>, vector<512x4xf32>
    %c1 = arith.constant 1 : index
    %c0_76 = arith.constant 0 : index
    %c0_77 = arith.constant 0 : index
    %176 = vector.load %arg2[%c1, %c0_76, %c0_77] : memref<9x4x8xf32, #tpu.memory_space<vmem>>, vector<1x4x8xf32>
    %177 = vector.shape_cast %176 : vector<1x4x8xf32> to vector<4x8xf32>
    %cst_78 = arith.constant dense<0.000000e+00> : vector<512x8xf32>
    %178 = tpu.matmul %175, %177, %cst_78 {dimension_numbers = #tpu.dot_dimension_numbers<[1], [0], [0], [1], [0, 0, 1, 1], [], []>} : vector<512x4xf32>, vector<4x8xf32>, vector<512x8xf32> -> vector<512x8xf32>
    %c0_79 = arith.constant 0 : index
    %c0_80 = arith.constant 0 : index
    %179 = vector.load %arg4[%c0_79, %c0_80] : memref<512x8xf32, #tpu.memory_space<vmem>>, vector<512x8xf32>
    %180 = arith.addf %179, %178 : vector<512x8xf32>
    %c0_81 = arith.constant 0 : index
    %c0_82 = arith.constant 0 : index
    %181 = vector.load %arg4[%c0_81, %c0_82] : memref<512x8xf32, #tpu.memory_space<vmem>>, vector<512x8xf32>
    tpu.vector_store %arg4[%c0_81, %c0_82], %180 {strides = array<i32>} : memref<512x8xf32, #tpu.memory_space<vmem>>, vector<512x8xf32>,
    %c9 = arith.constant 9 : index
    %c0_83 = arith.constant 0 : index
    %182 = vector.load %arg8[%c9, %c0_83] : memref<560x4xf32, #tpu.memory_space<vmem>>, vector<512x4xf32>
    %cst_84 = arith.constant 0.000000e+00 : f32
    %183 = vector.broadcast %cst_84 : f32 to vector<512x4xf32>
    %184 = vector.shape_cast %60 : vector<512x1xi1> to vector<512x1xi1>
    %185 = vector.broadcast %184 : vector<512x1xi1> to vector<512x4xi1>
    %186 = arith.select %185, %182, %183 : vector<512x4xi1>, vector<512x4xf32>
    %c2 = arith.constant 2 : index
    %c0_85 = arith.constant 0 : index
    %c0_86 = arith.constant 0 : index
    %187 = vector.load %arg2[%c2, %c0_85, %c0_86] : memref<9x4x8xf32, #tpu.memory_space<vmem>>, vector<1x4x8xf32>
    %188 = vector.shape_cast %187 : vector<1x4x8xf32> to vector<4x8xf32>
    %cst_87 = arith.constant dense<0.000000e+00> : vector<512x8xf32>
    %189 = tpu.matmul %186, %188, %cst_87 {dimension_numbers = #tpu.dot_dimension_numbers<[1], [0], [0], [1], [0, 0, 1, 1], [], []>} : vector<512x4xf32>, vector<4x8xf32>, vector<512x8xf32> -> vector<512x8xf32>
    %c0_88 = arith.constant 0 : index
    %c0_89 = arith.constant 0 : index
    %190 = vector.load %arg4[%c0_88, %c0_89] : memref<512x8xf32, #tpu.memory_space<vmem>>, vector<512x8xf32>
    %191 = arith.addf %190, %189 : vector<512x8xf32>
    %c0_90 = arith.constant 0 : index
    %c0_91 = arith.constant 0 : index
    %192 = vector.load %arg4[%c0_90, %c0_91] : memref<512x8xf32, #tpu.memory_space<vmem>>, vector<512x8xf32>
    tpu.vector_store %arg4[%c0_90, %c0_91], %191 {strides = array<i32>} : memref<512x8xf32, #tpu.memory_space<vmem>>, vector<512x8xf32>,
    %c23 = arith.constant 23 : index
    %c0_92 = arith.constant 0 : index
    %193 = vector.load %arg8[%c23, %c0_92] : memref<560x4xf32, #tpu.memory_space<vmem>>, vector<512x4xf32>
    %cst_93 = arith.constant 0.000000e+00 : f32
    %194 = vector.broadcast %cst_93 : f32 to vector<512x4xf32>
    %195 = vector.shape_cast %79 : vector<512x1xi1> to vector<512x1xi1>
    %196 = vector.broadcast %195 : vector<512x1xi1> to vector<512x4xi1>
    %197 = arith.select %196, %193, %194 : vector<512x4xi1>, vector<512x4xf32>
    %c3 = arith.constant 3 : index
    %c0_94 = arith.constant 0 : index
    %c0_95 = arith.constant 0 : index
    %198 = vector.load %arg2[%c3, %c0_94, %c0_95] : memref<9x4x8xf32, #tpu.memory_space<vmem>>, vector<1x4x8xf32>
    %199 = vector.shape_cast %198 : vector<1x4x8xf32> to vector<4x8xf32>
    %cst_96 = arith.constant dense<0.000000e+00> : vector<512x8xf32>
    %200 = tpu.matmul %197, %199, %cst_96 {dimension_numbers = #tpu.dot_dimension_numbers<[1], [0], [0], [1], [0, 0, 1, 1], [], []>} : vector<512x4xf32>, vector<4x8xf32>, vector<512x8xf32> -> vector<512x8xf32>
    %c0_97 = arith.constant 0 : index
    %c0_98 = arith.constant 0 : index
    %201 = vector.load %arg4[%c0_97, %c0_98] : memref<512x8xf32, #tpu.memory_space<vmem>>, vector<512x8xf32>
    %202 = arith.addf %201, %200 : vector<512x8xf32>
    %c0_99 = arith.constant 0 : index
    %c0_100 = arith.constant 0 : index
    %203 = vector.load %arg4[%c0_99, %c0_100] : memref<512x8xf32, #tpu.memory_space<vmem>>, vector<512x8xf32>
    tpu.vector_store %arg4[%c0_99, %c0_100], %202 {strides = array<i32>} : memref<512x8xf32, #tpu.memory_space<vmem>>, vector<512x8xf32>,
    %c24_101 = arith.constant 24 : index
    %c0_102 = arith.constant 0 : index
    %204 = vector.load %arg8[%c24_101, %c0_102] : memref<560x4xf32, #tpu.memory_space<vmem>>, vector<512x4xf32>
    %c4 = arith.constant 4 : index
    %c0_103 = arith.constant 0 : index
    %c0_104 = arith.constant 0 : index
    %205 = vector.load %arg2[%c4, %c0_103, %c0_104] : memref<9x4x8xf32, #tpu.memory_space<vmem>>, vector<1x4x8xf32>
    %206 = vector.shape_cast %205 : vector<1x4x8xf32> to vector<4x8xf32>
    %cst_105 = arith.constant dense<0.000000e+00> : vector<512x8xf32>
    %207 = tpu.matmul %204, %206, %cst_105 {dimension_numbers = #tpu.dot_dimension_numbers<[1], [0], [0], [1], [0, 0, 1, 1], [], []>} : vector<512x4xf32>, vector<4x8xf32>, vector<512x8xf32> -> vector<512x8xf32>
    %c0_106 = arith.constant 0 : index
    %c0_107 = arith.constant 0 : index
    %208 = vector.load %arg4[%c0_106, %c0_107] : memref<512x8xf32, #tpu.memory_space<vmem>>, vector<512x8xf32>
    %209 = arith.addf %208, %207 : vector<512x8xf32>
    %c0_108 = arith.constant 0 : index
    %c0_109 = arith.constant 0 : index
    %210 = vector.load %arg4[%c0_108, %c0_109] : memref<512x8xf32, #tpu.memory_space<vmem>>, vector<512x8xf32>
    tpu.vector_store %arg4[%c0_108, %c0_109], %209 {strides = array<i32>} : memref<512x8xf32, #tpu.memory_space<vmem>>, vector<512x8xf32>,
    %c25 = arith.constant 25 : index
    %c0_110 = arith.constant 0 : index
    %211 = vector.load %arg8[%c25, %c0_110] : memref<560x4xf32, #tpu.memory_space<vmem>>, vector<512x4xf32>
    %cst_111 = arith.constant 0.000000e+00 : f32
    %212 = vector.broadcast %cst_111 : f32 to vector<512x4xf32>
    %213 = vector.shape_cast %98 : vector<512x1xi1> to vector<512x1xi1>
    %214 = vector.broadcast %213 : vector<512x1xi1> to vector<512x4xi1>
    %215 = arith.select %214, %211, %212 : vector<512x4xi1>, vector<512x4xf32>
    %c5 = arith.constant 5 : index
    %c0_112 = arith.constant 0 : index
    %c0_113 = arith.constant 0 : index
    %216 = vector.load %arg2[%c5, %c0_112, %c0_113] : memref<9x4x8xf32, #tpu.memory_space<vmem>>, vector<1x4x8xf32>
    %217 = vector.shape_cast %216 : vector<1x4x8xf32> to vector<4x8xf32>
    %cst_114 = arith.constant dense<0.000000e+00> : vector<512x8xf32>
    %218 = tpu.matmul %215, %217, %cst_114 {dimension_numbers = #tpu.dot_dimension_numbers<[1], [0], [0], [1], [0, 0, 1, 1], [], []>} : vector<512x4xf32>, vector<4x8xf32>, vector<512x8xf32> -> vector<512x8xf32>
    %c0_115 = arith.constant 0 : index
    %c0_116 = arith.constant 0 : index
    %219 = vector.load %arg4[%c0_115, %c0_116] : memref<512x8xf32, #tpu.memory_space<vmem>>, vector<512x8xf32>
    %220 = arith.addf %219, %218 : vector<512x8xf32>
    %c0_117 = arith.constant 0 : index
    %c0_118 = arith.constant 0 : index
    %221 = vector.load %arg4[%c0_117, %c0_118] : memref<512x8xf32, #tpu.memory_space<vmem>>, vector<512x8xf32>
    tpu.vector_store %arg4[%c0_117, %c0_118], %220 {strides = array<i32>} : memref<512x8xf32, #tpu.memory_space<vmem>>, vector<512x8xf32>,
    %c39 = arith.constant 39 : index
    %c0_119 = arith.constant 0 : index
    %222 = vector.load %arg8[%c39, %c0_119] : memref<560x4xf32, #tpu.memory_space<vmem>>, vector<512x4xf32>
    %cst_120 = arith.constant 0.000000e+00 : f32
    %223 = vector.broadcast %cst_120 : f32 to vector<512x4xf32>
    %224 = vector.shape_cast %117 : vector<512x1xi1> to vector<512x1xi1>
    %225 = vector.broadcast %224 : vector<512x1xi1> to vector<512x4xi1>
    %226 = arith.select %225, %222, %223 : vector<512x4xi1>, vector<512x4xf32>
    %c6 = arith.constant 6 : index
    %c0_121 = arith.constant 0 : index
    %c0_122 = arith.constant 0 : index
    %227 = vector.load %arg2[%c6, %c0_121, %c0_122] : memref<9x4x8xf32, #tpu.memory_space<vmem>>, vector<1x4x8xf32>
    %228 = vector.shape_cast %227 : vector<1x4x8xf32> to vector<4x8xf32>
    %cst_123 = arith.constant dense<0.000000e+00> : vector<512x8xf32>
    %229 = tpu.matmul %226, %228, %cst_123 {dimension_numbers = #tpu.dot_dimension_numbers<[1], [0], [0], [1], [0, 0, 1, 1], [], []>} : vector<512x4xf32>, vector<4x8xf32>, vector<512x8xf32> -> vector<512x8xf32>
    %c0_124 = arith.constant 0 : index
    %c0_125 = arith.constant 0 : index
    %230 = vector.load %arg4[%c0_124, %c0_125] : memref<512x8xf32, #tpu.memory_space<vmem>>, vector<512x8xf32>
    %231 = arith.addf %230, %229 : vector<512x8xf32>
    %c0_126 = arith.constant 0 : index
    %c0_127 = arith.constant 0 : index
    %232 = vector.load %arg4[%c0_126, %c0_127] : memref<512x8xf32, #tpu.memory_space<vmem>>, vector<512x8xf32>
    tpu.vector_store %arg4[%c0_126, %c0_127], %231 {strides = array<i32>} : memref<512x8xf32, #tpu.memory_space<vmem>>, vector<512x8xf32>,
    %c40 = arith.constant 40 : index
    %c0_128 = arith.constant 0 : index
    %233 = vector.load %arg8[%c40, %c0_128] : memref<560x4xf32, #tpu.memory_space<vmem>>, vector<512x4xf32>
    %cst_129 = arith.constant 0.000000e+00 : f32
    %234 = vector.broadcast %cst_129 : f32 to vector<512x4xf32>
    %235 = vector.shape_cast %136 : vector<512x1xi1> to vector<512x1xi1>
    %236 = vector.broadcast %235 : vector<512x1xi1> to vector<512x4xi1>
    %237 = arith.select %236, %233, %234 : vector<512x4xi1>, vector<512x4xf32>
    %c7_130 = arith.constant 7 : index
    %c0_131 = arith.constant 0 : index
    %c0_132 = arith.constant 0 : index
    %238 = vector.load %arg2[%c7_130, %c0_131, %c0_132] : memref<9x4x8xf32, #tpu.memory_space<vmem>>, vector<1x4x8xf32>
    %239 = vector.shape_cast %238 : vector<1x4x8xf32> to vector<4x8xf32>
    %cst_133 = arith.constant dense<0.000000e+00> : vector<512x8xf32>
    %240 = tpu.matmul %237, %239, %cst_133 {dimension_numbers = #tpu.dot_dimension_numbers<[1], [0], [0], [1], [0, 0, 1, 1], [], []>} : vector<512x4xf32>, vector<4x8xf32>, vector<512x8xf32> -> vector<512x8xf32>
    %c0_134 = arith.constant 0 : index
    %c0_135 = arith.constant 0 : index
    %241 = vector.load %arg4[%c0_134, %c0_135] : memref<512x8xf32, #tpu.memory_space<vmem>>, vector<512x8xf32>
    %242 = arith.addf %241, %240 : vector<512x8xf32>
    %c0_136 = arith.constant 0 : index
    %c0_137 = arith.constant 0 : index
    %243 = vector.load %arg4[%c0_136, %c0_137] : memref<512x8xf32, #tpu.memory_space<vmem>>, vector<512x8xf32>
    tpu.vector_store %arg4[%c0_136, %c0_137], %242 {strides = array<i32>} : memref<512x8xf32, #tpu.memory_space<vmem>>, vector<512x8xf32>,
    %c41 = arith.constant 41 : index
    %c0_138 = arith.constant 0 : index
    %244 = vector.load %arg8[%c41, %c0_138] : memref<560x4xf32, #tpu.memory_space<vmem>>, vector<512x4xf32>
    %cst_139 = arith.constant 0.000000e+00 : f32
    %245 = vector.broadcast %cst_139 : f32 to vector<512x4xf32>
    %246 = vector.shape_cast %155 : vector<512x1xi1> to vector<512x1xi1>
    %247 = vector.broadcast %246 : vector<512x1xi1> to vector<512x4xi1>
    %248 = arith.select %247, %244, %245 : vector<512x4xi1>, vector<512x4xf32>
    %c8_140 = arith.constant 8 : index
    %c0_141 = arith.constant 0 : index
    %c0_142 = arith.constant 0 : index
    %249 = vector.load %arg2[%c8_140, %c0_141, %c0_142] : memref<9x4x8xf32, #tpu.memory_space<vmem>>, vector<1x4x8xf32>
    %250 = vector.shape_cast %249 : vector<1x4x8xf32> to vector<4x8xf32>
    %cst_143 = arith.constant dense<0.000000e+00> : vector<512x8xf32>
    %251 = tpu.matmul %248, %250, %cst_143 {dimension_numbers = #tpu.dot_dimension_numbers<[1], [0], [0], [1], [0, 0, 1, 1], [], []>} : vector<512x4xf32>, vector<4x8xf32>, vector<512x8xf32> -> vector<512x8xf32>
    %c0_144 = arith.constant 0 : index
    %c0_145 = arith.constant 0 : index
    %252 = vector.load %arg4[%c0_144, %c0_145] : memref<512x8xf32, #tpu.memory_space<vmem>>, vector<512x8xf32>
    %253 = arith.addf %252, %251 : vector<512x8xf32>
    %c0_146 = arith.constant 0 : index
    %c0_147 = arith.constant 0 : index
    %254 = vector.load %arg4[%c0_146, %c0_147] : memref<512x8xf32, #tpu.memory_space<vmem>>, vector<512x8xf32>
    tpu.vector_store %arg4[%c0_146, %c0_147], %253 {strides = array<i32>} : memref<512x8xf32, #tpu.memory_space<vmem>>, vector<512x8xf32>,
    %c0_148 = arith.constant 0 : index
    %c0_149 = arith.constant 0 : index
    %255 = vector.load %arg4[%c0_148, %c0_149] : memref<512x8xf32, #tpu.memory_space<vmem>>, vector<512x8xf32>
    %cst_150 = arith.constant dense<0.000000e+00> : vector<8xf32>
    %256 = vector.multi_reduction <add>, %255, %cst_150 [0] : vector<512x8xf32> to vector<8xf32>
    %257 = vector.shape_cast %256 : vector<8xf32> to vector<1x8xf32>
    %cst_151 = arith.constant 5.120000e+02 : f32
    %258 = vector.broadcast %cst_151 : f32 to vector<1x8xf32>
    %259 = arith.divf %257, %258 : vector<1x8xf32>
    %260 = vector.broadcast %259 : vector<1x8xf32> to vector<512x8xf32>
    %261 = arith.subf %255, %260 : vector<512x8xf32>
    %262 = arith.mulf %261, %261 : vector<512x8xf32>
    %cst_152 = arith.constant dense<0.000000e+00> : vector<8xf32>
    %263 = vector.multi_reduction <add>, %262, %cst_152 [0] : vector<512x8xf32> to vector<8xf32>
    %264 = vector.shape_cast %263 : vector<8xf32> to vector<1x8xf32>
    %cst_153 = arith.constant 5.120000e+02 : f32
    %265 = vector.broadcast %cst_153 : f32 to vector<1x8xf32>
    %266 = arith.mulf %259, %265 : vector<1x8xf32>
    %267 = tpu.concatenate %266, %264 in 0 : vector<1x8xf32>, vector<1x8xf32> -> vector<2x8xf32>
    %c0_154 = arith.constant 0 : index
    %c0_155 = arith.constant 0 : index
    %c0_156 = arith.constant 0 : index
    %268 = vector.load %arg5[%c0_154, %c0_155, %c0_156] : memref<1x2x8xf32, #tpu.memory_space<vmem>>, vector<1x2x8xf32>
    %269 = vector.shape_cast %268 : vector<1x2x8xf32> to vector<2x8xf32>
    %270 = vector.shape_cast %267 : vector<2x8xf32> to vector<1x2x8xf32>
    tpu.vector_store %arg5[%c0_154, %c0_155, %c0_156], %270 {strides = array<i32>} : memref<1x2x8xf32, #tpu.memory_space<vmem>>, vector<1x2x8xf32>,
    %c0_157 = arith.constant 0 : index
    %c0_158 = arith.constant 0 : index
    %271 = vector.load %arg3[%c0_157, %c0_158] : memref<4x8xf32, #tpu.memory_space<vmem>>, vector<4x8xf32>
    %cst_159 = arith.constant dense<0.000000e+00> : vector<512x8xf32>
    %272 = tpu.matmul %156, %271, %cst_159 {dimension_numbers = #tpu.dot_dimension_numbers<[1], [0], [0], [1], [0, 0, 1, 1], [], []>} : vector<512x4xf32>, vector<4x8xf32>, vector<512x8xf32> -> vector<512x8xf32>
    %c0_160 = arith.constant 0 : index
    %c0_161 = arith.constant 0 : index
    %273 = vector.load %arg6[%c0_160, %c0_161] : memref<512x8xf32, #tpu.memory_space<vmem>>, vector<512x8xf32>
    tpu.vector_store %arg6[%c0_160, %c0_161], %272 {strides = array<i32>} : memref<512x8xf32, #tpu.memory_space<vmem>>, vector<512x8xf32>,
    %c0_162 = arith.constant 0 : index
    %c0_163 = arith.constant 0 : index
    %274 = vector.load %arg6[%c0_162, %c0_163] : memref<512x8xf32, #tpu.memory_space<vmem>>, vector<512x8xf32>
    %cst_164 = arith.constant dense<0.000000e+00> : vector<8xf32>
    %275 = vector.multi_reduction <add>, %274, %cst_164 [0] : vector<512x8xf32> to vector<8xf32>
    %276 = vector.shape_cast %275 : vector<8xf32> to vector<1x8xf32>
    %cst_165 = arith.constant 5.120000e+02 : f32
    %277 = vector.broadcast %cst_165 : f32 to vector<1x8xf32>
    %278 = arith.divf %276, %277 : vector<1x8xf32>
    %279 = vector.broadcast %278 : vector<1x8xf32> to vector<512x8xf32>
    %280 = arith.subf %274, %279 : vector<512x8xf32>
    %281 = arith.mulf %280, %280 : vector<512x8xf32>
    %cst_166 = arith.constant dense<0.000000e+00> : vector<8xf32>
    %282 = vector.multi_reduction <add>, %281, %cst_166 [0] : vector<512x8xf32> to vector<8xf32>
    %283 = vector.shape_cast %282 : vector<8xf32> to vector<1x8xf32>
    %cst_167 = arith.constant 5.120000e+02 : f32
    %284 = vector.broadcast %cst_167 : f32 to vector<1x8xf32>
    %285 = arith.mulf %278, %284 : vector<1x8xf32>
    %286 = tpu.concatenate %285, %283 in 0 : vector<1x8xf32>, vector<1x8xf32> -> vector<2x8xf32>
    %c0_168 = arith.constant 0 : index
    %c0_169 = arith.constant 0 : index
    %c0_170 = arith.constant 0 : index
    %287 = vector.load %arg7[%c0_168, %c0_169, %c0_170] : memref<1x2x8xf32, #tpu.memory_space<vmem>>, vector<1x2x8xf32>
    %288 = vector.shape_cast %287 : vector<1x2x8xf32> to vector<2x8xf32>
    %289 = vector.shape_cast %286 : vector<2x8xf32> to vector<1x2x8xf32>
    tpu.vector_store %arg7[%c0_168, %c0_169, %c0_170], %289 {strides = array<i32>} : memref<1x2x8xf32, #tpu.memory_space<vmem>>, vector<1x2x8xf32>,
    return
  }
  func.func @transform_0(%arg0: i32) -> (i32, i32) {
    %c0_i32 = arith.constant 0 : i32
    %c0_i32_0 = arith.constant 0 : i32
    return %arg0, %c0_i32 : i32, i32
  }
  func.func @transform_1(%arg0: i32) -> (i32, i32, i32) {
    %c0_i32 = arith.constant 0 : i32
    %c0_i32_0 = arith.constant 0 : i32
    %c0_i32_1 = arith.constant 0 : i32
    %c0_i32_2 = arith.constant 0 : i32
    return %c0_i32, %c0_i32_0, %c0_i32_1 : i32, i32, i32
  }
  func.func @transform_2(%arg0: i32) -> (i32, i32) {
    %c0_i32 = arith.constant 0 : i32
    %c0_i32_0 = arith.constant 0 : i32
    %c0_i32_1 = arith.constant 0 : i32
    return %c0_i32, %c0_i32_0 : i32, i32
  }
  func.func @transform_3(%arg0: i32) -> (i32, i32) {
    %c0_i32 = arith.constant 0 : i32
    %c0_i32_0 = arith.constant 0 : i32
    return %arg0, %c0_i32 : i32, i32
  }
  func.func @transform_4(%arg0: i32) -> (i32, i32, i32) {
    %c0_i32 = arith.constant 0 : i32
    %c0_i32_0 = arith.constant 0 : i32
    %c0_i32_1 = arith.constant 0 : i32
    return %arg0, %c0_i32, %c0_i32_0 : i32, i32, i32
  }
  func.func @transform_5(%arg0: i32) -> (i32, i32) {
    %c0_i32 = arith.constant 0 : i32
    %c0_i32_0 = arith.constant 0 : i32
    return %arg0, %c0_i32 : i32, i32
  }
  func.func @transform_6(%arg0: i32) -> (i32, i32, i32) {
    %c0_i32 = arith.constant 0 : i32
    %c0_i32_0 = arith.constant 0 : i32
    %c0_i32_1 = arith.constant 0 : i32
    return %arg0, %c0_i32, %c0_i32_0 : i32, i32, i32
  }
}

</mosaic_0001>

<bundles_post_ra>
// kernel: tpu_custom_call.1
= control target key start
LH: loop header
LB: loop body
LE: loop exit
PB: predicated region body
PF: predicated region fallthrough
CT: control target
= control target key end

     0   :  { %12 = vsyncpa [#allocation4], 0  ;;  %vm488_vm0 = vcmask 1043456   ;;  %vm109_vm1 = vcmask 31744   ;;  %v20_v2 = vlaneseq  ;;  %v19667_v3 = vmov 0.0   ;;  %s19660_s0 = inlined_call_operand.vmem [shape: f32[512,4], index: 0, kind: input, shape index: {}]   ;;  %s19661_s1 = inlined_call_operand.vmem [shape: f32[9,4,8], index: 1, kind: input, shape index: {}]   ;;  %s19662_s2 = inlined_call_operand.vmem [shape: f32[4,8], index: 2, kind: input, shape index: {}]   ;;  %s19663_s3 = inlined_call_operand.vmem [shape: f32[512,8], index: 3, kind: output, shape index: {0}]   ;;  %s19664_s4 = inlined_call_operand.hbm [shape: f32[1,2,8], index: 4, kind: output, shape index: {1}]   ;;  %s19665_s5 = inlined_call_operand.vmem [shape: f32[512,8], index: 5, kind: output, shape index: {2}]   ;;  %s19666_s6 = inlined_call_operand.hbm [shape: f32[1,2,8], index: 6, kind: output, shape index: {3}]  }
   0x1   :  { %v304_v0 = vld [vmem:[%s19661_s1] sm:$0xf]  ;;  %10896 = vmatprep.mubr.f32.mxu0 %v19667_v3  ;;  %112 = vst.msk [vmem:[#allocation2 + $0x10] sm:$0xff] %vm109_vm1, %v19667_v3  ;;  %113 = vst.msk [vmem:[#allocation2 + $0x218] sm:$0xff] %vm109_vm1, %v19667_v3  ;;  %v9671_v4 = vld [vmem:[%s19661_s1 + $0x4] sm:$0xf]  ;;  %10994 = vmatprep.mubr.f32.mxu1 %v19667_v3 }
   0x2   :  { %v12056_v1 = vld [vmem:[%s19660_s0] sm:$0xff]  ;;  %10894 = vmatprep.subr.msk.mxu0 %vm488_vm0, %v304_v0  ;;  %v9733_v5 = vld [vmem:[%s19661_s1 + $0x8] sm:$0xf]  ;;  %v9795_v6 = vld [vmem:[%s19661_s1 + $0xc] sm:$0xf]  ;;  %10992 = vmatprep.subr.msk.mxu1 %vm488_vm0, %v9671_v4  ;;  %v12077_v7 = vshrl.u32 %v20_v2, 7 }
   0x3   :  { %19740 = vst [vmem:[#allocation9_spill] sm:$0xff] %v12056_v1  ;;  %116 = vst.msk [vmem:[#allocation2 + $0x18] sm:$0xff] %vm109_vm1, %v12056_v1  ;;  %10895 = vmatpush3.msk.msra.mxu0 %vm488_vm0, %v304_v0  ;;  %v12082_v8 = vld [vmem:[%s19660_s0 + $0x8] sm:$0xff]  ;;  %v12087_v9 = vld [vmem:[%s19660_s0 + $0x10] sm:$0xff]  ;;  %10993 = vmatpush3.msk.msra.mxu1 %vm488_vm0, %v9671_v4 }
   0x4   :  { %19741 = vst [vmem:[#allocation10_spill] sm:$0xff] %v12082_v8  ;;  %19742 = vst [vmem:[#allocation11_spill] sm:$0xff] %v12087_v9  ;;  %v12092_v10 = vld [vmem:[%s19660_s0 + $0x18] sm:$0xff]  ;;  %10897 = vmatmul.mubr.f32.vlgmr.msra.gmra.mxu0 %v19667_v3  ;;  %v12105_v11 = vld [vmem:[%s19660_s0 + $0x20] sm:$0xff]  ;;  %11090 = vmatprep.subr.msk.mxu0 %vm488_vm0, %v9733_v5  ;;  %v12120_v14 = vadd.s32 4294967295, %v12077_v7 }
   0x5   :  { %19743 = vst [vmem:[#allocation12_spill] sm:$0xff] %v12092_v10  ;;  %117 = vst.msk [vmem:[#allocation2 + $0x20] sm:$0xff] %vm109_vm1, %v12082_v8  ;;  %v12110_v12 = vld [vmem:[%s19660_s0 + $0x28] sm:$0xff]  ;;  %v12115_v13 = vld [vmem:[%s19660_s0 + $0x30] sm:$0xff]  ;;  %10995 = vmatmul.mubr.f32.vlgmr.msra.gmra.mxu1 %v19667_v3  ;;  %11091 = vmatpush3.msk.msra.mxu0 %vm488_vm0, %v9733_v5 }
   0x6   :  { %118 = vst.msk [vmem:[#allocation2 + $0x28] sm:$0xff] %vm109_vm1, %v12087_v9  ;;  %119 = vst.msk [vmem:[#allocation2 + $0x30] sm:$0xff] %vm109_vm1, %v12092_v10  ;;  %v12131_v15 = vld [vmem:[%s19660_s0 + $0x38] sm:$0xff]  ;;  %v12136_v16 = vld [vmem:[%s19660_s0 + $0x40] sm:$0xff]  ;;  %11188 = vmatprep.subr.msk.mxu1 %vm488_vm0, %v9795_v6  ;;  %vm25_vm2 = vcmp.ge.s32.totalorder %v12120_v14, 0 }
   0x7   :  { %19744 = vst [vmem:[#allocation13_spill] sm:$0xff] %v12105_v11  ;;  %19745 = vst [vmem:[#allocation14_spill] sm:$0xff] %v12110_v12  ;;  %v12141_v17 = vld [vmem:[%s19660_s0 + $0x48] sm:$0xff]  ;;  %v12154_v18 = vld [vmem:[%s19660_s0 + $0x50] sm:$0xff]  ;;  %11189 = vmatpush3.msk.msra.mxu1 %vm488_vm0, %v9795_v6 }
   0x8   :  { %19746 = vst [vmem:[#allocation15_spill] sm:$0xff] %v12115_v13  ;;  %120 = vst.msk [vmem:[#allocation2 + $0x38] sm:$0xff] %vm109_vm1, %v12105_v11  ;;  %v12159_v19 = vld [vmem:[%s19660_s0 + $0x58] sm:$0xff]  ;;  %v12164_v20 = vld [vmem:[%s19660_s0 + $0x60] sm:$0xff] }
   0x9   :  { %121 = vst.msk [vmem:[#allocation2 + $0x40] sm:$0xff] %vm109_vm1, %v12110_v12  ;;  %122 = vst.msk [vmem:[#allocation2 + $0x48] sm:$0xff] %vm109_vm1, %v12115_v13  ;;  %v12177_v21 = vld [vmem:[%s19660_s0 + $0x68] sm:$0xff]  ;;  %v12182_v22 = vld [vmem:[%s19660_s0 + $0x70] sm:$0xff] }
   0xa   :  { %19747 = vst [vmem:[#allocation16_spill] sm:$0xff] %v12131_v15  ;;  %19748 = vst [vmem:[#allocation17_spill] sm:$0xff] %v12136_v16  ;;  %v12187_v23 = vld [vmem:[%s19660_s0 + $0x78] sm:$0xff]  ;;  %v12199_v24 = vld [vmem:[%s19660_s0 + $0x80] sm:$0xff] }
   0xb   :  { %19749 = vst [vmem:[#allocation18_spill] sm:$0xff] %v12141_v17  ;;  %123 = vst.msk [vmem:[#allocation2 + $0x50] sm:$0xff] %vm109_vm1, %v12131_v15  ;;  %v12204_v25 = vld [vmem:[%s19660_s0 + $0x88] sm:$0xff]  ;;  %v12209_v26 = vld [vmem:[%s19660_s0 + $0x90] sm:$0xff] }
   0xc   :  { %124 = vst.msk [vmem:[#allocation2 + $0x58] sm:$0xff] %vm109_vm1, %v12136_v16  ;;  %125 = vst.msk [vmem:[#allocation2 + $0x60] sm:$0xff] %vm109_vm1, %v12141_v17  ;;  %v942_v27 = vld [vmem:[#allocation2 + $0x18] sm:$0xff]  ;;  %v12232_v31 = vld [vmem:[%s19660_s0 + $0xa0] sm:$0xff] }
   0xd   :  { %19750 = vst [vmem:[#allocation19_spill] sm:$0xff] %v12154_v18  ;;  %19751 = vst [vmem:[#allocation20_spill] sm:$0xff] %v12159_v19  ;;  %v180_v28 = vld [vmem:[#allocation2 + $0x17] sm:$0xff]  ;;  %10997 = vmatprep.mubr.msk.f32.mxu1 %vm109_vm1, %v942_v27  ;;  %v12237_v32 = vld [vmem:[%s19660_s0 + $0xa8] sm:$0xff] }
   0xe   :  { %19752 = vst [vmem:[#allocation21_spill] sm:$0xff] %v12164_v20  ;;  %126 = vst.msk [vmem:[#allocation2 + $0x68] sm:$0xff] %vm109_vm1, %v12154_v18  ;;  %v12220_v29 = vld [vmem:[%s19660_s0 + $0x98] sm:$0xff]  ;;  %v12225_v30 = vsel %vm25_vm2, %v180_v28, 0.0  ;;  %v12242_v33 = vld [vmem:[%s19660_s0 + $0xb0] sm:$0xff] }
   0xf   :  { %127 = vst.msk [vmem:[#allocation2 + $0x70] sm:$0xff] %vm109_vm1, %v12159_v19  ;;  %128 = vst.msk [vmem:[#allocation2 + $0x78] sm:$0xff] %vm109_vm1, %v12164_v20  ;;  %10899 = vmatprep.mubr.msk.f32.mxu0 %vm109_vm1, %v12225_v30  ;;  %v943_v34 = vld [vmem:[#allocation2 + $0x20] sm:$0xff]  ;;  %v944_v36 = vld [vmem:[#allocation2 + $0x28] sm:$0xff] }
  0x10   :  { %19753 = vst [vmem:[#allocation22_spill] sm:$0xff] %v12177_v21  ;;  %19754 = vst [vmem:[#allocation23_spill] sm:$0xff] %v12182_v22  ;;  %v12246_v35 = vld [vmem:[#allocation2 + $0x1f] sm:$0xff]  ;;  %10998 = vmatmul.mubr.msk.f32.gmra.mxu1 %vm109_vm1, %v943_v34  ;;  %v182_v37 = vld [vmem:[#allocation2 + $0x27] sm:$0xff] }
  0x11   :  { %19755 = vst [vmem:[#allocation24_spill] sm:$0xff] %v12187_v23  ;;  %129 = vst.msk [vmem:[#allocation2 + $0x80] sm:$0xff] %vm109_vm1, %v12177_v21  ;;  %10900 = vmatmul.mubr.msk.f32.gmra.mxu0 %vm109_vm1, %v12246_v35  ;;  %11000 = vmatprep.mubr.msk.f32.mxu1 %vm109_vm1, %v944_v36  ;;  %v12260_v38 = vsel %vm25_vm2, %v182_v37, 0.0  ;;  %v945_v39 = vld [vmem:[#allocation2 + $0x30] sm:$0xff]  ;;  %v946_v42 = vld [vmem:[#allocation2 + $0x38] sm:$0xff] }
  0x12   :  { %130 = vst.msk [vmem:[#allocation2 + $0x88] sm:$0xff] %vm109_vm1, %v12182_v22  ;;  %131 = vst.msk [vmem:[#allocation2 + $0x90] sm:$0xff] %vm109_vm1, %v12187_v23  ;;  %v12262_v40 = vld [vmem:[#allocation2 + $0x2f] sm:$0xff]  ;;  %v184_v41 = vld [vmem:[#allocation2 + $0x37] sm:$0xff]  ;;  %10902 = vmatprep.mubr.msk.f32.mxu0 %vm109_vm1, %v12260_v38 }
  0x13   :  { %19756 = vst [vmem:[#allocation25_spill] sm:$0xff] %v12199_v24  ;;  %19757 = vst [vmem:[#allocation26_spill] sm:$0xff] %v12204_v25  ;;  %v12268_v43 = vsel %vm25_vm2, %v184_v41, 0.0  ;;  %v186_v44 = vld [vmem:[#allocation2 + $0x47] sm:$0xff]  ;;  %v12276_v46 = vld [vmem:[#allocation2 + $0x3f] sm:$0xff] }
  0x14   :  { %19758 = vst [vmem:[#allocation27_spill] sm:$0xff] %v12209_v26  ;;  %132 = vst.msk [vmem:[#allocation2 + $0x98] sm:$0xff] %vm109_vm1, %v12199_v24  ;;  %11001 = vmatmul.mubr.msk.f32.gmra.mxu1 %vm109_vm1, %v945_v39  ;;  %v947_v45 = vld [vmem:[#allocation2 + $0x40] sm:$0xff]  ;;  %v948_v47 = vld [vmem:[#allocation2 + $0x48] sm:$0xff]  ;;  %v12280_v48 = vsel %vm25_vm2, %v186_v44, 0.0 }
  0x15   :  { %133 = vst.msk [vmem:[#allocation2 + $0xa0] sm:$0xff] %vm109_vm1, %v12204_v25  ;;  %134 = vst.msk [vmem:[#allocation2 + $0xa8] sm:$0xff] %vm109_vm1, %v12209_v26  ;;  %10903 = vmatmul.mubr.msk.f32.gmra.mxu0 %vm109_vm1, %v12262_v40  ;;  %11003 = vmatprep.mubr.msk.f32.mxu1 %vm109_vm1, %v946_v42  ;;  %v188_v49 = vld [vmem:[#allocation2 + $0x57] sm:$0xff]  ;;  %v12288_v51 = vld [vmem:[#allocation2 + $0x4f] sm:$0xff] }
  0x16   :  { %19759 = vst [vmem:[#allocation28_spill] sm:$0xff] %v12220_v29  ;;  %135 = vst.msk [vmem:[#allocation2 + $0xb0] sm:$0xff] %vm109_vm1, %v12220_v29  ;;  %10905 = vmatprep.mubr.msk.f32.mxu0 %vm109_vm1, %v12268_v43  ;;  %v949_v50 = vld [vmem:[#allocation2 + $0x50] sm:$0xff]  ;;  %v950_v52 = vld [vmem:[#allocation2 + $0x58] sm:$0xff]  ;;  %v12292_v53 = vsel %vm25_vm2, %v188_v49, 0.0 }
  0x17   :  { %19760 = vst [vmem:[#allocation29_spill] sm:$0xff] %v12232_v31  ;;  %19761 = vst [vmem:[#allocation30_spill] sm:$0xff] %v12237_v32  ;;  %v190_v54 = vld [vmem:[#allocation2 + $0x67] sm:$0xff]  ;;  %v12297_v56 = vld [vmem:[#allocation2 + $0x5f] sm:$0xff] }
  0x18   :  { %19762 = vst [vmem:[#allocation31_spill] sm:$0xff] %v12242_v33  ;;  %136 = vst.msk [vmem:[#allocation2 + $0xb8] sm:$0xff] %vm109_vm1, %v12232_v31  ;;  %11004 = vmatmul.mubr.msk.f32.gmra.mxu1 %vm109_vm1, %v947_v45  ;;  %v951_v55 = vld [vmem:[#allocation2 + $0x60] sm:$0xff]  ;;  %v952_v57 = vld [vmem:[#allocation2 + $0x68] sm:$0xff]  ;;  %v12309_v60 = vsel %vm25_vm2, %v190_v54, 0.0 }
  0x19   :  { %137 = vst.msk [vmem:[#allocation2 + $0xc0] sm:$0xff] %vm109_vm1, %v12237_v32  ;;  %138 = vst.msk [vmem:[#allocation2 + $0xc8] sm:$0xff] %vm109_vm1, %v12242_v33  ;;  %10906 = vmatmul.mubr.msk.f32.gmra.mxu0 %vm109_vm1, %v12276_v46  ;;  %11006 = vmatprep.mubr.msk.f32.mxu1 %vm109_vm1, %v948_v47  ;;  %v192_v58 = vld [vmem:[#allocation2 + $0x77] sm:$0xff]  ;;  %v12316_v61 = vld [vmem:[%s19660_s0 + $0xc0] sm:$0xff] }
  0x1a   :  { %10908 = vmatprep.mubr.msk.f32.mxu0 %vm109_vm1, %v12280_v48  ;;  %v12305_v59 = vld [vmem:[%s19660_s0 + $0xb8] sm:$0xff]  ;;  %19764 = vst [vmem:[#allocation33_spill] sm:$0xff] %v12316_v61  ;;  %v12321_v62 = vld [vmem:[%s19660_s0 + $0xc8] sm:$0xff]  ;;  %v12326_v63 = vld [vmem:[%s19660_s0 + $0xd0] sm:$0xff]  ;;  %v12401_v44 = vsel %vm25_vm2, %v192_v58, 0.0 }
  0x1b   :  { %19763 = vst [vmem:[#allocation32_spill] sm:$0xff] %v12305_v59  ;;  %139 = vst.msk [vmem:[#allocation2 + $0xd0] sm:$0xff] %vm109_vm1, %v12305_v59  ;;  %v953_v0 = vld [vmem:[#allocation2 + $0x70] sm:$0xff]  ;;  %v12339_v4 = vld [vmem:[%s19660_s0 + $0xd8] sm:$0xff] }
  0x1c   :  { %11007 = vmatmul.mubr.msk.f32.gmra.mxu1 %vm109_vm1, %v949_v50  ;;  %19765 = vst [vmem:[#allocation34_spill] sm:$0xff] %v12321_v62  ;;  %19766 = vst [vmem:[#allocation35_spill] sm:$0xff] %v12326_v63  ;;  %v12328_v2 = vld [vmem:[#allocation2 + $0x6f] sm:$0xff]  ;;  %v12344_v5 = vld [vmem:[%s19660_s0 + $0xe0] sm:$0xff] }
  0x1d   :  { %10909 = vmatmul.mubr.msk.f32.gmra.mxu0 %vm109_vm1, %v12288_v51  ;;  %11009 = vmatprep.mubr.msk.f32.mxu1 %vm109_vm1, %v950_v52  ;;  %140 = vst.msk [vmem:[#allocation2 + $0xd8] sm:$0xff] %vm109_vm1, %v12316_v61  ;;  %141 = vst.msk [vmem:[#allocation2 + $0xe0] sm:$0xff] %vm109_vm1, %v12321_v62  ;;  %v12349_v6 = vld [vmem:[%s19660_s0 + $0xe8] sm:$0xff]  ;;  %v954_v27 = vld [vmem:[#allocation2 + $0x78] sm:$0xff] }
  0x1e   :  { %10911 = vmatprep.mubr.msk.f32.mxu0 %vm109_vm1, %v12292_v53  ;;  %142 = vst.msk [vmem:[#allocation2 + $0xe8] sm:$0xff] %vm109_vm1, %v12326_v63  ;;  %19767 = vst [vmem:[#allocation36_spill] sm:$0xff] %v12339_v4  ;;  %v12363_v28 = vld [vmem:[%s19660_s0 + $0x100] sm:$0xff]  ;;  %v12368_v34 = vld [vmem:[%s19660_s0 + $0xf8] sm:$0xff] }
  0x1f   :  { %19768 = vst [vmem:[#allocation37_spill] sm:$0xff] %v12344_v5  ;;  %19769 = vst [vmem:[#allocation38_spill] sm:$0xff] %v12349_v6  ;;  %v12373_v36 = vld [vmem:[%s19660_s0 + $0x108] sm:$0xff]  ;;  %v12387_v39 = vld [vmem:[%s19660_s0 + $0x110] sm:$0xff] }
  0x20   :  { %11010 = vmatmul.mubr.msk.f32.gmra.mxu1 %vm109_vm1, %v951_v55  ;;  %143 = vst.msk [vmem:[#allocation2 + $0xf0] sm:$0xff] %vm109_vm1, %v12339_v4  ;;  %144 = vst.msk [vmem:[#allocation2 + $0xf8] sm:$0xff] %vm109_vm1, %v12344_v5  ;;  %v194_v37 = vld [vmem:[#allocation2 + $0x87] sm:$0xff]  ;;  %v12392_v41 = vld [vmem:[%s19660_s0 + $0x118] sm:$0xff] }
  0x21   :  { %10912 = vmatmul.mubr.msk.f32.gmra.mxu0 %vm109_vm1, %v12297_v56  ;;  %145 = vst.msk [vmem:[#allocation2 + $0x100] sm:$0xff] %vm109_vm1, %v12349_v6  ;;  %19770 = vst [vmem:[#allocation39_spill] sm:$0xff] %v12363_v28  ;;  %11012 = vmatprep.mubr.msk.f32.mxu1 %vm109_vm1, %v952_v57  ;;  %v12397_v42 = vld [vmem:[%s19660_s0 + $0x120] sm:$0xff]  ;;  %v12412_v45 = vld [vmem:[%s19660_s0 + $0x128] sm:$0xff] }
  0x22   :  { %19771 = vst [vmem:[#allocation40_spill] sm:$0xff] %v12368_v34  ;;  %19772 = vst [vmem:[#allocation41_spill] sm:$0xff] %v12373_v36  ;;  %10914 = vmatprep.mubr.msk.f32.mxu0 %vm109_vm1, %v12309_v60  ;;  %v12417_v47 = vld [vmem:[%s19660_s0 + $0x130] sm:$0xff]  ;;  %v12422_v49 = vld [vmem:[%s19660_s0 + $0x138] sm:$0xff] }
  0x23   :  { %148 = vst.msk [vmem:[#allocation2 + $0x118] sm:$0xff] %vm109_vm1, %v12363_v28  ;;  %147 = vst.msk [vmem:[#allocation2 + $0x110] sm:$0xff] %vm109_vm1, %v12368_v34  ;;  %v12433_v50 = vld [vmem:[%s19660_s0 + $0x140] sm:$0xff]  ;;  %v12438_v52 = vld [vmem:[%s19660_s0 + $0x148] sm:$0xff] }
  0x24   :  { %149 = vst.msk [vmem:[#allocation2 + $0x120] sm:$0xff] %vm109_vm1, %v12373_v36  ;;  %19773 = vst [vmem:[#allocation42_spill] sm:$0xff] %v12387_v39  ;;  %v12443_v54 = vld [vmem:[%s19660_s0 + $0x150] sm:$0xff]  ;;  %11013 = vmatmul.mubr.msk.f32.gmra.mxu1 %vm109_vm1, %v953_v0  ;;  %v12457_v55 = vld [vmem:[%s19660_s0 + $0x158] sm:$0xff] }
  0x25   :  { %19774 = vst [vmem:[#allocation43_spill] sm:$0xff] %v12392_v41  ;;  %19775 = vst [vmem:[#allocation44_spill] sm:$0xff] %v12397_v42  ;;  %10915 = vmatmul.mubr.msk.f32.gmra.mxu0 %vm109_vm1, %v12328_v2  ;;  %v12462_v57 = vld [vmem:[%s19660_s0 + $0x160] sm:$0xff]  ;;  %v12467_v58 = vld [vmem:[%s19660_s0 + $0x168] sm:$0xff]  ;;  %11015 = vmatprep.mubr.msk.f32.mxu1 %vm109_vm1, %v954_v27 }
  0x26   :  { %150 = vst.msk [vmem:[#allocation2 + $0x128] sm:$0xff] %vm109_vm1, %v12387_v39  ;;  %151 = vst.msk [vmem:[#allocation2 + $0x130] sm:$0xff] %vm109_vm1, %v12392_v41  ;;  %10917 = vmatprep.mubr.msk.f32.mxu0 %vm109_vm1, %v12401_v44  ;;  %v955_v0 = vld [vmem:[#allocation2 + $0x80] sm:$0xff]  ;;  %v956_v27 = vld [vmem:[#allocation2 + $0x88] sm:$0xff] }
  0x27   :  { %152 = vst.msk [vmem:[#allocation2 + $0x138] sm:$0xff] %vm109_vm1, %v12397_v42  ;;  %19776 = vst [vmem:[#allocation45_spill] sm:$0xff] %v12412_v45  ;;  %v12472_v3 = vld [vmem:[#allocation2 + $0x7f] sm:$0xff]  ;;  %v12545_v36 = vld [vmem:[%s19660_s0 + $0x188] sm:$0xff] }
  0x28   :  { %19777 = vst [vmem:[#allocation46_spill] sm:$0xff] %v12417_v47  ;;  %19778 = vst [vmem:[#allocation47_spill] sm:$0xff] %v12422_v49  ;;  %11016 = vmatmul.mubr.msk.f32.gmra.mxu1 %vm109_vm1, %v955_v0  ;;  %v959_v0 = vld [vmem:[#allocation2 + $0xa0] sm:$0xff]  ;;  %v12535_v39 = vld [vmem:[%s19660_s0 + $0x178] sm:$0xff] }
  0x29   :  { %153 = vst.msk [vmem:[#allocation2 + $0x140] sm:$0xff] %vm109_vm1, %v12412_v45  ;;  %154 = vst.msk [vmem:[#allocation2 + $0x148] sm:$0xff] %vm109_vm1, %v12417_v47  ;;  %10918 = vmatmul.mubr.msk.f32.gmra.mxu0 %vm109_vm1, %v12472_v3  ;;  %11018 = vmatprep.mubr.msk.f32.mxu1 %vm109_vm1, %v956_v27  ;;  %v12509_v27 = vld [vmem:[#allocation2 + $0x9f] sm:$0xff]  ;;  %v12559_v28 = vld [vmem:[%s19660_s0 + $0x190] sm:$0xff] }
  0x2a   :  { %155 = vst.msk [vmem:[#allocation2 + $0x150] sm:$0xff] %vm109_vm1, %v12422_v49  ;;  %19779 = vst [vmem:[#allocation48_spill] sm:$0xff] %v12433_v50  ;;  %v960_v49 = vld [vmem:[#allocation2 + $0xa8] sm:$0xff]  ;;  %v962_v45 = vld [vmem:[#allocation2 + $0xb8] sm:$0xff] }
  0x2b   :  { %19780 = vst [vmem:[#allocation49_spill] sm:$0xff] %v12438_v52  ;;  %19781 = vst [vmem:[#allocation50_spill] sm:$0xff] %v12443_v54  ;;  %v12527_v41 = vld [vmem:[#allocation2 + $0xbf] sm:$0xff]  ;;  %v12589_v34 = vld [vmem:[%s19660_s0 + $0x1b0] sm:$0xff] }
  0x2c   :  { %156 = vst.msk [vmem:[#allocation2 + $0x158] sm:$0xff] %vm109_vm1, %v12433_v50  ;;  %157 = vst.msk [vmem:[#allocation2 + $0x160] sm:$0xff] %vm109_vm1, %v12438_v52  ;;  %v12487_v52 = vsel %vm25_vm2, %v194_v37, 0.0  ;;  %v958_v50 = vld [vmem:[#allocation2 + $0x98] sm:$0xff]  ;;  %v968_v6 = vld [vmem:[#allocation2 + $0xe8] sm:$0xff] }
  0x2d   :  { %158 = vst.msk [vmem:[#allocation2 + $0x168] sm:$0xff] %vm109_vm1, %v12443_v54  ;;  %19782 = vst [vmem:[#allocation51_spill] sm:$0xff] %v12457_v55  ;;  %v12483_v54 = vld [vmem:[%s19660_s0 + $0x170] sm:$0xff]  ;;  %10920 = vmatprep.mubr.msk.f32.mxu0 %vm109_vm1, %v12487_v52  ;;  %v970_v63 = vld [vmem:[#allocation2 + $0xf8] sm:$0xff] }
  0x2e   :  { %19783 = vst [vmem:[#allocation52_spill] sm:$0xff] %v12462_v57  ;;  %19784 = vst [vmem:[#allocation53_spill] sm:$0xff] %v12467_v58  ;;  %v208_v4 = vld [vmem:[#allocation2 + $0xf7] sm:$0xff]  ;;  %v212_v61 = vld [vmem:[#allocation2 + $0x127] sm:$0xff] }
  0x2f   :  { %159 = vst.msk [vmem:[#allocation2 + $0x170] sm:$0xff] %vm109_vm1, %v12457_v55  ;;  %160 = vst.msk [vmem:[#allocation2 + $0x178] sm:$0xff] %vm109_vm1, %v12462_v57  ;;  %v196_v55 = vld [vmem:[#allocation2 + $0x97] sm:$0xff]  ;;  %v12497_v57 = vld [vmem:[#allocation2 + $0x8f] sm:$0xff]  ;;  %v12692_v62 = vsel %vm25_vm2, %v208_v4, 0.0  ;;  %v19801_v4 = vmov 0.0  }
  0x30   :  { %161 = vst.msk [vmem:[#allocation2 + $0x180] sm:$0xff] %vm109_vm1, %v12467_v58  ;;  %19785 = vst [vmem:[#allocation54_spill] sm:$0xff] %v12483_v54  ;;  %v957_v58 = vld [vmem:[#allocation2 + $0x90] sm:$0xff]  ;;  %v12501_v37 = vsel %vm25_vm2, %v196_v55, 0.0  ;;  %10921 = vmatmul.mubr.msk.f32.gmra.mxu0 %vm109_vm1, %v12497_v57  ;;  %v973_v59 = vld [vmem:[#allocation2 + $0x120] sm:$0xff] }
  0x31   :  { %162 = vst.msk [vmem:[#allocation2 + $0x188] sm:$0xff] %vm109_vm1, %v12483_v54  ;;  %v198_v54 = vld [vmem:[#allocation2 + $0xa7] sm:$0xff]  ;;  %11019 = vmatmul.mubr.msk.f32.gmra.mxu1 %vm109_vm1, %v957_v58  ;;  %10923 = vmatprep.mubr.msk.f32.mxu0 %vm109_vm1, %v12501_v37  ;;  %v200_v55 = vld [vmem:[#allocation2 + $0xb7] sm:$0xff]  ;;  %v12521_v58 = vld [vmem:[#allocation2 + $0xaf] sm:$0xff] }
  0x32   :  { %11021 = vmatprep.mubr.msk.f32.mxu1 %vm109_vm1, %v958_v50  ;;  %v12513_v47 = vsel %vm25_vm2, %v198_v54, 0.0  ;;  %v961_v50 = vld [vmem:[#allocation2 + $0xb0] sm:$0xff]  ;;  %v12525_v42 = vsel %vm25_vm2, %v200_v55, 0.0  ;;  %v963_v54 = vld [vmem:[#allocation2 + $0xc0] sm:$0xff]  ;;  %19786 = vst [vmem:[#allocation55_spill] sm:$0xff] %v12535_v39  ;;  %19788 = vst [vmem:[#allocation57_spill] sm:$0xff] %v12545_v36 }
  0x33   :  { %v12540_v55 = vld [vmem:[%s19660_s0 + $0x180] sm:$0xff]  ;;  %163 = vst.msk [vmem:[#allocation2 + $0x190] sm:$0xff] %vm109_vm1, %v12535_v39  ;;  %165 = vst.msk [vmem:[#allocation2 + $0x1a0] sm:$0xff] %vm109_vm1, %v12545_v36  ;;  %v12584_v36 = vld [vmem:[%s19660_s0 + $0x1a8] sm:$0xff] }
  0x34   :  { %10924 = vmatmul.mubr.msk.f32.gmra.mxu0 %vm109_vm1, %v12509_v27  ;;  %19787 = vst [vmem:[#allocation56_spill] sm:$0xff] %v12540_v55  ;;  %164 = vst.msk [vmem:[#allocation2 + $0x198] sm:$0xff] %vm109_vm1, %v12540_v55  ;;  %v12569_v39 = vld [vmem:[%s19660_s0 + $0x1a0] sm:$0xff]  ;;  %v12721_v33 = vld [vmem:[%s19660_s0 + $0xf0] sm:$0xff] }
  0x35   :  { %11022 = vmatmul.mubr.msk.f32.gmra.mxu1 %vm109_vm1, %v959_v0  ;;  %10926 = vmatprep.mubr.msk.f32.mxu0 %vm109_vm1, %v12513_v47  ;;  %v202_v0 = vld [vmem:[#allocation2 + $0xc7] sm:$0xff]  ;;  %19789 = vst [vmem:[#allocation58_spill] sm:$0xff] %v12559_v28  ;;  %19791 = vst [vmem:[#allocation60_spill] sm:$0xff] %v12569_v39 }
  0x36   :  { %11024 = vmatprep.mubr.msk.f32.mxu1 %vm109_vm1, %v960_v49  ;;  %v964_v49 = vld [vmem:[#allocation2 + $0xc8] sm:$0xff]  ;;  %v12573_v55 = vsel %vm25_vm2, %v202_v0, 0.0  ;;  %166 = vst.msk [vmem:[#allocation2 + $0x1a8] sm:$0xff] %vm109_vm1, %v12559_v28  ;;  %168 = vst.msk [vmem:[#allocation2 + $0x1b8] sm:$0xff] %vm109_vm1, %v12569_v39  ;;  %v12594_v0 = vld [vmem:[%s19660_s0 + $0x1b8] sm:$0xff] }
  0x37   :  { %19792 = vst [vmem:[#allocation61_spill] sm:$0xff] %v12584_v36  ;;  %19793 = vst [vmem:[#allocation62_spill] sm:$0xff] %v12589_v34  ;;  %v965_v28 = vld [vmem:[#allocation2 + $0xd0] sm:$0xff]  ;;  %v12605_v39 = vld [vmem:[%s19660_s0 + $0x1c0] sm:$0xff] }
  0x38   :  { %10927 = vmatmul.mubr.msk.f32.gmra.mxu0 %vm109_vm1, %v12521_v58  ;;  %19794 = vst [vmem:[#allocation63_spill] sm:$0xff] %v12594_v0  ;;  %169 = vst.msk [vmem:[#allocation2 + $0x1c0] sm:$0xff] %vm109_vm1, %v12584_v36  ;;  %v12615_v36 = vld [vmem:[%s19660_s0 + $0x1d0] sm:$0xff] }
  0x39   :  { %11025 = vmatmul.mubr.msk.f32.gmra.mxu1 %vm109_vm1, %v961_v50  ;;  %10929 = vmatprep.mubr.msk.f32.mxu0 %vm109_vm1, %v12525_v42  ;;  %v204_v50 = vld [vmem:[#allocation2 + $0xd7] sm:$0xff]  ;;  %170 = vst.msk [vmem:[#allocation2 + $0x1c8] sm:$0xff] %vm109_vm1, %v12589_v34  ;;  %171 = vst.msk [vmem:[#allocation2 + $0x1d0] sm:$0xff] %vm109_vm1, %v12594_v0 }
  0x3a   :  { %11027 = vmatprep.mubr.msk.f32.mxu1 %vm109_vm1, %v962_v45  ;;  %v12564_v45 = vld [vmem:[%s19660_s0 + $0x198] sm:$0xff]  ;;  %19795 = vst [vmem:[#allocation64_spill] sm:$0xff] %v12605_v39  ;;  %19797 = vst [vmem:[#allocation66_spill] sm:$0xff] %v12615_v36 }
  0x3b   :  { %19790 = vst [vmem:[#allocation59_spill] sm:$0xff] %v12564_v45  ;;  %167 = vst.msk [vmem:[#allocation2 + $0x1b0] sm:$0xff] %vm109_vm1, %v12564_v45  ;;  %v12610_v45 = vld [vmem:[%s19660_s0 + $0x1c8] sm:$0xff]  ;;  %v12629_v0 = vld [vmem:[%s19660_s0 + $0x1d8] sm:$0xff] }
  0x3c   :  { %19796 = vst [vmem:[#allocation65_spill] sm:$0xff] %v12610_v45  ;;  %10930 = vmatmul.mubr.msk.f32.gmra.mxu0 %vm109_vm1, %v12527_v41  ;;  %172 = vst.msk [vmem:[#allocation2 + $0x1d8] sm:$0xff] %vm109_vm1, %v12605_v39  ;;  %v12639_v39 = vld [vmem:[%s19660_s0 + $0x1e8] sm:$0xff]  ;;  %v966_v34 = vld [vmem:[#allocation2 + $0xd8] sm:$0xff] }
  0x3d   :  { %11028 = vmatmul.mubr.msk.f32.gmra.mxu1 %vm109_vm1, %v963_v54  ;;  %173 = vst.msk [vmem:[#allocation2 + $0x1e0] sm:$0xff] %vm109_vm1, %v12610_v45  ;;  %174 = vst.msk [vmem:[#allocation2 + $0x1e8] sm:$0xff] %vm109_vm1, %v12615_v36  ;;  %v12634_v54 = vld [vmem:[%s19660_s0 + $0x1e0] sm:$0xff]  ;;  %10932 = vmatprep.mubr.msk.f32.mxu0 %vm109_vm1, %v12573_v55  ;;  %v12644_v36 = vld [vmem:[#allocation2 + $0xcf] sm:$0xff] }
  0x3e   :  { %19798 = vst [vmem:[#allocation67_spill] sm:$0xff] %v12629_v0  ;;  %19799 = vst [vmem:[#allocation68_spill] sm:$0xff] %v12634_v54  ;;  %11030 = vmatprep.mubr.msk.f32.mxu1 %vm109_vm1, %v964_v49  ;;  %v12655_v45 = vld [vmem:[%s19661_s1 + $0x10] sm:$0xf]  ;;  %v12660_v49 = vld [vmem:[%s19661_s1 + $0x14] sm:$0xf] }
  0x3f   :  { %19800 = vst [vmem:[#allocation69_spill] sm:$0xff] %v12639_v39  ;;  %175 = vst.msk [vmem:[#allocation2 + $0x1f0] sm:$0xff] %vm109_vm1, %v12629_v0  ;;  %v12664_v0 = vsel %vm25_vm2, %v204_v50, 0.0  ;;  %11286 = vmatprep.subr.msk.mxu0 %vm488_vm0, %v12655_v45  ;;  %11384 = vmatprep.subr.msk.mxu1 %vm488_vm0, %v12660_v49  ;;  %v12676_v50 = vld [vmem:[#allocation2 + $0xdf] sm:$0xff] }
  0x40   :  { %176 = vst.msk [vmem:[#allocation2 + $0x1f8] sm:$0xff] %vm109_vm1, %v12634_v54  ;;  %177 = vst.msk [vmem:[#allocation2 + $0x200] sm:$0xff] %vm109_vm1, %v12639_v39  ;;  %v206_v39 = vld [vmem:[#allocation2 + $0xe7] sm:$0xff]  ;;  %10933 = vmatmul.mubr.msk.f32.gmra.mxu0 %vm109_vm1, %v12644_v36 }
  0x41   :  { %11031 = vmatmul.mubr.msk.f32.gmra.mxu1 %vm109_vm1, %v965_v28  ;;  %10935 = vmatprep.mubr.msk.f32.mxu0 %vm109_vm1, %v12664_v0  ;;  %v967_v54 = vld [vmem:[#allocation2 + $0xe0] sm:$0xff]  ;;  %v12680_v5 = vsel %vm25_vm2, %v206_v39, 0.0  ;;  %v969_v28 = vld [vmem:[#allocation2 + $0xf0] sm:$0xff]  ;;  %19802 = vst [vmem:[#allocation70_spill] sm:$0xff] %v12721_v33 }
  0x42   :  { %11033 = vmatprep.mubr.msk.f32.mxu1 %vm109_vm1, %v966_v34  ;;  %v12688_v34 = vld [vmem:[#allocation2 + $0xef] sm:$0xff]  ;;  %v12700_v39 = vld [vmem:[#allocation2 + $0xff] sm:$0xff] }
  0x44   :  { %10936 = vmatmul.mubr.msk.f32.gmra.mxu0 %vm109_vm1, %v12676_v50 }
  0x45   :  { %11034 = vmatmul.mubr.msk.f32.gmra.mxu1 %vm109_vm1, %v967_v54  ;;  %10938 = vmatprep.mubr.msk.f32.mxu0 %vm109_vm1, %v12680_v5  ;;  %v210_v54 = vld [vmem:[#allocation2 + $0x117] sm:$0xff] }
  0x46   :  { %11036 = vmatprep.mubr.msk.f32.mxu1 %vm109_vm1, %v968_v6  ;;  %v971_v6 = vld [vmem:[#allocation2 + $0x100] sm:$0xff] }
  0x48   :  { %10939 = vmatmul.mubr.msk.f32.gmra.mxu0 %vm109_vm1, %v12688_v34 }
  0x49   :  { %11037 = vmatmul.mubr.msk.f32.gmra.mxu1 %vm109_vm1, %v969_v28  ;;  %10941 = vmatprep.mubr.msk.f32.mxu0 %vm109_vm1, %v12692_v62  ;;  %v972_v28 = vld [vmem:[#allocation2 + $0x118] sm:$0xff] }
  0x4a   :  { %11039 = vmatprep.mubr.msk.f32.mxu1 %vm109_vm1, %v970_v63  ;;  %v12709_v63 = vsel %vm25_vm2, %v210_v54, 0.0 }
  0x4c   :  { %10942 = vmatmul.mubr.msk.f32.gmra.mxu0 %vm109_vm1, %v12700_v39 }
  0x4d   :  { %11040 = vmatmul.mubr.msk.f32.gmra.mxu1 %vm109_vm1, %v971_v6  ;;  %10944 = vmatprep.mubr.f32.mxu0 %v19801_v4  ;;  %v12716_v6 = vld [vmem:[#allocation2 + $0x11f] sm:$0xff] }
  0x4e   :  { %11042 = vmatprep.mubr.f32.mxu1 %v19801_v4 }
  0x50   :  { %10945 = vmatmul.mubr.f32.gmra.mxu0 %v19801_v4 }
  0x51   :  { %11043 = vmatmul.mubr.f32.gmra.mxu1 %v19801_v4  ;;  %10947 = vmatprep.mubr.msk.f32.mxu0 %vm109_vm1, %v12709_v63 }
  0x52   :  { %11045 = vmatprep.mubr.msk.f32.mxu1 %vm109_vm1, %v972_v28 }
  0x53   :  { %13 = vsyncpa [#allocation6], 0  ;;  %v974_v54 = vld [vmem:[#allocation2 + $0x128] sm:$0xff]  ;;  %v12725_v32 = vsel %vm25_vm2, %v212_v61, 0.0  ;;  %146 = vst.msk [vmem:[#allocation2 + $0x108] sm:$0xff] %vm109_vm1, %v12721_v33  ;;  %v214_v28 = vld [vmem:[#allocation2 + $0x137] sm:$0xff] }
  0x54   :  { %10948 = vmatmul.mubr.msk.f32.gmra.mxu0 %vm109_vm1, %v12716_v6  ;;  %v975_v31 = vld [vmem:[#allocation2 + $0x130] sm:$0xff]  ;;  %v976_v26 = vld [vmem:[#allocation2 + $0x138] sm:$0xff]  ;;  %v12739_v61 = vsel %vm25_vm2, %v214_v28, 0.0  ;;  %v216_v33 = vld [vmem:[#allocation2 + $0x147] sm:$0xff]  ;;  %vm877_vm4 = vcmask 64512   ;;  %s12013_s11 = smov [#allocation3]  }
  0x55   :  { %11046 = vmatmul.mubr.msk.f32.gmra.mxu1 %vm109_vm1, %v973_v59  ;;  %10950 = vmatprep.mubr.msk.f32.mxu0 %vm109_vm1, %v12725_v32  ;;  %v12735_v29 = vld [vmem:[#allocation2 + $0x12f] sm:$0xff]  ;;  %v977_v59 = vld [vmem:[#allocation2 + $0x140] sm:$0xff]  ;;  %v12751_v24 = vsel %vm25_vm2, %v216_v33, 0.0  ;;  %v218_v28 = vld [vmem:[#allocation2 + $0x157] sm:$0xff]  ;;  %s9582_s12 = sshll.u32 %s12013_s11, 4  ;;  %vm8463_vm5 = vcmask 1040384   ;;  %s9583_s12 = int_to_ptr.vmem [resolvable:$true] %s9582_s12 }
  0x56   :  { %11048 = vmatprep.mubr.msk.f32.mxu1 %vm109_vm1, %v974_v54  ;;  %v12747_v54 = vld [vmem:[#allocation2 + $0x13f] sm:$0xff]  ;;  %v978_v25 = vld [vmem:[#allocation2 + $0x148] sm:$0xff]  ;;  %v12763_v22 = vsel %vm25_vm2, %v218_v28, 0.0  ;;  %v222_v28 = vld [vmem:[#allocation2 + $0x177] sm:$0xff]  ;;  %vm8465_vm6 = vcmask 58368   ;;  %s11968_s17 = scalar_lea.vmem %s9583_s12, 32  ;;  %p11973_p1 = scmp.lt.s32.totalorder %s9583_s12, %s9583_s12 }
  0x57   :  { %v980_v23 = vld [vmem:[#allocation2 + $0x158] sm:$0xff]  ;;  %v220_v33 = vld [vmem:[#allocation2 + $0x167] sm:$0xff]  ;;  %v12787_v18 = vsel %vm25_vm2, %v222_v28, 0.0  ;;  %p11969_p0 = scmp.ne.s32.totalorder %s9583_s12, %s11968_s17  ;;  %p11974_p2 = scmp.lt.s32.totalorder %s11968_s17, %s11968_s17 }
  0x58   :  { %10951 = vmatmul.mubr.msk.f32.gmra.mxu0 %vm109_vm1, %v12735_v29  ;;  %v982_v21 = vld [vmem:[#allocation2 + $0x168] sm:$0xff]  ;;  %v12775_v20 = vsel %vm25_vm2, %v220_v33, 0.0  ;;  %v984_v19 = vld [vmem:[#allocation2 + $0x178] sm:$0xff] }
  0x59   :  { %11049 = vmatmul.mubr.msk.f32.gmra.mxu1 %vm109_vm1, %v975_v31  ;;  %10953 = vmatprep.mubr.msk.f32.mxu0 %vm109_vm1, %v12739_v61  ;;  %v12759_v31 = vld [vmem:[#allocation2 + $0x14f] sm:$0xff]  ;;  %v224_v33 = vld [vmem:[#allocation2 + $0x187] sm:$0xff]  ;;  %v226_v28 = vld [vmem:[#allocation2 + $0x197] sm:$0xff]  ;;  %p11975_p3 = por %p11974_p2, %p11973_p1 }
  0x5a   :  { %11051 = vmatprep.mubr.msk.f32.mxu1 %vm109_vm1, %v976_v26  ;;  %v979_v26 = vld [vmem:[#allocation2 + $0x150] sm:$0xff]  ;;  %v986_v17 = vld [vmem:[#allocation2 + $0x188] sm:$0xff]  ;;  %v12799_v16 = vsel %vm25_vm2, %v224_v33, 0.0  ;;  %v988_v15 = vld [vmem:[#allocation2 + $0x198] sm:$0xff]  ;;  %v12811_v13 = vsel %vm25_vm2, %v226_v28, 0.0 }
  0x5b   :  { %v228_v33 = vld [vmem:[#allocation2 + $0x1a7] sm:$0xff]  ;;  %v230_v28 = vld [vmem:[#allocation2 + $0x1b7] sm:$0xff]  ;;  %p11976_p4 = pnand %p11975_p3, %p11969_p0 }
  0x5c   :  { %10954 = vmatmul.mubr.msk.f32.gmra.mxu0 %vm109_vm1, %v12747_v54  ;;  %v990_v12 = vld [vmem:[#allocation2 + $0x1a8] sm:$0xff]  ;;  %v12823_v11 = vsel %vm25_vm2, %v228_v33, 0.0  ;;  %v992_v10 = vld [vmem:[#allocation2 + $0x1b8] sm:$0xff]  ;;  %v12835_v9 = vsel %vm25_vm2, %v230_v28, 0.0 }
  0x5d   :  { %11052 = vmatmul.mubr.msk.f32.gmra.mxu1 %vm109_vm1, %v977_v59  ;;  %10956 = vmatprep.mubr.msk.f32.mxu0 %vm109_vm1, %v12751_v24  ;;  %v12771_v59 = vld [vmem:[#allocation2 + $0x15f] sm:$0xff]  ;;  %19804 = vst [vmem:[#allocation72_spill] sm:$0xff] %v12835_v9  ;;  %v232_v33 = vld [vmem:[#allocation2 + $0x1c7] sm:$0xff]  ;;  %v234_v28 = vld [vmem:[#allocation2 + $0x1d7] sm:$0xff] }
  0x5e   :  { %11054 = vmatprep.mubr.msk.f32.mxu1 %vm109_vm1, %v978_v25  ;;  %v981_v25 = vld [vmem:[#allocation2 + $0x160] sm:$0xff]  ;;  %v994_v8 = vld [vmem:[#allocation2 + $0x1c8] sm:$0xff]  ;;  %v12847_v1 = vsel %vm25_vm2, %v232_v33, 0.0 }
  0x5f   :  { %19806 = vst [vmem:[#allocation74_spill] sm:$0xff] %v12847_v1  ;;  %v236_v33 = vld [vmem:[#allocation2 + $0x1e7] sm:$0xff] }
  0x60   :  { %10957 = vmatmul.mubr.msk.f32.gmra.mxu0 %vm109_vm1, %v12759_v31 }
  0x61   :  { %11055 = vmatmul.mubr.msk.f32.gmra.mxu1 %vm109_vm1, %v979_v26  ;;  %10959 = vmatprep.mubr.msk.f32.mxu0 %vm109_vm1, %v12763_v22  ;;  %v12783_v26 = vld [vmem:[#allocation2 + $0x16f] sm:$0xff] }
  0x62   :  { %11057 = vmatprep.mubr.msk.f32.mxu1 %vm109_vm1, %v980_v23  ;;  %v983_v23 = vld [vmem:[#allocation2 + $0x170] sm:$0xff] }
  0x64   :  { %10960 = vmatmul.mubr.msk.f32.gmra.mxu0 %vm109_vm1, %v12771_v59 }
  0x65   :  { %11058 = vmatmul.mubr.msk.f32.gmra.mxu1 %vm109_vm1, %v981_v25  ;;  %10962 = vmatprep.mubr.msk.f32.mxu0 %vm109_vm1, %v12775_v20  ;;  %v12795_v25 = vld [vmem:[#allocation2 + $0x17f] sm:$0xff] }
  0x66   :  { %11060 = vmatprep.mubr.msk.f32.mxu1 %vm109_vm1, %v982_v21  ;;  %v985_v21 = vld [vmem:[#allocation2 + $0x180] sm:$0xff] }
  0x68   :  { %10963 = vmatmul.mubr.msk.f32.gmra.mxu0 %vm109_vm1, %v12783_v26 }
  0x69   :  { %11061 = vmatmul.mubr.msk.f32.gmra.mxu1 %vm109_vm1, %v983_v23  ;;  %10965 = vmatprep.mubr.msk.f32.mxu0 %vm109_vm1, %v12787_v18  ;;  %v12807_v23 = vld [vmem:[#allocation2 + $0x18f] sm:$0xff] }
  0x6a   :  { %11063 = vmatprep.mubr.msk.f32.mxu1 %vm109_vm1, %v984_v19  ;;  %v987_v19 = vld [vmem:[#allocation2 + $0x190] sm:$0xff] }
  0x6c   :  { %10966 = vmatmul.mubr.msk.f32.gmra.mxu0 %vm109_vm1, %v12795_v25 }
  0x6d   :  { %11064 = vmatmul.mubr.msk.f32.gmra.mxu1 %vm109_vm1, %v985_v21  ;;  %10968 = vmatprep.mubr.msk.f32.mxu0 %vm109_vm1, %v12799_v16  ;;  %v12819_v21 = vld [vmem:[#allocation2 + $0x19f] sm:$0xff] }
  0x6e   :  { %11066 = vmatprep.mubr.msk.f32.mxu1 %vm109_vm1, %v986_v17  ;;  %v989_v17 = vld [vmem:[#allocation2 + $0x1a0] sm:$0xff] }
  0x70   :  { %10969 = vmatmul.mubr.msk.f32.gmra.mxu0 %vm109_vm1, %v12807_v23 }
  0x71   :  { %11067 = vmatmul.mubr.msk.f32.gmra.mxu1 %vm109_vm1, %v987_v19  ;;  %10971 = vmatprep.mubr.msk.f32.mxu0 %vm109_vm1, %v12811_v13  ;;  %v12831_v19 = vld [vmem:[#allocation2 + $0x1af] sm:$0xff] }
  0x72   :  { %11069 = vmatprep.mubr.msk.f32.mxu1 %vm109_vm1, %v988_v15  ;;  %v991_v15 = vld [vmem:[#allocation2 + $0x1b0] sm:$0xff]  ;;  %19803 = vst [vmem:[#allocation71_spill] sm:$0xff] %v12831_v19 }
  0x74   :  { %10972 = vmatmul.mubr.msk.f32.gmra.mxu0 %vm109_vm1, %v12819_v21 }
  0x75   :  { %11070 = vmatmul.mubr.msk.f32.gmra.mxu1 %vm109_vm1, %v989_v17  ;;  %10974 = vmatprep.mubr.msk.f32.mxu0 %vm109_vm1, %v12823_v11  ;;  %v12843_v17 = vld [vmem:[#allocation2 + $0x1bf] sm:$0xff] }
  0x76   :  { %11072 = vmatprep.mubr.msk.f32.mxu1 %vm109_vm1, %v990_v12  ;;  %v993_v12 = vld [vmem:[#allocation2 + $0x1c0] sm:$0xff]  ;;  %19805 = vst [vmem:[#allocation73_spill] sm:$0xff] %v12843_v17 }
  0x78   :  { %10975 = vmatmul.mubr.msk.f32.gmra.mxu0 %vm109_vm1, %v12831_v19  ;;  %v12859_v19 = vsel %vm25_vm2, %v234_v28, 0.0  ;;  %v998_v28 = vld [vmem:[#allocation2 + $0x1e8] sm:$0xff] }
  0x79   :  { %11073 = vmatmul.mubr.msk.f32.gmra.mxu1 %vm109_vm1, %v991_v15  ;;  %10977 = vmatprep.mubr.msk.f32.mxu0 %vm109_vm1, %v12835_v9  ;;  %v12855_v15 = vld [vmem:[#allocation2 + $0x1cf] sm:$0xff]  ;;  %v996_v9 = vld [vmem:[#allocation2 + $0x1d8] sm:$0xff]  ;;  %19808 = vst [vmem:[#allocation76_spill] sm:$0xff] %v12859_v19 }
  0x7a   :  { %11075 = vmatprep.mubr.msk.f32.mxu1 %vm109_vm1, %v992_v10  ;;  %v995_v10 = vld [vmem:[#allocation2 + $0x1d0] sm:$0xff]  ;;  %19807 = vst [vmem:[#allocation75_spill] sm:$0xff] %v12855_v15 }
  0x7c   :  { %10978 = vmatmul.mubr.msk.f32.gmra.mxu0 %vm109_vm1, %v12843_v17 }
  0x7d   :  { %11076 = vmatmul.mubr.msk.f32.gmra.mxu1 %vm109_vm1, %v993_v12  ;;  %10980 = vmatprep.mubr.msk.f32.mxu0 %vm109_vm1, %v12847_v1  ;;  %v12867_v12 = vld [vmem:[#allocation2 + $0x1df] sm:$0xff]  ;;  %v12872_v1 = vld [vmem:[%s19660_s0 + $0x1f0] sm:$0xff] }
  0x7e   :  { %11078 = vmatprep.mubr.msk.f32.mxu1 %vm109_vm1, %v994_v8  ;;  %v997_v8 = vld [vmem:[#allocation2 + $0x1e0] sm:$0xff]  ;;  %19809 = vst [vmem:[#allocation77_spill] sm:$0xff] %v12872_v1  ;;  %178 = vst.msk [vmem:[#allocation2 + $0x208] sm:$0xff] %vm109_vm1, %v12872_v1  ;;  %v12893_v1 = vld [vmem:[#allocation2 + $0x1ef] sm:$0xff] }
  0x80   :  { %10981 = vmatmul.mubr.msk.f32.gmra.mxu0 %vm109_vm1, %v12855_v15  ;;  %v1000_v15 = vld [vmem:[#allocation2 + $0x1f8] sm:$0xff] }
  0x81   :  { %11079 = vmatmul.mubr.msk.f32.gmra.mxu1 %vm109_vm1, %v995_v10  ;;  %10983 = vmatprep.mubr.msk.f32.mxu0 %vm109_vm1, %v12859_v19  ;;  %v12876_v10 = vsel %vm25_vm2, %v236_v33, 0.0  ;;  %v12883_v19 = vld [vmem:[%s19660_s0 + $0x1f8] sm:$0xff]  ;;  %v999_v33 = vld [vmem:[#allocation2 + $0x1f0] sm:$0xff] }
  0x82   :  { %11081 = vmatprep.mubr.msk.f32.mxu1 %vm109_vm1, %v996_v9  ;;  %19810 = vst [vmem:[#allocation78_spill] sm:$0xff] %v12876_v10  ;;  %v238_v9 = vld [vmem:[#allocation2 + $0x1f7] sm:$0xff]  ;;  %19811 = vst [vmem:[#allocation79_spill] sm:$0xff] %v12883_v19 }
  0x83   :  { %179 = vst.msk [vmem:[#allocation2 + $0x210] sm:$0xff] %vm109_vm1, %v12883_v19  ;;  %v12897_v17 = vsel %vm25_vm2, %v238_v9, 0.0  ;;  %v12906_v19 = vld [vmem:[#allocation2 + $0x1ff] sm:$0xff]  ;;  %v1830_v9 = vld [vmem:[#allocation2 + $0x29] sm:$0xff] }
  0x84   :  { %10984 = vmatmul.mubr.msk.f32.gmra.mxu0 %vm109_vm1, %v12867_v12 }
  0x85   :  { %11082 = vmatmul.mubr.msk.f32.gmra.mxu1 %vm109_vm1, %v997_v8  ;;  %10986 = vmatprep.mubr.msk.f32.mxu0 %vm109_vm1, %v12876_v10  ;;  %v22_v8 = vadd.s32 8, %v12077_v7  ;;  %v1829_v7 = vld [vmem:[#allocation2 + $0x21] sm:$0xff] }
  0x86   :  { %11084 = vmatprep.mubr.msk.f32.mxu1 %vm109_vm1, %v998_v28  ;;  %v1001_v28 = vld [vmem:[#allocation2 + $0x200] sm:$0xff] }
  0x87   :  { %v12908_v10 = vadd.s32 1, %v22_v8  ;;  %v1835_v8 = vld [vmem:[#allocation2 + $0x51] sm:$0xff] }
  0x88   :  { %10987 = vmatmul.mubr.msk.f32.gmra.mxu0 %vm109_vm1, %v12893_v1 }
  0x89   :  { %11085 = vmatmul.mubr.msk.f32.gmra.mxu1 %vm109_vm1, %v999_v33  ;;  %10989 = vmatprep.mubr.msk.f32.mxu0 %vm109_vm1, %v12897_v17  ;;  %vm42_vm3 = vcmp.lt.s32.totalorder %v12908_v10, 16  ;;  %v1834_v33 = vld [vmem:[#allocation2 + $0x49] sm:$0xff] }
  0x8a   :  { %11087 = vmatprep.mubr.msk.f32.mxu1 %vm109_vm1, %v1000_v15  ;;  %v12917_v15 = vld [vmem:[#allocation2 + $0x19] sm:$0xff] }
  0x8c   :  { %10990 = vmatmul.mubr.msk.f32.gmra.mxu0 %vm109_vm1, %v12906_v19 }
  0x8d   :  { %11088 = vmatmul.mubr.msk.f32.gmra.mxu1 %vm109_vm1, %v1001_v28  ;;  %11092 = vmatprep.mubr.f32.mxu0 %v19801_v4  ;;  %v1836_v28 = vld [vmem:[#allocation2 + $0x59] sm:$0xff] }
  0x8e   :  { %11190 = vmatprep.mubr.msk.f32.mxu1 %vm109_vm1, %v12225_v30  ;;  %v12928_v30 = vsel %vm42_vm3, %v1829_v7, 0.0  ;;  %v1837_v7 = vld [vmem:[#allocation2 + $0x61] sm:$0xff] }
  0x90   :  { %11093 = vmatmul.mubr.f32.vlgmr.msra.gmra.mxu0 %v19801_v4 }
  0x91   :  { %11191 = vmatmul.mubr.msk.f32.vlgmr.msra.gmra.mxu1 %vm109_vm1, %v12246_v35  ;;  %11287 = vmatpush3.msk.msra.mxu0 %vm488_vm0, %v12655_v45  ;;  %v1831_v35 = vld [vmem:[#allocation2 + $0x31] sm:$0xff]  ;;  %v1832_v45 = vld [vmem:[#allocation2 + $0x39] sm:$0xff] }
  0x92   :  { %11193 = vmatprep.mubr.msk.f32.mxu1 %vm109_vm1, %v12260_v38  ;;  %11385 = vmatpush3.msk.msra.mxu1 %vm488_vm0, %v12660_v49  ;;  %v1895_v38 = vsel %vm42_vm3, %v1831_v35, 0.0  ;;  %v1833_v49 = vld [vmem:[#allocation2 + $0x41] sm:$0xff] }
  0x93   :  { %11095 = vmatprep.mubr.msk.f32.mxu0 %vm109_vm1, %v12917_v15  ;;  %v1841_v35 = vld [vmem:[#allocation2 + $0x81] sm:$0xff] }
  0x94   :  { %11096 = vmatmul.mubr.msk.f32.gmra.mxu0 %vm109_vm1, %v12928_v30 }
  0x95   :  { %11194 = vmatmul.mubr.msk.f32.gmra.mxu1 %vm109_vm1, %v12262_v40  ;;  %11098 = vmatprep.mubr.msk.f32.mxu0 %vm109_vm1, %v1830_v9  ;;  %v1897_v40 = vsel %vm42_vm3, %v1833_v49, 0.0  ;;  %v1839_v9 = vld [vmem:[#allocation2 + $0x71] sm:$0xff] }
  0x96   :  { %11196 = vmatprep.mubr.msk.f32.mxu1 %vm109_vm1, %v12268_v43  ;;  %v12954_v43 = vld [vmem:[%s19661_s1 + $0x18] sm:$0xf] }
  0x97   :  { %11482 = vmatprep.subr.msk.mxu0 %vm488_vm0, %v12954_v43  ;;  %v1847_v49 = vld [vmem:[#allocation2 + $0xb1] sm:$0xff] }
  0x98   :  { %11099 = vmatmul.mubr.msk.f32.gmra.mxu0 %vm109_vm1, %v1895_v38  ;;  %v1843_v38 = vld [vmem:[#allocation2 + $0x91] sm:$0xff] }
  0x99   :  { %11197 = vmatmul.mubr.msk.f32.gmra.mxu1 %vm109_vm1, %v12276_v46  ;;  %11101 = vmatprep.mubr.msk.f32.mxu0 %vm109_vm1, %v1832_v45  ;;  %v12961_v46 = vld [vmem:[%s19661_s1 + $0x1c] sm:$0xf]  ;;  %v1845_v45 = vld [vmem:[#allocation2 + $0xa1] sm:$0xff] }
  0x9a   :  { %11199 = vmatprep.mubr.msk.f32.mxu1 %vm109_vm1, %v12280_v48  ;;  %v1899_v48 = vsel %vm42_vm3, %v1835_v8, 0.0  ;;  %11580 = vmatprep.subr.msk.mxu1 %vm488_vm0, %v12961_v46  ;;  %v1853_v8 = vld [vmem:[#allocation2 + $0xe1] sm:$0xff] }
  0x9c   :  { %11102 = vmatmul.mubr.msk.f32.gmra.mxu0 %vm109_vm1, %v1897_v40  ;;  %v1849_v40 = vld [vmem:[#allocation2 + $0xc1] sm:$0xff] }
  0x9d   :  { %11200 = vmatmul.mubr.msk.f32.gmra.mxu1 %vm109_vm1, %v12288_v51  ;;  %11104 = vmatprep.mubr.msk.f32.mxu0 %vm109_vm1, %v1834_v33  ;;  %v1901_v51 = vsel %vm42_vm3, %v1837_v7, 0.0  ;;  %v1851_v33 = vld [vmem:[#allocation2 + $0xd1] sm:$0xff]  ;;  %v1856_v7 = vld [vmem:[#allocation2 + $0xf9] sm:$0xff] }
  0x9e   :  { %11202 = vmatprep.mubr.msk.f32.mxu1 %vm109_vm1, %v12292_v53  ;;  %v1838_v53 = vld [vmem:[#allocation2 + $0x69] sm:$0xff] }
  0xa0   :  { %11105 = vmatmul.mubr.msk.f32.gmra.mxu0 %vm109_vm1, %v1899_v48  ;;  %v1855_v48 = vld [vmem:[#allocation2 + $0xf1] sm:$0xff] }
  0xa1   :  { %11203 = vmatmul.mubr.msk.f32.gmra.mxu1 %vm109_vm1, %v12297_v56  ;;  %11107 = vmatprep.mubr.msk.f32.mxu0 %vm109_vm1, %v1836_v28  ;;  %v1903_v56 = vsel %vm42_vm3, %v1839_v9, 0.0  ;;  %v2744_v28 = vld [vmem:[#allocation2 + $0x107] sm:$0xff] }
  0xa2   :  { %11205 = vmatprep.mubr.msk.f32.mxu1 %vm109_vm1, %v12309_v60  ;;  %v1840_v60 = vld [vmem:[#allocation2 + $0x79] sm:$0xff] }
  0xa4   :  { %11108 = vmatmul.mubr.msk.f32.gmra.mxu0 %vm109_vm1, %v1901_v51  ;;  %v1857_v51 = vld [vmem:[#allocation2 + $0x101] sm:$0xff] }
  0xa5   :  { %11206 = vmatmul.mubr.msk.f32.gmra.mxu1 %vm109_vm1, %v12328_v2  ;;  %11110 = vmatprep.mubr.msk.f32.mxu0 %vm109_vm1, %v1838_v53  ;;  %v1905_v2 = vsel %vm42_vm3, %v1841_v35, 0.0 }
  0xa6   :  { %11208 = vmatprep.mubr.msk.f32.mxu1 %vm109_vm1, %v12401_v44  ;;  %v1842_v44 = vld [vmem:[#allocation2 + $0x89] sm:$0xff] }
  0xa8   :  { %11111 = vmatmul.mubr.msk.f32.gmra.mxu0 %vm109_vm1, %v1903_v56  ;;  %v1858_v56 = vld [vmem:[#allocation2 + $0x119] sm:$0xff] }
  0xa9   :  { %11209 = vmatmul.mubr.msk.f32.gmra.mxu1 %vm109_vm1, %v12472_v3  ;;  %11113 = vmatprep.mubr.msk.f32.mxu0 %vm109_vm1, %v1840_v60  ;;  %v1907_v3 = vsel %vm42_vm3, %v1843_v38, 0.0  ;;  %v1859_v60 = vld [vmem:[#allocation2 + $0x121] sm:$0xff] }
  0xaa   :  { %11211 = vmatprep.mubr.msk.f32.mxu1 %vm109_vm1, %v12487_v52  ;;  %v1844_v52 = vld [vmem:[#allocation2 + $0x99] sm:$0xff] }
  0xac   :  { %11114 = vmatmul.mubr.msk.f32.gmra.mxu0 %vm109_vm1, %v1905_v2  ;;  %v1860_v2 = vld [vmem:[#allocation2 + $0x129] sm:$0xff] }
  0xad   :  { %11212 = vmatmul.mubr.msk.f32.gmra.mxu1 %vm109_vm1, %v12497_v57  ;;  %11116 = vmatprep.mubr.msk.f32.mxu0 %vm109_vm1, %v1842_v44  ;;  %v1909_v57 = vsel %vm42_vm3, %v1845_v45, 0.0  ;;  %v1861_v44 = vld [vmem:[#allocation2 + $0x131] sm:$0xff] }
  0xae   :  { %11214 = vmatprep.mubr.msk.f32.mxu1 %vm109_vm1, %v12501_v37  ;;  %v1846_v37 = vld [vmem:[#allocation2 + $0xa9] sm:$0xff] }
  0xb0   :  { %11117 = vmatmul.mubr.msk.f32.gmra.mxu0 %vm109_vm1, %v1907_v3 }
  0xb1   :  { %11215 = vmatmul.mubr.msk.f32.gmra.mxu1 %vm109_vm1, %v12509_v27  ;;  %11119 = vmatprep.mubr.msk.f32.mxu0 %vm109_vm1, %v1844_v52  ;;  %v1848_v27 = vld [vmem:[#allocation2 + $0xb9] sm:$0xff] }
  0xb2   :  { %11217 = vmatprep.mubr.msk.f32.mxu1 %vm109_vm1, %v12513_v47  ;;  %v1911_v47 = vsel %vm42_vm3, %v1847_v49, 0.0  ;;  %v1863_v49 = vld [vmem:[#allocation2 + $0x141] sm:$0xff] }
  0xb4   :  { %11120 = vmatmul.mubr.msk.f32.gmra.mxu0 %vm109_vm1, %v1909_v57 }
  0xb5   :  { %11218 = vmatmul.mubr.msk.f32.gmra.mxu1 %vm109_vm1, %v12521_v58  ;;  %11122 = vmatprep.mubr.msk.f32.mxu0 %vm109_vm1, %v1846_v37  ;;  %v1850_v58 = vld [vmem:[#allocation2 + $0xc9] sm:$0xff]  ;;  %v1862_v37 = vld [vmem:[#allocation2 + $0x139] sm:$0xff] }
  0xb6   :  { %11220 = vmatprep.mubr.msk.f32.mxu1 %vm109_vm1, %v12525_v42  ;;  %v1913_v42 = vsel %vm42_vm3, %v1849_v40, 0.0 }
  0xb8   :  { %11123 = vmatmul.mubr.msk.f32.gmra.mxu0 %vm109_vm1, %v1911_v47 }
  0xb9   :  { %11221 = vmatmul.mubr.msk.f32.gmra.mxu1 %vm109_vm1, %v12527_v41  ;;  %11125 = vmatprep.mubr.msk.f32.mxu0 %vm109_vm1, %v1848_v27  ;;  %v1915_v41 = vsel %vm42_vm3, %v1851_v33, 0.0  ;;  %v1865_v33 = vld [vmem:[#allocation2 + $0x151] sm:$0xff] }
  0xba   :  { %11223 = vmatprep.mubr.msk.f32.mxu1 %vm109_vm1, %v12573_v55  ;;  %v1852_v55 = vld [vmem:[#allocation2 + $0xd9] sm:$0xff] }
  0xbc   :  { %11126 = vmatmul.mubr.msk.f32.gmra.mxu0 %vm109_vm1, %v1913_v42 }
  0xbd   :  { %11224 = vmatmul.mubr.msk.f32.gmra.mxu1 %vm109_vm1, %v12644_v36  ;;  %11128 = vmatprep.mubr.msk.f32.mxu0 %vm109_vm1, %v1850_v58  ;;  %v1917_v36 = vsel %vm42_vm3, %v1853_v8, 0.0  ;;  %v1864_v58 = vld [vmem:[#allocation2 + $0x149] sm:$0xff] }
  0xbe   :  { %11226 = vmatprep.mubr.msk.f32.mxu1 %vm109_vm1, %v12664_v0  ;;  %v1854_v0 = vld [vmem:[#allocation2 + $0xe9] sm:$0xff] }
  0xc0   :  { %11129 = vmatmul.mubr.msk.f32.gmra.mxu0 %vm109_vm1, %v1915_v41 }
  0xc1   :  { %11227 = vmatmul.mubr.msk.f32.gmra.mxu1 %vm109_vm1, %v12676_v50  ;;  %11131 = vmatprep.mubr.msk.f32.mxu0 %vm109_vm1, %v1852_v55  ;;  %v2808_v50 = vsel %vm25_vm2, %v2744_v28, 0.0  ;;  %v1866_v28 = vld [vmem:[#allocation2 + $0x159] sm:$0xff] }
  0xc2   :  { %11229 = vmatprep.mubr.msk.f32.mxu1 %vm109_vm1, %v12680_v5  ;;  %v1919_v5 = vsel %vm42_vm3, %v1855_v48, 0.0 }
  0xc4   :  { %11132 = vmatmul.mubr.msk.f32.gmra.mxu0 %vm109_vm1, %v1917_v36  ;;  %v10898_v53 = vpop.f32.mrf.mxu0  ;;  %v1929_v36 = vsel %vm42_vm3, %v1865_v33, 0.0 }
  0xc5   :  { %11230 = vmatmul.mubr.msk.f32.gmra.mxu1 %vm109_vm1, %v12688_v34  ;;  %11134 = vmatprep.mubr.msk.f32.mxu0 %vm109_vm1, %v1854_v0  ;;  %v1921_v34 = vsel %vm42_vm3, %v1857_v51, 0.0  ;;  %879 = vst.msk [vmem:[%s19663_s3 + $0x8] sm:$0xff] %vm877_vm4, %v10898_v53  ;;  %v10996_v9 = vpop.f32.mrf.mxu1 }
  0xc6   :  { %11232 = vmatprep.mubr.msk.f32.mxu1 %vm109_vm1, %v12692_v62  ;;  %v2745_v62 = vld [vmem:[#allocation2 + $0x10f] sm:$0xff] }
  0xc7   :  { %v1317_v35 = vpop.f32.mrf.mxu1 }
  0xc8   :  { %11135 = vmatmul.mubr.msk.f32.gmra.mxu0 %vm109_vm1, %v1919_v5  ;;  %v1867_v5 = vld [vmem:[#allocation2 + $0x161] sm:$0xff] }
  0xc9   :  { %11233 = vmatmul.mubr.msk.f32.gmra.mxu1 %vm109_vm1, %v12700_v39  ;;  %11137 = vmatprep.mubr.msk.f32.mxu0 %vm109_vm1, %v1856_v7  ;;  %v558_v39 = vpop.f32.mrf.mxu0 }
  0xca   :  { %11235 = vmatprep.mubr.msk.f32.mxu1 %vm109_vm1, %v2808_v50  ;;  %878 = vst.msk [vmem:[%s19663_s3] sm:$0xff] %vm877_vm4, %v558_v39 }
  0xcc   :  { %11138 = vmatmul.mubr.msk.f32.gmra.mxu0 %vm109_vm1, %v1921_v34  ;;  %v1637_v38 = vld [vmem:[%s19663_s3 + $0x8] sm:$0xff] }
  0xcd   :  { %11236 = vmatmul.mubr.msk.f32.gmra.mxu1 %vm109_vm1, %v2745_v62  ;;  %11140 = vmatprep.mubr.f32.mxu0 %v19801_v4  ;;  %v1701_v52 = vadd.f32 %v10996_v9, %v1637_v38  ;;  %v1868_v9 = vld [vmem:[#allocation2 + $0x169] sm:$0xff] }
  0xce   :  { %11238 = vmatprep.mubr.msk.f32.mxu1 %vm109_vm1, %v12709_v63  ;;  %v1923_v63 = vsel %vm42_vm3, %v1859_v60, 0.0 }
  0xcf   :  { %1765 = vst.msk [vmem:[%s19663_s3 + $0x8] sm:$0xff] %vm877_vm4, %v1701_v52  ;;  %v1871_v52 = vld [vmem:[#allocation2 + $0x181] sm:$0xff] }
  0xd0   :  { %11141 = vmatmul.mubr.f32.gmra.mxu0 %v19801_v4  ;;  %v10999_v3 = vpop.f32.mrf.mxu1 }
  0xd1   :  { %11239 = vmatmul.mubr.msk.f32.gmra.mxu1 %vm109_vm1, %v12716_v6  ;;  %11143 = vmatprep.mubr.msk.f32.mxu0 %vm109_vm1, %v1858_v56  ;;  %v10901_v6 = vpop.f32.mrf.mxu0  ;;  %v1869_v56 = vld [vmem:[#allocation2 + $0x171] sm:$0xff] }
  0xd2   :  { %11241 = vmatprep.mubr.msk.f32.mxu1 %vm109_vm1, %v12725_v32  ;;  %881 = vst.msk [vmem:[%s19663_s3 + $0x18] sm:$0xff] %vm877_vm4, %v10901_v6  ;;  %v1925_v32 = vsel %vm42_vm3, %v1861_v44, 0.0  ;;  %v1327_v45 = vpop.f32.mrf.mxu1  ;;  %v1870_v6 = vld [vmem:[#allocation2 + $0x179] sm:$0xff] }
  0xd3   :  { %v568_v57 = vpop.f32.mrf.mxu0 }
  0xd4   :  { %11144 = vmatmul.mubr.msk.f32.gmra.mxu0 %vm109_vm1, %v1923_v63  ;;  %880 = vst.msk [vmem:[%s19663_s3 + $0x10] sm:$0xff] %vm877_vm4, %v568_v57 }
  0xd5   :  { %11242 = vmatmul.mubr.msk.f32.gmra.mxu1 %vm109_vm1, %v12735_v29  ;;  %11146 = vmatprep.mubr.msk.f32.mxu0 %vm109_vm1, %v1860_v2  ;;  %v1636_v29 = vld [vmem:[%s19663_s3] sm:$0xff]  ;;  %v10904_v27 = vpop.f32.mrf.mxu0 }
  0xd6   :  { %11244 = vmatprep.mubr.msk.f32.mxu1 %vm109_vm1, %v12739_v61  ;;  %v1700_v47 = vadd.f32 %v1636_v29, %v1317_v35  ;;  %v11002_v61 = vpop.f32.mrf.mxu1  ;;  %883 = vst.msk [vmem:[%s19663_s3 + $0x28] sm:$0xff] %vm877_vm4, %v10904_v27  ;;  %v1873_v27 = vld [vmem:[#allocation2 + $0x191] sm:$0xff] }
  0xd7   :  { %v578_v42 = vpop.f32.mrf.mxu0 }
  0xd8   :  { %11147 = vmatmul.mubr.msk.f32.gmra.mxu0 %vm109_vm1, %v1925_v32  ;;  %1764 = vst.msk [vmem:[%s19663_s3] sm:$0xff] %vm877_vm4, %v1700_v47  ;;  %v1337_v40 = vpop.f32.mrf.mxu1  ;;  %882 = vst.msk [vmem:[%s19663_s3 + $0x20] sm:$0xff] %vm877_vm4, %v578_v42 }
  0xd9   :  { %11245 = vmatmul.mubr.msk.f32.gmra.mxu1 %vm109_vm1, %v12747_v54  ;;  %11149 = vmatprep.mubr.msk.f32.mxu0 %vm109_vm1, %v1862_v37  ;;  %v1927_v54 = vsel %vm42_vm3, %v1863_v49, 0.0  ;;  %v1639_v41 = vld [vmem:[%s19663_s3 + $0x18] sm:$0xff] }
  0xda   :  { %11247 = vmatprep.mubr.msk.f32.mxu1 %vm109_vm1, %v12751_v24  ;;  %v11005_v55 = vpop.f32.mrf.mxu1  ;;  %v10907_v24 = vpop.f32.mrf.mxu0  ;;  %v1703_v8 = vadd.f32 %v10999_v3, %v1639_v41 }
  0xdb   :  { %885 = vst.msk [vmem:[%s19663_s3 + $0x38] sm:$0xff] %vm877_vm4, %v10907_v24  ;;  %v1874_v24 = vld [vmem:[#allocation2 + $0x199] sm:$0xff] }
  0xdc   :  { %11150 = vmatmul.mubr.msk.f32.gmra.mxu0 %vm109_vm1, %v1927_v54  ;;  %v1347_v0 = vpop.f32.mrf.mxu1  ;;  %v588_v48 = vpop.f32.mrf.mxu0  ;;  %1767 = vst.msk [vmem:[%s19663_s3 + $0x18] sm:$0xff] %vm877_vm4, %v1703_v8  ;;  %v1875_v8 = vld [vmem:[#allocation2 + $0x1a1] sm:$0xff] }
  0xdd   :  { %11248 = vmatmul.mubr.msk.f32.gmra.mxu1 %vm109_vm1, %v12759_v31  ;;  %11152 = vmatprep.mubr.msk.f32.mxu0 %vm109_vm1, %v1864_v58  ;;  %v1638_v31 = vld [vmem:[%s19663_s3 + $0x10] sm:$0xff]  ;;  %884 = vst.msk [vmem:[%s19663_s3 + $0x30] sm:$0xff] %vm877_vm4, %v588_v48 }
  0xde   :  { %11250 = vmatprep.mubr.msk.f32.mxu1 %vm109_vm1, %v12763_v22  ;;  %v1702_v50 = vadd.f32 %v1638_v31, %v1327_v45  ;;  %v1641_v22 = vld [vmem:[%s19663_s3 + $0x28] sm:$0xff]  ;;  %v11008_v7 = vpop.f32.mrf.mxu1  ;;  %v10910_v51 = vpop.f32.mrf.mxu0 }
  0xdf   :  { %v1705_v62 = vadd.f32 %v11002_v61, %v1641_v22  ;;  %887 = vst.msk [vmem:[%s19663_s3 + $0x48] sm:$0xff] %vm877_vm4, %v10910_v51  ;;  %v1640_v34 = vld [vmem:[%s19663_s3 + $0x20] sm:$0xff]  ;;  %v1872_v61 = vld [vmem:[#allocation2 + $0x189] sm:$0xff] }
  0xe0   :  { %11153 = vmatmul.mubr.msk.f32.gmra.mxu0 %vm109_vm1, %v1929_v36  ;;  %1766 = vst.msk [vmem:[%s19663_s3 + $0x10] sm:$0xff] %vm877_vm4, %v1702_v50  ;;  %v1357_v53 = vpop.f32.mrf.mxu1  ;;  %v598_v39 = vpop.f32.mrf.mxu0  ;;  %v1704_v60 = vadd.f32 %v1640_v34, %v1337_v40  ;;  %v1876_v22 = vld [vmem:[#allocation2 + $0x1a9] sm:$0xff] }
  0xe1   :  { %11251 = vmatmul.mubr.msk.f32.gmra.mxu1 %vm109_vm1, %v12771_v59  ;;  %11155 = vmatprep.mubr.msk.f32.mxu0 %vm109_vm1, %v1866_v28  ;;  %v1931_v59 = vsel %vm42_vm3, %v1867_v5, 0.0  ;;  %1769 = vst.msk [vmem:[%s19663_s3 + $0x28] sm:$0xff] %vm877_vm4, %v1705_v62  ;;  %886 = vst.msk [vmem:[%s19663_s3 + $0x40] sm:$0xff] %vm877_vm4, %v598_v39  ;;  %v19813_v39 = vld [vmem:[#allocation72_spill] sm:$0xff] }
  0xe2   :  { %11253 = vmatprep.mubr.msk.f32.mxu1 %vm109_vm1, %v12775_v20  ;;  %v1643_v20 = vld [vmem:[%s19663_s3 + $0x38] sm:$0xff]  ;;  %v11011_v35 = vpop.f32.mrf.mxu1  ;;  %v10913_v63 = vpop.f32.mrf.mxu0  ;;  %1768 = vst.msk [vmem:[%s19663_s3 + $0x20] sm:$0xff] %vm877_vm4, %v1704_v60 }
  0xe3   :  { %v1707_v2 = vadd.f32 %v11005_v55, %v1643_v20  ;;  %889 = vst.msk [vmem:[%s19663_s3 + $0x58] sm:$0xff] %vm877_vm4, %v10913_v63  ;;  %v1879_v63 = vld [vmem:[#allocation2 + $0x1c1] sm:$0xff] }
  0xe4   :  { %11156 = vmatmul.mubr.msk.f32.gmra.mxu0 %vm109_vm1, %v1931_v59  ;;  %v1642_v44 = vld [vmem:[%s19663_s3 + $0x30] sm:$0xff]  ;;  %v1367_v38 = vpop.f32.mrf.mxu1  ;;  %v608_v3 = vpop.f32.mrf.mxu0  ;;  %v19812_v59 = vld [vmem:[#allocation71_spill] sm:$0xff] }
  0xe5   :  { %11254 = vmatmul.mubr.msk.f32.gmra.mxu1 %vm109_vm1, %v12783_v26  ;;  %11158 = vmatprep.mubr.msk.f32.mxu0 %vm109_vm1, %v1868_v9  ;;  %v1933_v26 = vsel %vm42_vm3, %v1869_v56, 0.0  ;;  %1771 = vst.msk [vmem:[%s19663_s3 + $0x38] sm:$0xff] %vm877_vm4, %v1707_v2  ;;  %v1706_v32 = vadd.f32 %v1642_v44, %v1347_v0  ;;  %888 = vst.msk [vmem:[%s19663_s3 + $0x50] sm:$0xff] %vm877_vm4, %v608_v3 }
  0xe6   :  { %11256 = vmatprep.mubr.msk.f32.mxu1 %vm109_vm1, %v12787_v18  ;;  %v1645_v18 = vld [vmem:[%s19663_s3 + $0x48] sm:$0xff]  ;;  %v11014_v29 = vpop.f32.mrf.mxu1  ;;  %v10916_v45 = vpop.f32.mrf.mxu0 }
  0xe7   :  { %1770 = vst.msk [vmem:[%s19663_s3 + $0x30] sm:$0xff] %vm877_vm4, %v1706_v32  ;;  %v1709_v57 = vadd.f32 %v11008_v7, %v1645_v18  ;;  %891 = vst.msk [vmem:[%s19663_s3 + $0x68] sm:$0xff] %vm877_vm4, %v10916_v45  ;;  %v1877_v7 = vld [vmem:[#allocation2 + $0x1b1] sm:$0xff]  ;;  %v1943_v32 = vsel %vm42_vm3, %v1879_v63, 0.0 }
  0xe8   :  { %11159 = vmatmul.mubr.msk.f32.gmra.mxu0 %vm109_vm1, %v1933_v26  ;;  %v1644_v37 = vld [vmem:[%s19663_s3 + $0x40] sm:$0xff]  ;;  %v1377_v49 = vpop.f32.mrf.mxu1  ;;  %v618_v47 = vpop.f32.mrf.mxu0  ;;  %v1941_v9 = vsel %vm42_vm3, %v1877_v7, 0.0 }
  0xe9   :  { %11257 = vmatmul.mubr.msk.f32.gmra.mxu1 %vm109_vm1, %v12795_v25  ;;  %11161 = vmatprep.mubr.msk.f32.mxu0 %vm109_vm1, %v1870_v6  ;;  %v1935_v25 = vsel %vm42_vm3, %v1871_v52, 0.0  ;;  %1773 = vst.msk [vmem:[%s19663_s3 + $0x48] sm:$0xff] %vm877_vm4, %v1709_v57  ;;  %v1708_v54 = vadd.f32 %v1644_v37, %v1357_v53  ;;  %890 = vst.msk [vmem:[%s19663_s3 + $0x60] sm:$0xff] %vm877_vm4, %v618_v47  ;;  %v19815_v52 = vld [vmem:[#allocation74_spill] sm:$0xff]  ;;  %v1880_v57 = vld [vmem:[#allocation2 + $0x1c9] sm:$0xff] }
  0xea   :  { %11259 = vmatprep.mubr.msk.f32.mxu1 %vm109_vm1, %v12799_v16  ;;  %v1647_v16 = vld [vmem:[%s19663_s3 + $0x58] sm:$0xff]  ;;  %v11017_v40 = vpop.f32.mrf.mxu1  ;;  %v10919_v42 = vpop.f32.mrf.mxu0 }
  0xeb   :  { %1772 = vst.msk [vmem:[%s19663_s3 + $0x40] sm:$0xff] %vm877_vm4, %v1708_v54  ;;  %v1711_v58 = vadd.f32 %v11011_v35, %v1647_v16  ;;  %893 = vst.msk [vmem:[%s19663_s3 + $0x78] sm:$0xff] %vm877_vm4, %v10919_v42  ;;  %v1878_v35 = vld [vmem:[#allocation2 + $0x1b9] sm:$0xff]  ;;  %v19817_v16 = vld [vmem:[#allocation76_spill] sm:$0xff] }
  0xec   :  { %11162 = vmatmul.mubr.msk.f32.gmra.mxu0 %vm109_vm1, %v1935_v25  ;;  %v1646_v33 = vld [vmem:[%s19663_s3 + $0x50] sm:$0xff]  ;;  %v1387_v41 = vpop.f32.mrf.mxu1  ;;  %v628_v55 = vpop.f32.mrf.mxu0 }
  0xed   :  { %11260 = vmatmul.mubr.msk.f32.gmra.mxu1 %vm109_vm1, %v12807_v23  ;;  %11164 = vmatprep.mubr.msk.f32.mxu0 %vm109_vm1, %v1872_v61  ;;  %v1937_v23 = vsel %vm42_vm3, %v1873_v27, 0.0  ;;  %1775 = vst.msk [vmem:[%s19663_s3 + $0x58] sm:$0xff] %vm877_vm4, %v1711_v58  ;;  %v1710_v36 = vadd.f32 %v1646_v33, %v1367_v38  ;;  %892 = vst.msk [vmem:[%s19663_s3 + $0x70] sm:$0xff] %vm877_vm4, %v628_v55  ;;  %v19814_v38 = vld [vmem:[#allocation73_spill] sm:$0xff]  ;;  %v19816_v61 = vld [vmem:[#allocation75_spill] sm:$0xff] }
  0xee   :  { %11262 = vmatprep.mubr.msk.f32.mxu1 %vm109_vm1, %v12811_v13  ;;  %v1649_v13 = vld [vmem:[%s19663_s3 + $0x68] sm:$0xff]  ;;  %v1881_v25 = vld [vmem:[#allocation2 + $0x1d1] sm:$0xff]  ;;  %v1882_v33 = vld [vmem:[#allocation2 + $0x1d9] sm:$0xff] }
  0xef   :  { %1774 = vst.msk [vmem:[%s19663_s3 + $0x50] sm:$0xff] %vm877_vm4, %v1710_v36  ;;  %v1713_v48 = vadd.f32 %v11014_v29, %v1649_v13 }
  0xf0   :  { %v10922_v0 = vpop.f32.mrf.mxu0  ;;  %11165 = vmatmul.mubr.msk.f32.gmra.mxu0 %vm109_vm1, %v1937_v23  ;;  %v1648_v28 = vld [vmem:[%s19663_s3 + $0x60] sm:$0xff] }
  0xf1   :  { %v11020_v31 = vpop.f32.mrf.mxu1  ;;  %11263 = vmatmul.mubr.msk.f32.gmra.mxu1 %vm109_vm1, %v12819_v21  ;;  %895 = vst.msk [vmem:[%s19663_s3 + $0x88] sm:$0xff] %vm877_vm4, %v10922_v0  ;;  %11167 = vmatprep.mubr.msk.f32.mxu0 %vm109_vm1, %v1874_v24  ;;  %v1939_v21 = vsel %vm42_vm3, %v1875_v8, 0.0  ;;  %1777 = vst.msk [vmem:[%s19663_s3 + $0x68] sm:$0xff] %vm877_vm4, %v1713_v48  ;;  %v1712_v51 = vadd.f32 %v1648_v28, %v1377_v49  ;;  %v1884_v28 = vld [vmem:[#allocation2 + $0x1e9] sm:$0xff] }
  0xf2   :  { %11265 = vmatprep.mubr.msk.f32.mxu1 %vm109_vm1, %v12823_v11  ;;  %v638_v50 = vpop.f32.mrf.mxu0  ;;  %v1651_v11 = vld [vmem:[%s19663_s3 + $0x78] sm:$0xff] }
  0xf3   :  { %v1397_v5 = vpop.f32.mrf.mxu1  ;;  %894 = vst.msk [vmem:[%s19663_s3 + $0x80] sm:$0xff] %vm877_vm4, %v638_v50  ;;  %1776 = vst.msk [vmem:[%s19663_s3 + $0x60] sm:$0xff] %vm877_vm4, %v1712_v51  ;;  %v1715_v53 = vadd.f32 %v11017_v40, %v1651_v11  ;;  %v1945_v40 = vsel %vm42_vm3, %v1881_v25, 0.0 }
  0xf4   :  { %v10925_v34 = vpop.f32.mrf.mxu0  ;;  %11168 = vmatmul.mubr.msk.f32.gmra.mxu0 %vm109_vm1, %v1939_v21  ;;  %v1650_v56 = vld [vmem:[%s19663_s3 + $0x70] sm:$0xff] }
  0xf5   :  { %v11023_v62 = vpop.f32.mrf.mxu1  ;;  %11266 = vmatmul.mubr.msk.f32.gmra.mxu1 %vm109_vm1, %v19812_v59  ;;  %897 = vst.msk [vmem:[%s19663_s3 + $0x98] sm:$0xff] %vm877_vm4, %v10925_v34  ;;  %11170 = vmatprep.mubr.msk.f32.mxu0 %vm109_vm1, %v1876_v22  ;;  %1779 = vst.msk [vmem:[%s19663_s3 + $0x78] sm:$0xff] %vm877_vm4, %v1715_v53  ;;  %v1714_v2 = vadd.f32 %v1650_v56, %v1387_v41  ;;  %v1883_v41 = vld [vmem:[#allocation2 + $0x1e1] sm:$0xff] }
  0xf6   :  { %11268 = vmatprep.mubr.msk.f32.mxu1 %vm109_vm1, %v19813_v39  ;;  %v648_v20 = vpop.f32.mrf.mxu0  ;;  %v2776_v22 = vld [vmem:[#allocation2 + $0x207] sm:$0xff] }
  0xf7   :  { %v1407_v60 = vpop.f32.mrf.mxu1  ;;  %896 = vst.msk [vmem:[%s19663_s3 + $0x90] sm:$0xff] %vm877_vm4, %v648_v20  ;;  %1778 = vst.msk [vmem:[%s19663_s3 + $0x70] sm:$0xff] %vm877_vm4, %v1714_v2  ;;  %v2840_v39 = vsel %vm25_vm2, %v2776_v22, 0.0  ;;  %v1887_v56 = vld [vmem:[#allocation2 + $0x201] sm:$0xff]  ;;  %v2777_v2 = vld [vmem:[#allocation2 + $0x20f] sm:$0xff] }
  0xf8   :  { %v1653_v26 = vld [vmem:[%s19663_s3 + $0x88] sm:$0xff]  ;;  %v10928_v3 = vpop.f32.mrf.mxu0  ;;  %11171 = vmatmul.mubr.msk.f32.gmra.mxu0 %vm109_vm1, %v1941_v9  ;;  %v1886_v9 = vld [vmem:[#allocation2 + $0x1f9] sm:$0xff] }
  0xf9   :  { %v11026_v44 = vpop.f32.mrf.mxu1  ;;  %11269 = vmatmul.mubr.msk.f32.gmra.mxu1 %vm109_vm1, %v19814_v38  ;;  %v1717_v6 = vadd.f32 %v11020_v31, %v1653_v26  ;;  %899 = vst.msk [vmem:[%s19663_s3 + $0xa8] sm:$0xff] %vm877_vm4, %v10928_v3  ;;  %11173 = vmatprep.mubr.msk.f32.mxu0 %vm109_vm1, %v1878_v35  ;;  %v19818_v31 = vld [vmem:[#allocation78_spill] sm:$0xff]  ;;  %v3622_v22 = vld [vmem:[#allocation2 + $0x48] sm:$0xff] }
  0xfa   :  { %11271 = vmatprep.mubr.msk.f32.mxu1 %vm109_vm1, %v19815_v52  ;;  %v1652_v18 = vld [vmem:[%s19663_s3 + $0x80] sm:$0xff]  ;;  %v658_v45 = vpop.f32.mrf.mxu0  ;;  %v3616_v3 = vld [vmem:[#allocation2 + $0x18] sm:$0xff] }
  0xfb   :  { %v1417_v29 = vpop.f32.mrf.mxu1  ;;  %1781 = vst.msk [vmem:[%s19663_s3 + $0x88] sm:$0xff] %vm877_vm4, %v1717_v6  ;;  %v1716_v37 = vadd.f32 %v1652_v18, %v1397_v5  ;;  %898 = vst.msk [vmem:[%s19663_s3 + $0xa0] sm:$0xff] %vm877_vm4, %v658_v45  ;;  %v1885_v5 = vld [vmem:[#allocation2 + $0x1f1] sm:$0xff]  ;;  %v3617_v45 = vld [vmem:[#allocation2 + $0x20] sm:$0xff] }
  0xfc   :  { %v1655_v49 = vld [vmem:[%s19663_s3 + $0x98] sm:$0xff]  ;;  %v10931_v27 = vpop.f32.mrf.mxu0  ;;  %11174 = vmatmul.mubr.msk.f32.gmra.mxu0 %vm109_vm1, %v1943_v32 }
  0xfd   :  { %v11029_v47 = vpop.f32.mrf.mxu1  ;;  %11272 = vmatmul.mubr.msk.f32.gmra.mxu1 %vm109_vm1, %v19816_v61  ;;  %1780 = vst.msk [vmem:[%s19663_s3 + $0x80] sm:$0xff] %vm877_vm4, %v1716_v37  ;;  %v1719_v54 = vadd.f32 %v11023_v62, %v1655_v49  ;;  %901 = vst.msk [vmem:[%s19663_s3 + $0xb8] sm:$0xff] %vm877_vm4, %v10931_v27  ;;  %11176 = vmatprep.mubr.msk.f32.mxu0 %vm109_vm1, %v1880_v57  ;;  %v4456_v49 = vld [vmem:[#allocation2 + $0x29] sm:$0xff] }
  0xfe   :  { %11274 = vmatprep.mubr.msk.f32.mxu1 %vm109_vm1, %v19817_v16  ;;  %v1654_v42 = vld [vmem:[%s19663_s3 + $0x90] sm:$0xff]  ;;  %v668_v23 = vpop.f32.mrf.mxu0 }
  0xff   :  { %v1427_v58 = vpop.f32.mrf.mxu1  ;;  %1783 = vst.msk [vmem:[%s19663_s3 + $0x98] sm:$0xff] %vm877_vm4, %v1719_v54  ;;  %v1718_v55 = vadd.f32 %v1654_v42, %v1407_v60  ;;  %900 = vst.msk [vmem:[%s19663_s3 + $0xb0] sm:$0xff] %vm877_vm4, %v668_v23  ;;  %v3619_v42 = vld [vmem:[#allocation2 + $0x30] sm:$0xff]  ;;  %v10117_v23 = vld [vmem:[%s19661_s1 + $0x20] sm:$0xf] }
 0x100   :  { %v1657_v24 = vld [vmem:[%s19663_s3 + $0xa8] sm:$0xff]  ;;  %v10934_v36 = vpop.f32.mrf.mxu0  ;;  %11177 = vmatmul.mubr.msk.f32.gmra.mxu0 %vm109_vm1, %v1945_v40 }
 0x101   :  { %v11032_v8 = vpop.f32.mrf.mxu1  ;;  %11275 = vmatmul.mubr.msk.f32.gmra.mxu1 %vm109_vm1, %v12867_v12  ;;  %1782 = vst.msk [vmem:[%s19663_s3 + $0x90] sm:$0xff] %vm877_vm4, %v1718_v55  ;;  %v1721_v13 = vadd.f32 %v11026_v44, %v1657_v24  ;;  %903 = vst.msk [vmem:[%s19663_s3 + $0xc8] sm:$0xff] %vm877_vm4, %v10934_v36  ;;  %11179 = vmatprep.mubr.msk.f32.mxu0 %vm109_vm1, %v1882_v33  ;;  %v1947_v12 = vsel %vm42_vm3, %v1883_v41, 0.0  ;;  %v4459_v24 = vld [vmem:[#allocation2 + $0x41] sm:$0xff] }
 0x102   :  { %11277 = vmatprep.mubr.msk.f32.mxu1 %vm109_vm1, %v19818_v31  ;;  %v1656_v0 = vld [vmem:[%s19663_s3 + $0xa0] sm:$0xff]  ;;  %v678_v21 = vpop.f32.mrf.mxu0 }
 0x103   :  { %v1437_v48 = vpop.f32.mrf.mxu1  ;;  %1785 = vst.msk [vmem:[%s19663_s3 + $0xa8] sm:$0xff] %vm877_vm4, %v1721_v13  ;;  %v1720_v50 = vadd.f32 %v1656_v0, %v1417_v29  ;;  %902 = vst.msk [vmem:[%s19663_s3 + $0xc0] sm:$0xff] %vm877_vm4, %v678_v21  ;;  %v4523_v0 = vsel %vm42_vm3, %v4459_v24, 0.0  ;;  %v4460_v21 = vld [vmem:[#allocation2 + $0x49] sm:$0xff] }
 0x104   :  { %v1659_v7 = vld [vmem:[%s19663_s3 + $0xb8] sm:$0xff]  ;;  %v10937_v11 = vpop.f32.mrf.mxu0  ;;  %11180 = vmatmul.mubr.msk.f32.gmra.mxu0 %vm109_vm1, %v1947_v12  ;;  %v4468_v24 = vld [vmem:[#allocation2 + $0x89] sm:$0xff] }
 0x105   :  { %v11035_v51 = vpop.f32.mrf.mxu1  ;;  %11278 = vmatmul.mubr.msk.f32.gmra.mxu1 %vm109_vm1, %v12893_v1  ;;  %1784 = vst.msk [vmem:[%s19663_s3 + $0xa0] sm:$0xff] %vm877_vm4, %v1720_v50  ;;  %v1723_v62 = vadd.f32 %v11029_v47, %v1659_v7  ;;  %905 = vst.msk [vmem:[%s19663_s3 + $0xd8] sm:$0xff] %vm877_vm4, %v10937_v11  ;;  %11182 = vmatprep.mubr.msk.f32.mxu0 %vm109_vm1, %v1884_v28  ;;  %v1949_v1 = vsel %vm42_vm3, %v1885_v5, 0.0  ;;  %v4457_v47 = vld [vmem:[#allocation2 + $0x31] sm:$0xff] }
 0x106   :  { %11280 = vmatprep.mubr.msk.f32.mxu1 %vm109_vm1, %v12897_v17  ;;  %v1658_v59 = vld [vmem:[%s19663_s3 + $0xb0] sm:$0xff]  ;;  %v688_v53 = vpop.f32.mrf.mxu0 }
 0x107   :  { %v1447_v34 = vpop.f32.mrf.mxu1  ;;  %1787 = vst.msk [vmem:[%s19663_s3 + $0xb8] sm:$0xff] %vm877_vm4, %v1723_v62  ;;  %v1722_v17 = vadd.f32 %v1658_v59, %v1427_v58  ;;  %904 = vst.msk [vmem:[%s19663_s3 + $0xd0] sm:$0xff] %vm877_vm4, %v688_v53  ;;  %v4458_v58 = vld [vmem:[#allocation2 + $0x39] sm:$0xff]  ;;  %v4461_v7 = vld [vmem:[#allocation2 + $0x51] sm:$0xff] }
 0x108   :  { %v1661_v60 = vld [vmem:[%s19663_s3 + $0xc8] sm:$0xff]  ;;  %v10940_v35 = vpop.f32.mrf.mxu0  ;;  %11183 = vmatmul.mubr.msk.f32.gmra.mxu0 %vm109_vm1, %v1949_v1  ;;  %v3623_v53 = vld [vmem:[#allocation2 + $0x50] sm:$0xff] }
 0x109   :  { %v11038_v20 = vpop.f32.mrf.mxu1  ;;  %11281 = vmatmul.mubr.msk.f32.gmra.mxu1 %vm109_vm1, %v12906_v19  ;;  %1786 = vst.msk [vmem:[%s19663_s3 + $0xb0] sm:$0xff] %vm877_vm4, %v1722_v17  ;;  %v1725_v63 = vadd.f32 %v11032_v8, %v1661_v60  ;;  %907 = vst.msk [vmem:[%s19663_s3 + $0xe8] sm:$0xff] %vm877_vm4, %v10940_v35  ;;  %11185 = vmatprep.mubr.msk.f32.mxu0 %vm109_vm1, %v1886_v9  ;;  %v1951_v19 = vsel %vm42_vm3, %v1887_v56, 0.0  ;;  %v3624_v60 = vld [vmem:[#allocation2 + $0x58] sm:$0xff] }
 0x10a   :  { %11283 = vmatprep.mubr.msk.f32.mxu1 %vm109_vm1, %v2840_v39  ;;  %v1660_v26 = vld [vmem:[%s19663_s3 + $0xc0] sm:$0xff]  ;;  %v698_v38 = vpop.f32.mrf.mxu0 }
 0x10b   :  { %v1457_v44 = vpop.f32.mrf.mxu1  ;;  %1789 = vst.msk [vmem:[%s19663_s3 + $0xc8] sm:$0xff] %vm877_vm4, %v1725_v63  ;;  %v1724_v6 = vadd.f32 %v1660_v26, %v1437_v48  ;;  %906 = vst.msk [vmem:[%s19663_s3 + $0xe0] sm:$0xff] %vm877_vm4, %v698_v38  ;;  %v3621_v48 = vld [vmem:[#allocation2 + $0x40] sm:$0xff] }
 0x10c   :  { %v1663_v52 = vld [vmem:[%s19663_s3 + $0xd8] sm:$0xff]  ;;  %v10943_v18 = vpop.f32.mrf.mxu0  ;;  %11186 = vmatmul.mubr.msk.f32.gmra.mxu0 %vm109_vm1, %v1951_v19  ;;  %v3625_v38 = vld [vmem:[#allocation2 + $0x60] sm:$0xff] }
 0x10d   :  { %v11041_v32 = vpop.f32.mrf.mxu1  ;;  %11284 = vmatmul.mubr.msk.f32.gmra.mxu1 %vm109_vm1, %v2777_v2  ;;  %1788 = vst.msk [vmem:[%s19663_s3 + $0xc0] sm:$0xff] %vm877_vm4, %v1724_v6  ;;  %v1727_v29 = vadd.f32 %v11035_v51, %v1663_v52  ;;  %909 = vst.msk [vmem:[%s19663_s3 + $0xf8] sm:$0xff] %vm877_vm4, %v10943_v18  ;;  %11288 = vmatprep.mubr.msk.f32.mxu0 %vm109_vm1, %v3616_v3  ;;  %v4462_v39 = vld [vmem:[#allocation2 + $0x59] sm:$0xff]  ;;  %v4464_v3 = vld [vmem:[#allocation2 + $0x69] sm:$0xff] }
 0x10e   :  { %11386 = vmatprep.mubr.msk.f32.mxu1 %vm109_vm1, %v12917_v15  ;;  %v1662_v57 = vld [vmem:[%s19663_s3 + $0xd0] sm:$0xff]  ;;  %v708_v37 = vpop.f32.mrf.mxu0  ;;  %v3618_v15 = vld [vmem:[#allocation2 + $0x28] sm:$0xff] }
 0x10f   :  { %v1467_v25 = vpop.f32.mrf.mxu1  ;;  %1791 = vst.msk [vmem:[%s19663_s3 + $0xd8] sm:$0xff] %vm877_vm4, %v1727_v29  ;;  %v1726_v61 = vadd.f32 %v1662_v57, %v1447_v34  ;;  %908 = vst.msk [vmem:[%s19663_s3 + $0xf0] sm:$0xff] %vm877_vm4, %v708_v37  ;;  %v4525_v34 = vsel %vm42_vm3, %v4461_v7, 0.0  ;;  %v3626_v18 = vld [vmem:[#allocation2 + $0x68] sm:$0xff]  ;;  %v4465_v29 = vld [vmem:[#allocation2 + $0x71] sm:$0xff] }
 0x110   :  { %v1665_v27 = vld [vmem:[%s19663_s3 + $0xe8] sm:$0xff]  ;;  %v10946_v16 = vpop.f32.mrf.mxu0  ;;  %11289 = vmatmul.mubr.msk.f32.vlgmr.msra.gmra.mxu0 %vm109_vm1, %v3617_v45 }
 0x111   :  { %v11044_v54 = vpop.f32.mrf.mxu1  ;;  %11387 = vmatmul.mubr.msk.f32.vlgmr.msra.gmra.mxu1 %vm109_vm1, %v12928_v30  ;;  %1790 = vst.msk [vmem:[%s19663_s3 + $0xd0] sm:$0xff] %vm877_vm4, %v1726_v61  ;;  %v1729_v40 = vadd.f32 %v11038_v20, %v1665_v27  ;;  %911 = vst.msk [vmem:[%s19663_s3 + $0x108] sm:$0xff] %vm877_vm4, %v10946_v16  ;;  %11483 = vmatpush3.msk.msra.mxu0 %vm488_vm0, %v12954_v43  ;;  %v4521_v30 = vsel %vm42_vm3, %v4457_v47, 0.0  ;;  %v3620_v43 = vld [vmem:[#allocation2 + $0x38] sm:$0xff]  ;;  %v4463_v20 = vld [vmem:[#allocation2 + $0x61] sm:$0xff]  ;;  %v4529_v47 = vsel %vm42_vm3, %v4465_v29, 0.0 }
 0x112   :  { %11389 = vmatprep.mubr.msk.f32.mxu1 %vm109_vm1, %v4456_v49  ;;  %v1664_v33 = vld [vmem:[%s19663_s3 + $0xe0] sm:$0xff]  ;;  %v718_v55 = vpop.f32.mrf.mxu0  ;;  %11581 = vmatpush3.msk.msra.mxu1 %vm488_vm0, %v12961_v46  ;;  %v3627_v61 = vld [vmem:[#allocation2 + $0x70] sm:$0xff] }
 0x113   :  { %v1477_v41 = vpop.f32.mrf.mxu1  ;;  %11291 = vmatprep.mubr.msk.f32.mxu0 %vm109_vm1, %v3618_v15  ;;  %1793 = vst.msk [vmem:[%s19663_s3 + $0xe8] sm:$0xff] %vm877_vm4, %v1729_v40  ;;  %v1728_v8 = vadd.f32 %v1664_v33, %v1457_v44  ;;  %910 = vst.msk [vmem:[%s19663_s3 + $0x100] sm:$0xff] %vm877_vm4, %v718_v55  ;;  %11678 = vmatprep.subr.msk.mxu0 %vm488_vm0, %v10117_v23  ;;  %v8467_v46 = vld [vmem:[%s19662_s2] sm:$0xf]  ;;  %v4527_v44 = vsel %vm42_vm3, %v4463_v20, 0.0  ;;  %v3628_v40 = vld [vmem:[#allocation2 + $0x78] sm:$0xff] }
 0x114   :  { %v1667_v36 = vld [vmem:[%s19663_s3 + $0xf8] sm:$0xff]  ;;  %v10949_v31 = vpop.f32.mrf.mxu0  ;;  %11292 = vmatmul.mubr.msk.f32.gmra.mxu0 %vm109_vm1, %v3619_v42  ;;  %11776 = vmatprep.subr.msk.mxu1 %vm488_vm0, %v8467_v46 }
 0x115   :  { %v11047_v13 = vpop.f32.mrf.mxu1  ;;  %11390 = vmatmul.mubr.msk.f32.gmra.mxu1 %vm109_vm1, %v4521_v30  ;;  %1792 = vst.msk [vmem:[%s19663_s3 + $0xe0] sm:$0xff] %vm877_vm4, %v1728_v8  ;;  %v1731_v12 = vadd.f32 %v11041_v32, %v1667_v36  ;;  %913 = vst.msk [vmem:[%s19663_s3 + $0x118] sm:$0xff] %vm877_vm4, %v10949_v31  ;;  %11294 = vmatprep.mubr.msk.f32.mxu0 %vm109_vm1, %v3620_v43  ;;  %v4466_v15 = vld [vmem:[#allocation2 + $0x79] sm:$0xff]  ;;  %v4467_v30 = vld [vmem:[#allocation2 + $0x81] sm:$0xff] }
 0x116   :  { %11392 = vmatprep.mubr.msk.f32.mxu1 %vm109_vm1, %v4458_v58  ;;  %v1666_v28 = vld [vmem:[%s19663_s3 + $0xf0] sm:$0xff]  ;;  %v728_v50 = vpop.f32.mrf.mxu0  ;;  %v4531_v55 = vsel %vm42_vm3, %v4467_v30, 0.0  ;;  %v3629_v43 = vld [vmem:[#allocation2 + $0x80] sm:$0xff] }
 0x117   :  { %v1487_v5 = vpop.f32.mrf.mxu1  ;;  %1795 = vst.msk [vmem:[%s19663_s3 + $0xf8] sm:$0xff] %vm877_vm4, %v1731_v12  ;;  %v1730_v51 = vadd.f32 %v1666_v28, %v1467_v25  ;;  %912 = vst.msk [vmem:[%s19663_s3 + $0x110] sm:$0xff] %vm877_vm4, %v728_v50  ;;  %v4469_v31 = vld [vmem:[#allocation2 + $0x91] sm:$0xff] }
 0x118   :  { %v1669_v11 = vld [vmem:[%s19663_s3 + $0x108] sm:$0xff]  ;;  %v10952_v1 = vpop.f32.mrf.mxu0  ;;  %11295 = vmatmul.mubr.msk.f32.gmra.mxu0 %vm109_vm1, %v3621_v48  ;;  %v3631_v50 = vld [vmem:[#allocation2 + $0x90] sm:$0xff] }
 0x119   :  { %v11050_v62 = vpop.f32.mrf.mxu1  ;;  %11393 = vmatmul.mubr.msk.f32.gmra.mxu1 %vm109_vm1, %v4523_v0  ;;  %1794 = vst.msk [vmem:[%s19663_s3 + $0xf0] sm:$0xff] %vm877_vm4, %v1730_v51  ;;  %v1733_v59 = vadd.f32 %v11044_v54, %v1669_v11  ;;  %915 = vst.msk [vmem:[%s19663_s3 + $0x128] sm:$0xff] %vm877_vm4, %v10952_v1  ;;  %11297 = vmatprep.mubr.msk.f32.mxu0 %vm109_vm1, %v3622_v22  ;;  %v4470_v22 = vld [vmem:[#allocation2 + $0x99] sm:$0xff]  ;;  %v4471_v1 = vld [vmem:[#allocation2 + $0xa1] sm:$0xff] }
 0x11a   :  { %11395 = vmatprep.mubr.msk.f32.mxu1 %vm109_vm1, %v4460_v21  ;;  %v1668_v9 = vld [vmem:[%s19663_s3 + $0x100] sm:$0xff]  ;;  %v738_v17 = vpop.f32.mrf.mxu0 }
 0x11b   :  { %v1497_v56 = vpop.f32.mrf.mxu1  ;;  %1797 = vst.msk [vmem:[%s19663_s3 + $0x108] sm:$0xff] %vm877_vm4, %v1733_v59  ;;  %v1732_v35 = vadd.f32 %v1668_v9, %v1477_v41  ;;  %914 = vst.msk [vmem:[%s19663_s3 + $0x120] sm:$0xff] %vm877_vm4, %v738_v17  ;;  %v3633_v17 = vld [vmem:[#allocation2 + $0xa0] sm:$0xff] }
 0x11c   :  { %v1671_v63 = vld [vmem:[%s19663_s3 + $0x118] sm:$0xff]  ;;  %v10955_v19 = vpop.f32.mrf.mxu0  ;;  %11298 = vmatmul.mubr.msk.f32.gmra.mxu0 %vm109_vm1, %v3623_v53 }
 0x11d   :  { %v11053_v2 = vpop.f32.mrf.mxu1  ;;  %11396 = vmatmul.mubr.msk.f32.gmra.mxu1 %vm109_vm1, %v4525_v34  ;;  %1796 = vst.msk [vmem:[%s19663_s3 + $0x100] sm:$0xff] %vm877_vm4, %v1732_v35  ;;  %v1735_v26 = vadd.f32 %v11047_v13, %v1671_v63  ;;  %917 = vst.msk [vmem:[%s19663_s3 + $0x138] sm:$0xff] %vm877_vm4, %v10955_v19  ;;  %11300 = vmatprep.mubr.msk.f32.mxu0 %vm109_vm1, %v3624_v60  ;;  %v3630_v13 = vld [vmem:[#allocation2 + $0x88] sm:$0xff]  ;;  %v4473_v19 = vld [vmem:[#allocation2 + $0xb1] sm:$0xff] }
 0x11e   :  { %11398 = vmatprep.mubr.msk.f32.mxu1 %vm109_vm1, %v4462_v39  ;;  %v1670_v6 = vld [vmem:[%s19663_s3 + $0x110] sm:$0xff]  ;;  %v748_v32 = vpop.f32.mrf.mxu0 }
 0x11f   :  { %v1507_v52 = vpop.f32.mrf.mxu1  ;;  %1799 = vst.msk [vmem:[%s19663_s3 + $0x118] sm:$0xff] %vm877_vm4, %v1735_v26  ;;  %v1734_v45 = vadd.f32 %v1670_v6, %v1487_v5  ;;  %916 = vst.msk [vmem:[%s19663_s3 + $0x130] sm:$0xff] %vm877_vm4, %v748_v32  ;;  %v4533_v5 = vsel %vm42_vm3, %v4469_v31, 0.0  ;;  %v4472_v60 = vld [vmem:[#allocation2 + $0xa9] sm:$0xff] }
 0x120   :  { %v1673_v57 = vld [vmem:[%s19663_s3 + $0x128] sm:$0xff]  ;;  %v10958_v37 = vpop.f32.mrf.mxu0  ;;  %11301 = vmatmul.mubr.msk.f32.gmra.mxu0 %vm109_vm1, %v3625_v38  ;;  %v3635_v32 = vld [vmem:[#allocation2 + $0xb0] sm:$0xff] }
 0x121   :  { %v11056_v25 = vpop.f32.mrf.mxu1  ;;  %11399 = vmatmul.mubr.msk.f32.gmra.mxu1 %vm109_vm1, %v4527_v44  ;;  %1798 = vst.msk [vmem:[%s19663_s3 + $0x110] sm:$0xff] %vm877_vm4, %v1734_v45  ;;  %v1737_v49 = vadd.f32 %v11050_v62, %v1673_v57  ;;  %919 = vst.msk [vmem:[%s19663_s3 + $0x148] sm:$0xff] %vm877_vm4, %v10958_v37  ;;  %11303 = vmatprep.mubr.msk.f32.mxu0 %vm109_vm1, %v3626_v18  ;;  %v3632_v62 = vld [vmem:[#allocation2 + $0x98] sm:$0xff]  ;;  %v4475_v37 = vld [vmem:[#allocation2 + $0xc1] sm:$0xff] }
 0x122   :  { %11401 = vmatprep.mubr.msk.f32.mxu1 %vm109_vm1, %v4464_v3  ;;  %v1672_v27 = vld [vmem:[%s19663_s3 + $0x120] sm:$0xff]  ;;  %v758_v16 = vpop.f32.mrf.mxu0 }
 0x123   :  { %v1517_v54 = vpop.f32.mrf.mxu1  ;;  %1801 = vst.msk [vmem:[%s19663_s3 + $0x128] sm:$0xff] %vm877_vm4, %v1737_v49  ;;  %v1736_v42 = vadd.f32 %v1672_v27, %v1497_v56  ;;  %918 = vst.msk [vmem:[%s19663_s3 + $0x140] sm:$0xff] %vm877_vm4, %v758_v16  ;;  %v4535_v56 = vsel %vm42_vm3, %v4471_v1, 0.0  ;;  %v4474_v18 = vld [vmem:[#allocation2 + $0xb9] sm:$0xff] }
 0x124   :  { %v1675_v58 = vld [vmem:[%s19663_s3 + $0x138] sm:$0xff]  ;;  %v10961_v33 = vpop.f32.mrf.mxu0  ;;  %11304 = vmatmul.mubr.msk.f32.gmra.mxu0 %vm109_vm1, %v3627_v61  ;;  %v3637_v16 = vld [vmem:[#allocation2 + $0xc0] sm:$0xff] }
 0x125   :  { %v11059_v23 = vpop.f32.mrf.mxu1  ;;  %11402 = vmatmul.mubr.msk.f32.gmra.mxu1 %vm109_vm1, %v4529_v47  ;;  %1800 = vst.msk [vmem:[%s19663_s3 + $0x120] sm:$0xff] %vm877_vm4, %v1736_v42  ;;  %v1739_v41 = vadd.f32 %v11053_v2, %v1675_v58  ;;  %921 = vst.msk [vmem:[%s19663_s3 + $0x158] sm:$0xff] %vm877_vm4, %v10961_v33  ;;  %11306 = vmatprep.mubr.msk.f32.mxu0 %vm109_vm1, %v3628_v40  ;;  %v3634_v2 = vld [vmem:[#allocation2 + $0xa8] sm:$0xff]  ;;  %v4477_v33 = vld [vmem:[#allocation2 + $0xd1] sm:$0xff] }
 0x126   :  { %11404 = vmatprep.mubr.msk.f32.mxu1 %vm109_vm1, %v4466_v15  ;;  %v1674_v8 = vld [vmem:[%s19663_s3 + $0x130] sm:$0xff]  ;;  %v768_v36 = vpop.f32.mrf.mxu0 }
 0x127   :  { %v1527_v46 = vpop.f32.mrf.mxu1  ;;  %1803 = vst.msk [vmem:[%s19663_s3 + $0x138] sm:$0xff] %vm877_vm4, %v1739_v41  ;;  %v1738_v12 = vadd.f32 %v1674_v8, %v1507_v52  ;;  %920 = vst.msk [vmem:[%s19663_s3 + $0x150] sm:$0xff] %vm877_vm4, %v768_v36  ;;  %v4537_v52 = vsel %vm42_vm3, %v4473_v19, 0.0  ;;  %v4476_v40 = vld [vmem:[#allocation2 + $0xc9] sm:$0xff] }
 0x128   :  { %v1677_v0 = vld [vmem:[%s19663_s3 + $0x148] sm:$0xff]  ;;  %v10964_v21 = vpop.f32.mrf.mxu0  ;;  %11307 = vmatmul.mubr.msk.f32.gmra.mxu0 %vm109_vm1, %v3629_v43  ;;  %v3639_v36 = vld [vmem:[#allocation2 + $0xd0] sm:$0xff] }
 0x129   :  { %v11062_v48 = vpop.f32.mrf.mxu1  ;;  %11405 = vmatmul.mubr.msk.f32.gmra.mxu1 %vm109_vm1, %v4531_v55  ;;  %1802 = vst.msk [vmem:[%s19663_s3 + $0x130] sm:$0xff] %vm877_vm4, %v1738_v12  ;;  %v1741_v28 = vadd.f32 %v11056_v25, %v1677_v0  ;;  %923 = vst.msk [vmem:[%s19663_s3 + $0x168] sm:$0xff] %vm877_vm4, %v10964_v21  ;;  %11309 = vmatprep.mubr.msk.f32.mxu0 %vm109_vm1, %v3630_v13  ;;  %v3636_v25 = vld [vmem:[#allocation2 + $0xb8] sm:$0xff]  ;;  %v4479_v21 = vld [vmem:[#allocation2 + $0xe1] sm:$0xff] }
 0x12a   :  { %11407 = vmatprep.mubr.msk.f32.mxu1 %vm109_vm1, %v4468_v24  ;;  %v1676_v7 = vld [vmem:[%s19663_s3 + $0x140] sm:$0xff]  ;;  %v778_v11 = vpop.f32.mrf.mxu0 }
 0x12b   :  { %v1537_v51 = vpop.f32.mrf.mxu1  ;;  %1805 = vst.msk [vmem:[%s19663_s3 + $0x148] sm:$0xff] %vm877_vm4, %v1741_v28  ;;  %v1740_v59 = vadd.f32 %v1676_v7, %v1517_v54  ;;  %922 = vst.msk [vmem:[%s19663_s3 + $0x160] sm:$0xff] %vm877_vm4, %v778_v11  ;;  %v4539_v54 = vsel %vm42_vm3, %v4475_v37, 0.0  ;;  %v4478_v13 = vld [vmem:[#allocation2 + $0xd9] sm:$0xff] }
 0x12c   :  { %v1679_v34 = vld [vmem:[%s19663_s3 + $0x158] sm:$0xff]  ;;  %v10967_v39 = vpop.f32.mrf.mxu0  ;;  %11310 = vmatmul.mubr.msk.f32.gmra.mxu0 %vm109_vm1, %v3631_v50  ;;  %v3641_v11 = vld [vmem:[#allocation2 + $0xe0] sm:$0xff] }
 0x12d   :  { %v11065_v53 = vpop.f32.mrf.mxu1  ;;  %11408 = vmatmul.mubr.msk.f32.gmra.mxu1 %vm109_vm1, %v4533_v5  ;;  %1804 = vst.msk [vmem:[%s19663_s3 + $0x140] sm:$0xff] %vm877_vm4, %v1740_v59  ;;  %v1743_v9 = vadd.f32 %v11059_v23, %v1679_v34  ;;  %925 = vst.msk [vmem:[%s19663_s3 + $0x178] sm:$0xff] %vm877_vm4, %v10967_v39  ;;  %11312 = vmatprep.mubr.msk.f32.mxu0 %vm109_vm1, %v3632_v62  ;;  %v3638_v23 = vld [vmem:[#allocation2 + $0xc8] sm:$0xff]  ;;  %v4481_v39 = vld [vmem:[#allocation2 + $0xf1] sm:$0xff] }
 0x12e   :  { %11410 = vmatprep.mubr.msk.f32.mxu1 %vm109_vm1, %v4470_v22  ;;  %v1678_v20 = vld [vmem:[%s19663_s3 + $0x150] sm:$0xff]  ;;  %v788_v63 = vpop.f32.mrf.mxu0 }
 0x12f   :  { %v1547_v35 = vpop.f32.mrf.mxu1  ;;  %1807 = vst.msk [vmem:[%s19663_s3 + $0x158] sm:$0xff] %vm877_vm4, %v1743_v9  ;;  %v1742_v26 = vadd.f32 %v1678_v20, %v1527_v46  ;;  %924 = vst.msk [vmem:[%s19663_s3 + $0x170] sm:$0xff] %vm877_vm4, %v788_v63  ;;  %v4541_v46 = vsel %vm42_vm3, %v4477_v33, 0.0  ;;  %v4480_v62 = vld [vmem:[#allocation2 + $0xe9] sm:$0xff] }
 0x130   :  { %v1681_v44 = vld [vmem:[%s19663_s3 + $0x168] sm:$0xff]  ;;  %v10970_v3 = vpop.f32.mrf.mxu0  ;;  %11313 = vmatmul.mubr.msk.f32.gmra.mxu0 %vm109_vm1, %v3633_v17  ;;  %v3643_v63 = vld [vmem:[#allocation2 + $0xf0] sm:$0xff] }
 0x131   :  { %v11068_v38 = vpop.f32.mrf.mxu1  ;;  %11411 = vmatmul.mubr.msk.f32.gmra.mxu1 %vm109_vm1, %v4535_v56  ;;  %1806 = vst.msk [vmem:[%s19663_s3 + $0x150] sm:$0xff] %vm877_vm4, %v1742_v26  ;;  %v1745_v6 = vadd.f32 %v11062_v48, %v1681_v44  ;;  %927 = vst.msk [vmem:[%s19663_s3 + $0x188] sm:$0xff] %vm877_vm4, %v10970_v3  ;;  %11315 = vmatprep.mubr.msk.f32.mxu0 %vm109_vm1, %v3634_v2  ;;  %v3640_v48 = vld [vmem:[#allocation2 + $0xd8] sm:$0xff]  ;;  %v4483_v3 = vld [vmem:[#allocation2 + $0x101] sm:$0xff] }
 0x132   :  { %11413 = vmatprep.mubr.msk.f32.mxu1 %vm109_vm1, %v4472_v60  ;;  %v1680_v29 = vld [vmem:[%s19663_s3 + $0x160] sm:$0xff]  ;;  %v798_v57 = vpop.f32.mrf.mxu0 }
 0x133   :  { %v1557_v45 = vpop.f32.mrf.mxu1  ;;  %1809 = vst.msk [vmem:[%s19663_s3 + $0x168] sm:$0xff] %vm877_vm4, %v1745_v6  ;;  %v1744_v49 = vadd.f32 %v1680_v29, %v1537_v51  ;;  %926 = vst.msk [vmem:[%s19663_s3 + $0x180] sm:$0xff] %vm877_vm4, %v798_v57  ;;  %v4543_v51 = vsel %vm42_vm3, %v4479_v21, 0.0  ;;  %v4482_v2 = vld [vmem:[#allocation2 + $0xf9] sm:$0xff] }
 0x134   :  { %v1683_v47 = vld [vmem:[%s19663_s3 + $0x178] sm:$0xff]  ;;  %v10973_v15 = vpop.f32.mrf.mxu0  ;;  %11316 = vmatmul.mubr.msk.f32.gmra.mxu0 %vm109_vm1, %v3635_v32  ;;  %v3645_v57 = vld [vmem:[#allocation2 + $0x100] sm:$0xff] }
 0x135   :  { %v11071_v61 = vpop.f32.mrf.mxu1  ;;  %11414 = vmatmul.mubr.msk.f32.gmra.mxu1 %vm109_vm1, %v4537_v52  ;;  %1808 = vst.msk [vmem:[%s19663_s3 + $0x160] sm:$0xff] %vm877_vm4, %v1744_v49  ;;  %v1747_v27 = vadd.f32 %v11065_v53, %v1683_v47  ;;  %929 = vst.msk [vmem:[%s19663_s3 + $0x198] sm:$0xff] %vm877_vm4, %v10973_v15  ;;  %11318 = vmatprep.mubr.msk.f32.mxu0 %vm109_vm1, %v3636_v25  ;;  %v3642_v53 = vld [vmem:[#allocation2 + $0xe8] sm:$0xff]  ;;  %v4485_v15 = vld [vmem:[#allocation2 + $0x111] sm:$0xff] }
 0x136   :  { %11416 = vmatprep.mubr.msk.f32.mxu1 %vm109_vm1, %v4474_v18  ;;  %v1682_v30 = vld [vmem:[%s19663_s3 + $0x170] sm:$0xff]  ;;  %v808_v58 = vpop.f32.mrf.mxu0 }
 0x137   :  { %v1567_v42 = vpop.f32.mrf.mxu1  ;;  %1811 = vst.msk [vmem:[%s19663_s3 + $0x178] sm:$0xff] %vm877_vm4, %v1747_v27  ;;  %v1746_v41 = vadd.f32 %v1682_v30, %v1547_v35  ;;  %928 = vst.msk [vmem:[%s19663_s3 + $0x190] sm:$0xff] %vm877_vm4, %v808_v58  ;;  %v4545_v35 = vsel %vm42_vm3, %v4481_v39, 0.0  ;;  %v4484_v25 = vld [vmem:[#allocation2 + $0x109] sm:$0xff] }
 0x138   :  { %v1685_v55 = vld [vmem:[%s19663_s3 + $0x188] sm:$0xff]  ;;  %v10976_v24 = vpop.f32.mrf.mxu0  ;;  %11319 = vmatmul.mubr.msk.f32.gmra.mxu0 %vm109_vm1, %v3637_v16  ;;  %v3647_v58 = vld [vmem:[#allocation2 + $0x110] sm:$0xff] }
 0x139   :  { %v11074_v43 = vpop.f32.mrf.mxu1  ;;  %11417 = vmatmul.mubr.msk.f32.gmra.mxu1 %vm109_vm1, %v4539_v54  ;;  %1810 = vst.msk [vmem:[%s19663_s3 + $0x170] sm:$0xff] %vm877_vm4, %v1746_v41  ;;  %v1749_v8 = vadd.f32 %v11068_v38, %v1685_v55  ;;  %931 = vst.msk [vmem:[%s19663_s3 + $0x1a8] sm:$0xff] %vm877_vm4, %v10976_v24  ;;  %11321 = vmatprep.mubr.msk.f32.mxu0 %vm109_vm1, %v3638_v23  ;;  %v3644_v38 = vld [vmem:[#allocation2 + $0xf8] sm:$0xff]  ;;  %v4487_v24 = vld [vmem:[#allocation2 + $0x121] sm:$0xff] }
 0x13a   :  { %11419 = vmatprep.mubr.msk.f32.mxu1 %vm109_vm1, %v4476_v40  ;;  %v1684_v31 = vld [vmem:[%s19663_s3 + $0x180] sm:$0xff]  ;;  %v818_v0 = vpop.f32.mrf.mxu0  ;;  %v3651_v39 = vld [vmem:[#allocation2 + $0x130] sm:$0xff] }
 0x13b   :  { %v1577_v12 = vpop.f32.mrf.mxu1  ;;  %1813 = vst.msk [vmem:[%s19663_s3 + $0x188] sm:$0xff] %vm877_vm4, %v1749_v8  ;;  %v1748_v28 = vadd.f32 %v1684_v31, %v1557_v45  ;;  %930 = vst.msk [vmem:[%s19663_s3 + $0x1a0] sm:$0xff] %vm877_vm4, %v818_v0  ;;  %v4547_v45 = vsel %vm42_vm3, %v4483_v3, 0.0  ;;  %v4486_v23 = vld [vmem:[#allocation2 + $0x119] sm:$0xff] }
 0x13c   :  { %v1687_v5 = vld [vmem:[%s19663_s3 + $0x198] sm:$0xff]  ;;  %v10979_v22 = vpop.f32.mrf.mxu0  ;;  %11322 = vmatmul.mubr.msk.f32.gmra.mxu0 %vm109_vm1, %v3639_v36  ;;  %v3649_v0 = vld [vmem:[#allocation2 + $0x120] sm:$0xff] }
 0x13d   :  { %v11077_v50 = vpop.f32.mrf.mxu1  ;;  %11420 = vmatmul.mubr.msk.f32.gmra.mxu1 %vm109_vm1, %v4541_v46  ;;  %1812 = vst.msk [vmem:[%s19663_s3 + $0x180] sm:$0xff] %vm877_vm4, %v1748_v28  ;;  %v1751_v7 = vadd.f32 %v11071_v61, %v1687_v5  ;;  %933 = vst.msk [vmem:[%s19663_s3 + $0x1b8] sm:$0xff] %vm877_vm4, %v10979_v22  ;;  %11324 = vmatprep.mubr.msk.f32.mxu0 %vm109_vm1, %v3640_v48  ;;  %v3646_v61 = vld [vmem:[#allocation2 + $0x108] sm:$0xff]  ;;  %v4489_v22 = vld [vmem:[#allocation2 + $0x131] sm:$0xff] }
 0x13e   :  { %11422 = vmatprep.mubr.msk.f32.mxu1 %vm109_vm1, %v4478_v13  ;;  %v1686_v1 = vld [vmem:[%s19663_s3 + $0x190] sm:$0xff]  ;;  %v828_v34 = vpop.f32.mrf.mxu0  ;;  %v2525_v3 = vld [vmem:[%s19663_s3 + $0x18] sm:$0xff] }
 0x13f   :  { %v1587_v59 = vpop.f32.mrf.mxu1  ;;  %1815 = vst.msk [vmem:[%s19663_s3 + $0x198] sm:$0xff] %vm877_vm4, %v1751_v7  ;;  %v1750_v9 = vadd.f32 %v1686_v1, %v1567_v42  ;;  %932 = vst.msk [vmem:[%s19663_s3 + $0x1b0] sm:$0xff] %vm877_vm4, %v828_v34  ;;  %v4549_v42 = vsel %vm42_vm3, %v4485_v15, 0.0  ;;  %v4488_v48 = vld [vmem:[#allocation2 + $0x129] sm:$0xff] }
 0x140   :  { %v1689_v56 = vld [vmem:[%s19663_s3 + $0x1a8] sm:$0xff]  ;;  %v10982_v60 = vpop.f32.mrf.mxu0  ;;  %11325 = vmatmul.mubr.msk.f32.gmra.mxu0 %vm109_vm1, %v3641_v11 }
 0x141   :  { %v11080_v17 = vpop.f32.mrf.mxu1  ;;  %11423 = vmatmul.mubr.msk.f32.gmra.mxu1 %vm109_vm1, %v4543_v51  ;;  %1814 = vst.msk [vmem:[%s19663_s3 + $0x190] sm:$0xff] %vm877_vm4, %v1750_v9  ;;  %v1753_v20 = vadd.f32 %v11074_v43, %v1689_v56  ;;  %935 = vst.msk [vmem:[%s19663_s3 + $0x1c8] sm:$0xff] %vm877_vm4, %v10982_v60  ;;  %11327 = vmatprep.mubr.msk.f32.mxu0 %vm109_vm1, %v3642_v53  ;;  %v3648_v43 = vld [vmem:[#allocation2 + $0x118] sm:$0xff]  ;;  %v2523_v1 = vld [vmem:[%s19663_s3 + $0x8] sm:$0xff]  ;;  %v4553_v53 = vsel %vm42_vm3, %v4489_v22, 0.0 }
 0x142   :  { %11425 = vmatprep.mubr.msk.f32.mxu1 %vm109_vm1, %v4480_v62  ;;  %v1688_v19 = vld [vmem:[%s19663_s3 + $0x1a0] sm:$0xff]  ;;  %v838_v44 = vpop.f32.mrf.mxu0 }
 0x143   :  { %v1597_v26 = vpop.f32.mrf.mxu1  ;;  %1817 = vst.msk [vmem:[%s19663_s3 + $0x1a8] sm:$0xff] %vm877_vm4, %v1753_v20  ;;  %v1752_v6 = vadd.f32 %v1688_v19, %v1577_v12  ;;  %934 = vst.msk [vmem:[%s19663_s3 + $0x1c0] sm:$0xff] %vm877_vm4, %v838_v44  ;;  %v4551_v12 = vsel %vm42_vm3, %v4487_v24, 0.0  ;;  %v4490_v9 = vld [vmem:[#allocation2 + $0x139] sm:$0xff]  ;;  %v4491_v56 = vld [vmem:[#allocation2 + $0x141] sm:$0xff] }
 0x144   :  { %v1691_v52 = vld [vmem:[%s19663_s3 + $0x1b8] sm:$0xff]  ;;  %v10985_v18 = vpop.f32.mrf.mxu0  ;;  %11328 = vmatmul.mubr.msk.f32.gmra.mxu0 %vm109_vm1, %v3643_v63 }
 0x145   :  { %v11083_v32 = vpop.f32.mrf.mxu1  ;;  %11426 = vmatmul.mubr.msk.f32.gmra.mxu1 %vm109_vm1, %v4545_v35  ;;  %1816 = vst.msk [vmem:[%s19663_s3 + $0x1a0] sm:$0xff] %vm877_vm4, %v1752_v6  ;;  %v1755_v29 = vadd.f32 %v11077_v50, %v1691_v52  ;;  %937 = vst.msk [vmem:[%s19663_s3 + $0x1d8] sm:$0xff] %vm877_vm4, %v10985_v18  ;;  %11330 = vmatprep.mubr.msk.f32.mxu0 %vm109_vm1, %v3644_v38  ;;  %v3650_v50 = vld [vmem:[#allocation2 + $0x128] sm:$0xff]  ;;  %v2522_v35 = vld [vmem:[%s19663_s3] sm:$0xff] }
 0x146   :  { %11428 = vmatprep.mubr.msk.f32.mxu1 %vm109_vm1, %v4482_v2  ;;  %v1690_v37 = vld [vmem:[%s19663_s3 + $0x1b0] sm:$0xff]  ;;  %v848_v47 = vpop.f32.mrf.mxu0  ;;  %v3652_v63 = vld [vmem:[#allocation2 + $0x138] sm:$0xff]  ;;  %v3653_v18 = vld [vmem:[#allocation2 + $0x140] sm:$0xff] }
 0x147   :  { %v1607_v49 = vpop.f32.mrf.mxu1  ;;  %1819 = vst.msk [vmem:[%s19663_s3 + $0x1b8] sm:$0xff] %vm877_vm4, %v1755_v29  ;;  %v1754_v27 = vadd.f32 %v1690_v37, %v1587_v59  ;;  %936 = vst.msk [vmem:[%s19663_s3 + $0x1d0] sm:$0xff] %vm877_vm4, %v848_v47  ;;  %v4492_v29 = vld [vmem:[#allocation2 + $0x149] sm:$0xff] }
 0x148   :  { %v1693_v54 = vld [vmem:[%s19663_s3 + $0x1c8] sm:$0xff]  ;;  %v10988_v40 = vpop.f32.mrf.mxu0  ;;  %11331 = vmatmul.mubr.msk.f32.gmra.mxu0 %vm109_vm1, %v3645_v57 }
 0x149   :  { %v11086_v16 = vpop.f32.mrf.mxu1  ;;  %11429 = vmatmul.mubr.msk.f32.gmra.mxu1 %vm109_vm1, %v4547_v45  ;;  %1818 = vst.msk [vmem:[%s19663_s3 + $0x1b0] sm:$0xff] %vm877_vm4, %v1754_v27  ;;  %v1757_v30 = vadd.f32 %v11080_v17, %v1693_v54  ;;  %939 = vst.msk [vmem:[%s19663_s3 + $0x1e8] sm:$0xff] %vm877_vm4, %v10988_v40  ;;  %11333 = vmatprep.mubr.msk.f32.mxu0 %vm109_vm1, %v3646_v61  ;;  %v4493_v45 = vld [vmem:[#allocation2 + $0x151] sm:$0xff]  ;;  %v3654_v47 = vld [vmem:[#allocation2 + $0x148] sm:$0xff] }
 0x14a   :  { %11431 = vmatprep.mubr.msk.f32.mxu1 %vm109_vm1, %v4484_v25  ;;  %v1692_v33 = vld [vmem:[%s19663_s3 + $0x1c0] sm:$0xff]  ;;  %v858_v55 = vpop.f32.mrf.mxu0 }
 0x14b   :  { %v1617_v41 = vpop.f32.mrf.mxu1  ;;  %1821 = vst.msk [vmem:[%s19663_s3 + $0x1c8] sm:$0xff] %vm877_vm4, %v1757_v30  ;;  %v1756_v8 = vadd.f32 %v1692_v33, %v1597_v26  ;;  %938 = vst.msk [vmem:[%s19663_s3 + $0x1e0] sm:$0xff] %vm877_vm4, %v858_v55  ;;  %v4557_v30 = vsel %vm42_vm3, %v4493_v45, 0.0  ;;  %v2526_v55 = vld [vmem:[%s19663_s3 + $0x20] sm:$0xff] }
 0x14c   :  { %v1695_v46 = vld [vmem:[%s19663_s3 + $0x1d8] sm:$0xff]  ;;  %v10991_v13 = vpop.f32.mrf.mxu0  ;;  %11334 = vmatmul.mubr.msk.f32.gmra.mxu0 %vm109_vm1, %v3647_v58 }
 0x14d   :  { %v11089_v36 = vpop.f32.mrf.mxu1  ;;  %11432 = vmatmul.mubr.msk.f32.gmra.mxu1 %vm109_vm1, %v4549_v42  ;;  %1820 = vst.msk [vmem:[%s19663_s3 + $0x1c0] sm:$0xff] %vm877_vm4, %v1756_v8  ;;  %v1759_v31 = vadd.f32 %v11083_v32, %v1695_v46  ;;  %941 = vst.msk [vmem:[%s19663_s3 + $0x1f8] sm:$0xff] %vm877_vm4, %v10991_v13  ;;  %11336 = vmatprep.mubr.msk.f32.mxu0 %vm109_vm1, %v3648_v43  ;;  %v4555_v32 = vsel %vm42_vm3, %v4491_v56, 0.0  ;;  %v3655_v42 = vld [vmem:[#allocation2 + $0x150] sm:$0xff]  ;;  %v4494_v58 = vld [vmem:[#allocation2 + $0x159] sm:$0xff] }
 0x14e   :  { %11434 = vmatprep.mubr.msk.f32.mxu1 %vm109_vm1, %v4486_v23  ;;  %v1694_v21 = vld [vmem:[%s19663_s3 + $0x1d0] sm:$0xff]  ;;  %v868_v5 = vpop.f32.mrf.mxu0  ;;  %v3656_v23 = vld [vmem:[#allocation2 + $0x158] sm:$0xff]  ;;  %v4495_v43 = vld [vmem:[#allocation2 + $0x161] sm:$0xff] }
 0x14f   :  { %v1627_v28 = vpop.f32.mrf.mxu1  ;;  %1823 = vst.msk [vmem:[%s19663_s3 + $0x1d8] sm:$0xff] %vm877_vm4, %v1759_v31  ;;  %v1758_v7 = vadd.f32 %v1694_v21, %v1607_v49  ;;  %940 = vst.msk [vmem:[%s19663_s3 + $0x1f0] sm:$0xff] %vm877_vm4, %v868_v5  ;;  %v2524_v49 = vld [vmem:[%s19663_s3 + $0x10] sm:$0xff]  ;;  %v2529_v31 = vld [vmem:[%s19663_s3 + $0x38] sm:$0xff] }
 0x150   :  { %v1697_v51 = vld [vmem:[%s19663_s3 + $0x1e8] sm:$0xff]  ;;  %v11094_v62 = vpop.f32.mrf.mxu0  ;;  %11337 = vmatmul.mubr.msk.f32.gmra.mxu0 %vm109_vm1, %v3649_v0  ;;  %v3657_v21 = vld [vmem:[#allocation2 + $0x160] sm:$0xff]  ;;  %v4497_v5 = vld [vmem:[#allocation2 + $0x171] sm:$0xff] }
 0x151   :  { %v13977_v11 = vpop.f32.mrf.mxu1  ;;  %11435 = vmatmul.mubr.msk.f32.gmra.mxu1 %vm109_vm1, %v4551_v12  ;;  %1822 = vst.msk [vmem:[%s19663_s3 + $0x1d0] sm:$0xff] %vm877_vm4, %v1758_v7  ;;  %v1761_v59 = vadd.f32 %v11086_v16, %v1697_v51  ;;  %v2587_v34 = vadd.f32 %v11094_v62, %v2523_v1  ;;  %11339 = vmatprep.mubr.msk.f32.mxu0 %vm109_vm1, %v3650_v50  ;;  %v2527_v16 = vld [vmem:[%s19663_s3 + $0x28] sm:$0xff]  ;;  %v2528_v51 = vld [vmem:[%s19663_s3 + $0x30] sm:$0xff] }
 0x152   :  { %11437 = vmatprep.mubr.msk.f32.mxu1 %vm109_vm1, %v4488_v48  ;;  %v1696_v17 = vld [vmem:[%s19663_s3 + $0x1e0] sm:$0xff]  ;;  %v2203_v20 = vpop.f32.mrf.mxu0  ;;  %v4559_v48 = vsel %vm42_vm3, %v4495_v43, 0.0  ;;  %v3663_v43 = vld [vmem:[#allocation2 + $0x190] sm:$0xff] }
 0x153   :  { %v13995_v60 = vpop.f32.mrf.mxu1  ;;  %1825 = vst.msk [vmem:[%s19663_s3 + $0x1e8] sm:$0xff] %vm877_vm4, %v1761_v59  ;;  %v1760_v2 = vadd.f32 %v1696_v17, %v1617_v41  ;;  %2651 = vst.msk [vmem:[%s19663_s3 + $0x8] sm:$0xff] %vm877_vm4, %v2587_v34  ;;  %v2586_v19 = vadd.f32 %v2522_v35, %v2203_v20  ;;  %v4561_v17 = vsel %vm42_vm3, %v4497_v5, 0.0  ;;  %v4498_v20 = vld [vmem:[#allocation2 + $0x179] sm:$0xff] }
 0x154   :  { %v1699_v26 = vld [vmem:[%s19663_s3 + $0x1f8] sm:$0xff]  ;;  %v11097_v38 = vpop.f32.mrf.mxu0  ;;  %11340 = vmatmul.mubr.msk.f32.gmra.mxu0 %vm109_vm1, %v3651_v39  ;;  %v2531_v39 = vld [vmem:[%s19663_s3 + $0x48] sm:$0xff] }
 0x155   :  { %v14011_v44 = vpop.f32.mrf.mxu1  ;;  %11438 = vmatmul.mubr.msk.f32.gmra.mxu1 %vm109_vm1, %v4553_v53  ;;  %1824 = vst.msk [vmem:[%s19663_s3 + $0x1e0] sm:$0xff] %vm877_vm4, %v1760_v2  ;;  %v1763_v6 = vadd.f32 %v11089_v36, %v1699_v26  ;;  %2650 = vst.msk [vmem:[%s19663_s3] sm:$0xff] %vm877_vm4, %v2586_v19  ;;  %v2589_v52 = vadd.f32 %v11097_v38, %v2525_v3  ;;  %11342 = vmatprep.mubr.msk.f32.mxu0 %vm109_vm1, %v3652_v63  ;;  %v3660_v35 = vld [vmem:[#allocation2 + $0x178] sm:$0xff]  ;;  %v2530_v26 = vld [vmem:[%s19663_s3 + $0x40] sm:$0xff] }
 0x156   :  { %11440 = vmatprep.mubr.msk.f32.mxu1 %vm109_vm1, %v4490_v9  ;;  %v1698_v57 = vld [vmem:[%s19663_s3 + $0x1f0] sm:$0xff]  ;;  %v2213_v37 = vpop.f32.mrf.mxu0 }
 0x157   :  { %v14033_v25 = vpop.f32.mrf.mxu1  ;;  %1827 = vst.msk [vmem:[%s19663_s3 + $0x1f8] sm:$0xff] %vm877_vm4, %v1763_v6  ;;  %v1762_v61 = vadd.f32 %v1698_v57, %v1627_v28  ;;  %2653 = vst.msk [vmem:[%s19663_s3 + $0x18] sm:$0xff] %vm877_vm4, %v2589_v52  ;;  %v2588_v15 = vadd.f32 %v2524_v49, %v2213_v37  ;;  %v4496_v28 = vld [vmem:[#allocation2 + $0x169] sm:$0xff] }
 0x158   :  { %v11100_v54 = vpop.f32.mrf.mxu0  ;;  %11343 = vmatmul.mubr.msk.f32.gmra.mxu0 %vm109_vm1, %v3653_v18  ;;  %v2533_v18 = vld [vmem:[%s19663_s3 + $0x58] sm:$0xff]  ;;  %v4500_v37 = vld [vmem:[#allocation2 + $0x189] sm:$0xff] }
 0x159   :  { %v14046_v27 = vpop.f32.mrf.mxu1  ;;  %11441 = vmatmul.mubr.msk.f32.gmra.mxu1 %vm109_vm1, %v4555_v32  ;;  %1826 = vst.msk [vmem:[%s19663_s3 + $0x1f0] sm:$0xff] %vm877_vm4, %v1762_v61  ;;  %2652 = vst.msk [vmem:[%s19663_s3 + $0x10] sm:$0xff] %vm877_vm4, %v2588_v15  ;;  %v2591_v40 = vadd.f32 %v11100_v54, %v2527_v16  ;;  %11345 = vmatprep.mubr.msk.f32.mxu0 %vm109_vm1, %v3654_v47  ;;  %v3662_v49 = vld [vmem:[#allocation2 + $0x188] sm:$0xff]  ;;  %v4501_v54 = vld [vmem:[#allocation2 + $0x191] sm:$0xff] }
 0x15a   :  { %11443 = vmatprep.mubr.msk.f32.mxu1 %vm109_vm1, %v4492_v29  ;;  %v2223_v41 = vpop.f32.mrf.mxu0  ;;  %v3425_v24 = vld [vmem:[%s19663_s3 + $0x8] sm:$0xff] }
 0x15b   :  { %v14065_v33 = vpop.f32.mrf.mxu1  ;;  %2655 = vst.msk [vmem:[%s19663_s3 + $0x28] sm:$0xff] %vm877_vm4, %v2591_v40  ;;  %v2590_v8 = vadd.f32 %v2526_v55, %v2223_v41  ;;  %v3489_v46 = vadd.f32 %v13977_v11, %v3425_v24  ;;  %v3658_v11 = vld [vmem:[#allocation2 + $0x168] sm:$0xff]  ;;  %v4565_v55 = vsel %vm42_vm3, %v4501_v54, 0.0  ;;  %v4502_v24 = vld [vmem:[#allocation2 + $0x199] sm:$0xff] }
 0x15c   :  { %v11103_v13 = vpop.f32.mrf.mxu0  ;;  %11346 = vmatmul.mubr.msk.f32.gmra.mxu0 %vm109_vm1, %v3655_v42  ;;  %v3424_v12 = vld [vmem:[%s19663_s3] sm:$0xff] }
 0x15d   :  { %v14078_v36 = vpop.f32.mrf.mxu1  ;;  %11444 = vmatmul.mubr.msk.f32.gmra.mxu1 %vm109_vm1, %v4557_v30  ;;  %2654 = vst.msk [vmem:[%s19663_s3 + $0x20] sm:$0xff] %vm877_vm4, %v2590_v8  ;;  %v2593_v0 = vadd.f32 %v11103_v13, %v2529_v31  ;;  %11348 = vmatprep.mubr.msk.f32.mxu0 %vm109_vm1, %v3656_v23  ;;  %3553 = vst.msk [vmem:[%s19663_s3 + $0x8] sm:$0xff] %vm877_vm4, %v3489_v46  ;;  %v3488_v50 = vadd.f32 %v3424_v12, %v13995_v60  ;;  %v3659_v60 = vld [vmem:[#allocation2 + $0x170] sm:$0xff]  ;;  %v2535_v23 = vld [vmem:[%s19663_s3 + $0x68] sm:$0xff] }
 0x15e   :  { %11446 = vmatprep.mubr.msk.f32.mxu1 %vm109_vm1, %v4494_v58  ;;  %v2233_v7 = vpop.f32.mrf.mxu0  ;;  %v3427_v62 = vld [vmem:[%s19663_s3 + $0x18] sm:$0xff]  ;;  %v2534_v31 = vld [vmem:[%s19663_s3 + $0x60] sm:$0xff] }
 0x15f   :  { %v14101_v22 = vpop.f32.mrf.mxu1  ;;  %2657 = vst.msk [vmem:[%s19663_s3 + $0x38] sm:$0xff] %vm877_vm4, %v2593_v0  ;;  %v2592_v1 = vadd.f32 %v2528_v51, %v2233_v7  ;;  %3552 = vst.msk [vmem:[%s19663_s3] sm:$0xff] %vm877_vm4, %v3488_v50  ;;  %v3491_v59 = vadd.f32 %v14011_v44, %v3427_v62  ;;  %v4499_v44 = vld [vmem:[#allocation2 + $0x181] sm:$0xff]  ;;  %v3664_v8 = vld [vmem:[#allocation2 + $0x198] sm:$0xff] }
 0x160   :  { %v11106_v53 = vpop.f32.mrf.mxu0  ;;  %11349 = vmatmul.mubr.msk.f32.gmra.mxu0 %vm109_vm1, %v3657_v21  ;;  %v3426_v9 = vld [vmem:[%s19663_s3 + $0x10] sm:$0xff]  ;;  %v4563_v57 = vsel %vm42_vm3, %v4499_v44, 0.0  ;;  %v4503_v12 = vld [vmem:[#allocation2 + $0x1a1] sm:$0xff]  ;;  %v2537_v50 = vld [vmem:[%s19663_s3 + $0x78] sm:$0xff] }
 0x161   :  { %v14118_v34 = vpop.f32.mrf.mxu1  ;;  %11447 = vmatmul.mubr.msk.f32.gmra.mxu1 %vm109_vm1, %v4559_v48  ;;  %2656 = vst.msk [vmem:[%s19663_s3 + $0x30] sm:$0xff] %vm877_vm4, %v2592_v1  ;;  %v2595_v56 = vadd.f32 %v11106_v53, %v2531_v39  ;;  %11351 = vmatprep.mubr.msk.f32.mxu0 %vm109_vm1, %v3658_v11  ;;  %3555 = vst.msk [vmem:[%s19663_s3 + $0x18] sm:$0xff] %vm877_vm4, %v3491_v59  ;;  %v3490_v63 = vadd.f32 %v3426_v9, %v14033_v25  ;;  %v3661_v25 = vld [vmem:[#allocation2 + $0x180] sm:$0xff]  ;;  %v4567_v51 = vsel %vm42_vm3, %v4503_v12, 0.0  ;;  %v4504_v62 = vld [vmem:[#allocation2 + $0x1a9] sm:$0xff] }
 0x162   :  { %11449 = vmatprep.mubr.msk.f32.mxu1 %vm109_vm1, %v4496_v28  ;;  %v2243_v19 = vpop.f32.mrf.mxu0  ;;  %v3429_v38 = vld [vmem:[%s19663_s3 + $0x28] sm:$0xff]  ;;  %v3665_v11 = vld [vmem:[#allocation2 + $0x1a0] sm:$0xff]  ;;  %v2536_v39 = vld [vmem:[%s19663_s3 + $0x70] sm:$0xff] }
 0x163   :  { %v14141_v2 = vpop.f32.mrf.mxu1  ;;  %2659 = vst.msk [vmem:[%s19663_s3 + $0x48] sm:$0xff] %vm877_vm4, %v2595_v56  ;;  %v2594_v3 = vadd.f32 %v2530_v26, %v2243_v19  ;;  %3554 = vst.msk [vmem:[%s19663_s3 + $0x10] sm:$0xff] %vm877_vm4, %v3490_v63  ;;  %v3493_v6 = vadd.f32 %v14046_v27, %v3429_v38  ;;  %v2532_v27 = vld [vmem:[%s19663_s3 + $0x50] sm:$0xff]  ;;  %v3666_v1 = vld [vmem:[#allocation2 + $0x1a8] sm:$0xff] }
 0x164   :  { %v11109_v32 = vpop.f32.mrf.mxu0  ;;  %11352 = vmatmul.mubr.msk.f32.gmra.mxu0 %vm109_vm1, %v3659_v60  ;;  %v3428_v29 = vld [vmem:[%s19663_s3 + $0x20] sm:$0xff]  ;;  %v4505_v9 = vld [vmem:[#allocation2 + $0x1b1] sm:$0xff]  ;;  %v2539_v63 = vld [vmem:[%s19663_s3 + $0x88] sm:$0xff] }
 0x165   :  { %v14158_v52 = vpop.f32.mrf.mxu1  ;;  %11450 = vmatmul.mubr.msk.f32.gmra.mxu1 %vm109_vm1, %v4561_v17  ;;  %2658 = vst.msk [vmem:[%s19663_s3 + $0x40] sm:$0xff] %vm877_vm4, %v2594_v3  ;;  %v2597_v45 = vadd.f32 %v11109_v32, %v2533_v18  ;;  %11354 = vmatprep.mubr.msk.f32.mxu0 %vm109_vm1, %v3660_v35  ;;  %3557 = vst.msk [vmem:[%s19663_s3 + $0x28] sm:$0xff] %vm877_vm4, %v3493_v6  ;;  %v3492_v47 = vadd.f32 %v3428_v29, %v14065_v33  ;;  %v4569_v26 = vsel %vm42_vm3, %v4505_v9, 0.0  ;;  %v3667_v44 = vld [vmem:[#allocation2 + $0x1b0] sm:$0xff]  ;;  %v4506_v38 = vld [vmem:[#allocation2 + $0x1b9] sm:$0xff] }
 0x166   :  { %11452 = vmatprep.mubr.msk.f32.mxu1 %vm109_vm1, %v4498_v20  ;;  %v2253_v15 = vpop.f32.mrf.mxu0  ;;  %v3431_v16 = vld [vmem:[%s19663_s3 + $0x38] sm:$0xff]  ;;  %v2538_v18 = vld [vmem:[%s19663_s3 + $0x80] sm:$0xff]  ;;  %v3671_v12 = vld [vmem:[#allocation2 + $0x1d0] sm:$0xff] }
 0x167   :  { %v14181_v61 = vpop.f32.mrf.mxu1  ;;  %2661 = vst.msk [vmem:[%s19663_s3 + $0x58] sm:$0xff] %vm877_vm4, %v2597_v45  ;;  %v2596_v40 = vadd.f32 %v2532_v27, %v2253_v15  ;;  %3556 = vst.msk [vmem:[%s19663_s3 + $0x20] sm:$0xff] %vm877_vm4, %v3492_v47  ;;  %v3495_v30 = vadd.f32 %v14078_v36, %v3431_v16  ;;  %v3668_v3 = vld [vmem:[#allocation2 + $0x1b8] sm:$0xff]  ;;  %v4507_v29 = vld [vmem:[#allocation2 + $0x1c1] sm:$0xff] }
 0x168   :  { %v11112_v58 = vpop.f32.mrf.mxu0  ;;  %11355 = vmatmul.mubr.msk.f32.gmra.mxu0 %vm109_vm1, %v3661_v25  ;;  %v3430_v33 = vld [vmem:[%s19663_s3 + $0x30] sm:$0xff]  ;;  %v2541_v47 = vld [vmem:[%s19663_s3 + $0x98] sm:$0xff]  ;;  %v4571_v27 = vsel %vm42_vm3, %v4507_v29, 0.0  ;;  %v3669_v54 = vld [vmem:[#allocation2 + $0x1c0] sm:$0xff] }
 0x169   :  { %v14198_v42 = vpop.f32.mrf.mxu1  ;;  %11453 = vmatmul.mubr.msk.f32.gmra.mxu1 %vm109_vm1, %v4563_v57  ;;  %2660 = vst.msk [vmem:[%s19663_s3 + $0x50] sm:$0xff] %vm877_vm4, %v2596_v40  ;;  %v2599_v41 = vadd.f32 %v11112_v58, %v2535_v23  ;;  %11357 = vmatprep.mubr.msk.f32.mxu0 %vm109_vm1, %v3662_v49  ;;  %3559 = vst.msk [vmem:[%s19663_s3 + $0x38] sm:$0xff] %vm877_vm4, %v3495_v30  ;;  %v3494_v46 = vadd.f32 %v3430_v33, %v14101_v22  ;;  %v4508_v16 = vld [vmem:[#allocation2 + $0x1c9] sm:$0xff]  ;;  %v4509_v33 = vld [vmem:[#allocation2 + $0x1d1] sm:$0xff] }
 0x16a   :  { %11455 = vmatprep.mubr.msk.f32.mxu1 %vm109_vm1, %v4500_v37  ;;  %v2263_v13 = vpop.f32.mrf.mxu0  ;;  %v3433_v0 = vld [vmem:[%s19663_s3 + $0x48] sm:$0xff]  ;;  %v2540_v23 = vld [vmem:[%s19663_s3 + $0x90] sm:$0xff]  ;;  %v3673_v9 = vld [vmem:[#allocation2 + $0x1e0] sm:$0xff] }
 0x16b   :  { %v14221_v36 = vpop.f32.mrf.mxu1  ;;  %2663 = vst.msk [vmem:[%s19663_s3 + $0x68] sm:$0xff] %vm877_vm4, %v2599_v41  ;;  %v2598_v48 = vadd.f32 %v2534_v31, %v2263_v13  ;;  %3558 = vst.msk [vmem:[%s19663_s3 + $0x30] sm:$0xff] %vm877_vm4, %v3494_v46  ;;  %v3497_v21 = vadd.f32 %v14118_v34, %v3433_v0  ;;  %v3670_v40 = vld [vmem:[#allocation2 + $0x1c8] sm:$0xff]  ;;  %v4573_v31 = vsel %vm42_vm3, %v4509_v33, 0.0  ;;  %v4510_v0 = vld [vmem:[#allocation2 + $0x1d9] sm:$0xff] }
 0x16c   :  { %v11115_v5 = vpop.f32.mrf.mxu0  ;;  %11358 = vmatmul.mubr.msk.f32.gmra.mxu0 %vm109_vm1, %v3663_v43  ;;  %v3432_v22 = vld [vmem:[%s19663_s3 + $0x40] sm:$0xff]  ;;  %v2543_v46 = vld [vmem:[%s19663_s3 + $0xa8] sm:$0xff]  ;;  %v3675_v29 = vld [vmem:[#allocation2 + $0x1f0] sm:$0xff] }
 0x16d   :  { %v14238_v28 = vpop.f32.mrf.mxu1  ;;  %11456 = vmatmul.mubr.msk.f32.gmra.mxu1 %vm109_vm1, %v4565_v55  ;;  %2662 = vst.msk [vmem:[%s19663_s3 + $0x60] sm:$0xff] %vm877_vm4, %v2598_v48  ;;  %v2601_v7 = vadd.f32 %v11115_v5, %v2537_v50  ;;  %11360 = vmatprep.mubr.msk.f32.mxu0 %vm109_vm1, %v3664_v8  ;;  %3561 = vst.msk [vmem:[%s19663_s3 + $0x48] sm:$0xff] %vm877_vm4, %v3497_v21  ;;  %v3496_v59 = vadd.f32 %v3432_v22, %v14141_v2  ;;  %v3672_v48 = vld [vmem:[#allocation2 + $0x1d8] sm:$0xff]  ;;  %v2542_v50 = vld [vmem:[%s19663_s3 + $0xa0] sm:$0xff] }
 0x16e   :  { %11458 = vmatprep.mubr.msk.f32.mxu1 %vm109_vm1, %v4502_v24  ;;  %v2273_v53 = vpop.f32.mrf.mxu0  ;;  %v3435_v56 = vld [vmem:[%s19663_s3 + $0x58] sm:$0xff]  ;;  %v4511_v22 = vld [vmem:[#allocation2 + $0x1e1] sm:$0xff] }
 0x16f   :  { %v14261_v34 = vpop.f32.mrf.mxu1  ;;  %2665 = vst.msk [vmem:[%s19663_s3 + $0x78] sm:$0xff] %vm877_vm4, %v2601_v7  ;;  %v2600_v17 = vadd.f32 %v2536_v39, %v2273_v53  ;;  %3560 = vst.msk [vmem:[%s19663_s3 + $0x40] sm:$0xff] %vm877_vm4, %v3496_v59  ;;  %v3499_v60 = vadd.f32 %v14158_v52, %v3435_v56  ;;  %v2545_v59 = vld [vmem:[%s19663_s3 + $0xb8] sm:$0xff]  ;;  %v4575_v39 = vsel %vm42_vm3, %v4511_v22, 0.0  ;;  %v4512_v56 = vld [vmem:[#allocation2 + $0x1e9] sm:$0xff] }
 0x170   :  { %v11118_v35 = vpop.f32.mrf.mxu0  ;;  %11361 = vmatmul.mubr.msk.f32.gmra.mxu0 %vm109_vm1, %v3665_v11  ;;  %v3434_v2 = vld [vmem:[%s19663_s3 + $0x50] sm:$0xff]  ;;  %v3677_v33 = vld [vmem:[#allocation2 + $0x200] sm:$0xff] }
 0x171   :  { %v14278_v20 = vpop.f32.mrf.mxu1  ;;  %11459 = vmatmul.mubr.msk.f32.gmra.mxu1 %vm109_vm1, %v4567_v51  ;;  %2664 = vst.msk [vmem:[%s19663_s3 + $0x70] sm:$0xff] %vm877_vm4, %v2600_v17  ;;  %v2603_v19 = vadd.f32 %v11118_v35, %v2539_v63  ;;  %11363 = vmatprep.mubr.msk.f32.mxu0 %vm109_vm1, %v3666_v1  ;;  %3563 = vst.msk [vmem:[%s19663_s3 + $0x58] sm:$0xff] %vm877_vm4, %v3499_v60  ;;  %v3498_v6 = vadd.f32 %v3434_v2, %v14181_v61  ;;  %v3674_v17 = vld [vmem:[#allocation2 + $0x1e8] sm:$0xff]  ;;  %v2544_v63 = vld [vmem:[%s19663_s3 + $0xb0] sm:$0xff] }
 0x172   :  { %11461 = vmatprep.mubr.msk.f32.mxu1 %vm109_vm1, %v4504_v62  ;;  %v2283_v32 = vpop.f32.mrf.mxu0  ;;  %v3437_v45 = vld [vmem:[%s19663_s3 + $0x68] sm:$0xff]  ;;  %v4513_v2 = vld [vmem:[#allocation2 + $0x1f1] sm:$0xff] }
 0x173   :  { %v14301_v52 = vpop.f32.mrf.mxu1  ;;  %2667 = vst.msk [vmem:[%s19663_s3 + $0x88] sm:$0xff] %vm877_vm4, %v2603_v19  ;;  %v2602_v57 = vadd.f32 %v2538_v18, %v2283_v32  ;;  %3562 = vst.msk [vmem:[%s19663_s3 + $0x50] sm:$0xff] %vm877_vm4, %v3498_v6  ;;  %v3501_v25 = vadd.f32 %v14198_v42, %v3437_v45  ;;  %v2547_v6 = vld [vmem:[%s19663_s3 + $0xc8] sm:$0xff]  ;;  %v4577_v18 = vsel %vm42_vm3, %v4513_v2, 0.0  ;;  %v4514_v45 = vld [vmem:[#allocation2 + $0x1f9] sm:$0xff] }
 0x174   :  { %v11121_v49 = vpop.f32.mrf.mxu0  ;;  %11364 = vmatmul.mubr.msk.f32.gmra.mxu0 %vm109_vm1, %v3667_v44  ;;  %v3436_v61 = vld [vmem:[%s19663_s3 + $0x60] sm:$0xff]  ;;  %v6239_v2 = vld [vmem:[#allocation2 + $0x30] sm:$0xff] }
 0x175   :  { %v14318_v37 = vpop.f32.mrf.mxu1  ;;  %11462 = vmatmul.mubr.msk.f32.gmra.mxu1 %vm109_vm1, %v4569_v26  ;;  %2666 = vst.msk [vmem:[%s19663_s3 + $0x80] sm:$0xff] %vm877_vm4, %v2602_v57  ;;  %v2605_v15 = vadd.f32 %v11121_v49, %v2541_v47  ;;  %11366 = vmatprep.mubr.msk.f32.mxu0 %vm109_vm1, %v3668_v3  ;;  %3565 = vst.msk [vmem:[%s19663_s3 + $0x68] sm:$0xff] %vm877_vm4, %v3501_v25  ;;  %v3500_v30 = vadd.f32 %v3436_v61, %v14221_v36  ;;  %v3676_v57 = vld [vmem:[#allocation2 + $0x1f8] sm:$0xff]  ;;  %v2546_v47 = vld [vmem:[%s19663_s3 + $0xc0] sm:$0xff] }
 0x176   :  { %11464 = vmatprep.mubr.msk.f32.mxu1 %vm109_vm1, %v4506_v38  ;;  %v2293_v58 = vpop.f32.mrf.mxu0  ;;  %v3439_v41 = vld [vmem:[%s19663_s3 + $0x78] sm:$0xff]  ;;  %v4515_v61 = vld [vmem:[#allocation2 + $0x201] sm:$0xff] }
 0x177   :  { %v14341_v42 = vpop.f32.mrf.mxu1  ;;  %2669 = vst.msk [vmem:[%s19663_s3 + $0x98] sm:$0xff] %vm877_vm4, %v2605_v15  ;;  %v2604_v55 = vadd.f32 %v2540_v23, %v2293_v58  ;;  %3564 = vst.msk [vmem:[%s19663_s3 + $0x60] sm:$0xff] %vm877_vm4, %v3500_v30  ;;  %v3503_v43 = vadd.f32 %v14238_v28, %v3439_v41  ;;  %v2549_v30 = vld [vmem:[%s19663_s3 + $0xd8] sm:$0xff]  ;;  %v4579_v23 = vsel %vm42_vm3, %v4515_v61, 0.0  ;;  %v4516_v41 = vld [vmem:[#allocation2 + $0x209] sm:$0xff] }
 0x178   :  { %v11124_v8 = vpop.f32.mrf.mxu0  ;;  %11367 = vmatmul.mubr.msk.f32.gmra.mxu0 %vm109_vm1, %v3669_v54  ;;  %v3438_v36 = vld [vmem:[%s19663_s3 + $0x70] sm:$0xff]  ;;  %v11877_v61 = vld [vmem:[%s19661_s1 + $0x20] sm:$0xf] }
 0x179   :  { %v14358_v24 = vpop.f32.mrf.mxu1  ;;  %11465 = vmatmul.mubr.msk.f32.gmra.mxu1 %vm109_vm1, %v4571_v27  ;;  %2668 = vst.msk [vmem:[%s19663_s3 + $0x90] sm:$0xff] %vm877_vm4, %v2604_v55  ;;  %v2607_v13 = vadd.f32 %v11124_v8, %v2543_v46  ;;  %11369 = vmatprep.mubr.msk.f32.mxu0 %vm109_vm1, %v3670_v40  ;;  %3567 = vst.msk [vmem:[%s19663_s3 + $0x78] sm:$0xff] %vm877_vm4, %v3503_v43  ;;  %v3502_v21 = vadd.f32 %v3438_v36, %v14261_v34  ;;  %v3678_v55 = vld [vmem:[#allocation2 + $0x208] sm:$0xff]  ;;  %v2548_v46 = vld [vmem:[%s19663_s3 + $0xd0] sm:$0xff] }
 0x17a   :  { %11467 = vmatprep.mubr.msk.f32.mxu1 %vm109_vm1, %v4508_v16  ;;  %v2303_v5 = vpop.f32.mrf.mxu0  ;;  %v3441_v7 = vld [vmem:[%s19663_s3 + $0x88] sm:$0xff]  ;;  %v4517_v36 = vld [vmem:[#allocation2 + $0x211] sm:$0xff] }
 0x17b   :  { %v14381_v28 = vpop.f32.mrf.mxu1  ;;  %2671 = vst.msk [vmem:[%s19663_s3 + $0xa8] sm:$0xff] %vm877_vm4, %v2607_v13  ;;  %v2606_v51 = vadd.f32 %v2542_v50, %v2303_v5  ;;  %3566 = vst.msk [vmem:[%s19663_s3 + $0x70] sm:$0xff] %vm877_vm4, %v3502_v21  ;;  %v3505_v11 = vadd.f32 %v14278_v20, %v3441_v7  ;;  %v4581_v22 = vsel %vm42_vm3, %v4517_v36, 0.0  ;;  %v3679_v7 = vld [vmem:[#allocation2 + $0x210] sm:$0xff] }
 0x17c   :  { %v11127_v1 = vpop.f32.mrf.mxu0  ;;  %11370 = vmatmul.mubr.msk.f32.gmra.mxu0 %vm109_vm1, %v3671_v12  ;;  %v3440_v34 = vld [vmem:[%s19663_s3 + $0x80] sm:$0xff] }
 0x17d   :  { %v14398_v62 = vpop.f32.mrf.mxu1  ;;  %11468 = vmatmul.mubr.msk.f32.gmra.mxu1 %vm109_vm1, %v4573_v31  ;;  %2670 = vst.msk [vmem:[%s19663_s3 + $0xa0] sm:$0xff] %vm877_vm4, %v2606_v51  ;;  %v2609_v53 = vadd.f32 %v11127_v1, %v2545_v59  ;;  %11372 = vmatprep.mubr.msk.f32.mxu0 %vm109_vm1, %v3672_v48  ;;  %3569 = vst.msk [vmem:[%s19663_s3 + $0x88] sm:$0xff] %vm877_vm4, %v3505_v11  ;;  %v3504_v60 = vadd.f32 %v3440_v34, %v14301_v52  ;;  %v5356_v12 = vld [vmem:[#allocation2 + $0x27] sm:$0xff] }
 0x17e   :  { %11470 = vmatprep.mubr.msk.f32.mxu1 %vm109_vm1, %v4510_v0  ;;  %v2313_v35 = vpop.f32.mrf.mxu0  ;;  %v3443_v19 = vld [vmem:[%s19663_s3 + $0x98] sm:$0xff]  ;;  %v2550_v1 = vld [vmem:[%s19663_s3 + $0xe0] sm:$0xff]  ;;  %v6238_v59 = vld [vmem:[#allocation2 + $0x28] sm:$0xff]  ;;  %v5416_v34 = vsel %vm25_vm2, %v5356_v12, 0.0 }
 0x17f   :  { %v14421_v20 = vpop.f32.mrf.mxu1  ;;  %2673 = vst.msk [vmem:[%s19663_s3 + $0xb8] sm:$0xff] %vm877_vm4, %v2609_v53  ;;  %v2608_v26 = vadd.f32 %v2544_v63, %v2313_v35  ;;  %3568 = vst.msk [vmem:[%s19663_s3 + $0x80] sm:$0xff] %vm877_vm4, %v3504_v60  ;;  %v3507_v44 = vadd.f32 %v14318_v37, %v3443_v19  ;;  %v2553_v60 = vld [vmem:[%s19663_s3 + $0xf8] sm:$0xff]  ;;  %v5357_v19 = vld [vmem:[#allocation2 + $0x2f] sm:$0xff] }
 0x180   :  { %v11130_v3 = vpop.f32.mrf.mxu0  ;;  %11373 = vmatmul.mubr.msk.f32.gmra.mxu0 %vm109_vm1, %v3673_v9  ;;  %v3442_v52 = vld [vmem:[%s19663_s3 + $0x90] sm:$0xff] }
 0x181   :  { %v14438_v38 = vpop.f32.mrf.mxu1  ;;  %11471 = vmatmul.mubr.msk.f32.gmra.mxu1 %vm109_vm1, %v4575_v39  ;;  %2672 = vst.msk [vmem:[%s19663_s3 + $0xb0] sm:$0xff] %vm877_vm4, %v2608_v26  ;;  %v2611_v32 = vadd.f32 %v11130_v3, %v2547_v6  ;;  %11375 = vmatprep.mubr.msk.f32.mxu0 %vm109_vm1, %v3674_v17  ;;  %3571 = vst.msk [vmem:[%s19663_s3 + $0x98] sm:$0xff] %vm877_vm4, %v3507_v44  ;;  %v3506_v25 = vadd.f32 %v3442_v52, %v14341_v42  ;;  %v2552_v3 = vld [vmem:[%s19663_s3 + $0xf0] sm:$0xff]  ;;  %v6240_v6 = vld [vmem:[#allocation2 + $0x38] sm:$0xff] }
 0x182   :  { %11473 = vmatprep.mubr.msk.f32.mxu1 %vm109_vm1, %v4512_v56  ;;  %v2323_v49 = vpop.f32.mrf.mxu0  ;;  %v3445_v15 = vld [vmem:[%s19663_s3 + $0xa8] sm:$0xff] }
 0x183   :  { %v14461_v37 = vpop.f32.mrf.mxu1  ;;  %2675 = vst.msk [vmem:[%s19663_s3 + $0xc8] sm:$0xff] %vm877_vm4, %v2611_v32  ;;  %v2610_v27 = vadd.f32 %v2546_v47, %v2323_v49  ;;  %3570 = vst.msk [vmem:[%s19663_s3 + $0x90] sm:$0xff] %vm877_vm4, %v3506_v25  ;;  %v3509_v54 = vadd.f32 %v14358_v24, %v3445_v15  ;;  %v6241_v15 = vld [vmem:[#allocation2 + $0x40] sm:$0xff]  ;;  %v5361_v12 = vld [vmem:[#allocation2 + $0x4f] sm:$0xff] }
 0x184   :  { %v11133_v40 = vpop.f32.mrf.mxu0  ;;  %11376 = vmatmul.mubr.msk.f32.gmra.mxu0 %vm109_vm1, %v3675_v29  ;;  %v3444_v42 = vld [vmem:[%s19663_s3 + $0xa0] sm:$0xff] }
 0x185   :  { %v14478_v16 = vpop.f32.mrf.mxu1  ;;  %11474 = vmatmul.mubr.msk.f32.gmra.mxu1 %vm109_vm1, %v4577_v18  ;;  %2674 = vst.msk [vmem:[%s19663_s3 + $0xc0] sm:$0xff] %vm877_vm4, %v2610_v27  ;;  %v2613_v58 = vadd.f32 %v11133_v40, %v2549_v30  ;;  %11378 = vmatprep.mubr.msk.f32.mxu0 %vm109_vm1, %v3676_v57  ;;  %3573 = vst.msk [vmem:[%s19663_s3 + $0xa8] sm:$0xff] %vm877_vm4, %v3509_v54  ;;  %v3508_v43 = vadd.f32 %v3444_v42, %v14381_v28  ;;  %v2551_v28 = vld [vmem:[%s19663_s3 + $0xe8] sm:$0xff]  ;;  %v5359_v27 = vld [vmem:[#allocation2 + $0x3f] sm:$0xff] }
 0x186   :  { %11476 = vmatprep.mubr.msk.f32.mxu1 %vm109_vm1, %v4514_v45  ;;  %v2333_v8 = vpop.f32.mrf.mxu0  ;;  %v3447_v13 = vld [vmem:[%s19663_s3 + $0xb8] sm:$0xff]  ;;  %v5360_v29 = vld [vmem:[#allocation2 + $0x47] sm:$0xff]  ;;  %v11878_v42 = vld [vmem:[%s19662_s2] sm:$0xf] }
 0x187   :  { %v14501_v24 = vpop.f32.mrf.mxu1  ;;  %2677 = vst.msk [vmem:[%s19663_s3 + $0xd8] sm:$0xff] %vm877_vm4, %v2613_v58  ;;  %v2612_v31 = vadd.f32 %v2548_v46, %v2333_v8  ;;  %3572 = vst.msk [vmem:[%s19663_s3 + $0xa0] sm:$0xff] %vm877_vm4, %v3508_v43  ;;  %v3511_v0 = vadd.f32 %v14398_v62, %v3447_v13  ;;  %v2554_v30 = vld [vmem:[%s19663_s3 + $0x100] sm:$0xff]  ;;  %v6242_v58 = vld [vmem:[#allocation2 + $0x48] sm:$0xff] }
 0x188   :  { %v11136_v21 = vpop.f32.mrf.mxu0  ;;  %11379 = vmatmul.mubr.msk.f32.gmra.mxu0 %vm109_vm1, %v3677_v33  ;;  %v3446_v5 = vld [vmem:[%s19663_s3 + $0xb0] sm:$0xff]  ;;  %v2557_v46 = vld [vmem:[%s19663_s3 + $0x118] sm:$0xff] }
 0x189   :  { %v14518_v48 = vpop.f32.mrf.mxu1  ;;  %11477 = vmatmul.mubr.msk.f32.gmra.mxu1 %vm109_vm1, %v4579_v23  ;;  %2676 = vst.msk [vmem:[%s19663_s3 + $0xd0] sm:$0xff] %vm877_vm4, %v2612_v31  ;;  %v2615_v50 = vadd.f32 %v11136_v21, %v2551_v28  ;;  %11381 = vmatprep.mubr.msk.f32.mxu0 %vm109_vm1, %v3678_v55  ;;  %3575 = vst.msk [vmem:[%s19663_s3 + $0xb8] sm:$0xff] %vm877_vm4, %v3511_v0  ;;  %v3510_v51 = vadd.f32 %v3446_v5, %v14421_v20  ;;  %v5358_v20 = vld [vmem:[#allocation2 + $0x37] sm:$0xff]  ;;  %v5420_v23 = vsel %vm25_vm2, %v5360_v29, 0.0  ;;  %v5365_v29 = vld [vmem:[#allocation2 + $0x6f] sm:$0xff] }
 0x18a   :  { %11479 = vmatprep.mubr.msk.f32.mxu1 %vm109_vm1, %v4516_v41  ;;  %v2343_v62 = vpop.f32.mrf.mxu0  ;;  %v3449_v53 = vld [vmem:[%s19663_s3 + $0xc8] sm:$0xff]  ;;  %v5418_v18 = vsel %vm25_vm2, %v5358_v20, 0.0  ;;  %v5362_v55 = vld [vmem:[#allocation2 + $0x57] sm:$0xff]  ;;  %v2558_v20 = vld [vmem:[%s19663_s3 + $0x120] sm:$0xff] }
 0x18b   :  { %v14541_v11 = vpop.f32.mrf.mxu1  ;;  %2679 = vst.msk [vmem:[%s19663_s3 + $0xe8] sm:$0xff] %vm877_vm4, %v2615_v50  ;;  %v2614_v39 = vadd.f32 %v2550_v1, %v2343_v62  ;;  %3574 = vst.msk [vmem:[%s19663_s3 + $0xb0] sm:$0xff] %vm877_vm4, %v3510_v51  ;;  %v3513_v9 = vadd.f32 %v14438_v38, %v3449_v53  ;;  %v6243_v31 = vld [vmem:[#allocation2 + $0x50] sm:$0xff]  ;;  %v6244_v5 = vld [vmem:[#allocation2 + $0x58] sm:$0xff]  ;;  %v5422_v50 = vsel %vm25_vm2, %v5362_v55, 0.0 }
 0x18c   :  { %v11139_v17 = vpop.f32.mrf.mxu0  ;;  %11382 = vmatmul.mubr.msk.f32.gmra.mxu0 %vm109_vm1, %v3679_v7  ;;  %v3448_v35 = vld [vmem:[%s19663_s3 + $0xc0] sm:$0xff]  ;;  %v2556_v28 = vld [vmem:[%s19663_s3 + $0x110] sm:$0xff] }
 0x18d   :  { %v14560_v56 = vpop.f32.mrf.mxu1  ;;  %11480 = vmatmul.mubr.msk.f32.gmra.mxu1 %vm109_vm1, %v4581_v22  ;;  %2678 = vst.msk [vmem:[%s19663_s3 + $0xe0] sm:$0xff] %vm877_vm4, %v2614_v39  ;;  %v2617_v63 = vadd.f32 %v11139_v17, %v2553_v60  ;;  %11484 = vmatprep.mubr.msk.f32.mxu0 %vm109_vm1, %v5416_v34  ;;  %3577 = vst.msk [vmem:[%s19663_s3 + $0xc8] sm:$0xff] %vm877_vm4, %v3513_v9  ;;  %v3512_v26 = vadd.f32 %v3448_v35, %v14461_v37  ;;  %v2555_v37 = vld [vmem:[%s19663_s3 + $0x108] sm:$0xff]  ;;  %v6245_v39 = vld [vmem:[#allocation2 + $0x60] sm:$0xff] }
 0x18e   :  { %11582 = vmatprep.mubr.msk.f32.mxu1 %vm109_vm1, %v6238_v59  ;;  %v2353_v38 = vpop.f32.mrf.mxu0  ;;  %v3451_v52 = vld [vmem:[%s19663_s3 + $0xd8] sm:$0xff]  ;;  %v5364_v51 = vld [vmem:[#allocation2 + $0x67] sm:$0xff] }
 0x18f   :  { %v14581_v44 = vpop.f32.mrf.mxu1  ;;  %2681 = vst.msk [vmem:[%s19663_s3 + $0xf8] sm:$0xff] %vm877_vm4, %v2617_v63  ;;  %v2616_v32 = vadd.f32 %v2552_v3, %v2353_v38  ;;  %3576 = vst.msk [vmem:[%s19663_s3 + $0xc0] sm:$0xff] %vm877_vm4, %v3512_v26  ;;  %v3515_v45 = vadd.f32 %v14478_v16, %v3451_v52  ;;  %v2559_v59 = vld [vmem:[%s19663_s3 + $0x128] sm:$0xff]  ;;  %v5363_v9 = vld [vmem:[#allocation2 + $0x5f] sm:$0xff]  ;;  %v5424_v63 = vsel %vm25_vm2, %v5364_v51, 0.0 }
 0x190   :  { %v11142_v25 = vpop.f32.mrf.mxu0  ;;  %11485 = vmatmul.mubr.msk.f32.vlgmr.msra.gmra.mxu0 %vm109_vm1, %v5357_v19  ;;  %v3450_v49 = vld [vmem:[%s19663_s3 + $0xd0] sm:$0xff]  ;;  %v6246_v35 = vld [vmem:[#allocation2 + $0x68] sm:$0xff] }
 0x191   :  { %v14600_v57 = vpop.f32.mrf.mxu1  ;;  %11583 = vmatmul.mubr.msk.f32.vlgmr.msra.gmra.mxu1 %vm109_vm1, %v6239_v2  ;;  %2680 = vst.msk [vmem:[%s19663_s3 + $0xf0] sm:$0xff] %vm877_vm4, %v2616_v32  ;;  %v2619_v47 = vadd.f32 %v11142_v25, %v2555_v37  ;;  %11679 = vmatpush3.msk.msra.mxu0 %vm488_vm0, %v11877_v61  ;;  %3579 = vst.msk [vmem:[%s19663_s3 + $0xd8] sm:$0xff] %vm877_vm4, %v3515_v45  ;;  %v3514_v54 = vadd.f32 %v3450_v49, %v14501_v24  ;;  %v5366_v26 = vld [vmem:[#allocation2 + $0x77] sm:$0xff] }
 0x192   :  { %11585 = vmatprep.mubr.msk.f32.mxu1 %vm109_vm1, %v6240_v6  ;;  %v2363_v40 = vpop.f32.mrf.mxu0  ;;  %11777 = vmatpush3.msk.msra.mxu1 %vm488_vm0, %v11878_v42  ;;  %v3453_v33 = vld [vmem:[%s19663_s3 + $0xe8] sm:$0xff]  ;;  %v2561_v6 = vld [vmem:[%s19663_s3 + $0x138] sm:$0xff]  ;;  %v2560_v37 = vld [vmem:[%s19663_s3 + $0x130] sm:$0xff] }
 0x193   :  { %v14624_v16 = vpop.f32.mrf.mxu1  ;;  %11487 = vmatprep.mubr.msk.f32.mxu0 %vm109_vm1, %v5418_v18  ;;  %2683 = vst.msk [vmem:[%s19663_s3 + $0x108] sm:$0xff] %vm877_vm4, %v2619_v47  ;;  %v2618_v41 = vadd.f32 %v2554_v30, %v2363_v40  ;;  %3578 = vst.msk [vmem:[%s19663_s3 + $0xd0] sm:$0xff] %vm877_vm4, %v3514_v54  ;;  %v3517_v43 = vadd.f32 %v14518_v48, %v3453_v33  ;;  %v6247_v18 = vld [vmem:[#allocation2 + $0x70] sm:$0xff]  ;;  %v6248_v49 = vld [vmem:[#allocation2 + $0x78] sm:$0xff]  ;;  %v5426_v47 = vsel %vm25_vm2, %v5366_v26, 0.0 }
 0x194   :  { %v11145_v8 = vpop.f32.mrf.mxu0  ;;  %11488 = vmatmul.mubr.msk.f32.gmra.mxu0 %vm109_vm1, %v5359_v27  ;;  %v3452_v36 = vld [vmem:[%s19663_s3 + $0xe0] sm:$0xff]  ;;  %v2563_v30 = vld [vmem:[%s19663_s3 + $0x148] sm:$0xff] }
 0x195   :  { %v14648_v24 = vpop.f32.mrf.mxu1  ;;  %11586 = vmatmul.mubr.msk.f32.gmra.mxu1 %vm109_vm1, %v6241_v15  ;;  %2682 = vst.msk [vmem:[%s19663_s3 + $0x100] sm:$0xff] %vm877_vm4, %v2618_v41  ;;  %v2621_v13 = vadd.f32 %v11145_v8, %v2557_v46  ;;  %11490 = vmatprep.mubr.msk.f32.mxu0 %vm109_vm1, %v5420_v23  ;;  %3581 = vst.msk [vmem:[%s19663_s3 + $0xe8] sm:$0xff] %vm877_vm4, %v3517_v43  ;;  %v3516_v0 = vadd.f32 %v3452_v36, %v14541_v11  ;;  %v5368_v27 = vld [vmem:[#allocation2 + $0x87] sm:$0xff]  ;;  %v5367_v33 = vld [vmem:[#allocation2 + $0x7f] sm:$0xff] }
 0x196   :  { %11588 = vmatprep.mubr.msk.f32.mxu1 %vm109_vm1, %v6242_v58  ;;  %v2373_v21 = vpop.f32.mrf.mxu0  ;;  %v3455_v22 = vld [vmem:[%s19663_s3 + $0xf8] sm:$0xff]  ;;  %v6249_v23 = vld [vmem:[#allocation2 + $0x80] sm:$0xff]  ;;  %v6250_v8 = vld [vmem:[#allocation2 + $0x88] sm:$0xff]  ;;  %v5428_v46 = vsel %vm25_vm2, %v5368_v27, 0.0 }
 0x197   :  { %v14669_v48 = vpop.f32.mrf.mxu1  ;;  %2685 = vst.msk [vmem:[%s19663_s3 + $0x118] sm:$0xff] %vm877_vm4, %v2621_v13  ;;  %v2620_v7 = vadd.f32 %v2556_v28, %v2373_v21  ;;  %3580 = vst.msk [vmem:[%s19663_s3 + $0xe0] sm:$0xff] %vm877_vm4, %v3516_v0  ;;  %v3519_v11 = vadd.f32 %v14560_v56, %v3455_v22  ;;  %v2565_v21 = vld [vmem:[%s19663_s3 + $0x158] sm:$0xff]  ;;  %v5369_v22 = vld [vmem:[#allocation2 + $0x8f] sm:$0xff] }
 0x198   :  { %v11148_v1 = vpop.f32.mrf.mxu0  ;;  %11491 = vmatmul.mubr.msk.f32.gmra.mxu0 %vm109_vm1, %v5361_v12  ;;  %v3454_v34 = vld [vmem:[%s19663_s3 + $0xf0] sm:$0xff] }
 0x199   :  { %v14688_v62 = vpop.f32.mrf.mxu1  ;;  %11589 = vmatmul.mubr.msk.f32.gmra.mxu1 %vm109_vm1, %v6243_v31  ;;  %2684 = vst.msk [vmem:[%s19663_s3 + $0x110] sm:$0xff] %vm877_vm4, %v2620_v7  ;;  %v2623_v53 = vadd.f32 %v11148_v1, %v2559_v59  ;;  %11493 = vmatprep.mubr.msk.f32.mxu0 %vm109_vm1, %v5422_v50  ;;  %3583 = vst.msk [vmem:[%s19663_s3 + $0xf8] sm:$0xff] %vm877_vm4, %v3519_v11  ;;  %v3518_v56 = vadd.f32 %v3454_v34, %v14581_v44  ;;  %v5370_v31 = vld [vmem:[#allocation2 + $0x97] sm:$0xff] }
 0x19a   :  { %11591 = vmatprep.mubr.msk.f32.mxu1 %vm109_vm1, %v6244_v5  ;;  %v2383_v60 = vpop.f32.mrf.mxu0  ;;  %v3457_v2 = vld [vmem:[%s19663_s3 + $0x108] sm:$0xff]  ;;  %v6251_v50 = vld [vmem:[#allocation2 + $0x90] sm:$0xff]  ;;  %v6252_v1 = vld [vmem:[#allocation2 + $0x98] sm:$0xff]  ;;  %v5430_v59 = vsel %vm25_vm2, %v5370_v31, 0.0 }
 0x19b   :  { %v14709_v17 = vpop.f32.mrf.mxu1  ;;  %2687 = vst.msk [vmem:[%s19663_s3 + $0x128] sm:$0xff] %vm877_vm4, %v2623_v53  ;;  %v2622_v19 = vadd.f32 %v2558_v20, %v2383_v60  ;;  %3582 = vst.msk [vmem:[%s19663_s3 + $0xf0] sm:$0xff] %vm877_vm4, %v3518_v56  ;;  %v3521_v44 = vadd.f32 %v14600_v57, %v3457_v2  ;;  %v2567_v60 = vld [vmem:[%s19663_s3 + $0x168] sm:$0xff]  ;;  %v5371_v2 = vld [vmem:[#allocation2 + $0x9f] sm:$0xff] }
 0x19c   :  { %v11151_v3 = vpop.f32.mrf.mxu0  ;;  %11494 = vmatmul.mubr.msk.f32.gmra.mxu0 %vm109_vm1, %v5363_v9  ;;  %v3456_v52 = vld [vmem:[%s19663_s3 + $0x100] sm:$0xff] }
 0x19d   :  { %v14728_v38 = vpop.f32.mrf.mxu1  ;;  %11592 = vmatmul.mubr.msk.f32.gmra.mxu1 %vm109_vm1, %v6245_v39  ;;  %2686 = vst.msk [vmem:[%s19663_s3 + $0x120] sm:$0xff] %vm877_vm4, %v2622_v19  ;;  %v2625_v32 = vadd.f32 %v11151_v3, %v2561_v6  ;;  %11496 = vmatprep.mubr.msk.f32.mxu0 %vm109_vm1, %v5424_v63  ;;  %3585 = vst.msk [vmem:[%s19663_s3 + $0x108] sm:$0xff] %vm877_vm4, %v3521_v44  ;;  %v3520_v45 = vadd.f32 %v3456_v52, %v14624_v16  ;;  %v5372_v39 = vld [vmem:[#allocation2 + $0xa7] sm:$0xff] }
 0x19e   :  { %11594 = vmatprep.mubr.msk.f32.mxu1 %vm109_vm1, %v6246_v35  ;;  %v2393_v25 = vpop.f32.mrf.mxu0  ;;  %v3459_v61 = vld [vmem:[%s19663_s3 + $0x118] sm:$0xff]  ;;  %v6253_v63 = vld [vmem:[#allocation2 + $0xa0] sm:$0xff]  ;;  %v6254_v3 = vld [vmem:[#allocation2 + $0xa8] sm:$0xff]  ;;  %v5432_v6 = vsel %vm25_vm2, %v5372_v39, 0.0 }
 0x19f   :  { %v14749_v57 = vpop.f32.mrf.mxu1  ;;  %2689 = vst.msk [vmem:[%s19663_s3 + $0x138] sm:$0xff] %vm877_vm4, %v2625_v32  ;;  %v2624_v15 = vadd.f32 %v2560_v37, %v2393_v25  ;;  %3584 = vst.msk [vmem:[%s19663_s3 + $0x100] sm:$0xff] %vm877_vm4, %v3520_v45  ;;  %v3523_v54 = vadd.f32 %v14648_v24, %v3459_v61  ;;  %v2562_v24 = vld [vmem:[%s19663_s3 + $0x140] sm:$0xff]  ;;  %v2569_v25 = vld [vmem:[%s19663_s3 + $0x178] sm:$0xff] }
 0x1a0   :  { %v11154_v40 = vpop.f32.mrf.mxu0  ;;  %11497 = vmatmul.mubr.msk.f32.gmra.mxu0 %vm109_vm1, %v5365_v29  ;;  %v3458_v42 = vld [vmem:[%s19663_s3 + $0x110] sm:$0xff] }
 0x1a1   :  { %v14768_v16 = vpop.f32.mrf.mxu1  ;;  %11595 = vmatmul.mubr.msk.f32.gmra.mxu1 %vm109_vm1, %v6247_v18  ;;  %2688 = vst.msk [vmem:[%s19663_s3 + $0x130] sm:$0xff] %vm877_vm4, %v2624_v15  ;;  %v2627_v58 = vadd.f32 %v11154_v40, %v2563_v30  ;;  %11499 = vmatprep.mubr.msk.f32.mxu0 %vm109_vm1, %v5426_v47  ;;  %3587 = vst.msk [vmem:[%s19663_s3 + $0x118] sm:$0xff] %vm877_vm4, %v3523_v54  ;;  %v3522_v41 = vadd.f32 %v3458_v42, %v14669_v48  ;;  %v5374_v18 = vld [vmem:[#allocation2 + $0xb7] sm:$0xff]  ;;  %v5373_v61 = vld [vmem:[#allocation2 + $0xaf] sm:$0xff] }
 0x1a2   :  { %11597 = vmatprep.mubr.msk.f32.mxu1 %vm109_vm1, %v6248_v49  ;;  %v2403_v43 = vpop.f32.mrf.mxu0  ;;  %v3461_v36 = vld [vmem:[%s19663_s3 + $0x128] sm:$0xff]  ;;  %v6255_v47 = vld [vmem:[#allocation2 + $0xb0] sm:$0xff]  ;;  %v6256_v40 = vld [vmem:[#allocation2 + $0xb8] sm:$0xff]  ;;  %v5434_v30 = vsel %vm25_vm2, %v5374_v18, 0.0 }
 0x1a3   :  { %v14789_v55 = vpop.f32.mrf.mxu1  ;;  %2691 = vst.msk [vmem:[%s19663_s3 + $0x148] sm:$0xff] %vm877_vm4, %v2627_v58  ;;  %v2626_v13 = vadd.f32 %v2562_v24, %v2403_v43  ;;  %3586 = vst.msk [vmem:[%s19663_s3 + $0x110] sm:$0xff] %vm877_vm4, %v3522_v41  ;;  %v3525_v12 = vadd.f32 %v14688_v62, %v3461_v36  ;;  %v2564_v62 = vld [vmem:[%s19663_s3 + $0x150] sm:$0xff]  ;;  %v2571_v43 = vld [vmem:[%s19663_s3 + $0x188] sm:$0xff] }
 0x1a4   :  { %v11157_v48 = vpop.f32.mrf.mxu0  ;;  %11500 = vmatmul.mubr.msk.f32.gmra.mxu0 %vm109_vm1, %v5367_v33  ;;  %v3460_v28 = vld [vmem:[%s19663_s3 + $0x120] sm:$0xff] }
 0x1a5   :  { %v14808_v0 = vpop.f32.mrf.mxu1  ;;  %11598 = vmatmul.mubr.msk.f32.gmra.mxu1 %vm109_vm1, %v6249_v23  ;;  %2690 = vst.msk [vmem:[%s19663_s3 + $0x140] sm:$0xff] %vm877_vm4, %v2626_v13  ;;  %v2629_v5 = vadd.f32 %v11157_v48, %v2565_v21  ;;  %11502 = vmatprep.mubr.msk.f32.mxu0 %vm109_vm1, %v5428_v46  ;;  %3589 = vst.msk [vmem:[%s19663_s3 + $0x128] sm:$0xff] %vm877_vm4, %v3525_v12  ;;  %v3524_v7 = vadd.f32 %v3460_v28, %v14709_v17  ;;  %v5376_v23 = vld [vmem:[#allocation2 + $0xc7] sm:$0xff]  ;;  %v5375_v36 = vld [vmem:[#allocation2 + $0xbf] sm:$0xff] }
 0x1a6   :  { %11600 = vmatprep.mubr.msk.f32.mxu1 %vm109_vm1, %v6250_v8  ;;  %v2413_v11 = vpop.f32.mrf.mxu0  ;;  %v3463_v34 = vld [vmem:[%s19663_s3 + $0x138] sm:$0xff]  ;;  %v6257_v46 = vld [vmem:[#allocation2 + $0xc0] sm:$0xff]  ;;  %v6258_v48 = vld [vmem:[#allocation2 + $0xc8] sm:$0xff]  ;;  %v5436_v21 = vsel %vm25_vm2, %v5376_v23, 0.0 }
 0x1a7   :  { %v14829_v51 = vpop.f32.mrf.mxu1  ;;  %2693 = vst.msk [vmem:[%s19663_s3 + $0x158] sm:$0xff] %vm877_vm4, %v2629_v5  ;;  %v2628_v53 = vadd.f32 %v2564_v62, %v2413_v11  ;;  %3588 = vst.msk [vmem:[%s19663_s3 + $0x120] sm:$0xff] %vm877_vm4, %v3524_v7  ;;  %v3527_v9 = vadd.f32 %v14728_v38, %v3463_v34  ;;  %v2566_v38 = vld [vmem:[%s19663_s3 + $0x160] sm:$0xff]  ;;  %v2573_v11 = vld [vmem:[%s19663_s3 + $0x198] sm:$0xff] }
 0x1a8   :  { %v11160_v17 = vpop.f32.mrf.mxu0  ;;  %11503 = vmatmul.mubr.msk.f32.gmra.mxu0 %vm109_vm1, %v5369_v22  ;;  %v3462_v20 = vld [vmem:[%s19663_s3 + $0x130] sm:$0xff] }
 0x1a9   :  { %v14848_v56 = vpop.f32.mrf.mxu1  ;;  %11601 = vmatmul.mubr.msk.f32.gmra.mxu1 %vm109_vm1, %v6251_v50  ;;  %2692 = vst.msk [vmem:[%s19663_s3 + $0x150] sm:$0xff] %vm877_vm4, %v2628_v53  ;;  %v2631_v35 = vadd.f32 %v11160_v17, %v2567_v60  ;;  %11505 = vmatprep.mubr.msk.f32.mxu0 %vm109_vm1, %v5430_v59  ;;  %3591 = vst.msk [vmem:[%s19663_s3 + $0x138] sm:$0xff] %vm877_vm4, %v3527_v9  ;;  %v3526_v19 = vadd.f32 %v3462_v20, %v14749_v57  ;;  %v5378_v50 = vld [vmem:[#allocation2 + $0xd7] sm:$0xff]  ;;  %v5377_v34 = vld [vmem:[#allocation2 + $0xcf] sm:$0xff] }
 0x1aa   :  { %11603 = vmatprep.mubr.msk.f32.mxu1 %vm109_vm1, %v6252_v1  ;;  %v2423_v44 = vpop.f32.mrf.mxu0  ;;  %v3465_v52 = vld [vmem:[%s19663_s3 + $0x148] sm:$0xff]  ;;  %v6259_v59 = vld [vmem:[#allocation2 + $0xd0] sm:$0xff]  ;;  %v6260_v17 = vld [vmem:[#allocation2 + $0xd8] sm:$0xff]  ;;  %v5438_v60 = vsel %vm25_vm2, %v5378_v50, 0.0 }
 0x1ab   :  { %v14869_v26 = vpop.f32.mrf.mxu1  ;;  %2695 = vst.msk [vmem:[%s19663_s3 + $0x168] sm:$0xff] %vm877_vm4, %v2631_v35  ;;  %v2630_v32 = vadd.f32 %v2566_v38, %v2423_v44  ;;  %3590 = vst.msk [vmem:[%s19663_s3 + $0x130] sm:$0xff] %vm877_vm4, %v3526_v19  ;;  %v3529_v29 = vadd.f32 %v14768_v16, %v3465_v52  ;;  %v2568_v16 = vld [vmem:[%s19663_s3 + $0x170] sm:$0xff]  ;;  %v2575_v44 = vld [vmem:[%s19663_s3 + $0x1a8] sm:$0xff] }
 0x1ac   :  { %v11163_v57 = vpop.f32.mrf.mxu0  ;;  %11506 = vmatmul.mubr.msk.f32.gmra.mxu0 %vm109_vm1, %v5371_v2  ;;  %v3464_v37 = vld [vmem:[%s19663_s3 + $0x140] sm:$0xff] }
 0x1ad   :  { %v14888_v45 = vpop.f32.mrf.mxu1  ;;  %11604 = vmatmul.mubr.msk.f32.gmra.mxu1 %vm109_vm1, %v6253_v63  ;;  %2694 = vst.msk [vmem:[%s19663_s3 + $0x160] sm:$0xff] %vm877_vm4, %v2630_v32  ;;  %v2633_v49 = vadd.f32 %v11163_v57, %v2569_v25  ;;  %11508 = vmatprep.mubr.msk.f32.mxu0 %vm109_vm1, %v5432_v6  ;;  %3593 = vst.msk [vmem:[%s19663_s3 + $0x148] sm:$0xff] %vm877_vm4, %v3529_v29  ;;  %v3528_v15 = vadd.f32 %v3464_v37, %v14789_v55  ;;  %v5380_v63 = vld [vmem:[#allocation2 + $0xe7] sm:$0xff]  ;;  %v5379_v52 = vld [vmem:[#allocation2 + $0xdf] sm:$0xff] }
 0x1ae   :  { %11606 = vmatprep.mubr.msk.f32.mxu1 %vm109_vm1, %v6254_v3  ;;  %v2433_v54 = vpop.f32.mrf.mxu0  ;;  %v3467_v42 = vld [vmem:[%s19663_s3 + $0x158] sm:$0xff]  ;;  %v6261_v6 = vld [vmem:[#allocation2 + $0xe0] sm:$0xff]  ;;  %v6262_v57 = vld [vmem:[#allocation2 + $0xe8] sm:$0xff]  ;;  %v5440_v25 = vsel %vm25_vm2, %v5380_v63, 0.0 }
 0x1af   :  { %v14909_v27 = vpop.f32.mrf.mxu1  ;;  %2697 = vst.msk [vmem:[%s19663_s3 + $0x178] sm:$0xff] %vm877_vm4, %v2633_v49  ;;  %v2632_v58 = vadd.f32 %v2568_v16, %v2433_v54  ;;  %3592 = vst.msk [vmem:[%s19663_s3 + $0x140] sm:$0xff] %vm877_vm4, %v3528_v15  ;;  %v3531_v33 = vadd.f32 %v14808_v0, %v3467_v42  ;;  %v2570_v0 = vld [vmem:[%s19663_s3 + $0x180] sm:$0xff]  ;;  %v2577_v54 = vld [vmem:[%s19663_s3 + $0x1b8] sm:$0xff] }
 0x1b0   :  { %v11166_v55 = vpop.f32.mrf.mxu0  ;;  %11509 = vmatmul.mubr.msk.f32.gmra.mxu0 %vm109_vm1, %v5373_v61  ;;  %v3466_v24 = vld [vmem:[%s19663_s3 + $0x150] sm:$0xff] }
 0x1b1   :  { %v14928_v41 = vpop.f32.mrf.mxu1  ;;  %11607 = vmatmul.mubr.msk.f32.gmra.mxu1 %vm109_vm1, %v6255_v47  ;;  %2696 = vst.msk [vmem:[%s19663_s3 + $0x170] sm:$0xff] %vm877_vm4, %v2632_v58  ;;  %v2635_v8 = vadd.f32 %v11166_v55, %v2571_v43  ;;  %11511 = vmatprep.mubr.msk.f32.mxu0 %vm109_vm1, %v5434_v30  ;;  %3595 = vst.msk [vmem:[%s19663_s3 + $0x158] sm:$0xff] %vm877_vm4, %v3531_v33  ;;  %v3530_v13 = vadd.f32 %v3466_v24, %v14829_v51  ;;  %v5382_v47 = vld [vmem:[#allocation2 + $0xf7] sm:$0xff]  ;;  %v5381_v42 = vld [vmem:[#allocation2 + $0xef] sm:$0xff] }
 0x1b2   :  { %11609 = vmatprep.mubr.msk.f32.mxu1 %vm109_vm1, %v6256_v40  ;;  %v2443_v12 = vpop.f32.mrf.mxu0  ;;  %v3469_v28 = vld [vmem:[%s19663_s3 + $0x168] sm:$0xff]  ;;  %v6263_v30 = vld [vmem:[#allocation2 + $0xf0] sm:$0xff]  ;;  %v6264_v55 = vld [vmem:[#allocation2 + $0xf8] sm:$0xff]  ;;  %v5442_v43 = vsel %vm25_vm2, %v5382_v47, 0.0 }
 0x1b3   :  { %v14949_v31 = vpop.f32.mrf.mxu1  ;;  %2699 = vst.msk [vmem:[%s19663_s3 + $0x188] sm:$0xff] %vm877_vm4, %v2635_v8  ;;  %v2634_v5 = vadd.f32 %v2570_v0, %v2443_v12  ;;  %3594 = vst.msk [vmem:[%s19663_s3 + $0x150] sm:$0xff] %vm877_vm4, %v3530_v13  ;;  %v3533_v22 = vadd.f32 %v14848_v56, %v3469_v28  ;;  %v2572_v56 = vld [vmem:[%s19663_s3 + $0x190] sm:$0xff]  ;;  %v2579_v12 = vld [vmem:[%s19663_s3 + $0x1c8] sm:$0xff] }
 0x1b4   :  { %v11169_v51 = vpop.f32.mrf.mxu0  ;;  %11512 = vmatmul.mubr.msk.f32.gmra.mxu0 %vm109_vm1, %v5375_v36  ;;  %v3468_v62 = vld [vmem:[%s19663_s3 + $0x160] sm:$0xff] }
 0x1b5   :  { %v14968_v7 = vpop.f32.mrf.mxu1  ;;  %11610 = vmatmul.mubr.msk.f32.gmra.mxu1 %vm109_vm1, %v6257_v46  ;;  %2698 = vst.msk [vmem:[%s19663_s3 + $0x180] sm:$0xff] %vm877_vm4, %v2634_v5  ;;  %v2637_v1 = vadd.f32 %v11169_v51, %v2573_v11  ;;  %11514 = vmatprep.mubr.msk.f32.mxu0 %vm109_vm1, %v5436_v21  ;;  %3597 = vst.msk [vmem:[%s19663_s3 + $0x168] sm:$0xff] %vm877_vm4, %v3533_v22  ;;  %v3532_v53 = vadd.f32 %v3468_v62, %v14869_v26  ;;  %v5384_v46 = vld [vmem:[#allocation2 + $0x107] sm:$0xff]  ;;  %v5383_v28 = vld [vmem:[#allocation2 + $0xff] sm:$0xff] }
 0x1b6   :  { %11612 = vmatprep.mubr.msk.f32.mxu1 %vm109_vm1, %v6258_v48  ;;  %v2453_v9 = vpop.f32.mrf.mxu0  ;;  %v3471_v20 = vld [vmem:[%s19663_s3 + $0x178] sm:$0xff]  ;;  %v6265_v21 = vld [vmem:[#allocation2 + $0x100] sm:$0xff]  ;;  %v6266_v51 = vld [vmem:[#allocation2 + $0x108] sm:$0xff]  ;;  %v5444_v11 = vsel %vm25_vm2, %v5384_v46, 0.0 }
 0x1b7   :  { %v14989_v39 = vpop.f32.mrf.mxu1  ;;  %2701 = vst.msk [vmem:[%s19663_s3 + $0x198] sm:$0xff] %vm877_vm4, %v2637_v1  ;;  %v2636_v35 = vadd.f32 %v2572_v56, %v2453_v9  ;;  %3596 = vst.msk [vmem:[%s19663_s3 + $0x160] sm:$0xff] %vm877_vm4, %v3532_v53  ;;  %v3535_v2 = vadd.f32 %v14888_v45, %v3471_v20  ;;  %v2574_v45 = vld [vmem:[%s19663_s3 + $0x1a0] sm:$0xff] }
 0x1b8   :  { %v11172_v26 = vpop.f32.mrf.mxu0  ;;  %11515 = vmatmul.mubr.msk.f32.gmra.mxu0 %vm109_vm1, %v5377_v34  ;;  %v3470_v38 = vld [vmem:[%s19663_s3 + $0x170] sm:$0xff] }
 0x1b9   :  { %v15008_v19 = vpop.f32.mrf.mxu1  ;;  %11613 = vmatmul.mubr.msk.f32.gmra.mxu1 %vm109_vm1, %v6259_v59  ;;  %2700 = vst.msk [vmem:[%s19663_s3 + $0x190] sm:$0xff] %vm877_vm4, %v2636_v35  ;;  %v2639_v3 = vadd.f32 %v11172_v26, %v2575_v44  ;;  %11517 = vmatprep.mubr.msk.f32.mxu0 %vm109_vm1, %v5438_v60  ;;  %3599 = vst.msk [vmem:[%s19663_s3 + $0x178] sm:$0xff] %vm877_vm4, %v3535_v2  ;;  %v3534_v32 = vadd.f32 %v3470_v38, %v14909_v27  ;;  %v5385_v60 = vld [vmem:[#allocation2 + $0x10f] sm:$0xff]  ;;  %v5386_v44 = vld [vmem:[#allocation2 + $0x127] sm:$0xff] }
 0x1ba   :  { %11615 = vmatprep.mubr.msk.f32.mxu1 %vm109_vm1, %v6260_v17  ;;  %v2463_v29 = vpop.f32.mrf.mxu0  ;;  %v3473_v37 = vld [vmem:[%s19663_s3 + $0x188] sm:$0xff]  ;;  %v6267_v17 = vld [vmem:[#allocation2 + $0x110] sm:$0xff] }
 0x1bb   :  { %v15029_v18 = vpop.f32.mrf.mxu1  ;;  %2703 = vst.msk [vmem:[%s19663_s3 + $0x1a8] sm:$0xff] %vm877_vm4, %v2639_v3  ;;  %v2638_v49 = vadd.f32 %v2574_v45, %v2463_v29  ;;  %3598 = vst.msk [vmem:[%s19663_s3 + $0x170] sm:$0xff] %vm877_vm4, %v3534_v32  ;;  %v3537_v61 = vadd.f32 %v14928_v41, %v3473_v37  ;;  %v2576_v41 = vld [vmem:[%s19663_s3 + $0x1b0] sm:$0xff]  ;;  %v6268_v37 = vld [vmem:[#allocation2 + $0x128] sm:$0xff] }
 0x1bc   :  { %v11175_v27 = vpop.f32.mrf.mxu0  ;;  %11518 = vmatmul.mubr.msk.f32.gmra.mxu0 %vm109_vm1, %v5379_v52  ;;  %v3472_v16 = vld [vmem:[%s19663_s3 + $0x180] sm:$0xff]  ;;  %v2580_v2 = vld [vmem:[%s19663_s3 + $0x1d0] sm:$0xff]  ;;  %v2583_v52 = vld [vmem:[%s19663_s3 + $0x1e8] sm:$0xff] }
 0x1bd   :  { %v15048_v15 = vpop.f32.mrf.mxu1  ;;  %11616 = vmatmul.mubr.msk.f32.gmra.mxu1 %vm109_vm1, %v6261_v6  ;;  %2702 = vst.msk [vmem:[%s19663_s3 + $0x1a0] sm:$0xff] %vm877_vm4, %v2638_v49  ;;  %v2641_v40 = vadd.f32 %v11175_v27, %v2577_v54  ;;  %11520 = vmatprep.mubr.msk.f32.mxu0 %vm109_vm1, %v5440_v25  ;;  %3601 = vst.msk [vmem:[%s19663_s3 + $0x188] sm:$0xff] %vm877_vm4, %v3537_v61  ;;  %v3536_v58 = vadd.f32 %v3472_v16, %v14949_v31  ;;  %v2582_v25 = vld [vmem:[%s19663_s3 + $0x1e0] sm:$0xff]  ;;  %v5446_v49 = vsel %vm25_vm2, %v5386_v44, 0.0  ;;  %v4264_v44 = vld [vmem:[%s19663_s3 + $0x10] sm:$0xff] }
 0x1be   :  { %11618 = vmatprep.mubr.msk.f32.mxu1 %vm109_vm1, %v6262_v57  ;;  %v2473_v33 = vpop.f32.mrf.mxu0  ;;  %v3475_v24 = vld [vmem:[%s19663_s3 + $0x198] sm:$0xff] }
 0x1bf   :  { %v15069_v23 = vpop.f32.mrf.mxu1  ;;  %2705 = vst.msk [vmem:[%s19663_s3 + $0x1b8] sm:$0xff] %vm877_vm4, %v2641_v40  ;;  %v2640_v8 = vadd.f32 %v2576_v41, %v2473_v33  ;;  %3600 = vst.msk [vmem:[%s19663_s3 + $0x180] sm:$0xff] %vm877_vm4, %v3536_v58  ;;  %v3539_v36 = vadd.f32 %v14968_v7, %v3475_v24  ;;  %v2578_v7 = vld [vmem:[%s19663_s3 + $0x1c0] sm:$0xff]  ;;  %v2585_v40 = vld [vmem:[%s19663_s3 + $0x1f8] sm:$0xff] }
 0x1c0   :  { %v11178_v31 = vpop.f32.mrf.mxu0  ;;  %11521 = vmatmul.mubr.msk.f32.gmra.mxu0 %vm109_vm1, %v5381_v42  ;;  %v3474_v0 = vld [vmem:[%s19663_s3 + $0x190] sm:$0xff]  ;;  %v6270_v24 = vld [vmem:[#allocation2 + $0x138] sm:$0xff] }
 0x1c1   :  { %v15088_v13 = vpop.f32.mrf.mxu1  ;;  %11619 = vmatmul.mubr.msk.f32.gmra.mxu1 %vm109_vm1, %v6263_v30  ;;  %2704 = vst.msk [vmem:[%s19663_s3 + $0x1b0] sm:$0xff] %vm877_vm4, %v2640_v8  ;;  %v2643_v48 = vadd.f32 %v11178_v31, %v2579_v12  ;;  %11523 = vmatprep.mubr.msk.f32.mxu0 %vm109_vm1, %v5442_v43  ;;  %3603 = vst.msk [vmem:[%s19663_s3 + $0x198] sm:$0xff] %vm877_vm4, %v3539_v36  ;;  %v3538_v5 = vadd.f32 %v3474_v0, %v14989_v39  ;;  %v2581_v39 = vld [vmem:[%s19663_s3 + $0x1d8] sm:$0xff]  ;;  %v6269_v58 = vld [vmem:[#allocation2 + $0x130] sm:$0xff] }
 0x1c2   :  { %11621 = vmatprep.mubr.msk.f32.mxu1 %vm109_vm1, %v6264_v55  ;;  %v2483_v22 = vpop.f32.mrf.mxu0  ;;  %v3477_v62 = vld [vmem:[%s19663_s3 + $0x1a8] sm:$0xff]  ;;  %v2584_v43 = vld [vmem:[%s19663_s3 + $0x1f0] sm:$0xff] }
 0x1c3   :  { %v15109_v50 = vpop.f32.mrf.mxu1  ;;  %2707 = vst.msk [vmem:[%s19663_s3 + $0x1c8] sm:$0xff] %vm877_vm4, %v2643_v48  ;;  %v2642_v1 = vadd.f32 %v2578_v7, %v2483_v22  ;;  %3602 = vst.msk [vmem:[%s19663_s3 + $0x190] sm:$0xff] %vm877_vm4, %v3538_v5  ;;  %v3541_v59 = vadd.f32 %v15008_v19, %v3477_v62  ;;  %v4263_v48 = vld [vmem:[%s19663_s3 + $0x8] sm:$0xff]  ;;  %v6271_v5 = vld [vmem:[#allocation2 + $0x140] sm:$0xff] }
 0x1c4   :  { %v11181_v53 = vpop.f32.mrf.mxu0  ;;  %11524 = vmatmul.mubr.msk.f32.gmra.mxu0 %vm109_vm1, %v5383_v28  ;;  %v3476_v9 = vld [vmem:[%s19663_s3 + $0x1a0] sm:$0xff]  ;;  %v6272_v62 = vld [vmem:[#allocation2 + $0x148] sm:$0xff] }
 0x1c5   :  { %v15128_v34 = vpop.f32.mrf.mxu1  ;;  %11622 = vmatmul.mubr.msk.f32.gmra.mxu1 %vm109_vm1, %v6265_v21  ;;  %2706 = vst.msk [vmem:[%s19663_s3 + $0x1c0] sm:$0xff] %vm877_vm4, %v2642_v1  ;;  %v2645_v56 = vadd.f32 %v11181_v53, %v2581_v39  ;;  %11526 = vmatprep.mubr.msk.f32.mxu0 %vm109_vm1, %v5444_v11  ;;  %3605 = vst.msk [vmem:[%s19663_s3 + $0x1a8] sm:$0xff] %vm877_vm4, %v3541_v59  ;;  %v3540_v20 = vadd.f32 %v3476_v9, %v15029_v18  ;;  %v4262_v11 = vld [vmem:[%s19663_s3] sm:$0xff]  ;;  %v5392_v53 = vld [vmem:[#allocation2 + $0x157] sm:$0xff] }
 0x1c6   :  { %11624 = vmatprep.mubr.msk.f32.mxu1 %vm109_vm1, %v6266_v51  ;;  %v2493_v63 = vpop.f32.mrf.mxu0  ;;  %v3479_v19 = vld [vmem:[%s19663_s3 + $0x1b8] sm:$0xff] }
 0x1c7   :  { %v15149_v35 = vpop.f32.mrf.mxu1  ;;  %2709 = vst.msk [vmem:[%s19663_s3 + $0x1d8] sm:$0xff] %vm877_vm4, %v2645_v56  ;;  %v2644_v26 = vadd.f32 %v2580_v2, %v2493_v63  ;;  %3604 = vst.msk [vmem:[%s19663_s3 + $0x1a0] sm:$0xff] %vm877_vm4, %v3540_v20  ;;  %v3543_v38 = vadd.f32 %v15048_v15, %v3479_v19  ;;  %v5388_v15 = vld [vmem:[#allocation2 + $0x137] sm:$0xff]  ;;  %v5391_v63 = vld [vmem:[#allocation2 + $0x14f] sm:$0xff] }
 0x1c8   :  { %v11184_v6 = vpop.f32.mrf.mxu0  ;;  %11527 = vmatmul.mubr.msk.f32.gmra.mxu0 %vm109_vm1, %v5385_v60  ;;  %v3478_v32 = vld [vmem:[%s19663_s3 + $0x1b0] sm:$0xff]  ;;  %v5448_v8 = vsel %vm25_vm2, %v5388_v15, 0.0 }
 0x1c9   :  { %v15166_v3 = vpop.f32.mrf.mxu1  ;;  %11625 = vmatmul.mubr.msk.f32.gmra.mxu1 %vm109_vm1, %v6267_v17  ;;  %2708 = vst.msk [vmem:[%s19663_s3 + $0x1d0] sm:$0xff] %vm877_vm4, %v2644_v26  ;;  %v2647_v18 = vadd.f32 %v11184_v6, %v2583_v52  ;;  %11529 = vmatprep.mubr.f32.mxu0 %v19801_v4  ;;  %3607 = vst.msk [vmem:[%s19663_s3 + $0x1b8] sm:$0xff] %vm877_vm4, %v3543_v38  ;;  %v3542_v29 = vadd.f32 %v3478_v32, %v15069_v23  ;;  %v5387_v23 = vld [vmem:[#allocation2 + $0x12f] sm:$0xff]  ;;  %v4265_v17 = vld [vmem:[%s19663_s3 + $0x18] sm:$0xff] }
 0x1ca   :  { %11627 = vmatprep.mubr.f32.mxu1 %v19801_v4  ;;  %v2503_v57 = vpop.f32.mrf.mxu0  ;;  %v3481_v47 = vld [vmem:[%s19663_s3 + $0x1c8] sm:$0xff]  ;;  %v6274_v38 = vld [vmem:[#allocation2 + $0x158] sm:$0xff] }
 0x1cb   :  { %v15187_v45 = vpop.f32.mrf.mxu1  ;;  %2711 = vst.msk [vmem:[%s19663_s3 + $0x1e8] sm:$0xff] %vm877_vm4, %v2647_v18  ;;  %v2646_v61 = vadd.f32 %v2582_v25, %v2503_v57  ;;  %3606 = vst.msk [vmem:[%s19663_s3 + $0x1b0] sm:$0xff] %vm877_vm4, %v3542_v29  ;;  %v3545_v27 = vadd.f32 %v15088_v13, %v3481_v47  ;;  %v5390_v13 = vld [vmem:[#allocation2 + $0x147] sm:$0xff]  ;;  %v5393_v47 = vld [vmem:[#allocation2 + $0x15f] sm:$0xff] }
 0x1cc   :  { %v11187_v16 = vpop.f32.mrf.mxu0  ;;  %11530 = vmatmul.mubr.f32.gmra.mxu0 %v19801_v4  ;;  %v3480_v30 = vld [vmem:[%s19663_s3 + $0x1c0] sm:$0xff]  ;;  %v5450_v1 = vsel %vm25_vm2, %v5390_v13, 0.0  ;;  %v4267_v57 = vld [vmem:[%s19663_s3 + $0x28] sm:$0xff] }
 0x1cd   :  { %v15206_v54 = vpop.f32.mrf.mxu1  ;;  %11628 = vmatmul.mubr.f32.gmra.mxu1 %v19801_v4  ;;  %2710 = vst.msk [vmem:[%s19663_s3 + $0x1e0] sm:$0xff] %vm877_vm4, %v2646_v61  ;;  %v2649_v42 = vadd.f32 %v11187_v16, %v2585_v40  ;;  %11532 = vmatprep.mubr.msk.f32.mxu0 %vm109_vm1, %v5446_v49  ;;  %3609 = vst.msk [vmem:[%s19663_s3 + $0x1c8] sm:$0xff] %vm877_vm4, %v3545_v27  ;;  %v3544_v33 = vadd.f32 %v3480_v30, %v15109_v50  ;;  %v5389_v50 = vld [vmem:[#allocation2 + $0x13f] sm:$0xff]  ;;  %v5394_v32 = vld [vmem:[#allocation2 + $0x167] sm:$0xff] }
 0x1ce   :  { %11630 = vmatprep.mubr.msk.f32.mxu1 %vm109_vm1, %v6268_v37  ;;  %v2513_v55 = vpop.f32.mrf.mxu0  ;;  %v3483_v46 = vld [vmem:[%s19663_s3 + $0x1d8] sm:$0xff]  ;;  %v6275_v49 = vld [vmem:[#allocation2 + $0x160] sm:$0xff]  ;;  %v6276_v16 = vld [vmem:[#allocation2 + $0x168] sm:$0xff]  ;;  %v5454_v40 = vsel %vm25_vm2, %v5394_v32, 0.0 }
 0x1cf   :  { %v15227_v41 = vpop.f32.mrf.mxu1  ;;  %2713 = vst.msk [vmem:[%s19663_s3 + $0x1f8] sm:$0xff] %vm877_vm4, %v2649_v42  ;;  %v2648_v36 = vadd.f32 %v2584_v43, %v2513_v55  ;;  %3608 = vst.msk [vmem:[%s19663_s3 + $0x1c0] sm:$0xff] %vm877_vm4, %v3544_v33  ;;  %v3547_v31 = vadd.f32 %v15128_v34, %v3483_v46  ;;  %v4269_v55 = vld [vmem:[%s19663_s3 + $0x38] sm:$0xff]  ;;  %v5395_v46 = vld [vmem:[#allocation2 + $0x16f] sm:$0xff] }
 0x1d0   :  { %v11290_v0 = vpop.f32.mrf.mxu0  ;;  %11533 = vmatmul.mubr.msk.f32.gmra.mxu0 %vm109_vm1, %v5387_v23  ;;  %v3482_v21 = vld [vmem:[%s19663_s3 + $0x1d0] sm:$0xff] }
 0x1d1   :  { %v15246_v12 = vpop.f32.mrf.mxu1  ;;  %11631 = vmatmul.mubr.msk.f32.gmra.mxu1 %vm109_vm1, %v6269_v58  ;;  %2712 = vst.msk [vmem:[%s19663_s3 + $0x1f0] sm:$0xff] %vm877_vm4, %v2648_v36  ;;  %v4327_v28 = vadd.f32 %v11290_v0, %v4263_v48  ;;  %11535 = vmatprep.mubr.msk.f32.mxu0 %vm109_vm1, %v5448_v8  ;;  %3611 = vst.msk [vmem:[%s19663_s3 + $0x1d8] sm:$0xff] %vm877_vm4, %v3547_v31  ;;  %v3546_v22 = vadd.f32 %v3482_v21, %v15149_v35  ;;  %v6273_v35 = vld [vmem:[#allocation2 + $0x150] sm:$0xff]  ;;  %v6278_v0 = vld [vmem:[#allocation2 + $0x178] sm:$0xff] }
 0x1d2   :  { %11633 = vmatprep.mubr.msk.f32.mxu1 %vm109_vm1, %v6270_v24  ;;  %v3943_v51 = vpop.f32.mrf.mxu0  ;;  %v3485_v59 = vld [vmem:[%s19663_s3 + $0x1e8] sm:$0xff]  ;;  %v5396_v58 = vld [vmem:[#allocation2 + $0x177] sm:$0xff] }
 0x1d3   :  { %v15267_v7 = vpop.f32.mrf.mxu1  ;;  %4391 = vst.msk [vmem:[%s19663_s3 + $0x8] sm:$0xff] %vm877_vm4, %v4327_v28  ;;  %v4326_v34 = vadd.f32 %v4262_v11, %v3943_v51  ;;  %3610 = vst.msk [vmem:[%s19663_s3 + $0x1d0] sm:$0xff] %vm877_vm4, %v3546_v22  ;;  %v3549_v39 = vadd.f32 %v15166_v3, %v3485_v59  ;;  %v5452_v3 = vsel %vm25_vm2, %v5392_v53, 0.0  ;;  %v6277_v8 = vld [vmem:[#allocation2 + $0x170] sm:$0xff]  ;;  %v5456_v48 = vsel %vm25_vm2, %v5396_v58, 0.0  ;;  %v4271_v51 = vld [vmem:[%s19663_s3 + $0x48] sm:$0xff] }
 0x1d4   :  { %v11293_v56 = vpop.f32.mrf.mxu0  ;;  %11536 = vmatmul.mubr.msk.f32.gmra.mxu0 %vm109_vm1, %v5389_v50  ;;  %v3484_v60 = vld [vmem:[%s19663_s3 + $0x1e0] sm:$0xff] }
 0x1d5   :  { %v15286_v9 = vpop.f32.mrf.mxu1  ;;  %11634 = vmatmul.mubr.msk.f32.gmra.mxu1 %vm109_vm1, %v6271_v5  ;;  %4390 = vst.msk [vmem:[%s19663_s3] sm:$0xff] %vm877_vm4, %v4326_v34  ;;  %v4329_v20 = vadd.f32 %v11293_v56, %v4265_v17  ;;  %11538 = vmatprep.mubr.msk.f32.mxu0 %vm109_vm1, %v5450_v1  ;;  %3613 = vst.msk [vmem:[%s19663_s3 + $0x1e8] sm:$0xff] %vm877_vm4, %v3549_v39  ;;  %v3548_v2 = vadd.f32 %v3484_v60, %v15187_v45  ;;  %v5398_v5 = vld [vmem:[#allocation2 + $0x187] sm:$0xff]  ;;  %v5397_v59 = vld [vmem:[#allocation2 + $0x17f] sm:$0xff] }
 0x1d6   :  { %11636 = vmatprep.mubr.msk.f32.mxu1 %vm109_vm1, %v6272_v62  ;;  %v3953_v26 = vpop.f32.mrf.mxu0  ;;  %v3487_v6 = vld [vmem:[%s19663_s3 + $0x1f8] sm:$0xff]  ;;  %v6279_v1 = vld [vmem:[#allocation2 + $0x180] sm:$0xff]  ;;  %v6280_v56 = vld [vmem:[#allocation2 + $0x188] sm:$0xff]  ;;  %v5458_v17 = vsel %vm25_vm2, %v5398_v5, 0.0 }
 0x1d7   :  { %v15307_v19 = vpop.f32.mrf.mxu1  ;;  %4393 = vst.msk [vmem:[%s19663_s3 + $0x18] sm:$0xff] %vm877_vm4, %v4329_v20  ;;  %v4328_v52 = vadd.f32 %v4264_v44, %v3953_v26  ;;  %3612 = vst.msk [vmem:[%s19663_s3 + $0x1e0] sm:$0xff] %vm877_vm4, %v3548_v2  ;;  %v3551_v18 = vadd.f32 %v15206_v54, %v3487_v6  ;;  %v4266_v54 = vld [vmem:[%s19663_s3 + $0x20] sm:$0xff]  ;;  %v4273_v26 = vld [vmem:[%s19663_s3 + $0x58] sm:$0xff] }
 0x1d8   :  { %v11296_v45 = vpop.f32.mrf.mxu0  ;;  %11539 = vmatmul.mubr.msk.f32.gmra.mxu0 %vm109_vm1, %v5391_v63  ;;  %v3486_v25 = vld [vmem:[%s19663_s3 + $0x1f0] sm:$0xff] }
 0x1d9   :  { %v15326_v29 = vpop.f32.mrf.mxu1  ;;  %11637 = vmatmul.mubr.msk.f32.gmra.mxu1 %vm109_vm1, %v6273_v35  ;;  %4392 = vst.msk [vmem:[%s19663_s3 + $0x10] sm:$0xff] %vm877_vm4, %v4328_v52  ;;  %v4331_v37 = vadd.f32 %v11296_v45, %v4267_v57  ;;  %11541 = vmatprep.mubr.msk.f32.mxu0 %vm109_vm1, %v5452_v3  ;;  %3615 = vst.msk [vmem:[%s19663_s3 + $0x1f8] sm:$0xff] %vm877_vm4, %v3551_v18  ;;  %v3550_v61 = vadd.f32 %v3486_v25, %v15227_v41  ;;  %v5400_v35 = vld [vmem:[#allocation2 + $0x197] sm:$0xff]  ;;  %v5399_v6 = vld [vmem:[#allocation2 + $0x18f] sm:$0xff] }
 0x1da   :  { %11639 = vmatprep.mubr.msk.f32.mxu1 %vm109_vm1, %v6274_v38  ;;  %v3963_v27 = vpop.f32.mrf.mxu0  ;;  %v5165_v30 = vld [vmem:[%s19663_s3 + $0x8] sm:$0xff]  ;;  %v6281_v3 = vld [vmem:[#allocation2 + $0x190] sm:$0xff]  ;;  %v6282_v45 = vld [vmem:[#allocation2 + $0x198] sm:$0xff]  ;;  %v5460_v57 = vsel %vm25_vm2, %v5400_v35, 0.0 }
 0x1db   :  { %v15347_v15 = vpop.f32.mrf.mxu1  ;;  %4395 = vst.msk [vmem:[%s19663_s3 + $0x28] sm:$0xff] %vm877_vm4, %v4331_v37  ;;  %v4330_v42 = vadd.f32 %v4266_v54, %v3963_v27  ;;  %3614 = vst.msk [vmem:[%s19663_s3 + $0x1f0] sm:$0xff] %vm877_vm4, %v3550_v61  ;;  %v5229_v23 = vadd.f32 %v15246_v12, %v5165_v30  ;;  %v4268_v12 = vld [vmem:[%s19663_s3 + $0x30] sm:$0xff]  ;;  %v4275_v27 = vld [vmem:[%s19663_s3 + $0x68] sm:$0xff] }
 0x1dc   :  { %v11299_v41 = vpop.f32.mrf.mxu0  ;;  %11542 = vmatmul.mubr.msk.f32.gmra.mxu0 %vm109_vm1, %v5393_v47  ;;  %v5164_v43 = vld [vmem:[%s19663_s3] sm:$0xff] }
 0x1dd   :  { %v15366_v33 = vpop.f32.mrf.mxu1  ;;  %11640 = vmatmul.mubr.msk.f32.gmra.mxu1 %vm109_vm1, %v6275_v49  ;;  %4394 = vst.msk [vmem:[%s19663_s3 + $0x20] sm:$0xff] %vm877_vm4, %v4330_v42  ;;  %v4333_v24 = vadd.f32 %v11299_v41, %v4269_v55  ;;  %11544 = vmatprep.mubr.msk.f32.mxu0 %vm109_vm1, %v5454_v40  ;;  %5293 = vst.msk [vmem:[%s19663_s3 + $0x8] sm:$0xff] %vm877_vm4, %v5229_v23  ;;  %v5228_v36 = vadd.f32 %v5164_v43, %v15267_v7  ;;  %v5402_v49 = vld [vmem:[#allocation2 + $0x1a7] sm:$0xff]  ;;  %v5401_v30 = vld [vmem:[#allocation2 + $0x19f] sm:$0xff] }
 0x1de   :  { %11642 = vmatprep.mubr.msk.f32.mxu1 %vm109_vm1, %v6276_v16  ;;  %v3973_v31 = vpop.f32.mrf.mxu0  ;;  %v5167_v21 = vld [vmem:[%s19663_s3 + $0x18] sm:$0xff]  ;;  %v6283_v40 = vld [vmem:[#allocation2 + $0x1a0] sm:$0xff]  ;;  %v6284_v41 = vld [vmem:[#allocation2 + $0x1a8] sm:$0xff]  ;;  %v5462_v55 = vsel %vm25_vm2, %v5402_v49, 0.0 }
 0x1df   :  { %v15387_v13 = vpop.f32.mrf.mxu1  ;;  %4397 = vst.msk [vmem:[%s19663_s3 + $0x38] sm:$0xff] %vm877_vm4, %v4333_v24  ;;  %v4332_v28 = vadd.f32 %v4268_v12, %v3973_v31  ;;  %5292 = vst.msk [vmem:[%s19663_s3] sm:$0xff] %vm877_vm4, %v5228_v36  ;;  %v5231_v50 = vadd.f32 %v15286_v9, %v5167_v21  ;;  %v4270_v9 = vld [vmem:[%s19663_s3 + $0x40] sm:$0xff]  ;;  %v4277_v31 = vld [vmem:[%s19663_s3 + $0x78] sm:$0xff] }
 0x1e0   :  { %v11302_v7 = vpop.f32.mrf.mxu0  ;;  %11545 = vmatmul.mubr.msk.f32.gmra.mxu0 %vm109_vm1, %v5395_v46  ;;  %v5166_v11 = vld [vmem:[%s19663_s3 + $0x10] sm:$0xff] }
 0x1e1   :  { %v15406_v22 = vpop.f32.mrf.mxu1  ;;  %11643 = vmatmul.mubr.msk.f32.gmra.mxu1 %vm109_vm1, %v6277_v8  ;;  %4396 = vst.msk [vmem:[%s19663_s3 + $0x30] sm:$0xff] %vm877_vm4, %v4332_v28  ;;  %v4335_v62 = vadd.f32 %v11302_v7, %v4271_v51  ;;  %11547 = vmatprep.mubr.msk.f32.mxu0 %vm109_vm1, %v5456_v48  ;;  %5295 = vst.msk [vmem:[%s19663_s3 + $0x18] sm:$0xff] %vm877_vm4, %v5231_v50  ;;  %v5230_v34 = vadd.f32 %v5166_v11, %v15307_v19  ;;  %v5404_v8 = vld [vmem:[#allocation2 + $0x1b7] sm:$0xff]  ;;  %v5403_v21 = vld [vmem:[#allocation2 + $0x1af] sm:$0xff] }
 0x1e2   :  { %11645 = vmatprep.mubr.msk.f32.mxu1 %vm109_vm1, %v6278_v0  ;;  %v3983_v39 = vpop.f32.mrf.mxu0  ;;  %v5169_v60 = vld [vmem:[%s19663_s3 + $0x28] sm:$0xff]  ;;  %v6285_v48 = vld [vmem:[#allocation2 + $0x1b0] sm:$0xff]  ;;  %v6286_v7 = vld [vmem:[#allocation2 + $0x1b8] sm:$0xff]  ;;  %v5464_v51 = vsel %vm25_vm2, %v5404_v8, 0.0 }
 0x1e3   :  { %v15427_v53 = vpop.f32.mrf.mxu1  ;;  %4399 = vst.msk [vmem:[%s19663_s3 + $0x48] sm:$0xff] %vm877_vm4, %v4335_v62  ;;  %v4334_v20 = vadd.f32 %v4270_v9, %v3983_v39  ;;  %5294 = vst.msk [vmem:[%s19663_s3 + $0x10] sm:$0xff] %vm877_vm4, %v5230_v34  ;;  %v5233_v63 = vadd.f32 %v15326_v29, %v5169_v60  ;;  %v4272_v29 = vld [vmem:[%s19663_s3 + $0x50] sm:$0xff]  ;;  %v4279_v39 = vld [vmem:[%s19663_s3 + $0x88] sm:$0xff] }
 0x1e4   :  { %v11305_v19 = vpop.f32.mrf.mxu0  ;;  %11548 = vmatmul.mubr.msk.f32.gmra.mxu0 %vm109_vm1, %v5397_v59  ;;  %v5168_v44 = vld [vmem:[%s19663_s3 + $0x20] sm:$0xff] }
 0x1e5   :  { %v15446_v2 = vpop.f32.mrf.mxu1  ;;  %11646 = vmatmul.mubr.msk.f32.gmra.mxu1 %vm109_vm1, %v6279_v1  ;;  %4398 = vst.msk [vmem:[%s19663_s3 + $0x40] sm:$0xff] %vm877_vm4, %v4334_v20  ;;  %v4337_v38 = vadd.f32 %v11305_v19, %v4273_v26  ;;  %11550 = vmatprep.mubr.msk.f32.mxu0 %vm109_vm1, %v5458_v17  ;;  %5297 = vst.msk [vmem:[%s19663_s3 + $0x28] sm:$0xff] %vm877_vm4, %v5233_v63  ;;  %v5232_v52 = vadd.f32 %v5168_v44, %v15347_v15  ;;  %v5406_v1 = vld [vmem:[#allocation2 + $0x1c7] sm:$0xff]  ;;  %v5405_v60 = vld [vmem:[#allocation2 + $0x1bf] sm:$0xff] }
 0x1e6   :  { %11648 = vmatprep.mubr.msk.f32.mxu1 %vm109_vm1, %v6280_v56  ;;  %v3993_v18 = vpop.f32.mrf.mxu0  ;;  %v5171_v25 = vld [vmem:[%s19663_s3 + $0x38] sm:$0xff]  ;;  %v6287_v17 = vld [vmem:[#allocation2 + $0x1c0] sm:$0xff]  ;;  %v6288_v19 = vld [vmem:[#allocation2 + $0x1c8] sm:$0xff]  ;;  %v5466_v26 = vsel %vm25_vm2, %v5406_v1, 0.0 }
 0x1e7   :  { %v15467_v32 = vpop.f32.mrf.mxu1  ;;  %4401 = vst.msk [vmem:[%s19663_s3 + $0x58] sm:$0xff] %vm877_vm4, %v4337_v38  ;;  %v4336_v37 = vadd.f32 %v4272_v29, %v3993_v18  ;;  %5296 = vst.msk [vmem:[%s19663_s3 + $0x20] sm:$0xff] %vm877_vm4, %v5232_v52  ;;  %v5235_v47 = vadd.f32 %v15366_v33, %v5171_v25  ;;  %v4274_v33 = vld [vmem:[%s19663_s3 + $0x60] sm:$0xff]  ;;  %v4281_v18 = vld [vmem:[%s19663_s3 + $0x98] sm:$0xff] }
 0x1e8   :  { %v11308_v15 = vpop.f32.mrf.mxu0  ;;  %11551 = vmatmul.mubr.msk.f32.gmra.mxu0 %vm109_vm1, %v5399_v6  ;;  %v5170_v54 = vld [vmem:[%s19663_s3 + $0x30] sm:$0xff] }
 0x1e9   :  { %v15486_v61 = vpop.f32.mrf.mxu1  ;;  %11649 = vmatmul.mubr.msk.f32.gmra.mxu1 %vm109_vm1, %v6281_v3  ;;  %4400 = vst.msk [vmem:[%s19663_s3 + $0x50] sm:$0xff] %vm877_vm4, %v4336_v37  ;;  %v4339_v16 = vadd.f32 %v11308_v15, %v4275_v27  ;;  %11553 = vmatprep.mubr.msk.f32.mxu0 %vm109_vm1, %v5460_v57  ;;  %5299 = vst.msk [vmem:[%s19663_s3 + $0x38] sm:$0xff] %vm877_vm4, %v5235_v47  ;;  %v5234_v42 = vadd.f32 %v5170_v54, %v15387_v13  ;;  %v5408_v3 = vld [vmem:[#allocation2 + $0x1d7] sm:$0xff]  ;;  %v5407_v25 = vld [vmem:[#allocation2 + $0x1cf] sm:$0xff] }
 0x1ea   :  { %11651 = vmatprep.mubr.msk.f32.mxu1 %vm109_vm1, %v6282_v45  ;;  %v4003_v23 = vpop.f32.mrf.mxu0  ;;  %v5173_v43 = vld [vmem:[%s19663_s3 + $0x48] sm:$0xff]  ;;  %v6289_v57 = vld [vmem:[#allocation2 + $0x1d0] sm:$0xff]  ;;  %v6290_v15 = vld [vmem:[#allocation2 + $0x1d8] sm:$0xff]  ;;  %v5468_v27 = vsel %vm25_vm2, %v5408_v3, 0.0 }
 0x1eb   :  { %v15507_v58 = vpop.f32.mrf.mxu1  ;;  %4403 = vst.msk [vmem:[%s19663_s3 + $0x68] sm:$0xff] %vm877_vm4, %v4339_v16  ;;  %v4338_v24 = vadd.f32 %v4274_v33, %v4003_v23  ;;  %5298 = vst.msk [vmem:[%s19663_s3 + $0x30] sm:$0xff] %vm877_vm4, %v5234_v42  ;;  %v5237_v46 = vadd.f32 %v15406_v22, %v5173_v43  ;;  %v4276_v22 = vld [vmem:[%s19663_s3 + $0x70] sm:$0xff]  ;;  %v4283_v23 = vld [vmem:[%s19663_s3 + $0xa8] sm:$0xff] }
 0x1ec   :  { %v11311_v13 = vpop.f32.mrf.mxu0  ;;  %11554 = vmatmul.mubr.msk.f32.gmra.mxu0 %vm109_vm1, %v5401_v30  ;;  %v5172_v12 = vld [vmem:[%s19663_s3 + $0x40] sm:$0xff] }
 0x1ed   :  { %v15526_v36 = vpop.f32.mrf.mxu1  ;;  %11652 = vmatmul.mubr.msk.f32.gmra.mxu1 %vm109_vm1, %v6283_v40  ;;  %4402 = vst.msk [vmem:[%s19663_s3 + $0x60] sm:$0xff] %vm877_vm4, %v4338_v24  ;;  %v4341_v0 = vadd.f32 %v11311_v13, %v4277_v31  ;;  %11556 = vmatprep.mubr.msk.f32.mxu0 %vm109_vm1, %v5462_v55  ;;  %5301 = vst.msk [vmem:[%s19663_s3 + $0x48] sm:$0xff] %vm877_vm4, %v5237_v46  ;;  %v5236_v28 = vadd.f32 %v5172_v12, %v15427_v53  ;;  %v5410_v40 = vld [vmem:[#allocation2 + $0x1e7] sm:$0xff]  ;;  %v5409_v43 = vld [vmem:[#allocation2 + $0x1df] sm:$0xff] }
 0x1ee   :  { %11654 = vmatprep.mubr.msk.f32.mxu1 %vm109_vm1, %v6284_v41  ;;  %v4013_v50 = vpop.f32.mrf.mxu0  ;;  %v5175_v11 = vld [vmem:[%s19663_s3 + $0x58] sm:$0xff]  ;;  %v6291_v55 = vld [vmem:[#allocation2 + $0x1e0] sm:$0xff]  ;;  %v6292_v13 = vld [vmem:[#allocation2 + $0x1e8] sm:$0xff]  ;;  %v5470_v31 = vsel %vm25_vm2, %v5410_v40, 0.0 }
 0x1ef   :  { %v15547_v5 = vpop.f32.mrf.mxu1  ;;  %4405 = vst.msk [vmem:[%s19663_s3 + $0x78] sm:$0xff] %vm877_vm4, %v4341_v0  ;;  %v4340_v62 = vadd.f32 %v4276_v22, %v4013_v50  ;;  %5300 = vst.msk [vmem:[%s19663_s3 + $0x40] sm:$0xff] %vm877_vm4, %v5236_v28  ;;  %v5239_v59 = vadd.f32 %v15446_v2, %v5175_v11  ;;  %v4278_v2 = vld [vmem:[%s19663_s3 + $0x80] sm:$0xff]  ;;  %v4285_v50 = vld [vmem:[%s19663_s3 + $0xb8] sm:$0xff] }
 0x1f0   :  { %v11314_v53 = vpop.f32.mrf.mxu0  ;;  %11557 = vmatmul.mubr.msk.f32.gmra.mxu0 %vm109_vm1, %v5403_v21  ;;  %v5174_v9 = vld [vmem:[%s19663_s3 + $0x50] sm:$0xff] }
 0x1f1   :  { %v15566_v34 = vpop.f32.mrf.mxu1  ;;  %11655 = vmatmul.mubr.msk.f32.gmra.mxu1 %vm109_vm1, %v6285_v48  ;;  %4404 = vst.msk [vmem:[%s19663_s3 + $0x70] sm:$0xff] %vm877_vm4, %v4340_v62  ;;  %v4343_v56 = vadd.f32 %v11314_v53, %v4279_v39  ;;  %11559 = vmatprep.mubr.msk.f32.mxu0 %vm109_vm1, %v5464_v51  ;;  %5303 = vst.msk [vmem:[%s19663_s3 + $0x58] sm:$0xff] %vm877_vm4, %v5239_v59  ;;  %v5238_v20 = vadd.f32 %v5174_v9, %v15467_v32  ;;  %v5412_v48 = vld [vmem:[#allocation2 + $0x1f7] sm:$0xff]  ;;  %v5411_v11 = vld [vmem:[#allocation2 + $0x1ef] sm:$0xff] }
 0x1f2   :  { %11657 = vmatprep.mubr.msk.f32.mxu1 %vm109_vm1, %v6286_v7  ;;  %v4023_v63 = vpop.f32.mrf.mxu0  ;;  %v5177_v44 = vld [vmem:[%s19663_s3 + $0x68] sm:$0xff]  ;;  %v6293_v51 = vld [vmem:[#allocation2 + $0x1f0] sm:$0xff]  ;;  %v6294_v53 = vld [vmem:[#allocation2 + $0x1f8] sm:$0xff]  ;;  %v5472_v39 = vsel %vm25_vm2, %v5412_v48, 0.0 }
 0x1f3   :  { %v15587_v35 = vpop.f32.mrf.mxu1  ;;  %4407 = vst.msk [vmem:[%s19663_s3 + $0x88] sm:$0xff] %vm877_vm4, %v4343_v56  ;;  %v4342_v38 = vadd.f32 %v4278_v2, %v4023_v63  ;;  %5302 = vst.msk [vmem:[%s19663_s3 + $0x50] sm:$0xff] %vm877_vm4, %v5238_v20  ;;  %v5241_v6 = vadd.f32 %v15486_v61, %v5177_v44  ;;  %v4280_v61 = vld [vmem:[%s19663_s3 + $0x90] sm:$0xff]  ;;  %v4287_v63 = vld [vmem:[%s19663_s3 + $0xc8] sm:$0xff] }
 0x1f4   :  { %v11317_v32 = vpop.f32.mrf.mxu0  ;;  %11560 = vmatmul.mubr.msk.f32.gmra.mxu0 %vm109_vm1, %v5405_v60  ;;  %v5176_v29 = vld [vmem:[%s19663_s3 + $0x60] sm:$0xff]  ;;  %v4288_v40 = vld [vmem:[%s19663_s3 + $0xd0] sm:$0xff] }
 0x1f5   :  { %v15606_v52 = vpop.f32.mrf.mxu1  ;;  %11658 = vmatmul.mubr.msk.f32.gmra.mxu1 %vm109_vm1, %v6287_v17  ;;  %4406 = vst.msk [vmem:[%s19663_s3 + $0x80] sm:$0xff] %vm877_vm4, %v4342_v38  ;;  %v4345_v45 = vadd.f32 %v11317_v32, %v4281_v18  ;;  %11562 = vmatprep.mubr.msk.f32.mxu0 %vm109_vm1, %v5466_v26  ;;  %5305 = vst.msk [vmem:[%s19663_s3 + $0x68] sm:$0xff] %vm877_vm4, %v5241_v6  ;;  %v5240_v37 = vadd.f32 %v5176_v29, %v15507_v58  ;;  %v5414_v17 = vld [vmem:[#allocation2 + $0x207] sm:$0xff]  ;;  %v5413_v44 = vld [vmem:[#allocation2 + $0x1ff] sm:$0xff] }
 0x1f6   :  { %11660 = vmatprep.mubr.msk.f32.mxu1 %vm109_vm1, %v6288_v19  ;;  %v4033_v47 = vpop.f32.mrf.mxu0  ;;  %v5179_v54 = vld [vmem:[%s19663_s3 + $0x78] sm:$0xff]  ;;  %v6295_v26 = vld [vmem:[#allocation2 + $0x200] sm:$0xff]  ;;  %v6296_v32 = vld [vmem:[#allocation2 + $0x208] sm:$0xff]  ;;  %v5474_v18 = vsel %vm25_vm2, %v5414_v17, 0.0 }
 0x1f7   :  { %v15627_v49 = vpop.f32.mrf.mxu1  ;;  %4409 = vst.msk [vmem:[%s19663_s3 + $0x98] sm:$0xff] %vm877_vm4, %v4345_v45  ;;  %v4344_v16 = vadd.f32 %v4280_v61, %v4033_v47  ;;  %5304 = vst.msk [vmem:[%s19663_s3 + $0x60] sm:$0xff] %vm877_vm4, %v5240_v37  ;;  %v5243_v30 = vadd.f32 %v15526_v36, %v5179_v54  ;;  %v4282_v36 = vld [vmem:[%s19663_s3 + $0xa0] sm:$0xff]  ;;  %v4289_v37 = vld [vmem:[%s19663_s3 + $0xd8] sm:$0xff] }
 0x1f8   :  { %v11320_v58 = vpop.f32.mrf.mxu0  ;;  %11563 = vmatmul.mubr.msk.f32.gmra.mxu0 %vm109_vm1, %v5407_v25  ;;  %v5178_v33 = vld [vmem:[%s19663_s3 + $0x70] sm:$0xff] }
 0x1f9   :  { %v15646_v42 = vpop.f32.mrf.mxu1  ;;  %11661 = vmatmul.mubr.msk.f32.gmra.mxu1 %vm109_vm1, %v6289_v57  ;;  %4408 = vst.msk [vmem:[%s19663_s3 + $0x90] sm:$0xff] %vm877_vm4, %v4344_v16  ;;  %v4347_v41 = vadd.f32 %v11320_v58, %v4283_v23  ;;  %11565 = vmatprep.mubr.msk.f32.mxu0 %vm109_vm1, %v5468_v27  ;;  %5307 = vst.msk [vmem:[%s19663_s3 + $0x78] sm:$0xff] %vm877_vm4, %v5243_v30  ;;  %v5242_v24 = vadd.f32 %v5178_v33, %v15547_v5  ;;  %v6297_v61 = vld [vmem:[#allocation2 + $0x210] sm:$0xff] }
 0x1fa   :  { %11663 = vmatprep.mubr.msk.f32.mxu1 %vm109_vm1, %v6290_v15  ;;  %v4043_v46 = vpop.f32.mrf.mxu0  ;;  %v5181_v12 = vld [vmem:[%s19663_s3 + $0x88] sm:$0xff] }
 0x1fb   :  { %v15667_v8 = vpop.f32.mrf.mxu1  ;;  %4411 = vst.msk [vmem:[%s19663_s3 + $0xa8] sm:$0xff] %vm877_vm4, %v4347_v41  ;;  %v4346_v0 = vadd.f32 %v4282_v36, %v4043_v46  ;;  %5306 = vst.msk [vmem:[%s19663_s3 + $0x70] sm:$0xff] %vm877_vm4, %v5242_v24  ;;  %v5245_v21 = vadd.f32 %v15566_v34, %v5181_v12  ;;  %v4284_v34 = vld [vmem:[%s19663_s3 + $0xb0] sm:$0xff]  ;;  %v4291_v41 = vld [vmem:[%s19663_s3 + $0xe8] sm:$0xff] }
 0x1fc   :  { %v11323_v5 = vpop.f32.mrf.mxu0  ;;  %11566 = vmatmul.mubr.msk.f32.gmra.mxu0 %vm109_vm1, %v5409_v43  ;;  %v5180_v22 = vld [vmem:[%s19663_s3 + $0x80] sm:$0xff]  ;;  %v5415_v15 = vld [vmem:[#allocation2 + $0x20f] sm:$0xff] }
 0x1fd   :  { %v15686_v28 = vpop.f32.mrf.mxu1  ;;  %11664 = vmatmul.mubr.msk.f32.gmra.mxu1 %vm109_vm1, %v6291_v55  ;;  %4410 = vst.msk [vmem:[%s19663_s3 + $0xa0] sm:$0xff] %vm877_vm4, %v4346_v0  ;;  %v4349_v7 = vadd.f32 %v11323_v5, %v4285_v50  ;;  %11568 = vmatprep.mubr.msk.f32.mxu0 %vm109_vm1, %v5470_v31  ;;  %5309 = vst.msk [vmem:[%s19663_s3 + $0x88] sm:$0xff] %vm877_vm4, %v5245_v21  ;;  %v5244_v62 = vadd.f32 %v5180_v22, %v15587_v35  ;;  %v7120_v24 = vld [vmem:[#allocation2 + $0x29] sm:$0xff]  ;;  %v7121_v31 = vld [vmem:[#allocation2 + $0x31] sm:$0xff] }
 0x1fe   :  { %11666 = vmatprep.mubr.msk.f32.mxu1 %vm109_vm1, %v6292_v13  ;;  %v4053_v59 = vpop.f32.mrf.mxu0  ;;  %v5183_v9 = vld [vmem:[%s19663_s3 + $0x98] sm:$0xff]  ;;  %v4290_v13 = vld [vmem:[%s19663_s3 + $0xe0] sm:$0xff] }
 0x1ff   :  { %v15707_v1 = vpop.f32.mrf.mxu1  ;;  %4413 = vst.msk [vmem:[%s19663_s3 + $0xb8] sm:$0xff] %vm877_vm4, %v4349_v7  ;;  %v4348_v56 = vadd.f32 %v4284_v34, %v4053_v59  ;;  %5308 = vst.msk [vmem:[%s19663_s3 + $0x80] sm:$0xff] %vm877_vm4, %v5244_v62  ;;  %v5247_v60 = vadd.f32 %v15606_v52, %v5183_v9  ;;  %v4286_v52 = vld [vmem:[%s19663_s3 + $0xc0] sm:$0xff]  ;;  %v4293_v5 = vld [vmem:[%s19663_s3 + $0xf8] sm:$0xff] }
 0x200   :  { %v11326_v35 = vpop.f32.mrf.mxu0  ;;  %11569 = vmatmul.mubr.msk.f32.gmra.mxu0 %vm109_vm1, %v5411_v11  ;;  %v5182_v2 = vld [vmem:[%s19663_s3 + $0x90] sm:$0xff]  ;;  %v7122_v11 = vld [vmem:[#allocation2 + $0x39] sm:$0xff] }
 0x201   :  { %v15726_v20 = vpop.f32.mrf.mxu1  ;;  %11667 = vmatmul.mubr.msk.f32.gmra.mxu1 %vm109_vm1, %v6293_v51  ;;  %4412 = vst.msk [vmem:[%s19663_s3 + $0xb0] sm:$0xff] %vm877_vm4, %v4348_v56  ;;  %v4351_v19 = vadd.f32 %v11326_v35, %v4287_v63  ;;  %11571 = vmatprep.mubr.msk.f32.mxu0 %vm109_vm1, %v5472_v39  ;;  %5311 = vst.msk [vmem:[%s19663_s3 + $0x98] sm:$0xff] %vm877_vm4, %v5247_v60  ;;  %v5246_v38 = vadd.f32 %v5182_v2, %v15627_v49  ;;  %v19819_v7 = vld [vmem:[#allocation9_spill] sm:$0xff]  ;;  %v7181_v51 = vsel %vm42_vm3, %v7121_v31, 0.0  ;;  %v19820_v60 = vld [vmem:[#allocation10_spill] sm:$0xff] }
 0x202   :  { %11669 = vmatprep.mubr.msk.f32.mxu1 %vm109_vm1, %v6294_v53  ;;  %v4063_v6 = vpop.f32.mrf.mxu0  ;;  %v5185_v29 = vld [vmem:[%s19663_s3 + $0xa8] sm:$0xff]  ;;  %v4292_v34 = vld [vmem:[%s19663_s3 + $0xf0] sm:$0xff] }
 0x203   :  { %v15747_v3 = vpop.f32.mrf.mxu1  ;;  %4415 = vst.msk [vmem:[%s19663_s3 + $0xc8] sm:$0xff] %vm877_vm4, %v4351_v19  ;;  %v4350_v45 = vadd.f32 %v4286_v52, %v4063_v6  ;;  %5310 = vst.msk [vmem:[%s19663_s3 + $0x90] sm:$0xff] %vm877_vm4, %v5246_v38  ;;  %v5249_v57 = vadd.f32 %v15646_v42, %v5185_v29  ;;  %v7123_v53 = vld [vmem:[#allocation2 + $0x41] sm:$0xff]  ;;  %v7128_v31 = vld [vmem:[#allocation2 + $0x69] sm:$0xff] }
 0x204   :  { %v11329_v14 = vpop.f32.mrf.mxu0  ;;  %11572 = vmatmul.mubr.msk.f32.gmra.mxu0 %vm109_vm1, %v5413_v44  ;;  %v5184_v49 = vld [vmem:[%s19663_s3 + $0xa0] sm:$0xff]  ;;  %v4295_v35 = vld [vmem:[%s19663_s3 + $0x108] sm:$0xff] }
 0x205   :  { %v15766_v25 = vpop.f32.mrf.mxu1  ;;  %11670 = vmatmul.mubr.msk.f32.gmra.mxu1 %vm109_vm1, %v6295_v26  ;;  %4414 = vst.msk [vmem:[%s19663_s3 + $0xc0] sm:$0xff] %vm877_vm4, %v4350_v45  ;;  %v4353_v47 = vadd.f32 %v11329_v14, %v4289_v37  ;;  %11574 = vmatprep.mubr.msk.f32.mxu0 %vm109_vm1, %v5474_v18  ;;  %5313 = vst.msk [vmem:[%s19663_s3 + $0xa8] sm:$0xff] %vm877_vm4, %v5249_v57  ;;  %v5248_v27 = vadd.f32 %v5184_v49, %v15667_v8  ;;  %v19821_v19 = vld [vmem:[#allocation11_spill] sm:$0xff]  ;;  %v7183_v26 = vsel %vm42_vm3, %v7123_v53, 0.0  ;;  %v4297_v37 = vld [vmem:[%s19663_s3 + $0x118] sm:$0xff] }
 0x206   :  { %11672 = vmatprep.mubr.msk.f32.mxu1 %vm109_vm1, %v6296_v32  ;;  %v4073_v16 = vpop.f32.mrf.mxu0  ;;  %v5187_v30 = vld [vmem:[%s19663_s3 + $0xb8] sm:$0xff]  ;;  %v7124_v44 = vld [vmem:[#allocation2 + $0x49] sm:$0xff]  ;;  %v4294_v52 = vld [vmem:[%s19663_s3 + $0x100] sm:$0xff] }
 0x207   :  { %v15787_v54 = vpop.f32.mrf.mxu1  ;;  %4417 = vst.msk [vmem:[%s19663_s3 + $0xd8] sm:$0xff] %vm877_vm4, %v4353_v47  ;;  %v4352_v42 = vadd.f32 %v4288_v40, %v4073_v16  ;;  %5312 = vst.msk [vmem:[%s19663_s3 + $0xa0] sm:$0xff] %vm877_vm4, %v5248_v27  ;;  %v5251_v58 = vadd.f32 %v15686_v28, %v5187_v30  ;;  %v7125_v32 = vld [vmem:[#allocation2 + $0x51] sm:$0xff]  ;;  %v7126_v27 = vld [vmem:[#allocation2 + $0x59] sm:$0xff] }
 0x208   :  { %v11332_v33 = vpop.f32.mrf.mxu0  ;;  %11575 = vmatmul.mubr.msk.f32.gmra.mxu0 %vm109_vm1, %v5415_v15  ;;  %v5186_v55 = vld [vmem:[%s19663_s3 + $0xb0] sm:$0xff]  ;;  %v7185_v15 = vsel %vm42_vm3, %v7125_v32, 0.0 }
 0x209   :  { %v15804_v23 = vpop.f32.mrf.mxu1  ;;  %11673 = vmatmul.mubr.msk.f32.gmra.mxu1 %vm109_vm1, %v6297_v61  ;;  %4416 = vst.msk [vmem:[%s19663_s3 + $0xd0] sm:$0xff] %vm877_vm4, %v4352_v42  ;;  %v4355_v43 = vadd.f32 %v11332_v33, %v4291_v41  ;;  %11577 = vmatprep.mubr.f32.mxu0 %v19801_v4  ;;  %5315 = vst.msk [vmem:[%s19663_s3 + $0xb8] sm:$0xff] %vm877_vm4, %v5251_v58  ;;  %v5250_v8 = vadd.f32 %v5186_v55, %v15707_v1  ;;  %v19823_v61 = vld [vmem:[#allocation13_spill] sm:$0xff]  ;;  %v7127_v42 = vld [vmem:[#allocation2 + $0x61] sm:$0xff] }
 0x20a   :  { %11675 = vmatprep.mubr.f32.mxu1 %v19801_v4  ;;  %v4083_v36 = vpop.f32.mrf.mxu0  ;;  %v5189_v12 = vld [vmem:[%s19663_s3 + $0xc8] sm:$0xff]  ;;  %v4296_v30 = vld [vmem:[%s19663_s3 + $0x110] sm:$0xff]  ;;  %v19824_v55 = vld [vmem:[#allocation14_spill] sm:$0xff] }
 0x20b   :  { %v15825_v46 = vpop.f32.mrf.mxu1  ;;  %4419 = vst.msk [vmem:[%s19663_s3 + $0xe8] sm:$0xff] %vm877_vm4, %v4355_v43  ;;  %v4354_v0 = vadd.f32 %v4290_v13, %v4083_v36  ;;  %5314 = vst.msk [vmem:[%s19663_s3 + $0xb0] sm:$0xff] %vm877_vm4, %v5250_v8  ;;  %v5253_v48 = vadd.f32 %v15726_v20, %v5189_v12  ;;  %v19825_v36 = vld [vmem:[#allocation15_spill] sm:$0xff]  ;;  %v7187_v13 = vsel %vm42_vm3, %v7127_v42, 0.0 }
 0x20c   :  { %v11335_v28 = vpop.f32.mrf.mxu0  ;;  %11578 = vmatmul.mubr.f32.gmra.mxu0 %v19801_v4  ;;  %v5188_v50 = vld [vmem:[%s19663_s3 + $0xc0] sm:$0xff] }
 0x20d   :  { %v15842_v21 = vpop.f32.mrf.mxu1  ;;  %11676 = vmatmul.mubr.f32.gmra.mxu1 %v19801_v4  ;;  %4418 = vst.msk [vmem:[%s19663_s3 + $0xe0] sm:$0xff] %vm877_vm4, %v4354_v0  ;;  %v4357_v22 = vadd.f32 %v11335_v28, %v4293_v5  ;;  %11680 = vmatprep.mubr.msk.f32.mxu0 %vm109_vm1, %v7120_v24  ;;  %5317 = vst.msk [vmem:[%s19663_s3 + $0xc8] sm:$0xff] %vm877_vm4, %v5253_v48  ;;  %v5252_v62 = vadd.f32 %v5188_v50, %v15747_v3  ;;  %v4299_v24 = vld [vmem:[%s19663_s3 + $0x128] sm:$0xff]  ;;  %v7129_v28 = vld [vmem:[#allocation2 + $0x71] sm:$0xff] }
 0x20e   :  { %11778 = vmatprep.mubr.msk.f32.mxu1 %vm109_vm1, %v19819_v7  ;;  %v4093_v59 = vpop.f32.mrf.mxu0  ;;  %v5191_v39 = vld [vmem:[%s19663_s3 + $0xd8] sm:$0xff]  ;;  %v7189_v53 = vsel %vm42_vm3, %v7129_v28, 0.0 }
 0x20f   :  { %v15866_v1 = vpop.f32.mrf.mxu1  ;;  %4421 = vst.msk [vmem:[%s19663_s3 + $0xf8] sm:$0xff] %vm877_vm4, %v4357_v22  ;;  %v4356_v9 = vadd.f32 %v4292_v34, %v4093_v59  ;;  %5316 = vst.msk [vmem:[%s19663_s3 + $0xc0] sm:$0xff] %vm877_vm4, %v5252_v62  ;;  %v5255_v56 = vadd.f32 %v15766_v25, %v5191_v39  ;;  %v19822_v25 = vld [vmem:[#allocation12_spill] sm:$0xff]  ;;  %v4301_v62 = vld [vmem:[%s19663_s3 + $0x138] sm:$0xff] }
 0x210   :  { %v11338_v20 = vpop.f32.mrf.mxu0  ;;  %11681 = vmatmul.mubr.msk.f32.vlgmr.msra.gmra.mxu0 %vm109_vm1, %v7181_v51  ;;  %v5190_v63 = vld [vmem:[%s19663_s3 + $0xd0] sm:$0xff]  ;;  %v7130_v39 = vld [vmem:[#allocation2 + $0x79] sm:$0xff] }
 0x211   :  { %v15883_v17 = vpop.f32.mrf.mxu1  ;;  %11779 = vmatmul.mubr.msk.f32.vlgmr.msra.gmra.mxu1 %vm109_vm1, %v19820_v60  ;;  %4420 = vst.msk [vmem:[%s19663_s3 + $0xf0] sm:$0xff] %vm877_vm4, %v4356_v9  ;;  %v4359_v2 = vadd.f32 %v11338_v20, %v4295_v35  ;;  %11683 = vmatprep.mubr.msk.f32.mxu0 %vm109_vm1, %v7122_v11  ;;  %5319 = vst.msk [vmem:[%s19663_s3 + $0xd8] sm:$0xff] %vm877_vm4, %v5255_v56  ;;  %v5254_v38 = vadd.f32 %v5190_v63, %v15787_v54  ;;  %v19826_v51 = vld [vmem:[#allocation16_spill] sm:$0xff]  ;;  %v19827_v34 = vld [vmem:[#allocation17_spill] sm:$0xff] }
 0x212   :  { %11781 = vmatprep.mubr.msk.f32.mxu1 %vm109_vm1, %v19821_v19  ;;  %v4103_v6 = vpop.f32.mrf.mxu0  ;;  %v5193_v18 = vld [vmem:[%s19663_s3 + $0xe8] sm:$0xff]  ;;  %v4300_v60 = vld [vmem:[%s19663_s3 + $0x130] sm:$0xff] }
 0x213   :  { %v15908_v3 = vpop.f32.mrf.mxu1  ;;  %4423 = vst.msk [vmem:[%s19663_s3 + $0x108] sm:$0xff] %vm877_vm4, %v4359_v2  ;;  %v4358_v29 = vadd.f32 %v4294_v52, %v4103_v6  ;;  %5318 = vst.msk [vmem:[%s19663_s3 + $0xd0] sm:$0xff] %vm877_vm4, %v5254_v38  ;;  %v5257_v45 = vadd.f32 %v15804_v23, %v5193_v18  ;;  %v7131_v20 = vld [vmem:[#allocation2 + $0x81] sm:$0xff]  ;;  %v7132_v18 = vld [vmem:[#allocation2 + $0x89] sm:$0xff] }
 0x214   :  { %v11341_v14 = vpop.f32.mrf.mxu0  ;;  %11684 = vmatmul.mubr.msk.f32.gmra.mxu0 %vm109_vm1, %v7183_v26  ;;  %v5192_v49 = vld [vmem:[%s19663_s3 + $0xe0] sm:$0xff]  ;;  %v4303_v38 = vld [vmem:[%s19663_s3 + $0x148] sm:$0xff]  ;;  %v7191_v32 = vsel %vm42_vm3, %v7131_v20, 0.0 }
 0x215   :  { %v15925_v57 = vpop.f32.mrf.mxu1  ;;  %11782 = vmatmul.mubr.msk.f32.gmra.mxu1 %vm109_vm1, %v19822_v25  ;;  %4422 = vst.msk [vmem:[%s19663_s3 + $0x100] sm:$0xff] %vm877_vm4, %v4358_v29  ;;  %v4361_v47 = vadd.f32 %v11341_v14, %v4297_v37  ;;  %11686 = vmatprep.mubr.msk.f32.mxu0 %vm109_vm1, %v7124_v44  ;;  %5321 = vst.msk [vmem:[%s19663_s3 + $0xe8] sm:$0xff] %vm877_vm4, %v5257_v45  ;;  %v5256_v54 = vadd.f32 %v5192_v49, %v15825_v46  ;;  %v19828_v26 = vld [vmem:[#allocation18_spill] sm:$0xff]  ;;  %v19829_v52 = vld [vmem:[#allocation19_spill] sm:$0xff] }
 0x216   :  { %11784 = vmatprep.mubr.msk.f32.mxu1 %vm109_vm1, %v19823_v61  ;;  %v4113_v40 = vpop.f32.mrf.mxu0  ;;  %v5195_v58 = vld [vmem:[%s19663_s3 + $0xf8] sm:$0xff]  ;;  %v4302_v25 = vld [vmem:[%s19663_s3 + $0x140] sm:$0xff] }
 0x217   :  { %v15950_v16 = vpop.f32.mrf.mxu1  ;;  %4425 = vst.msk [vmem:[%s19663_s3 + $0x118] sm:$0xff] %vm877_vm4, %v4361_v47  ;;  %v4360_v23 = vadd.f32 %v4296_v30, %v4113_v40  ;;  %5320 = vst.msk [vmem:[%s19663_s3 + $0xe0] sm:$0xff] %vm877_vm4, %v5256_v54  ;;  %v5259_v33 = vadd.f32 %v15842_v21, %v5195_v58  ;;  %v4298_v21 = vld [vmem:[%s19663_s3 + $0x120] sm:$0xff]  ;;  %v7133_v14 = vld [vmem:[#allocation2 + $0x91] sm:$0xff] }
 0x218   :  { %v11344_v43 = vpop.f32.mrf.mxu0  ;;  %11687 = vmatmul.mubr.msk.f32.gmra.mxu0 %vm109_vm1, %v7185_v15  ;;  %v5194_v8 = vld [vmem:[%s19663_s3 + $0xf0] sm:$0xff]  ;;  %v4305_v54 = vld [vmem:[%s19663_s3 + $0x158] sm:$0xff]  ;;  %v7193_v42 = vsel %vm42_vm3, %v7133_v14, 0.0 }
 0x219   :  { %v15967_v41 = vpop.f32.mrf.mxu1  ;;  %11785 = vmatmul.mubr.msk.f32.gmra.mxu1 %vm109_vm1, %v19824_v55  ;;  %4424 = vst.msk [vmem:[%s19663_s3 + $0x110] sm:$0xff] %vm877_vm4, %v4360_v23  ;;  %v4363_v46 = vadd.f32 %v11344_v43, %v4299_v24  ;;  %11689 = vmatprep.mubr.msk.f32.mxu0 %vm109_vm1, %v7126_v27  ;;  %5323 = vst.msk [vmem:[%s19663_s3 + $0xf8] sm:$0xff] %vm877_vm4, %v5259_v33  ;;  %v5258_v12 = vadd.f32 %v5194_v8, %v15866_v1  ;;  %v19830_v15 = vld [vmem:[#allocation20_spill] sm:$0xff]  ;;  %v19831_v30 = vld [vmem:[#allocation21_spill] sm:$0xff] }
 0x21a   :  { %11787 = vmatprep.mubr.msk.f32.mxu1 %vm109_vm1, %v19825_v36  ;;  %v4123_v48 = vpop.f32.mrf.mxu0  ;;  %v5197_v5 = vld [vmem:[%s19663_s3 + $0x108] sm:$0xff]  ;;  %v7134_v58 = vld [vmem:[#allocation2 + $0x99] sm:$0xff]  ;;  %v4304_v55 = vld [vmem:[%s19663_s3 + $0x150] sm:$0xff] }
 0x21b   :  { %v15992_v0 = vpop.f32.mrf.mxu1  ;;  %4427 = vst.msk [vmem:[%s19663_s3 + $0x128] sm:$0xff] %vm877_vm4, %v4363_v46  ;;  %v4362_v50 = vadd.f32 %v4298_v21, %v4123_v48  ;;  %5322 = vst.msk [vmem:[%s19663_s3 + $0xf0] sm:$0xff] %vm877_vm4, %v5258_v12  ;;  %v5261_v22 = vadd.f32 %v15883_v17, %v5197_v5  ;;  %v7135_v43 = vld [vmem:[#allocation2 + $0xa1] sm:$0xff]  ;;  %v7136_v5 = vld [vmem:[#allocation2 + $0xa9] sm:$0xff] }
 0x21c   :  { %v11347_v11 = vpop.f32.mrf.mxu0  ;;  %11690 = vmatmul.mubr.msk.f32.gmra.mxu0 %vm109_vm1, %v7187_v13  ;;  %v5196_v1 = vld [vmem:[%s19663_s3 + $0x100] sm:$0xff]  ;;  %v4307_v12 = vld [vmem:[%s19663_s3 + $0x168] sm:$0xff]  ;;  %v7195_v28 = vsel %vm42_vm3, %v7135_v43, 0.0 }
 0x21d   :  { %v16009_v7 = vpop.f32.mrf.mxu1  ;;  %11788 = vmatmul.mubr.msk.f32.gmra.mxu1 %vm109_vm1, %v19826_v51  ;;  %4426 = vst.msk [vmem:[%s19663_s3 + $0x120] sm:$0xff] %vm877_vm4, %v4362_v50  ;;  %v4365_v59 = vadd.f32 %v11347_v11, %v4301_v62  ;;  %11692 = vmatprep.mubr.msk.f32.mxu0 %vm109_vm1, %v7128_v31  ;;  %5325 = vst.msk [vmem:[%s19663_s3 + $0x108] sm:$0xff] %vm877_vm4, %v5261_v22  ;;  %v5260_v9 = vadd.f32 %v5196_v1, %v15908_v3  ;;  %v19832_v13 = vld [vmem:[#allocation22_spill] sm:$0xff]  ;;  %v19833_v21 = vld [vmem:[#allocation23_spill] sm:$0xff] }
 0x21e   :  { %11790 = vmatprep.mubr.msk.f32.mxu1 %vm109_vm1, %v19827_v34  ;;  %v4133_v17 = vpop.f32.mrf.mxu0  ;;  %v5199_v35 = vld [vmem:[%s19663_s3 + $0x118] sm:$0xff]  ;;  %v4306_v51 = vld [vmem:[%s19663_s3 + $0x160] sm:$0xff] }
 0x21f   :  { %v16034_v56 = vpop.f32.mrf.mxu1  ;;  %4429 = vst.msk [vmem:[%s19663_s3 + $0x138] sm:$0xff] %vm877_vm4, %v4365_v59  ;;  %v4364_v63 = vadd.f32 %v4300_v60, %v4133_v17  ;;  %5324 = vst.msk [vmem:[%s19663_s3 + $0x100] sm:$0xff] %vm877_vm4, %v5260_v9  ;;  %v5263_v2 = vadd.f32 %v15925_v57, %v5199_v35  ;;  %v7137_v11 = vld [vmem:[#allocation2 + $0xb1] sm:$0xff]  ;;  %v7138_v35 = vld [vmem:[#allocation2 + $0xb9] sm:$0xff] }
 0x220   :  { %v11350_v44 = vpop.f32.mrf.mxu0  ;;  %11693 = vmatmul.mubr.msk.f32.gmra.mxu0 %vm109_vm1, %v7189_v53  ;;  %v5198_v3 = vld [vmem:[%s19663_s3 + $0x110] sm:$0xff]  ;;  %v4309_v9 = vld [vmem:[%s19663_s3 + $0x178] sm:$0xff]  ;;  %v7197_v20 = vsel %vm42_vm3, %v7137_v11, 0.0 }
 0x221   :  { %v16051_v19 = vpop.f32.mrf.mxu1  ;;  %11791 = vmatmul.mubr.msk.f32.gmra.mxu1 %vm109_vm1, %v19828_v26  ;;  %4428 = vst.msk [vmem:[%s19663_s3 + $0x130] sm:$0xff] %vm877_vm4, %v4364_v63  ;;  %v4367_v6 = vadd.f32 %v11350_v44, %v4303_v38  ;;  %11695 = vmatprep.mubr.msk.f32.mxu0 %vm109_vm1, %v7130_v39  ;;  %5327 = vst.msk [vmem:[%s19663_s3 + $0x118] sm:$0xff] %vm877_vm4, %v5263_v2  ;;  %v5262_v29 = vadd.f32 %v5198_v3, %v15950_v16  ;;  %v19834_v53 = vld [vmem:[#allocation24_spill] sm:$0xff]  ;;  %v19835_v60 = vld [vmem:[#allocation25_spill] sm:$0xff] }
 0x222   :  { %11793 = vmatprep.mubr.msk.f32.mxu1 %vm109_vm1, %v19829_v52  ;;  %v4143_v57 = vpop.f32.mrf.mxu0  ;;  %v5201_v37 = vld [vmem:[%s19663_s3 + $0x128] sm:$0xff]  ;;  %v4308_v26 = vld [vmem:[%s19663_s3 + $0x170] sm:$0xff] }
 0x223   :  { %v16076_v45 = vpop.f32.mrf.mxu1  ;;  %4431 = vst.msk [vmem:[%s19663_s3 + $0x148] sm:$0xff] %vm877_vm4, %v4367_v6  ;;  %v4366_v49 = vadd.f32 %v4302_v25, %v4143_v57  ;;  %5326 = vst.msk [vmem:[%s19663_s3 + $0x110] sm:$0xff] %vm877_vm4, %v5262_v29  ;;  %v5265_v47 = vadd.f32 %v15967_v41, %v5201_v37  ;;  %v7139_v44 = vld [vmem:[#allocation2 + $0xc1] sm:$0xff]  ;;  %v7140_v37 = vld [vmem:[#allocation2 + $0xc9] sm:$0xff] }
 0x224   :  { %v11353_v27 = vpop.f32.mrf.mxu0  ;;  %11696 = vmatmul.mubr.msk.f32.gmra.mxu0 %vm109_vm1, %v7191_v32  ;;  %v5200_v16 = vld [vmem:[%s19663_s3 + $0x120] sm:$0xff]  ;;  %v4311_v29 = vld [vmem:[%s19663_s3 + $0x188] sm:$0xff]  ;;  %v7199_v14 = vsel %vm42_vm3, %v7139_v44, 0.0 }
 0x225   :  { %v16093_v61 = vpop.f32.mrf.mxu1  ;;  %11794 = vmatmul.mubr.msk.f32.gmra.mxu1 %vm109_vm1, %v19830_v15  ;;  %4430 = vst.msk [vmem:[%s19663_s3 + $0x140] sm:$0xff] %vm877_vm4, %v4366_v49  ;;  %v4369_v40 = vadd.f32 %v11353_v27, %v4305_v54  ;;  %11698 = vmatprep.mubr.msk.f32.mxu0 %vm109_vm1, %v7132_v18  ;;  %5329 = vst.msk [vmem:[%s19663_s3 + $0x128] sm:$0xff] %vm877_vm4, %v5265_v47  ;;  %v5264_v23 = vadd.f32 %v5200_v16, %v15992_v0  ;;  %v19836_v32 = vld [vmem:[#allocation26_spill] sm:$0xff]  ;;  %v19837_v25 = vld [vmem:[#allocation27_spill] sm:$0xff] }
 0x226   :  { %11796 = vmatprep.mubr.msk.f32.mxu1 %vm109_vm1, %v19831_v30  ;;  %v4153_v41 = vpop.f32.mrf.mxu0  ;;  %v5203_v24 = vld [vmem:[%s19663_s3 + $0x138] sm:$0xff]  ;;  %v4310_v15 = vld [vmem:[%s19663_s3 + $0x180] sm:$0xff] }
 0x227   :  { %v16118_v33 = vpop.f32.mrf.mxu1  ;;  %4433 = vst.msk [vmem:[%s19663_s3 + $0x158] sm:$0xff] %vm877_vm4, %v4369_v40  ;;  %v4368_v8 = vadd.f32 %v4304_v55, %v4153_v41  ;;  %5328 = vst.msk [vmem:[%s19663_s3 + $0x120] sm:$0xff] %vm877_vm4, %v5264_v23  ;;  %v5267_v46 = vadd.f32 %v16009_v7, %v5203_v24  ;;  %v7141_v27 = vld [vmem:[#allocation2 + $0xd1] sm:$0xff]  ;;  %v7142_v24 = vld [vmem:[#allocation2 + $0xd9] sm:$0xff] }
 0x228   :  { %v11356_v31 = vpop.f32.mrf.mxu0  ;;  %11699 = vmatmul.mubr.msk.f32.gmra.mxu0 %vm109_vm1, %v7193_v42  ;;  %v5202_v0 = vld [vmem:[%s19663_s3 + $0x130] sm:$0xff]  ;;  %v4313_v23 = vld [vmem:[%s19663_s3 + $0x198] sm:$0xff]  ;;  %v7201_v43 = vsel %vm42_vm3, %v7141_v27, 0.0 }
 0x229   :  { %v16135_v36 = vpop.f32.mrf.mxu1  ;;  %11797 = vmatmul.mubr.msk.f32.gmra.mxu1 %vm109_vm1, %v19832_v13  ;;  %4432 = vst.msk [vmem:[%s19663_s3 + $0x150] sm:$0xff] %vm877_vm4, %v4368_v8  ;;  %v4371_v48 = vadd.f32 %v11356_v31, %v4307_v12  ;;  %11701 = vmatprep.mubr.msk.f32.mxu0 %vm109_vm1, %v7134_v58  ;;  %5331 = vst.msk [vmem:[%s19663_s3 + $0x138] sm:$0xff] %vm877_vm4, %v5267_v46  ;;  %v5266_v50 = vadd.f32 %v5202_v0, %v16034_v56  ;;  %v19838_v42 = vld [vmem:[#allocation28_spill] sm:$0xff]  ;;  %v19839_v55 = vld [vmem:[#allocation29_spill] sm:$0xff] }
 0x22a   :  { %11799 = vmatprep.mubr.msk.f32.mxu1 %vm109_vm1, %v19833_v21  ;;  %v4163_v7 = vpop.f32.mrf.mxu0  ;;  %v5205_v62 = vld [vmem:[%s19663_s3 + $0x148] sm:$0xff]  ;;  %v4312_v13 = vld [vmem:[%s19663_s3 + $0x190] sm:$0xff] }
 0x22b   :  { %v16160_v22 = vpop.f32.mrf.mxu1  ;;  %4435 = vst.msk [vmem:[%s19663_s3 + $0x168] sm:$0xff] %vm877_vm4, %v4371_v48  ;;  %v4370_v1 = vadd.f32 %v4306_v51, %v4163_v7  ;;  %5330 = vst.msk [vmem:[%s19663_s3 + $0x130] sm:$0xff] %vm877_vm4, %v5266_v50  ;;  %v5269_v59 = vadd.f32 %v16051_v19, %v5205_v62  ;;  %v7143_v31 = vld [vmem:[#allocation2 + $0xe1] sm:$0xff]  ;;  %v7144_v62 = vld [vmem:[#allocation2 + $0xe9] sm:$0xff] }
 0x22c   :  { %v11359_v39 = vpop.f32.mrf.mxu0  ;;  %11702 = vmatmul.mubr.msk.f32.gmra.mxu0 %vm109_vm1, %v7195_v28  ;;  %v5204_v56 = vld [vmem:[%s19663_s3 + $0x140] sm:$0xff]  ;;  %v4315_v50 = vld [vmem:[%s19663_s3 + $0x1a8] sm:$0xff]  ;;  %v7203_v11 = vsel %vm42_vm3, %v7143_v31, 0.0 }
 0x22d   :  { %v16177_v34 = vpop.f32.mrf.mxu1  ;;  %11800 = vmatmul.mubr.msk.f32.gmra.mxu1 %vm109_vm1, %v19834_v53  ;;  %4434 = vst.msk [vmem:[%s19663_s3 + $0x160] sm:$0xff] %vm877_vm4, %v4370_v1  ;;  %v4373_v17 = vadd.f32 %v11359_v39, %v4309_v9  ;;  %11704 = vmatprep.mubr.msk.f32.mxu0 %vm109_vm1, %v7136_v5  ;;  %5333 = vst.msk [vmem:[%s19663_s3 + $0x148] sm:$0xff] %vm877_vm4, %v5269_v59  ;;  %v5268_v63 = vadd.f32 %v5204_v56, %v16076_v45  ;;  %v19840_v28 = vld [vmem:[#allocation30_spill] sm:$0xff]  ;;  %v19841_v51 = vld [vmem:[#allocation31_spill] sm:$0xff] }
 0x22e   :  { %11802 = vmatprep.mubr.msk.f32.mxu1 %vm109_vm1, %v19835_v60  ;;  %v4173_v19 = vpop.f32.mrf.mxu0  ;;  %v5207_v38 = vld [vmem:[%s19663_s3 + $0x158] sm:$0xff]  ;;  %v4314_v53 = vld [vmem:[%s19663_s3 + $0x1a0] sm:$0xff] }
 0x22f   :  { %v16202_v2 = vpop.f32.mrf.mxu1  ;;  %4437 = vst.msk [vmem:[%s19663_s3 + $0x178] sm:$0xff] %vm877_vm4, %v4373_v17  ;;  %v4372_v3 = vadd.f32 %v4308_v26, %v4173_v19  ;;  %5332 = vst.msk [vmem:[%s19663_s3 + $0x140] sm:$0xff] %vm877_vm4, %v5268_v63  ;;  %v5271_v6 = vadd.f32 %v16093_v61, %v5207_v38  ;;  %v7145_v39 = vld [vmem:[#allocation2 + $0xf1] sm:$0xff]  ;;  %v7146_v38 = vld [vmem:[#allocation2 + $0xf9] sm:$0xff] }
 0x230   :  { %v11362_v18 = vpop.f32.mrf.mxu0  ;;  %11705 = vmatmul.mubr.msk.f32.gmra.mxu0 %vm109_vm1, %v7197_v20  ;;  %v5206_v45 = vld [vmem:[%s19663_s3 + $0x150] sm:$0xff]  ;;  %v4317_v63 = vld [vmem:[%s19663_s3 + $0x1b8] sm:$0xff]  ;;  %v7205_v44 = vsel %vm42_vm3, %v7145_v39, 0.0 }
 0x231   :  { %v16219_v52 = vpop.f32.mrf.mxu1  ;;  %11803 = vmatmul.mubr.msk.f32.gmra.mxu1 %vm109_vm1, %v19836_v32  ;;  %4436 = vst.msk [vmem:[%s19663_s3 + $0x170] sm:$0xff] %vm877_vm4, %v4372_v3  ;;  %v4375_v57 = vadd.f32 %v11362_v18, %v4311_v29  ;;  %11707 = vmatprep.mubr.msk.f32.mxu0 %vm109_vm1, %v7138_v35  ;;  %5335 = vst.msk [vmem:[%s19663_s3 + $0x158] sm:$0xff] %vm877_vm4, %v5271_v6  ;;  %v5270_v49 = vadd.f32 %v5206_v45, %v16118_v33  ;;  %v19842_v20 = vld [vmem:[#allocation32_spill] sm:$0xff]  ;;  %v19843_v26 = vld [vmem:[#allocation33_spill] sm:$0xff] }
 0x232   :  { %11805 = vmatprep.mubr.msk.f32.mxu1 %vm109_vm1, %v19837_v25  ;;  %v4183_v61 = vpop.f32.mrf.mxu0  ;;  %v5209_v54 = vld [vmem:[%s19663_s3 + $0x168] sm:$0xff]  ;;  %v4316_v32 = vld [vmem:[%s19663_s3 + $0x1b0] sm:$0xff] }
 0x233   :  { %v16244_v47 = vpop.f32.mrf.mxu1  ;;  %4439 = vst.msk [vmem:[%s19663_s3 + $0x188] sm:$0xff] %vm877_vm4, %v4375_v57  ;;  %v4374_v16 = vadd.f32 %v4310_v15, %v4183_v61  ;;  %5334 = vst.msk [vmem:[%s19663_s3 + $0x150] sm:$0xff] %vm877_vm4, %v5270_v49  ;;  %v5273_v40 = vadd.f32 %v16135_v36, %v5209_v54  ;;  %v7147_v18 = vld [vmem:[#allocation2 + $0x101] sm:$0xff]  ;;  %v7148_v54 = vld [vmem:[#allocation2 + $0x109] sm:$0xff] }
 0x234   :  { %v11365_v58 = vpop.f32.mrf.mxu0  ;;  %11708 = vmatmul.mubr.msk.f32.gmra.mxu0 %vm109_vm1, %v7199_v14  ;;  %v5208_v33 = vld [vmem:[%s19663_s3 + $0x160] sm:$0xff]  ;;  %v4319_v49 = vld [vmem:[%s19663_s3 + $0x1c8] sm:$0xff]  ;;  %v7207_v27 = vsel %vm42_vm3, %v7147_v18, 0.0 }
 0x235   :  { %v16261_v30 = vpop.f32.mrf.mxu1  ;;  %11806 = vmatmul.mubr.msk.f32.gmra.mxu1 %vm109_vm1, %v19838_v42  ;;  %4438 = vst.msk [vmem:[%s19663_s3 + $0x180] sm:$0xff] %vm877_vm4, %v4374_v16  ;;  %v4377_v41 = vadd.f32 %v11365_v58, %v4313_v23  ;;  %11710 = vmatprep.mubr.msk.f32.mxu0 %vm109_vm1, %v7140_v37  ;;  %5337 = vst.msk [vmem:[%s19663_s3 + $0x168] sm:$0xff] %vm877_vm4, %v5273_v40  ;;  %v5272_v8 = vadd.f32 %v5208_v33, %v16160_v22  ;;  %v19844_v14 = vld [vmem:[#allocation34_spill] sm:$0xff]  ;;  %v19845_v15 = vld [vmem:[#allocation35_spill] sm:$0xff] }
 0x236   :  { %11808 = vmatprep.mubr.msk.f32.mxu1 %vm109_vm1, %v19839_v55  ;;  %v4193_v36 = vpop.f32.mrf.mxu0  ;;  %v5211_v12 = vld [vmem:[%s19663_s3 + $0x178] sm:$0xff]  ;;  %v4318_v42 = vld [vmem:[%s19663_s3 + $0x1c0] sm:$0xff] }
 0x237   :  { %v16286_v46 = vpop.f32.mrf.mxu1  ;;  %4441 = vst.msk [vmem:[%s19663_s3 + $0x198] sm:$0xff] %vm877_vm4, %v4377_v41  ;;  %v4376_v0 = vadd.f32 %v4312_v13, %v4193_v36  ;;  %5336 = vst.msk [vmem:[%s19663_s3 + $0x160] sm:$0xff] %vm877_vm4, %v5272_v8  ;;  %v5275_v48 = vadd.f32 %v16177_v34, %v5211_v12  ;;  %v7149_v58 = vld [vmem:[#allocation2 + $0x111] sm:$0xff] }
 0x238   :  { %v11368_v5 = vpop.f32.mrf.mxu0  ;;  %11711 = vmatmul.mubr.msk.f32.gmra.mxu0 %vm109_vm1, %v7201_v43  ;;  %v5210_v22 = vld [vmem:[%s19663_s3 + $0x170] sm:$0xff]  ;;  %v4321_v8 = vld [vmem:[%s19663_s3 + $0x1d8] sm:$0xff]  ;;  %v7209_v31 = vsel %vm42_vm3, %v7149_v58, 0.0 }
 0x239   :  { %v16303_v21 = vpop.f32.mrf.mxu1  ;;  %11809 = vmatmul.mubr.msk.f32.gmra.mxu1 %vm109_vm1, %v19840_v28  ;;  %4440 = vst.msk [vmem:[%s19663_s3 + $0x190] sm:$0xff] %vm877_vm4, %v4376_v0  ;;  %v4379_v7 = vadd.f32 %v11368_v5, %v4315_v50  ;;  %11713 = vmatprep.mubr.msk.f32.mxu0 %vm109_vm1, %v7142_v24  ;;  %5339 = vst.msk [vmem:[%s19663_s3 + $0x178] sm:$0xff] %vm877_vm4, %v5275_v48  ;;  %v5274_v1 = vadd.f32 %v5210_v22, %v16202_v2  ;;  %v19846_v43 = vld [vmem:[#allocation36_spill] sm:$0xff]  ;;  %v19847_v13 = vld [vmem:[#allocation37_spill] sm:$0xff] }
 0x23a   :  { %11811 = vmatprep.mubr.msk.f32.mxu1 %vm109_vm1, %v19841_v51  ;;  %v4203_v34 = vpop.f32.mrf.mxu0  ;;  %v5213_v9 = vld [vmem:[%s19663_s3 + $0x188] sm:$0xff] }
 0x23b   :  { %v16328_v59 = vpop.f32.mrf.mxu1  ;;  %4443 = vst.msk [vmem:[%s19663_s3 + $0x1a8] sm:$0xff] %vm877_vm4, %v4379_v7  ;;  %v4378_v56 = vadd.f32 %v4314_v53, %v4203_v34  ;;  %5338 = vst.msk [vmem:[%s19663_s3 + $0x170] sm:$0xff] %vm877_vm4, %v5274_v1  ;;  %v5277_v17 = vadd.f32 %v16219_v52, %v5213_v9  ;;  %v19848_v7 = vld [vmem:[#allocation38_spill] sm:$0xff]  ;;  %v7150_v34 = vld [vmem:[#allocation2 + $0x129] sm:$0xff] }
 0x23c   :  { %v11371_v35 = vpop.f32.mrf.mxu0  ;;  %11714 = vmatmul.mubr.msk.f32.gmra.mxu0 %vm109_vm1, %v7203_v11  ;;  %v5212_v2 = vld [vmem:[%s19663_s3 + $0x180] sm:$0xff]  ;;  %v4323_v11 = vld [vmem:[%s19663_s3 + $0x1e8] sm:$0xff] }
 0x23d   :  { %v16345_v60 = vpop.f32.mrf.mxu1  ;;  %11812 = vmatmul.mubr.msk.f32.gmra.mxu1 %vm109_vm1, %v19842_v20  ;;  %4442 = vst.msk [vmem:[%s19663_s3 + $0x1a0] sm:$0xff] %vm877_vm4, %v4378_v56  ;;  %v4381_v19 = vadd.f32 %v11371_v35, %v4317_v63  ;;  %11716 = vmatprep.mubr.msk.f32.mxu0 %vm109_vm1, %v7144_v62  ;;  %5341 = vst.msk [vmem:[%s19663_s3 + $0x188] sm:$0xff] %vm877_vm4, %v5277_v17  ;;  %v5276_v3 = vadd.f32 %v5212_v2, %v16244_v47  ;;  %v4322_v56 = vld [vmem:[%s19663_s3 + $0x1e0] sm:$0xff]  ;;  %v7151_v17 = vld [vmem:[#allocation2 + $0x131] sm:$0xff] }
 0x23e   :  { %11814 = vmatprep.mubr.msk.f32.mxu1 %vm109_vm1, %v19843_v26  ;;  %v4213_v52 = vpop.f32.mrf.mxu0  ;;  %v5215_v29 = vld [vmem:[%s19663_s3 + $0x198] sm:$0xff]  ;;  %v19850_v2 = vld [vmem:[#allocation40_spill] sm:$0xff] }
 0x23f   :  { %v16370_v6 = vpop.f32.mrf.mxu1  ;;  %4445 = vst.msk [vmem:[%s19663_s3 + $0x1b8] sm:$0xff] %vm877_vm4, %v4381_v19  ;;  %v4380_v45 = vadd.f32 %v4316_v32, %v4213_v52  ;;  %5340 = vst.msk [vmem:[%s19663_s3 + $0x180] sm:$0xff] %vm877_vm4, %v5276_v3  ;;  %v5279_v57 = vadd.f32 %v16261_v30, %v5215_v29  ;;  %v4325_v26 = vld [vmem:[%s19663_s3 + $0x1f8] sm:$0xff]  ;;  %v19851_v3 = vld [vmem:[#allocation39_spill] sm:$0xff] }
 0x240   :  { %v11374_v37 = vpop.f32.mrf.mxu0  ;;  %11717 = vmatmul.mubr.msk.f32.gmra.mxu0 %vm109_vm1, %v7205_v44  ;;  %v5214_v47 = vld [vmem:[%s19663_s3 + $0x190] sm:$0xff]  ;;  %v7152_v52 = vld [vmem:[#allocation2 + $0x139] sm:$0xff] }
 0x241   :  { %v16387_v25 = vpop.f32.mrf.mxu1  ;;  %11815 = vmatmul.mubr.msk.f32.gmra.mxu1 %vm109_vm1, %v19844_v14  ;;  %4444 = vst.msk [vmem:[%s19663_s3 + $0x1b0] sm:$0xff] %vm877_vm4, %v4380_v45  ;;  %v4383_v61 = vadd.f32 %v11374_v37, %v4319_v49  ;;  %11719 = vmatprep.mubr.msk.f32.mxu0 %vm109_vm1, %v7146_v38  ;;  %5343 = vst.msk [vmem:[%s19663_s3 + $0x198] sm:$0xff] %vm877_vm4, %v5279_v57  ;;  %v5278_v16 = vadd.f32 %v5214_v47, %v16286_v46  ;;  %v4324_v45 = vld [vmem:[%s19663_s3 + $0x1f0] sm:$0xff]  ;;  %v7153_v57 = vld [vmem:[#allocation2 + $0x141] sm:$0xff] }
 0x242   :  { %11817 = vmatprep.mubr.msk.f32.mxu1 %vm109_vm1, %v19845_v15  ;;  %v4223_v30 = vpop.f32.mrf.mxu0  ;;  %v5217_v23 = vld [vmem:[%s19663_s3 + $0x1a8] sm:$0xff]  ;;  %v19852_v47 = vld [vmem:[#allocation41_spill] sm:$0xff] }
 0x243   :  { %v16412_v40 = vpop.f32.mrf.mxu1  ;;  %4447 = vst.msk [vmem:[%s19663_s3 + $0x1c8] sm:$0xff] %vm877_vm4, %v4383_v61  ;;  %v4382_v33 = vadd.f32 %v4318_v42, %v4223_v30  ;;  %5342 = vst.msk [vmem:[%s19663_s3 + $0x190] sm:$0xff] %vm877_vm4, %v5278_v16  ;;  %v5281_v41 = vadd.f32 %v16303_v21, %v5217_v23  ;;  %v4320_v21 = vld [vmem:[%s19663_s3 + $0x1d0] sm:$0xff]  ;;  %v6047_v15 = vld [vmem:[%s19663_s3 + $0x8] sm:$0xff] }
 0x244   :  { %v11377_v24 = vpop.f32.mrf.mxu0  ;;  %11720 = vmatmul.mubr.msk.f32.gmra.mxu0 %vm109_vm1, %v7207_v27  ;;  %v5216_v46 = vld [vmem:[%s19663_s3 + $0x1a0] sm:$0xff]  ;;  %v7154_v30 = vld [vmem:[#allocation2 + $0x149] sm:$0xff] }
 0x245   :  { %v16429_v55 = vpop.f32.mrf.mxu1  ;;  %11818 = vmatmul.mubr.msk.f32.gmra.mxu1 %vm109_vm1, %v19846_v43  ;;  %4446 = vst.msk [vmem:[%s19663_s3 + $0x1c0] sm:$0xff] %vm877_vm4, %v4382_v33  ;;  %v4385_v36 = vadd.f32 %v11377_v24, %v4321_v8  ;;  %11722 = vmatprep.mubr.msk.f32.mxu0 %vm109_vm1, %v7148_v54  ;;  %5345 = vst.msk [vmem:[%s19663_s3 + $0x1a8] sm:$0xff] %vm877_vm4, %v5281_v41  ;;  %v5280_v12 = vadd.f32 %v5216_v46, %v16328_v59  ;;  %v19849_v59 = vld [vmem:[#allocation70_spill] sm:$0xff]  ;;  %v7155_v41 = vld [vmem:[#allocation2 + $0x151] sm:$0xff] }
 0x246   :  { %11820 = vmatprep.mubr.msk.f32.mxu1 %vm109_vm1, %v19847_v13  ;;  %v4233_v48 = vpop.f32.mrf.mxu0  ;;  %v5219_v28 = vld [vmem:[%s19663_s3 + $0x1b8] sm:$0xff]  ;;  %v6046_v33 = vld [vmem:[%s19663_s3] sm:$0xff] }
 0x247   :  { %v16454_v0 = vpop.f32.mrf.mxu1  ;;  %4449 = vst.msk [vmem:[%s19663_s3 + $0x1d8] sm:$0xff] %vm877_vm4, %v4385_v36  ;;  %v4384_v5 = vadd.f32 %v4320_v21, %v4233_v48  ;;  %5344 = vst.msk [vmem:[%s19663_s3 + $0x1a0] sm:$0xff] %vm877_vm4, %v5280_v12  ;;  %v5283_v50 = vadd.f32 %v16345_v60, %v5219_v28  ;;  %v19853_v16 = vld [vmem:[#allocation42_spill] sm:$0xff]  ;;  %v19854_v46 = vld [vmem:[#allocation43_spill] sm:$0xff]  ;;  %v7215_v48 = vsel %vm42_vm3, %v7155_v41, 0.0 }
 0x248   :  { %v11380_v51 = vpop.f32.mrf.mxu0  ;;  %11723 = vmatmul.mubr.msk.f32.gmra.mxu0 %vm109_vm1, %v7209_v31  ;;  %v5218_v62 = vld [vmem:[%s19663_s3 + $0x1b0] sm:$0xff]  ;;  %v6049_v13 = vld [vmem:[%s19663_s3 + $0x18] sm:$0xff] }
 0x249   :  { %v16471_v22 = vpop.f32.mrf.mxu1  ;;  %11821 = vmatmul.mubr.msk.f32.gmra.mxu1 %vm109_vm1, %v19848_v7  ;;  %4448 = vst.msk [vmem:[%s19663_s3 + $0x1d0] sm:$0xff] %vm877_vm4, %v4384_v5  ;;  %v4387_v1 = vadd.f32 %v11380_v51, %v4323_v11  ;;  %11725 = vmatprep.mubr.f32.mxu0 %v19801_v4  ;;  %5347 = vst.msk [vmem:[%s19663_s3 + $0x1b8] sm:$0xff] %vm877_vm4, %v5283_v50  ;;  %v5282_v53 = vadd.f32 %v5218_v62, %v16370_v6  ;;  %v7211_v6 = vsel %vm42_vm3, %v7151_v17, 0.0  ;;  %v7156_v21 = vld [vmem:[#allocation2 + $0x159] sm:$0xff]  ;;  %v7157_v7 = vld [vmem:[#allocation2 + $0x161] sm:$0xff] }
 0x24a   :  { %11823 = vmatprep.mubr.msk.f32.mxu1 %vm109_vm1, %v19849_v59  ;;  %v4243_v9 = vpop.f32.mrf.mxu0  ;;  %v5221_v60 = vld [vmem:[%s19663_s3 + $0x1c8] sm:$0xff]  ;;  %v19856_v59 = vld [vmem:[#allocation45_spill] sm:$0xff]  ;;  %v7217_v17 = vsel %vm42_vm3, %v7157_v7, 0.0 }
 0x24b   :  { %v16494_v39 = vpop.f32.mrf.mxu1  ;;  %4451 = vst.msk [vmem:[%s19663_s3 + $0x1e8] sm:$0xff] %vm877_vm4, %v4387_v1  ;;  %v4386_v20 = vadd.f32 %v4322_v56, %v4243_v9  ;;  %5346 = vst.msk [vmem:[%s19663_s3 + $0x1b0] sm:$0xff] %vm877_vm4, %v5282_v53  ;;  %v5285_v35 = vadd.f32 %v16387_v25, %v5221_v60  ;;  %v6051_v53 = vld [vmem:[%s19663_s3 + $0x28] sm:$0xff]  ;;  %v19857_v56 = vld [vmem:[#allocation46_spill] sm:$0xff] }
 0x24c   :  { %v11383_v19 = vpop.f32.mrf.mxu0  ;;  %11726 = vmatmul.mubr.f32.gmra.mxu0 %v19801_v4  ;;  %v5220_v44 = vld [vmem:[%s19663_s3 + $0x1c0] sm:$0xff]  ;;  %v7158_v60 = vld [vmem:[#allocation2 + $0x169] sm:$0xff] }
 0x24d   :  { %v16511_v63 = vpop.f32.mrf.mxu1  ;;  %11824 = vmatmul.mubr.msk.f32.gmra.mxu1 %vm109_vm1, %v19850_v2  ;;  %4450 = vst.msk [vmem:[%s19663_s3 + $0x1e0] sm:$0xff] %vm877_vm4, %v4386_v20  ;;  %v4389_v38 = vadd.f32 %v11383_v19, %v4325_v26  ;;  %11728 = vmatprep.mubr.msk.f32.mxu0 %vm109_vm1, %v7150_v34  ;;  %5349 = vst.msk [vmem:[%s19663_s3 + $0x1c8] sm:$0xff] %vm877_vm4, %v5285_v35  ;;  %v5284_v32 = vadd.f32 %v5220_v44, %v16412_v40  ;;  %v7213_v40 = vsel %vm42_vm3, %v7153_v57, 0.0  ;;  %v6050_v2 = vld [vmem:[%s19663_s3 + $0x20] sm:$0xff]  ;;  %v7159_v19 = vld [vmem:[#allocation2 + $0x171] sm:$0xff] }
 0x24e   :  { %11826 = vmatprep.mubr.msk.f32.mxu1 %vm109_vm1, %v19851_v3  ;;  %v4253_v29 = vpop.f32.mrf.mxu0  ;;  %v5223_v25 = vld [vmem:[%s19663_s3 + $0x1d8] sm:$0xff]  ;;  %v7219_v57 = vsel %vm42_vm3, %v7159_v19, 0.0 }
 0x24f   :  { %v16536_v18 = vpop.f32.mrf.mxu1  ;;  %4453 = vst.msk [vmem:[%s19663_s3 + $0x1f8] sm:$0xff] %vm877_vm4, %v4389_v38  ;;  %v4388_v14 = vadd.f32 %v4324_v45, %v4253_v29  ;;  %5348 = vst.msk [vmem:[%s19663_s3 + $0x1c0] sm:$0xff] %vm877_vm4, %v5284_v32  ;;  %v5287_v37 = vadd.f32 %v16429_v55, %v5223_v25  ;;  %v6053_v32 = vld [vmem:[%s19663_s3 + $0x38] sm:$0xff]  ;;  %v19859_v45 = vld [vmem:[#allocation48_spill] sm:$0xff] }
 0x250   :  { %v11486_v61 = vpop.f32.mrf.mxu0  ;;  %11729 = vmatmul.mubr.msk.f32.gmra.mxu0 %vm109_vm1, %v7211_v6  ;;  %v5222_v27 = vld [vmem:[%s19663_s3 + $0x1d0] sm:$0xff]  ;;  %v19858_v6 = vld [vmem:[#allocation47_spill] sm:$0xff]  ;;  %v7160_v25 = vld [vmem:[#allocation2 + $0x179] sm:$0xff] }
 0x251   :  { %v16553_v49 = vpop.f32.mrf.mxu1  ;;  %11827 = vmatmul.mubr.msk.f32.gmra.mxu1 %vm109_vm1, %v19852_v47  ;;  %4452 = vst.msk [vmem:[%s19663_s3 + $0x1f0] sm:$0xff] %vm877_vm4, %v4388_v14  ;;  %v6111_v54 = vadd.f32 %v11486_v61, %v6047_v15  ;;  %11731 = vmatprep.mubr.msk.f32.mxu0 %vm109_vm1, %v7152_v52  ;;  %5351 = vst.msk [vmem:[%s19663_s3 + $0x1d8] sm:$0xff] %vm877_vm4, %v5287_v37  ;;  %v5286_v42 = vadd.f32 %v5222_v27, %v16454_v0  ;;  %v19855_v0 = vld [vmem:[#allocation44_spill] sm:$0xff]  ;;  %v7161_v61 = vld [vmem:[#allocation2 + $0x181] sm:$0xff] }
 0x252   :  { %11829 = vmatprep.mubr.msk.f32.mxu1 %vm109_vm1, %v19853_v16  ;;  %v5727_v23 = vpop.f32.mrf.mxu0  ;;  %v5225_v55 = vld [vmem:[%s19663_s3 + $0x1e8] sm:$0xff]  ;;  %v6052_v47 = vld [vmem:[%s19663_s3 + $0x30] sm:$0xff]  ;;  %v7221_v41 = vsel %vm42_vm3, %v7161_v61, 0.0 }
 0x253   :  { %v16578_v58 = vpop.f32.mrf.mxu1  ;;  %6175 = vst.msk [vmem:[%s19663_s3 + $0x8] sm:$0xff] %vm877_vm4, %v6111_v54  ;;  %v6110_v43 = vadd.f32 %v6046_v33, %v5727_v23  ;;  %5350 = vst.msk [vmem:[%s19663_s3 + $0x1d0] sm:$0xff] %vm877_vm4, %v5286_v42  ;;  %v5289_v24 = vadd.f32 %v16471_v22, %v5225_v55  ;;  %v6048_v22 = vld [vmem:[%s19663_s3 + $0x10] sm:$0xff]  ;;  %v6055_v42 = vld [vmem:[%s19663_s3 + $0x48] sm:$0xff] }
 0x254   :  { %v11489_v36 = vpop.f32.mrf.mxu0  ;;  %11732 = vmatmul.mubr.msk.f32.gmra.mxu0 %vm109_vm1, %v7213_v40  ;;  %v5224_v31 = vld [vmem:[%s19663_s3 + $0x1e0] sm:$0xff]  ;;  %v19860_v40 = vld [vmem:[#allocation49_spill] sm:$0xff]  ;;  %v7162_v55 = vld [vmem:[#allocation2 + $0x189] sm:$0xff] }
 0x255   :  { %v16595_v8 = vpop.f32.mrf.mxu1  ;;  %11830 = vmatmul.mubr.msk.f32.gmra.mxu1 %vm109_vm1, %v19854_v46  ;;  %6174 = vst.msk [vmem:[%s19663_s3] sm:$0xff] %vm877_vm4, %v6110_v43  ;;  %v6113_v12 = vadd.f32 %v11489_v36, %v6049_v13  ;;  %11734 = vmatprep.mubr.msk.f32.mxu0 %vm109_vm1, %v7154_v30  ;;  %5353 = vst.msk [vmem:[%s19663_s3 + $0x1e8] sm:$0xff] %vm877_vm4, %v5289_v24  ;;  %v5288_v28 = vadd.f32 %v5224_v31, %v16494_v39  ;;  %v19861_v33 = vld [vmem:[#allocation50_spill] sm:$0xff]  ;;  %v7163_v36 = vld [vmem:[#allocation2 + $0x191] sm:$0xff] }
 0x256   :  { %11832 = vmatprep.mubr.msk.f32.mxu1 %vm109_vm1, %v19855_v0  ;;  %v5737_v50 = vpop.f32.mrf.mxu0  ;;  %v5227_v51 = vld [vmem:[%s19663_s3 + $0x1f8] sm:$0xff]  ;;  %v6054_v46 = vld [vmem:[%s19663_s3 + $0x40] sm:$0xff]  ;;  %v7223_v7 = vsel %vm42_vm3, %v7163_v36, 0.0 }
 0x257   :  { %v16620_v5 = vpop.f32.mrf.mxu1  ;;  %6177 = vst.msk [vmem:[%s19663_s3 + $0x18] sm:$0xff] %vm877_vm4, %v6113_v12  ;;  %v6112_v11 = vadd.f32 %v6048_v22, %v5737_v50  ;;  %5352 = vst.msk [vmem:[%s19663_s3 + $0x1e0] sm:$0xff] %vm877_vm4, %v5288_v28  ;;  %v5291_v62 = vadd.f32 %v16511_v63, %v5227_v51  ;;  %v6057_v28 = vld [vmem:[%s19663_s3 + $0x58] sm:$0xff]  ;;  %v19863_v22 = vld [vmem:[#allocation52_spill] sm:$0xff] }
 0x258   :  { %v11492_v34 = vpop.f32.mrf.mxu0  ;;  %11735 = vmatmul.mubr.msk.f32.gmra.mxu0 %vm109_vm1, %v7215_v48  ;;  %v5226_v39 = vld [vmem:[%s19663_s3 + $0x1f0] sm:$0xff]  ;;  %v19862_v48 = vld [vmem:[#allocation51_spill] sm:$0xff]  ;;  %v7164_v51 = vld [vmem:[#allocation2 + $0x199] sm:$0xff] }
 0x259   :  { %v16637_v1 = vpop.f32.mrf.mxu1  ;;  %11833 = vmatmul.mubr.msk.f32.gmra.mxu1 %vm109_vm1, %v19856_v59  ;;  %6176 = vst.msk [vmem:[%s19663_s3 + $0x10] sm:$0xff] %vm877_vm4, %v6112_v11  ;;  %v6115_v9 = vadd.f32 %v11492_v34, %v6051_v53  ;;  %11737 = vmatprep.mubr.msk.f32.mxu0 %vm109_vm1, %v7156_v21  ;;  %5355 = vst.msk [vmem:[%s19663_s3 + $0x1f8] sm:$0xff] %vm877_vm4, %v5291_v62  ;;  %v5290_v20 = vadd.f32 %v5226_v39, %v16536_v18  ;;  %v6056_v59 = vld [vmem:[%s19663_s3 + $0x50] sm:$0xff]  ;;  %v7165_v34 = vld [vmem:[#allocation2 + $0x1a1] sm:$0xff] }
 0x25a   :  { %11835 = vmatprep.mubr.msk.f32.mxu1 %vm109_vm1, %v19857_v56  ;;  %v5747_v63 = vpop.f32.mrf.mxu0  ;;  %v6929_v26 = vld [vmem:[%s19663_s3 + $0x8] sm:$0xff]  ;;  %v7225_v19 = vsel %vm42_vm3, %v7165_v34, 0.0 }
 0x25b   :  { %v16662_v35 = vpop.f32.mrf.mxu1  ;;  %6179 = vst.msk [vmem:[%s19663_s3 + $0x28] sm:$0xff] %vm877_vm4, %v6115_v9  ;;  %v6114_v44 = vadd.f32 %v6050_v2, %v5747_v63  ;;  %5354 = vst.msk [vmem:[%s19663_s3 + $0x1f0] sm:$0xff] %vm877_vm4, %v5290_v20  ;;  %v6993_v38 = vadd.f32 %v16553_v49, %v6929_v26  ;;  %v6059_v20 = vld [vmem:[%s19663_s3 + $0x68] sm:$0xff]  ;;  %v19865_v2 = vld [vmem:[#allocation54_spill] sm:$0xff] }
 0x25c   :  { %v11495_v52 = vpop.f32.mrf.mxu0  ;;  %11738 = vmatmul.mubr.msk.f32.gmra.mxu0 %vm109_vm1, %v7217_v17  ;;  %v6928_v18 = vld [vmem:[%s19663_s3] sm:$0xff]  ;;  %v19864_v17 = vld [vmem:[#allocation53_spill] sm:$0xff]  ;;  %v7166_v26 = vld [vmem:[#allocation2 + $0x1a9] sm:$0xff] }
 0x25d   :  { %v16679_v3 = vpop.f32.mrf.mxu1  ;;  %11836 = vmatmul.mubr.msk.f32.gmra.mxu1 %vm109_vm1, %v19858_v6  ;;  %6178 = vst.msk [vmem:[%s19663_s3 + $0x20] sm:$0xff] %vm877_vm4, %v6114_v44  ;;  %v6117_v29 = vadd.f32 %v11495_v52, %v6053_v32  ;;  %11740 = vmatprep.mubr.msk.f32.mxu0 %vm109_vm1, %v7158_v60  ;;  %7057 = vst.msk [vmem:[%s19663_s3 + $0x8] sm:$0xff] %vm877_vm4, %v6993_v38  ;;  %v6992_v14 = vadd.f32 %v6928_v18, %v16578_v58  ;;  %v6058_v6 = vld [vmem:[%s19663_s3 + $0x60] sm:$0xff]  ;;  %v7167_v52 = vld [vmem:[#allocation2 + $0x1b1] sm:$0xff] }
 0x25e   :  { %11838 = vmatprep.mubr.msk.f32.mxu1 %vm109_vm1, %v19859_v45  ;;  %v5757_v49 = vpop.f32.mrf.mxu0  ;;  %v6931_v15 = vld [vmem:[%s19663_s3 + $0x18] sm:$0xff]  ;;  %v7227_v61 = vsel %vm42_vm3, %v7167_v52, 0.0 }
 0x25f   :  { %v16704_v37 = vpop.f32.mrf.mxu1  ;;  %6181 = vst.msk [vmem:[%s19663_s3 + $0x38] sm:$0xff] %vm877_vm4, %v6117_v29  ;;  %v6116_v27 = vadd.f32 %v6052_v47, %v5757_v49  ;;  %7056 = vst.msk [vmem:[%s19663_s3] sm:$0xff] %vm877_vm4, %v6992_v14  ;;  %v6995_v54 = vadd.f32 %v16595_v8, %v6931_v15  ;;  %v6061_v14 = vld [vmem:[%s19663_s3 + $0x78] sm:$0xff]  ;;  %v19867_v47 = vld [vmem:[#allocation56_spill] sm:$0xff] }
 0x260   :  { %v11498_v30 = vpop.f32.mrf.mxu0  ;;  %11741 = vmatmul.mubr.msk.f32.gmra.mxu0 %vm109_vm1, %v7219_v57  ;;  %v6930_v58 = vld [vmem:[%s19663_s3 + $0x10] sm:$0xff]  ;;  %v19866_v57 = vld [vmem:[#allocation55_spill] sm:$0xff]  ;;  %v7168_v15 = vld [vmem:[#allocation2 + $0x1b9] sm:$0xff] }
 0x261   :  { %v16721_v16 = vpop.f32.mrf.mxu1  ;;  %11839 = vmatmul.mubr.msk.f32.gmra.mxu1 %vm109_vm1, %v19860_v40  ;;  %6180 = vst.msk [vmem:[%s19663_s3 + $0x30] sm:$0xff] %vm877_vm4, %v6116_v27  ;;  %v6119_v23 = vadd.f32 %v11498_v30, %v6055_v42  ;;  %11743 = vmatprep.mubr.msk.f32.mxu0 %vm109_vm1, %v7160_v25  ;;  %7059 = vst.msk [vmem:[%s19663_s3 + $0x18] sm:$0xff] %vm877_vm4, %v6995_v54  ;;  %v6994_v43 = vadd.f32 %v6930_v58, %v16620_v5  ;;  %v6060_v40 = vld [vmem:[%s19663_s3 + $0x70] sm:$0xff]  ;;  %v7169_v30 = vld [vmem:[#allocation2 + $0x1c1] sm:$0xff] }
 0x262   :  { %11841 = vmatprep.mubr.msk.f32.mxu1 %vm109_vm1, %v19861_v33  ;;  %v5767_v8 = vpop.f32.mrf.mxu0  ;;  %v6933_v13 = vld [vmem:[%s19663_s3 + $0x28] sm:$0xff]  ;;  %v7229_v36 = vsel %vm42_vm3, %v7169_v30, 0.0 }
 0x263   :  { %v16746_v24 = vpop.f32.mrf.mxu1  ;;  %6183 = vst.msk [vmem:[%s19663_s3 + $0x48] sm:$0xff] %vm877_vm4, %v6119_v23  ;;  %v6118_v31 = vadd.f32 %v6054_v46, %v5767_v8  ;;  %7058 = vst.msk [vmem:[%s19663_s3 + $0x10] sm:$0xff] %vm877_vm4, %v6994_v43  ;;  %v6997_v12 = vadd.f32 %v16637_v1, %v6933_v13  ;;  %v6063_v43 = vld [vmem:[%s19663_s3 + $0x88] sm:$0xff]  ;;  %v19869_v46 = vld [vmem:[#allocation58_spill] sm:$0xff] }
 0x264   :  { %v11501_v21 = vpop.f32.mrf.mxu0  ;;  %11744 = vmatmul.mubr.msk.f32.gmra.mxu0 %vm109_vm1, %v7221_v41  ;;  %v6932_v5 = vld [vmem:[%s19663_s3 + $0x20] sm:$0xff]  ;;  %v19868_v41 = vld [vmem:[#allocation57_spill] sm:$0xff]  ;;  %v7170_v13 = vld [vmem:[#allocation2 + $0x1c9] sm:$0xff] }
 0x265   :  { %v16763_v0 = vpop.f32.mrf.mxu1  ;;  %11842 = vmatmul.mubr.msk.f32.gmra.mxu1 %vm109_vm1, %v19862_v48  ;;  %6182 = vst.msk [vmem:[%s19663_s3 + $0x40] sm:$0xff] %vm877_vm4, %v6118_v31  ;;  %v6121_v50 = vadd.f32 %v11501_v21, %v6057_v28  ;;  %11746 = vmatprep.mubr.msk.f32.mxu0 %vm109_vm1, %v7162_v55  ;;  %7061 = vst.msk [vmem:[%s19663_s3 + $0x28] sm:$0xff] %vm877_vm4, %v6997_v12  ;;  %v6996_v11 = vadd.f32 %v6932_v5, %v16662_v35  ;;  %v6062_v48 = vld [vmem:[%s19663_s3 + $0x80] sm:$0xff]  ;;  %v7171_v21 = vld [vmem:[#allocation2 + $0x1d1] sm:$0xff] }
 0x266   :  { %11844 = vmatprep.mubr.msk.f32.mxu1 %vm109_vm1, %v19863_v22  ;;  %v5777_v1 = vpop.f32.mrf.mxu0  ;;  %v6935_v53 = vld [vmem:[%s19663_s3 + $0x38] sm:$0xff]  ;;  %v7231_v34 = vsel %vm42_vm3, %v7171_v21, 0.0 }
 0x267   :  { %v16788_v62 = vpop.f32.mrf.mxu1  ;;  %6185 = vst.msk [vmem:[%s19663_s3 + $0x58] sm:$0xff] %vm877_vm4, %v6121_v50  ;;  %v6120_v39 = vadd.f32 %v6056_v59, %v5777_v1  ;;  %7060 = vst.msk [vmem:[%s19663_s3 + $0x20] sm:$0xff] %vm877_vm4, %v6996_v11  ;;  %v6999_v9 = vadd.f32 %v16679_v3, %v6935_v53  ;;  %v6065_v11 = vld [vmem:[%s19663_s3 + $0x98] sm:$0xff]  ;;  %v19871_v59 = vld [vmem:[#allocation60_spill] sm:$0xff] }
 0x268   :  { %v11504_v60 = vpop.f32.mrf.mxu0  ;;  %11747 = vmatmul.mubr.msk.f32.gmra.mxu0 %vm109_vm1, %v7223_v7  ;;  %v6934_v35 = vld [vmem:[%s19663_s3 + $0x30] sm:$0xff]  ;;  %v19870_v7 = vld [vmem:[#allocation59_spill] sm:$0xff]  ;;  %v7172_v53 = vld [vmem:[#allocation2 + $0x1d9] sm:$0xff] }
 0x269   :  { %v16805_v56 = vpop.f32.mrf.mxu1  ;;  %11845 = vmatmul.mubr.msk.f32.gmra.mxu1 %vm109_vm1, %v19864_v17  ;;  %6184 = vst.msk [vmem:[%s19663_s3 + $0x50] sm:$0xff] %vm877_vm4, %v6120_v39  ;;  %v6123_v63 = vadd.f32 %v11504_v60, %v6059_v20  ;;  %11749 = vmatprep.mubr.msk.f32.mxu0 %vm109_vm1, %v7164_v51  ;;  %7063 = vst.msk [vmem:[%s19663_s3 + $0x38] sm:$0xff] %vm877_vm4, %v6999_v9  ;;  %v6998_v44 = vadd.f32 %v6934_v35, %v16704_v37  ;;  %v6064_v17 = vld [vmem:[%s19663_s3 + $0x90] sm:$0xff]  ;;  %v7173_v60 = vld [vmem:[#allocation2 + $0x1e1] sm:$0xff] }
 0x26a   :  { %11847 = vmatprep.mubr.msk.f32.mxu1 %vm109_vm1, %v19865_v2  ;;  %v5787_v3 = vpop.f32.mrf.mxu0  ;;  %v6937_v32 = vld [vmem:[%s19663_s3 + $0x48] sm:$0xff]  ;;  %v7233_v52 = vsel %vm42_vm3, %v7173_v60, 0.0 }
 0x26b   :  { %v16830_v38 = vpop.f32.mrf.mxu1  ;;  %6187 = vst.msk [vmem:[%s19663_s3 + $0x68] sm:$0xff] %vm877_vm4, %v6123_v63  ;;  %v6122_v18 = vadd.f32 %v6058_v6, %v5787_v3  ;;  %7062 = vst.msk [vmem:[%s19663_s3 + $0x30] sm:$0xff] %vm877_vm4, %v6998_v44  ;;  %v7001_v29 = vadd.f32 %v16721_v16, %v6937_v32  ;;  %v6067_v44 = vld [vmem:[%s19663_s3 + $0xa8] sm:$0xff]  ;;  %v19873_v6 = vld [vmem:[#allocation62_spill] sm:$0xff] }
 0x26c   :  { %v11507_v25 = vpop.f32.mrf.mxu0  ;;  %11750 = vmatmul.mubr.msk.f32.gmra.mxu0 %vm109_vm1, %v7225_v19  ;;  %v6936_v37 = vld [vmem:[%s19663_s3 + $0x40] sm:$0xff]  ;;  %v19872_v19 = vld [vmem:[#allocation61_spill] sm:$0xff]  ;;  %v7174_v32 = vld [vmem:[#allocation2 + $0x1e9] sm:$0xff] }
 0x26d   :  { %v16847_v45 = vpop.f32.mrf.mxu1  ;;  %11848 = vmatmul.mubr.msk.f32.gmra.mxu1 %vm109_vm1, %v19866_v57  ;;  %6186 = vst.msk [vmem:[%s19663_s3 + $0x60] sm:$0xff] %vm877_vm4, %v6122_v18  ;;  %v6125_v49 = vadd.f32 %v11507_v25, %v6061_v14  ;;  %11752 = vmatprep.mubr.msk.f32.mxu0 %vm109_vm1, %v7166_v26  ;;  %7065 = vst.msk [vmem:[%s19663_s3 + $0x48] sm:$0xff] %vm877_vm4, %v7001_v29  ;;  %v7000_v27 = vadd.f32 %v6936_v37, %v16746_v24  ;;  %v6066_v57 = vld [vmem:[%s19663_s3 + $0xa0] sm:$0xff]  ;;  %v7175_v25 = vld [vmem:[#allocation2 + $0x1f1] sm:$0xff] }
 0x26e   :  { %11850 = vmatprep.mubr.msk.f32.mxu1 %vm109_vm1, %v19867_v47  ;;  %v5797_v16 = vpop.f32.mrf.mxu0  ;;  %v6939_v42 = vld [vmem:[%s19663_s3 + $0x58] sm:$0xff]  ;;  %v7235_v30 = vsel %vm42_vm3, %v7175_v25, 0.0  ;;  %v6074_v25 = vld [vmem:[%s19663_s3 + $0xe0] sm:$0xff] }
 0x26f   :  { %v16872_v54 = vpop.f32.mrf.mxu1  ;;  %6189 = vst.msk [vmem:[%s19663_s3 + $0x78] sm:$0xff] %vm877_vm4, %v6125_v49  ;;  %v6124_v58 = vadd.f32 %v6060_v40, %v5797_v16  ;;  %7064 = vst.msk [vmem:[%s19663_s3 + $0x40] sm:$0xff] %vm877_vm4, %v7000_v27  ;;  %v7003_v23 = vadd.f32 %v16763_v0, %v6939_v42  ;;  %v6069_v27 = vld [vmem:[%s19663_s3 + $0xb8] sm:$0xff]  ;;  %v19875_v40 = vld [vmem:[#allocation64_spill] sm:$0xff] }
 0x270   :  { %v11510_v55 = vpop.f32.mrf.mxu0  ;;  %11753 = vmatmul.mubr.msk.f32.gmra.mxu0 %vm109_vm1, %v7227_v61  ;;  %v6938_v24 = vld [vmem:[%s19663_s3 + $0x50] sm:$0xff]  ;;  %v19874_v61 = vld [vmem:[#allocation63_spill] sm:$0xff]  ;;  %v7176_v42 = vld [vmem:[#allocation2 + $0x1f9] sm:$0xff] }
 0x271   :  { %v16889_v33 = vpop.f32.mrf.mxu1  ;;  %11851 = vmatmul.mubr.msk.f32.gmra.mxu1 %vm109_vm1, %v19868_v41  ;;  %6188 = vst.msk [vmem:[%s19663_s3 + $0x70] sm:$0xff] %vm877_vm4, %v6124_v58  ;;  %v6127_v8 = vadd.f32 %v11510_v55, %v6063_v43  ;;  %11755 = vmatprep.mubr.msk.f32.mxu0 %vm109_vm1, %v7168_v15  ;;  %7067 = vst.msk [vmem:[%s19663_s3 + $0x58] sm:$0xff] %vm877_vm4, %v7003_v23  ;;  %v7002_v31 = vadd.f32 %v6938_v24, %v16788_v62  ;;  %v6068_v41 = vld [vmem:[%s19663_s3 + $0xb0] sm:$0xff]  ;;  %v7177_v55 = vld [vmem:[#allocation2 + $0x201] sm:$0xff] }
 0x272   :  { %11853 = vmatprep.mubr.msk.f32.mxu1 %vm109_vm1, %v19869_v46  ;;  %v5807_v0 = vpop.f32.mrf.mxu0  ;;  %v6941_v28 = vld [vmem:[%s19663_s3 + $0x68] sm:$0xff]  ;;  %v7237_v21 = vsel %vm42_vm3, %v7177_v55, 0.0 }
 0x273   :  { %v16914_v12 = vpop.f32.mrf.mxu1  ;;  %6191 = vst.msk [vmem:[%s19663_s3 + $0x88] sm:$0xff] %vm877_vm4, %v6127_v8  ;;  %v6126_v5 = vadd.f32 %v6062_v48, %v5807_v0  ;;  %7066 = vst.msk [vmem:[%s19663_s3 + $0x50] sm:$0xff] %vm877_vm4, %v7002_v31  ;;  %v7005_v50 = vadd.f32 %v16805_v56, %v6941_v28  ;;  %v6071_v31 = vld [vmem:[%s19663_s3 + $0xc8] sm:$0xff]  ;;  %v19877_v48 = vld [vmem:[#allocation66_spill] sm:$0xff] }
 0x274   :  { %v11513_v51 = vpop.f32.mrf.mxu0  ;;  %11756 = vmatmul.mubr.msk.f32.gmra.mxu0 %vm109_vm1, %v7229_v36  ;;  %v6940_v62 = vld [vmem:[%s19663_s3 + $0x60] sm:$0xff]  ;;  %v19876_v36 = vld [vmem:[#allocation65_spill] sm:$0xff]  ;;  %v7178_v28 = vld [vmem:[#allocation2 + $0x209] sm:$0xff] }
 0x275   :  { %v16931_v22 = vpop.f32.mrf.mxu1  ;;  %11854 = vmatmul.mubr.msk.f32.gmra.mxu1 %vm109_vm1, %v19870_v7  ;;  %6190 = vst.msk [vmem:[%s19663_s3 + $0x80] sm:$0xff] %vm877_vm4, %v6126_v5  ;;  %v6129_v1 = vadd.f32 %v11513_v51, %v6065_v11  ;;  %11758 = vmatprep.mubr.msk.f32.mxu0 %vm109_vm1, %v7170_v13  ;;  %7069 = vst.msk [vmem:[%s19663_s3 + $0x68] sm:$0xff] %vm877_vm4, %v7005_v50  ;;  %v7004_v39 = vadd.f32 %v6940_v62, %v16830_v38  ;;  %v6070_v7 = vld [vmem:[%s19663_s3 + $0xc0] sm:$0xff]  ;;  %v7179_v51 = vld [vmem:[#allocation2 + $0x211] sm:$0xff] }
 0x276   :  { %11856 = vmatprep.mubr.msk.f32.mxu1 %vm109_vm1, %v19871_v59  ;;  %v5817_v56 = vpop.f32.mrf.mxu0  ;;  %v6943_v20 = vld [vmem:[%s19663_s3 + $0x78] sm:$0xff]  ;;  %v7239_v60 = vsel %vm42_vm3, %v7179_v51, 0.0 }
 0x277   :  { %v16956_v9 = vpop.f32.mrf.mxu1  ;;  %6193 = vst.msk [vmem:[%s19663_s3 + $0x98] sm:$0xff] %vm877_vm4, %v6129_v1  ;;  %v6128_v35 = vadd.f32 %v6064_v17, %v5817_v56  ;;  %7068 = vst.msk [vmem:[%s19663_s3 + $0x60] sm:$0xff] %vm877_vm4, %v7004_v39  ;;  %v7007_v63 = vadd.f32 %v16847_v45, %v6943_v20  ;;  %v6073_v39 = vld [vmem:[%s19663_s3 + $0xd8] sm:$0xff]  ;;  %v19879_v17 = vld [vmem:[#allocation68_spill] sm:$0xff] }
 0x278   :  { %v11516_v26 = vpop.f32.mrf.mxu0  ;;  %11759 = vmatmul.mubr.msk.f32.gmra.mxu0 %vm109_vm1, %v7231_v34  ;;  %v6942_v38 = vld [vmem:[%s19663_s3 + $0x70] sm:$0xff]  ;;  %v19878_v34 = vld [vmem:[#allocation67_spill] sm:$0xff] }
 0x279   :  { %v16973_v2 = vpop.f32.mrf.mxu1  ;;  %11857 = vmatmul.mubr.msk.f32.gmra.mxu1 %vm109_vm1, %v19872_v19  ;;  %6192 = vst.msk [vmem:[%s19663_s3 + $0x90] sm:$0xff] %vm877_vm4, %v6128_v35  ;;  %v6131_v3 = vadd.f32 %v11516_v26, %v6067_v44  ;;  %11761 = vmatprep.mubr.msk.f32.mxu0 %vm109_vm1, %v7172_v53  ;;  %7071 = vst.msk [vmem:[%s19663_s3 + $0x78] sm:$0xff] %vm877_vm4, %v7007_v63  ;;  %v7006_v18 = vadd.f32 %v6942_v38, %v16872_v54  ;;  %v19880_v38 = vld [vmem:[#allocation69_spill] sm:$0xff] }
 0x27a   :  { %11859 = vmatprep.mubr.msk.f32.mxu1 %vm109_vm1, %v19873_v6  ;;  %v5827_v45 = vpop.f32.mrf.mxu0  ;;  %v6945_v14 = vld [vmem:[%s19663_s3 + $0x88] sm:$0xff] }
 0x27b   :  { %v16998_v29 = vpop.f32.mrf.mxu1  ;;  %6195 = vst.msk [vmem:[%s19663_s3 + $0xa8] sm:$0xff] %vm877_vm4, %v6131_v3  ;;  %v6130_v37 = vadd.f32 %v6066_v57, %v5827_v45  ;;  %7070 = vst.msk [vmem:[%s19663_s3 + $0x70] sm:$0xff] %vm877_vm4, %v7006_v18  ;;  %v7009_v49 = vadd.f32 %v16889_v33, %v6945_v14  ;;  %v6075_v6 = vld [vmem:[%s19663_s3 + $0xe8] sm:$0xff]  ;;  %v19881_v18 = vld [vmem:[#allocation77_spill] sm:$0xff] }
 0x27c   :  { %v11519_v15 = vpop.f32.mrf.mxu0  ;;  %11762 = vmatmul.mubr.msk.f32.gmra.mxu0 %vm109_vm1, %v7233_v52  ;;  %v6944_v54 = vld [vmem:[%s19663_s3 + $0x80] sm:$0xff] }
 0x27d   :  { %v17015_v47 = vpop.f32.mrf.mxu1  ;;  %11860 = vmatmul.mubr.msk.f32.gmra.mxu1 %vm109_vm1, %v19874_v61  ;;  %6194 = vst.msk [vmem:[%s19663_s3 + $0xa0] sm:$0xff] %vm877_vm4, %v6130_v37  ;;  %v6133_v16 = vadd.f32 %v11519_v15, %v6069_v27  ;;  %11764 = vmatprep.mubr.msk.f32.mxu0 %vm109_vm1, %v7174_v32  ;;  %7073 = vst.msk [vmem:[%s19663_s3 + $0x88] sm:$0xff] %vm877_vm4, %v7009_v49  ;;  %v7008_v58 = vadd.f32 %v6944_v54, %v16914_v12  ;;  %v19882_v61 = vld [vmem:[#allocation79_spill] sm:$0xff]  ;;  %v6077_v27 = vld [vmem:[%s19663_s3 + $0xf8] sm:$0xff] }
 0x27e   :  { %11862 = vmatprep.mubr.msk.f32.mxu1 %vm109_vm1, %v19875_v40  ;;  %v5837_v33 = vpop.f32.mrf.mxu0  ;;  %v6947_v43 = vld [vmem:[%s19663_s3 + $0x98] sm:$0xff] }
 0x27f   :  { %v17040_v23 = vpop.f32.mrf.mxu1  ;;  %6197 = vst.msk [vmem:[%s19663_s3 + $0xb8] sm:$0xff] %vm877_vm4, %v6133_v16  ;;  %v6132_v24 = vadd.f32 %v6068_v41, %v5837_v33  ;;  %7072 = vst.msk [vmem:[%s19663_s3 + $0x80] sm:$0xff] %vm877_vm4, %v7008_v58  ;;  %v7011_v8 = vadd.f32 %v16931_v22, %v6947_v43  ;;  %v6079_v43 = vld [vmem:[%s19663_s3 + $0x108] sm:$0xff] }
 0x280   :  { %v11522_v13 = vpop.f32.mrf.mxu0  ;;  %11765 = vmatmul.mubr.msk.f32.gmra.mxu0 %vm109_vm1, %v7235_v30  ;;  %v6946_v12 = vld [vmem:[%s19663_s3 + $0x90] sm:$0xff] }
 0x281   :  { %v17057_v46 = vpop.f32.mrf.mxu1  ;;  %11863 = vmatmul.mubr.msk.f32.gmra.mxu1 %vm109_vm1, %v19876_v36  ;;  %6196 = vst.msk [vmem:[%s19663_s3 + $0xb0] sm:$0xff] %vm877_vm4, %v6132_v24  ;;  %v6135_v0 = vadd.f32 %v11522_v13, %v6071_v31  ;;  %11767 = vmatprep.mubr.msk.f32.mxu0 %vm109_vm1, %v7176_v42  ;;  %7075 = vst.msk [vmem:[%s19663_s3 + $0x98] sm:$0xff] %vm877_vm4, %v7011_v8  ;;  %v7010_v5 = vadd.f32 %v6946_v12, %v16956_v9  ;;  %v6078_v31 = vld [vmem:[%s19663_s3 + $0x100] sm:$0xff] }
 0x282   :  { %11865 = vmatprep.mubr.msk.f32.mxu1 %vm109_vm1, %v19877_v48  ;;  %v5847_v22 = vpop.f32.mrf.mxu0  ;;  %v6949_v11 = vld [vmem:[%s19663_s3 + $0xa8] sm:$0xff] }
 0x283   :  { %v6729_v50 = vpop.f32.mrf.mxu1  ;;  %6199 = vst.msk [vmem:[%s19663_s3 + $0xc8] sm:$0xff] %vm877_vm4, %v6135_v0  ;;  %v6134_v62 = vadd.f32 %v6070_v7, %v5847_v22  ;;  %7074 = vst.msk [vmem:[%s19663_s3 + $0x90] sm:$0xff] %vm877_vm4, %v7010_v5  ;;  %v7013_v1 = vadd.f32 %v16973_v2, %v6949_v11  ;;  %v6072_v2 = vld [vmem:[%s19663_s3 + $0xd0] sm:$0xff]  ;;  %v6081_v5 = vld [vmem:[%s19663_s3 + $0x118] sm:$0xff] }
 0x284   :  { %v11525_v53 = vpop.f32.mrf.mxu0  ;;  %11768 = vmatmul.mubr.msk.f32.gmra.mxu0 %vm109_vm1, %v7237_v21  ;;  %v6948_v9 = vld [vmem:[%s19663_s3 + $0xa0] sm:$0xff] }
 0x285   :  { %v11623_v59 = vpop.f32.mrf.mxu1  ;;  %11866 = vmatmul.mubr.msk.f32.gmra.mxu1 %vm109_vm1, %v19878_v34  ;;  %6198 = vst.msk [vmem:[%s19663_s3 + $0xc0] sm:$0xff] %vm877_vm4, %v6134_v62  ;;  %v6137_v56 = vadd.f32 %v11525_v53, %v6073_v39  ;;  %11770 = vmatprep.mubr.msk.f32.mxu0 %vm109_vm1, %v7178_v28  ;;  %7077 = vst.msk [vmem:[%s19663_s3 + $0xa8] sm:$0xff] %vm877_vm4, %v7013_v1  ;;  %v7012_v20 = vadd.f32 %v6948_v9, %v16998_v29  ;;  %v6080_v62 = vld [vmem:[%s19663_s3 + $0x110] sm:$0xff]  ;;  %v6083_v9 = vld [vmem:[%s19663_s3 + $0x128] sm:$0xff] }
 0x286   :  { %11868 = vmatprep.mubr.msk.f32.mxu1 %vm109_vm1, %v19879_v17  ;;  %v5857_v63 = vpop.f32.mrf.mxu0  ;;  %v6951_v19 = vld [vmem:[%s19663_s3 + $0xb8] sm:$0xff] }
 0x287   :  { %v6739_v35 = vpop.f32.mrf.mxu1  ;;  %6201 = vst.msk [vmem:[%s19663_s3 + $0xd8] sm:$0xff] %vm877_vm4, %v6137_v56  ;;  %v6136_v10 = vadd.f32 %v6072_v2, %v5857_v63  ;;  %7076 = vst.msk [vmem:[%s19663_s3 + $0xa0] sm:$0xff] %vm877_vm4, %v7012_v20  ;;  %v7015_v26 = vadd.f32 %v17015_v47, %v6951_v19  ;;  %v6082_v63 = vld [vmem:[%s19663_s3 + $0x120] sm:$0xff] }
 0x288   :  { %v11528_v3 = vpop.f32.mrf.mxu0  ;;  %11771 = vmatmul.mubr.msk.f32.gmra.mxu0 %vm109_vm1, %v7239_v60  ;;  %v6950_v52 = vld [vmem:[%s19663_s3 + $0xb0] sm:$0xff] }
 0x289   :  { %v11626_v44 = vpop.f32.mrf.mxu1  ;;  %11869 = vmatmul.mubr.msk.f32.gmra.mxu1 %vm109_vm1, %v19880_v38  ;;  %6200 = vst.msk [vmem:[%s19663_s3 + $0xd0] sm:$0xff] %vm877_vm4, %v6136_v10  ;;  %v6139_v32 = vadd.f32 %v11528_v3, %v6075_v6  ;;  %11773 = vmatprep.mubr.f32.mxu0 %v19801_v4  ;;  %7079 = vst.msk [vmem:[%s19663_s3 + $0xb8] sm:$0xff] %vm877_vm4, %v7015_v26  ;;  %v7014_v29 = vadd.f32 %v6950_v52, %v17040_v23  ;;  %v6085_v38 = vld [vmem:[%s19663_s3 + $0x138] sm:$0xff] }
 0x28a   :  { %11871 = vmatprep.mubr.msk.f32.mxu1 %vm109_vm1, %v19881_v18  ;;  %v5867_v57 = vpop.f32.mrf.mxu0  ;;  %v6953_v14 = vld [vmem:[%s19663_s3 + $0xc8] sm:$0xff] }
 0x28b   :  { %v6749_v45 = vpop.f32.mrf.mxu1  ;;  %6203 = vst.msk [vmem:[%s19663_s3 + $0xe8] sm:$0xff] %vm877_vm4, %v6139_v32  ;;  %v6138_v37 = vadd.f32 %v6074_v25, %v5867_v57  ;;  %7078 = vst.msk [vmem:[%s19663_s3 + $0xb0] sm:$0xff] %vm877_vm4, %v7014_v29  ;;  %v7017_v49 = vadd.f32 %v17057_v46, %v6953_v14  ;;  %v6084_v29 = vld [vmem:[%s19663_s3 + $0x130] sm:$0xff] }
 0x28c   :  { %v11531_v15 = vpop.f32.mrf.mxu0  ;;  %11774 = vmatmul.mubr.f32.gmra.mxu0 %v19801_v4  ;;  %v6952_v54 = vld [vmem:[%s19663_s3 + $0xc0] sm:$0xff]  ;;  %v6076_v4 = vld [vmem:[%s19663_s3 + $0xf0] sm:$0xff] }
 0x28d   :  { %v11629_v47 = vpop.f32.mrf.mxu1  ;;  %11872 = vmatmul.mubr.msk.f32.gmra.mxu1 %vm109_vm1, %v19882_v61  ;;  %6202 = vst.msk [vmem:[%s19663_s3 + $0xe0] sm:$0xff] %vm877_vm4, %v6138_v37  ;;  %v6141_v16 = vadd.f32 %v11531_v15, %v6077_v27  ;;  %7081 = vst.msk [vmem:[%s19663_s3 + $0xc8] sm:$0xff] %vm877_vm4, %v7017_v49  ;;  %v7016_v40 = vadd.f32 %v6952_v54, %v6729_v50  ;;  %v6087_v49 = vld [vmem:[%s19663_s3 + $0x148] sm:$0xff] }
 0x28e   :  { %v5877_v42 = vpop.f32.mrf.mxu0  ;;  %v6955_v58 = vld [vmem:[%s19663_s3 + $0xd8] sm:$0xff] }
 0x28f   :  { %v6759_v30 = vpop.f32.mrf.mxu1  ;;  %6205 = vst.msk [vmem:[%s19663_s3 + $0xf8] sm:$0xff] %vm877_vm4, %v6141_v16  ;;  %v6140_v23 = vadd.f32 %v6076_v4, %v5877_v42  ;;  %7080 = vst.msk [vmem:[%s19663_s3 + $0xc0] sm:$0xff] %vm877_vm4, %v7016_v40  ;;  %v7019_v33 = vadd.f32 %v11623_v59, %v6955_v58  ;;  %v6086_v16 = vld [vmem:[%s19663_s3 + $0x140] sm:$0xff] }
 0x290   :  { %v11534_v55 = vpop.f32.mrf.mxu0  ;;  %v6954_v24 = vld [vmem:[%s19663_s3 + $0xd0] sm:$0xff] }
 0x291   :  { %v11632_v41 = vpop.f32.mrf.mxu1  ;;  %6204 = vst.msk [vmem:[%s19663_s3 + $0xf0] sm:$0xff] %vm877_vm4, %v6140_v23  ;;  %v6143_v8 = vadd.f32 %v11534_v55, %v6079_v43  ;;  %7083 = vst.msk [vmem:[%s19663_s3 + $0xd8] sm:$0xff] %vm877_vm4, %v7019_v33  ;;  %v7018_v46 = vadd.f32 %v6954_v24, %v6739_v35  ;;  %v6089_v23 = vld [vmem:[%s19663_s3 + $0x158] sm:$0xff] }
 0x292   :  { %v5887_v13 = vpop.f32.mrf.mxu0  ;;  %v6957_v12 = vld [vmem:[%s19663_s3 + $0xe8] sm:$0xff] }
 0x293   :  { %v6769_v36 = vpop.f32.mrf.mxu1  ;;  %6207 = vst.msk [vmem:[%s19663_s3 + $0x108] sm:$0xff] %vm877_vm4, %v6143_v8  ;;  %v6142_v0 = vadd.f32 %v6078_v31, %v5887_v13  ;;  %7082 = vst.msk [vmem:[%s19663_s3 + $0xd0] sm:$0xff] %vm877_vm4, %v7018_v46  ;;  %v7021_v48 = vadd.f32 %v11626_v44, %v6957_v12  ;;  %v6088_v8 = vld [vmem:[%s19663_s3 + $0x150] sm:$0xff] }
 0x294   :  { %v11537_v28 = vpop.f32.mrf.mxu0  ;;  %v6956_v50 = vld [vmem:[%s19663_s3 + $0xe0] sm:$0xff] }
 0x295   :  { %v11635_v21 = vpop.f32.mrf.mxu1  ;;  %6206 = vst.msk [vmem:[%s19663_s3 + $0x100] sm:$0xff] %vm877_vm4, %v6142_v0  ;;  %v6145_v22 = vadd.f32 %v11537_v28, %v6081_v5  ;;  %7085 = vst.msk [vmem:[%s19663_s3 + $0xe8] sm:$0xff] %vm877_vm4, %v7021_v48  ;;  %v7020_v7 = vadd.f32 %v6956_v50, %v6749_v45  ;;  %v6091_v0 = vld [vmem:[%s19663_s3 + $0x168] sm:$0xff] }
 0x296   :  { %v5897_v11 = vpop.f32.mrf.mxu0  ;;  %v6959_v1 = vld [vmem:[%s19663_s3 + $0xf8] sm:$0xff] }
 0x297   :  { %v6779_v51 = vpop.f32.mrf.mxu1  ;;  %6209 = vst.msk [vmem:[%s19663_s3 + $0x118] sm:$0xff] %vm877_vm4, %v6145_v22  ;;  %v6144_v59 = vadd.f32 %v6080_v62, %v5897_v11  ;;  %7084 = vst.msk [vmem:[%s19663_s3 + $0xe0] sm:$0xff] %vm877_vm4, %v7020_v7  ;;  %v7023_v34 = vadd.f32 %v11629_v47, %v6959_v1  ;;  %v6090_v22 = vld [vmem:[%s19663_s3 + $0x160] sm:$0xff] }
 0x298   :  { %v11540_v39 = vpop.f32.mrf.mxu0  ;;  %v6958_v56 = vld [vmem:[%s19663_s3 + $0xf0] sm:$0xff] }
 0x299   :  { %v11638_v53 = vpop.f32.mrf.mxu1  ;;  %6208 = vst.msk [vmem:[%s19663_s3 + $0x110] sm:$0xff] %vm877_vm4, %v6144_v59  ;;  %v6147_v17 = vadd.f32 %v11540_v39, %v6083_v9  ;;  %7087 = vst.msk [vmem:[%s19663_s3 + $0xf8] sm:$0xff] %vm877_vm4, %v7023_v34  ;;  %v7022_v60 = vadd.f32 %v6958_v56, %v6759_v30  ;;  %v6093_v59 = vld [vmem:[%s19663_s3 + $0x178] sm:$0xff] }
 0x29a   :  { %v5907_v35 = vpop.f32.mrf.mxu0  ;;  %v6961_v2 = vld [vmem:[%s19663_s3 + $0x108] sm:$0xff] }
 0x29b   :  { %v6789_v20 = vpop.f32.mrf.mxu1  ;;  %6211 = vst.msk [vmem:[%s19663_s3 + $0x128] sm:$0xff] %vm877_vm4, %v6147_v17  ;;  %v6146_v19 = vadd.f32 %v6082_v63, %v5907_v35  ;;  %7086 = vst.msk [vmem:[%s19663_s3 + $0xf0] sm:$0xff] %vm877_vm4, %v7022_v60  ;;  %v7025_v10 = vadd.f32 %v11632_v41, %v6961_v2  ;;  %v6092_v17 = vld [vmem:[%s19663_s3 + $0x170] sm:$0xff] }
 0x29c   :  { %v11543_v44 = vpop.f32.mrf.mxu0  ;;  %v6960_v3 = vld [vmem:[%s19663_s3 + $0x100] sm:$0xff] }
 0x29d   :  { %v11641_v26 = vpop.f32.mrf.mxu1  ;;  %6210 = vst.msk [vmem:[%s19663_s3 + $0x120] sm:$0xff] %vm877_vm4, %v6146_v19  ;;  %v6149_v6 = vadd.f32 %v11543_v44, %v6085_v38  ;;  %7089 = vst.msk [vmem:[%s19663_s3 + $0x108] sm:$0xff] %vm877_vm4, %v7025_v10  ;;  %v7024_v52 = vadd.f32 %v6960_v3, %v6769_v36  ;;  %v6095_v19 = vld [vmem:[%s19663_s3 + $0x188] sm:$0xff] }
 0x29e   :  { %v5917_v18 = vpop.f32.mrf.mxu0  ;;  %v6963_v45 = vld [vmem:[%s19663_s3 + $0x118] sm:$0xff] }
 0x29f   :  { %v6799_v32 = vpop.f32.mrf.mxu1  ;;  %6213 = vst.msk [vmem:[%s19663_s3 + $0x138] sm:$0xff] %vm877_vm4, %v6149_v6  ;;  %v6148_v57 = vadd.f32 %v6084_v29, %v5917_v18  ;;  %7088 = vst.msk [vmem:[%s19663_s3 + $0x100] sm:$0xff] %vm877_vm4, %v7024_v52  ;;  %v7027_v25 = vadd.f32 %v11635_v21, %v6963_v45  ;;  %v6094_v6 = vld [vmem:[%s19663_s3 + $0x180] sm:$0xff] }
 0x2a0   :  { %v11546_v37 = vpop.f32.mrf.mxu0  ;;  %v6962_v47 = vld [vmem:[%s19663_s3 + $0x110] sm:$0xff] }
 0x2a1   :  { %v11644_v14 = vpop.f32.mrf.mxu1  ;;  %6212 = vst.msk [vmem:[%s19663_s3 + $0x130] sm:$0xff] %vm877_vm4, %v6148_v57  ;;  %v6151_v61 = vadd.f32 %v11546_v37, %v6087_v49  ;;  %7091 = vst.msk [vmem:[%s19663_s3 + $0x118] sm:$0xff] %vm877_vm4, %v7027_v25  ;;  %v7026_v15 = vadd.f32 %v6962_v47, %v6779_v51  ;;  %v6097_v57 = vld [vmem:[%s19663_s3 + $0x198] sm:$0xff] }
 0x2a2   :  { %v5927_v54 = vpop.f32.mrf.mxu0  ;;  %v6965_v40 = vld [vmem:[%s19663_s3 + $0x128] sm:$0xff] }
 0x2a3   :  { %v6809_v27 = vpop.f32.mrf.mxu1  ;;  %6215 = vst.msk [vmem:[%s19663_s3 + $0x148] sm:$0xff] %vm877_vm4, %v6151_v61  ;;  %v6150_v30 = vadd.f32 %v6086_v16, %v5927_v54  ;;  %7090 = vst.msk [vmem:[%s19663_s3 + $0x110] sm:$0xff] %vm877_vm4, %v7026_v15  ;;  %v7029_v42 = vadd.f32 %v11638_v53, %v6965_v40  ;;  %v6096_v61 = vld [vmem:[%s19663_s3 + $0x190] sm:$0xff] }
 0x2a4   :  { %v11549_v58 = vpop.f32.mrf.mxu0  ;;  %v6964_v33 = vld [vmem:[%s19663_s3 + $0x120] sm:$0xff] }
 0x2a5   :  { %v11647_v4 = vpop.f32.mrf.mxu1  ;;  %6214 = vst.msk [vmem:[%s19663_s3 + $0x140] sm:$0xff] %vm877_vm4, %v6150_v30  ;;  %v6153_v41 = vadd.f32 %v11549_v58, %v6089_v23  ;;  %7093 = vst.msk [vmem:[%s19663_s3 + $0x128] sm:$0xff] %vm877_vm4, %v7029_v42  ;;  %v7028_v55 = vadd.f32 %v6964_v33, %v6789_v20  ;;  %v6099_v30 = vld [vmem:[%s19663_s3 + $0x1a8] sm:$0xff] }
 0x2a6   :  { %v5937_v24 = vpop.f32.mrf.mxu0  ;;  %v6967_v46 = vld [vmem:[%s19663_s3 + $0x138] sm:$0xff] }
 0x2a7   :  { %v6819_v43 = vpop.f32.mrf.mxu1  ;;  %6217 = vst.msk [vmem:[%s19663_s3 + $0x158] sm:$0xff] %vm877_vm4, %v6153_v41  ;;  %v6152_v36 = vadd.f32 %v6088_v8, %v5937_v24  ;;  %7092 = vst.msk [vmem:[%s19663_s3 + $0x120] sm:$0xff] %vm877_vm4, %v7028_v55  ;;  %v7031_v13 = vadd.f32 %v11641_v26, %v6967_v46  ;;  %v6098_v41 = vld [vmem:[%s19663_s3 + $0x1a0] sm:$0xff] }
 0x2a8   :  { %v11552_v12 = vpop.f32.mrf.mxu0  ;;  %v6966_v48 = vld [vmem:[%s19663_s3 + $0x130] sm:$0xff] }
 0x2a9   :  { %v11650_v31 = vpop.f32.mrf.mxu1  ;;  %6216 = vst.msk [vmem:[%s19663_s3 + $0x150] sm:$0xff] %vm877_vm4, %v6152_v36  ;;  %v6155_v21 = vadd.f32 %v11552_v12, %v6091_v0  ;;  %7095 = vst.msk [vmem:[%s19663_s3 + $0x138] sm:$0xff] %vm877_vm4, %v7031_v13  ;;  %v7030_v28 = vadd.f32 %v6966_v48, %v6799_v32  ;;  %v6101_v36 = vld [vmem:[%s19663_s3 + $0x1b8] sm:$0xff] }
 0x2aa   :  { %v5947_v50 = vpop.f32.mrf.mxu0  ;;  %v6969_v7 = vld [vmem:[%s19663_s3 + $0x148] sm:$0xff] }
 0x2ab   :  { %v6829_v5 = vpop.f32.mrf.mxu1  ;;  %6219 = vst.msk [vmem:[%s19663_s3 + $0x168] sm:$0xff] %vm877_vm4, %v6155_v21  ;;  %v6154_v51 = vadd.f32 %v6090_v22, %v5947_v50  ;;  %7094 = vst.msk [vmem:[%s19663_s3 + $0x130] sm:$0xff] %vm877_vm4, %v7030_v28  ;;  %v7033_v11 = vadd.f32 %v11644_v14, %v6969_v7  ;;  %v6100_v21 = vld [vmem:[%s19663_s3 + $0x1b0] sm:$0xff] }
 0x2ac   :  { %v11555_v1 = vpop.f32.mrf.mxu0  ;;  %v6968_v34 = vld [vmem:[%s19663_s3 + $0x140] sm:$0xff] }
 0x2ad   :  { %v11653_v62 = vpop.f32.mrf.mxu1  ;;  %6218 = vst.msk [vmem:[%s19663_s3 + $0x160] sm:$0xff] %vm877_vm4, %v6154_v51  ;;  %v6157_v53 = vadd.f32 %v11555_v1, %v6093_v59  ;;  %7097 = vst.msk [vmem:[%s19663_s3 + $0x148] sm:$0xff] %vm877_vm4, %v7033_v11  ;;  %v7032_v39 = vadd.f32 %v6968_v34, %v6809_v27  ;;  %v6103_v51 = vld [vmem:[%s19663_s3 + $0x1c8] sm:$0xff] }
 0x2ae   :  { %v5957_v56 = vpop.f32.mrf.mxu0  ;;  %v6971_v60 = vld [vmem:[%s19663_s3 + $0x158] sm:$0xff] }
 0x2af   :  { %v6839_v9 = vpop.f32.mrf.mxu1  ;;  %6221 = vst.msk [vmem:[%s19663_s3 + $0x178] sm:$0xff] %vm877_vm4, %v6157_v53  ;;  %v6156_v20 = vadd.f32 %v6092_v17, %v5957_v56  ;;  %7096 = vst.msk [vmem:[%s19663_s3 + $0x140] sm:$0xff] %vm877_vm4, %v7032_v39  ;;  %v7035_v35 = vadd.f32 %v11647_v4, %v6971_v60  ;;  %v6102_v53 = vld [vmem:[%s19663_s3 + $0x1c0] sm:$0xff] }
 0x2b0   :  { %v11558_v2 = vpop.f32.mrf.mxu0  ;;  %v6970_v10 = vld [vmem:[%s19663_s3 + $0x150] sm:$0xff] }
 0x2b1   :  { %v11656_v63 = vpop.f32.mrf.mxu1  ;;  %6220 = vst.msk [vmem:[%s19663_s3 + $0x170] sm:$0xff] %vm877_vm4, %v6156_v20  ;;  %v6159_v26 = vadd.f32 %v11558_v2, %v6095_v19  ;;  %7099 = vst.msk [vmem:[%s19663_s3 + $0x158] sm:$0xff] %vm877_vm4, %v7035_v35  ;;  %v7034_v44 = vadd.f32 %v6970_v10, %v6819_v43  ;;  %v6105_v20 = vld [vmem:[%s19663_s3 + $0x1d8] sm:$0xff] }
 0x2b2   :  { %v5967_v3 = vpop.f32.mrf.mxu0  ;;  %v6973_v52 = vld [vmem:[%s19663_s3 + $0x168] sm:$0xff] }
 0x2b3   :  { %v6849_v38 = vpop.f32.mrf.mxu1  ;;  %6223 = vst.msk [vmem:[%s19663_s3 + $0x188] sm:$0xff] %vm877_vm4, %v6159_v26  ;;  %v6158_v32 = vadd.f32 %v6094_v6, %v5967_v3  ;;  %7098 = vst.msk [vmem:[%s19663_s3 + $0x150] sm:$0xff] %vm877_vm4, %v7034_v44  ;;  %v7037_v18 = vadd.f32 %v11650_v31, %v6973_v52  ;;  %v6104_v26 = vld [vmem:[%s19663_s3 + $0x1d0] sm:$0xff] }
 0x2b4   :  { %v11561_v45 = vpop.f32.mrf.mxu0  ;;  %v6972_v25 = vld [vmem:[%s19663_s3 + $0x160] sm:$0xff] }
 0x2b5   :  { %v11659_v29 = vpop.f32.mrf.mxu1  ;;  %6222 = vst.msk [vmem:[%s19663_s3 + $0x180] sm:$0xff] %vm877_vm4, %v6158_v32  ;;  %v6161_v14 = vadd.f32 %v11561_v45, %v6097_v57  ;;  %7101 = vst.msk [vmem:[%s19663_s3 + $0x168] sm:$0xff] %vm877_vm4, %v7037_v18  ;;  %v7036_v37 = vadd.f32 %v6972_v25, %v6829_v5  ;;  %v6107_v32 = vld [vmem:[%s19663_s3 + $0x1e8] sm:$0xff] }
 0x2b6   :  { %v5977_v47 = vpop.f32.mrf.mxu0  ;;  %v6975_v15 = vld [vmem:[%s19663_s3 + $0x178] sm:$0xff] }
 0x2b7   :  { %v6859_v49 = vpop.f32.mrf.mxu1  ;;  %6225 = vst.msk [vmem:[%s19663_s3 + $0x198] sm:$0xff] %vm877_vm4, %v6161_v14  ;;  %v6160_v27 = vadd.f32 %v6096_v61, %v5977_v47  ;;  %7100 = vst.msk [vmem:[%s19663_s3 + $0x160] sm:$0xff] %vm877_vm4, %v7036_v37  ;;  %v7039_v54 = vadd.f32 %v11653_v62, %v6975_v15  ;;  %v6106_v14 = vld [vmem:[%s19663_s3 + $0x1e0] sm:$0xff] }
 0x2b8   :  { %v11564_v40 = vpop.f32.mrf.mxu0  ;;  %v6974_v42 = vld [vmem:[%s19663_s3 + $0x170] sm:$0xff] }
 0x2b9   :  { %v11662_v16 = vpop.f32.mrf.mxu1  ;;  %6224 = vst.msk [vmem:[%s19663_s3 + $0x190] sm:$0xff] %vm877_vm4, %v6160_v27  ;;  %v6163_v4 = vadd.f32 %v11564_v40, %v6099_v30  ;;  %7103 = vst.msk [vmem:[%s19663_s3 + $0x178] sm:$0xff] %vm877_vm4, %v7039_v54  ;;  %v7038_v58 = vadd.f32 %v6974_v42, %v6839_v9  ;;  %v6109_v27 = vld [vmem:[%s19663_s3 + $0x1f8] sm:$0xff] }
 0x2ba   :  { %v5987_v33 = vpop.f32.mrf.mxu0  ;;  %v6977_v55 = vld [vmem:[%s19663_s3 + $0x188] sm:$0xff] }
 0x2bb   :  { %v6869_v23 = vpop.f32.mrf.mxu1  ;;  %6227 = vst.msk [vmem:[%s19663_s3 + $0x1a8] sm:$0xff] %vm877_vm4, %v6163_v4  ;;  %v6162_v43 = vadd.f32 %v6098_v41, %v5987_v33  ;;  %7102 = vst.msk [vmem:[%s19663_s3 + $0x170] sm:$0xff] %vm877_vm4, %v7038_v58  ;;  %v7041_v24 = vadd.f32 %v11656_v63, %v6977_v55  ;;  %v6108_v4 = vld [vmem:[%s19663_s3 + $0x1f0] sm:$0xff] }
 0x2bc   :  { %v11567_v46 = vpop.f32.mrf.mxu0  ;;  %v6976_v13 = vld [vmem:[%s19663_s3 + $0x180] sm:$0xff] }
 0x2bd   :  { %v11665_v8 = vpop.f32.mrf.mxu1  ;;  %6226 = vst.msk [vmem:[%s19663_s3 + $0x1a0] sm:$0xff] %vm877_vm4, %v6162_v43  ;;  %v6165_v31 = vadd.f32 %v11567_v46, %v6101_v36  ;;  %7105 = vst.msk [vmem:[%s19663_s3 + $0x188] sm:$0xff] %vm877_vm4, %v7041_v24  ;;  %v7040_v12 = vadd.f32 %v6976_v13, %v6849_v38  ;;  %v7811_v43 = vld [vmem:[%s19663_s3 + $0x8] sm:$0xff] }
 0x2be   :  { %v5997_v48 = vpop.f32.mrf.mxu0  ;;  %v6979_v28 = vld [vmem:[%s19663_s3 + $0x198] sm:$0xff] }
 0x2bf   :  { %v6879_v0 = vpop.f32.mrf.mxu1  ;;  %6229 = vst.msk [vmem:[%s19663_s3 + $0x1b8] sm:$0xff] %vm877_vm4, %v6165_v31  ;;  %v6164_v5 = vadd.f32 %v6100_v21, %v5997_v48  ;;  %7104 = vst.msk [vmem:[%s19663_s3 + $0x180] sm:$0xff] %vm877_vm4, %v7040_v12  ;;  %v7043_v50 = vadd.f32 %v11659_v29, %v6979_v28  ;;  %v7810_v31 = vld [vmem:[%s19663_s3] sm:$0xff] }
 0x2c0   :  { %v11570_v7 = vpop.f32.mrf.mxu0  ;;  %v6978_v11 = vld [vmem:[%s19663_s3 + $0x190] sm:$0xff] }
 0x2c1   :  { %v11668_v22 = vpop.f32.mrf.mxu1  ;;  %6228 = vst.msk [vmem:[%s19663_s3 + $0x1b0] sm:$0xff] %vm877_vm4, %v6164_v5  ;;  %v6167_v62 = vadd.f32 %v11570_v7, %v6103_v51  ;;  %7107 = vst.msk [vmem:[%s19663_s3 + $0x198] sm:$0xff] %vm877_vm4, %v7043_v50  ;;  %v7042_v1 = vadd.f32 %v6978_v11, %v6859_v49  ;;  %v7813_v5 = vld [vmem:[%s19663_s3 + $0x18] sm:$0xff] }
 0x2c2   :  { %v6007_v34 = vpop.f32.mrf.mxu0  ;;  %v6981_v39 = vld [vmem:[%s19663_s3 + $0x1a8] sm:$0xff] }
 0x2c3   :  { %v6889_v59 = vpop.f32.mrf.mxu1  ;;  %6231 = vst.msk [vmem:[%s19663_s3 + $0x1c8] sm:$0xff] %vm877_vm4, %v6167_v62  ;;  %v6166_v9 = vadd.f32 %v6102_v53, %v6007_v34  ;;  %7106 = vst.msk [vmem:[%s19663_s3 + $0x190] sm:$0xff] %vm877_vm4, %v7042_v1  ;;  %v7045_v56 = vadd.f32 %v11662_v16, %v6981_v39  ;;  %v7812_v62 = vld [vmem:[%s19663_s3 + $0x10] sm:$0xff] }
 0x2c4   :  { %v11573_v60 = vpop.f32.mrf.mxu0  ;;  %v6980_v35 = vld [vmem:[%s19663_s3 + $0x1a0] sm:$0xff] }
 0x2c5   :  { %v11671_v17 = vpop.f32.mrf.mxu1  ;;  %6230 = vst.msk [vmem:[%s19663_s3 + $0x1c0] sm:$0xff] %vm877_vm4, %v6166_v9  ;;  %v6169_v63 = vadd.f32 %v11573_v60, %v6105_v20  ;;  %7109 = vst.msk [vmem:[%s19663_s3 + $0x1a8] sm:$0xff] %vm877_vm4, %v7045_v56  ;;  %v7044_v2 = vadd.f32 %v6980_v35, %v6869_v23  ;;  %v7815_v56 = vld [vmem:[%s19663_s3 + $0x28] sm:$0xff] }
 0x2c6   :  { %v6017_v10 = vpop.f32.mrf.mxu0  ;;  %v6983_v44 = vld [vmem:[%s19663_s3 + $0x1b8] sm:$0xff] }
 0x2c7   :  { %v6899_v19 = vpop.f32.mrf.mxu1  ;;  %6233 = vst.msk [vmem:[%s19663_s3 + $0x1d8] sm:$0xff] %vm877_vm4, %v6169_v63  ;;  %v6168_v38 = vadd.f32 %v6104_v26, %v6017_v10  ;;  %7108 = vst.msk [vmem:[%s19663_s3 + $0x1a0] sm:$0xff] %vm877_vm4, %v7044_v2  ;;  %v7047_v3 = vadd.f32 %v11665_v8, %v6983_v44  ;;  %v7814_v10 = vld [vmem:[%s19663_s3 + $0x20] sm:$0xff] }
 0x2c8   :  { %v11576_v52 = vpop.f32.mrf.mxu0  ;;  %v6982_v18 = vld [vmem:[%s19663_s3 + $0x1b0] sm:$0xff] }
 0x2c9   :  { %v11674_v6 = vpop.f32.mrf.mxu1  ;;  %6232 = vst.msk [vmem:[%s19663_s3 + $0x1d0] sm:$0xff] %vm877_vm4, %v6168_v38  ;;  %v6171_v29 = vadd.f32 %v11576_v52, %v6107_v32  ;;  %7111 = vst.msk [vmem:[%s19663_s3 + $0x1b8] sm:$0xff] %vm877_vm4, %v7047_v3  ;;  %v7046_v45 = vadd.f32 %v6982_v18, %v6879_v0  ;;  %v7817_v38 = vld [vmem:[%s19663_s3 + $0x38] sm:$0xff] }
 0x2ca   :  { %v6027_v25 = vpop.f32.mrf.mxu0  ;;  %v6985_v37 = vld [vmem:[%s19663_s3 + $0x1c8] sm:$0xff] }
 0x2cb   :  { %v6909_v57 = vpop.f32.mrf.mxu1  ;;  %6235 = vst.msk [vmem:[%s19663_s3 + $0x1e8] sm:$0xff] %vm877_vm4, %v6171_v29  ;;  %v6170_v49 = vadd.f32 %v6106_v14, %v6027_v25  ;;  %7110 = vst.msk [vmem:[%s19663_s3 + $0x1b0] sm:$0xff] %vm877_vm4, %v7046_v45  ;;  %v7049_v47 = vadd.f32 %v11668_v22, %v6985_v37 }
 0x2cc   :  { %v11579_v15 = vpop.f32.mrf.mxu0  ;;  %v6984_v54 = vld [vmem:[%s19663_s3 + $0x1c0] sm:$0xff] }
 0x2cd   :  { %v11677_v61 = vpop.f32.mrf.mxu1  ;;  %6234 = vst.msk [vmem:[%s19663_s3 + $0x1e0] sm:$0xff] %vm877_vm4, %v6170_v49  ;;  %v6173_v16 = vadd.f32 %v11579_v15, %v6109_v27  ;;  %7113 = vst.msk [vmem:[%s19663_s3 + $0x1c8] sm:$0xff] %vm877_vm4, %v7049_v47  ;;  %v7048_v40 = vadd.f32 %v6984_v54, %v6889_v59  ;;  %v7816_v49 = vld [vmem:[%s19663_s3 + $0x30] sm:$0xff]  ;;  %v7819_v54 = vld [vmem:[%s19663_s3 + $0x48] sm:$0xff] }
 0x2ce   :  { %v6037_v42 = vpop.f32.mrf.mxu0  ;;  %v6987_v58 = vld [vmem:[%s19663_s3 + $0x1d8] sm:$0xff] }
 0x2cf   :  { %v6919_v30 = vpop.f32.mrf.mxu1  ;;  %6237 = vst.msk [vmem:[%s19663_s3 + $0x1f8] sm:$0xff] %vm877_vm4, %v6173_v16  ;;  %v6172_v23 = vadd.f32 %v6108_v4, %v6037_v42  ;;  %7112 = vst.msk [vmem:[%s19663_s3 + $0x1c0] sm:$0xff] %vm877_vm4, %v7048_v40  ;;  %v7051_v33 = vadd.f32 %v11671_v17, %v6987_v58 }
 0x2d0   :  { %v11682_v55 = vpop.f32.mrf.mxu0  ;;  %v6986_v24 = vld [vmem:[%s19663_s3 + $0x1d0] sm:$0xff] }
 0x2d1   :  { %v11780_v41 = vpop.f32.mrf.mxu1  ;;  %6236 = vst.msk [vmem:[%s19663_s3 + $0x1f0] sm:$0xff] %vm877_vm4, %v6172_v23  ;;  %v7875_v8 = vadd.f32 %v11682_v55, %v7811_v43  ;;  %7115 = vst.msk [vmem:[%s19663_s3 + $0x1d8] sm:$0xff] %vm877_vm4, %v7051_v33  ;;  %v7050_v46 = vadd.f32 %v6986_v24, %v6899_v19 }
 0x2d2   :  { %9049 = vst.msk [vmem:[%s19665_s5 + $0x8] sm:$0xff] %vm877_vm4, %v11780_v41  ;;  %v7491_v13 = vpop.f32.mrf.mxu0  ;;  %v6989_v12 = vld [vmem:[%s19663_s3 + $0x1e8] sm:$0xff] }
 0x2d3   :  { %v8729_v36 = vpop.f32.mrf.mxu1  ;;  %7939 = vst.msk [vmem:[%s19663_s3 + $0x8] sm:$0xff] %vm877_vm4, %v7875_v8  ;;  %v7874_v0 = vadd.f32 %v7810_v31, %v7491_v13  ;;  %7114 = vst.msk [vmem:[%s19663_s3 + $0x1d0] sm:$0xff] %vm877_vm4, %v7050_v46  ;;  %v7053_v48 = vadd.f32 %v11674_v6, %v6989_v12 }
 0x2d4   :  { %9048 = vst.msk [vmem:[%s19665_s5] sm:$0xff] %vm877_vm4, %v8729_v36  ;;  %v11685_v28 = vpop.f32.mrf.mxu0  ;;  %v6988_v50 = vld [vmem:[%s19663_s3 + $0x1e0] sm:$0xff] }
 0x2d5   :  { %v11783_v21 = vpop.f32.mrf.mxu1  ;;  %7938 = vst.msk [vmem:[%s19663_s3] sm:$0xff] %vm877_vm4, %v7874_v0  ;;  %v7877_v22 = vadd.f32 %v11685_v28, %v7813_v5  ;;  %7117 = vst.msk [vmem:[%s19663_s3 + $0x1e8] sm:$0xff] %vm877_vm4, %v7053_v48  ;;  %v7052_v7 = vadd.f32 %v6988_v50, %v6909_v57  ;;  %v7818_v36 = vld [vmem:[%s19663_s3 + $0x40] sm:$0xff]  ;;  %v7821_v48 = vld [vmem:[%s19663_s3 + $0x58] sm:$0xff] }
 0x2d6   :  { %9051 = vst.msk [vmem:[%s19665_s5 + $0x18] sm:$0xff] %vm877_vm4, %v11783_v21  ;;  %v7501_v11 = vpop.f32.mrf.mxu0  ;;  %v6991_v1 = vld [vmem:[%s19663_s3 + $0x1f8] sm:$0xff] }
 0x2d7   :  { %v8739_v51 = vpop.f32.mrf.mxu1  ;;  %7941 = vst.msk [vmem:[%s19663_s3 + $0x18] sm:$0xff] %vm877_vm4, %v7877_v22  ;;  %v7876_v59 = vadd.f32 %v7812_v62, %v7501_v11  ;;  %7116 = vst.msk [vmem:[%s19663_s3 + $0x1e0] sm:$0xff] %vm877_vm4, %v7052_v7  ;;  %v7055_v34 = vadd.f32 %v11677_v61, %v6991_v1 }
 0x2d8   :  { %9050 = vst.msk [vmem:[%s19665_s5 + $0x10] sm:$0xff] %vm877_vm4, %v8739_v51  ;;  %v11688_v9 = vpop.f32.mrf.mxu0  ;;  %v6990_v17 = vld [vmem:[%s19663_s3 + $0x1f0] sm:$0xff] }
 0x2d9   :  { %v9113_v53 = vld [vmem:[%s19665_s5 + $0x8] sm:$0xff]  ;;  %v11786_v39 = vpop.f32.mrf.mxu1  ;;  %7940 = vst.msk [vmem:[%s19663_s3 + $0x10] sm:$0xff] %vm877_vm4, %v7876_v59  ;;  %v7879_v20 = vadd.f32 %v11688_v9, %v7815_v56  ;;  %7119 = vst.msk [vmem:[%s19663_s3 + $0x1f8] sm:$0xff] %vm877_vm4, %v7055_v34  ;;  %v7054_v35 = vadd.f32 %v6990_v17, %v6919_v30  ;;  %v7820_v9 = vld [vmem:[%s19663_s3 + $0x50] sm:$0xff] }
 0x2da   :  { %v9177_v60 = vsel %vm877_vm4, %v9113_v53, 0.0  ;;  %9053 = vst.msk [vmem:[%s19665_s5 + $0x28] sm:$0xff] %vm877_vm4, %v11786_v39  ;;  %v7511_v19 = vpop.f32.mrf.mxu0  ;;  %v8003_v3 = vld [vmem:[%s19663_s3 + $0x8] sm:$0xff] }
 0x2db   :  { %v9112_v63 = vld [vmem:[%s19665_s5] sm:$0xff]  ;;  %v8749_v2 = vpop.f32.mrf.mxu1  ;;  %7943 = vst.msk [vmem:[%s19663_s3 + $0x28] sm:$0xff] %vm877_vm4, %v7879_v20  ;;  %v7878_v44 = vadd.f32 %v7814_v10, %v7511_v19  ;;  %7118 = vst.msk [vmem:[%s19663_s3 + $0x1f0] sm:$0xff] %vm877_vm4, %v7054_v35  ;;  %v8067_v47 = vsel %vm877_vm4, %v8003_v3, 0.0  ;;  %v7823_v35 = vld [vmem:[%s19663_s3 + $0x68] sm:$0xff] }
 0x2dc   :  { %v9176_v26 = vsel %vm877_vm4, %v9112_v63, 0.0  ;;  %9052 = vst.msk [vmem:[%s19665_s5 + $0x20] sm:$0xff] %vm877_vm4, %v8749_v2  ;;  %v8002_v52 = vld [vmem:[%s19663_s3] sm:$0xff]  ;;  %v11691_v29 = vpop.f32.mrf.mxu0 }
 0x2dd   :  { %v9178_v6 = vadd.f32 %v9177_v60, %v9176_v26  ;;  %v9115_v32 = vld [vmem:[%s19665_s5 + $0x18] sm:$0xff]  ;;  %v11789_v18 = vpop.f32.mrf.mxu1  ;;  %v8066_v45 = vsel %vm877_vm4, %v8002_v52, 0.0  ;;  %7942 = vst.msk [vmem:[%s19663_s3 + $0x20] sm:$0xff] %vm877_vm4, %v7878_v44  ;;  %v7881_v57 = vadd.f32 %v11691_v29, %v7817_v38 }
 0x2de   :  { %9055 = vst.msk [vmem:[%s19665_s5 + $0x38] sm:$0xff] %vm877_vm4, %v11789_v18  ;;  %v7521_v37 = vpop.f32.mrf.mxu0  ;;  %v9181_v61 = vsel %vm877_vm4, %v9115_v32, 0.0  ;;  %v8068_v16 = vadd.f32 %v8067_v47, %v8066_v45  ;;  %v8005_v40 = vld [vmem:[%s19663_s3 + $0x18] sm:$0xff] }
 0x2df   :  { %v9114_v25 = vld [vmem:[%s19665_s5 + $0x10] sm:$0xff]  ;;  %v8759_v14 = vpop.f32.mrf.mxu1  ;;  %7945 = vst.msk [vmem:[%s19663_s3 + $0x38] sm:$0xff] %vm877_vm4, %v7881_v57  ;;  %v7880_v27 = vadd.f32 %v7816_v49, %v7521_v37  ;;  %v8071_v13 = vsel %vm877_vm4, %v8005_v40, 0.0  ;;  %v7822_v57 = vld [vmem:[%s19663_s3 + $0x60] sm:$0xff]  ;;  %v7825_v47 = vld [vmem:[%s19663_s3 + $0x78] sm:$0xff] }
 0x2e0   :  { %v9179_v15 = vsel %vm877_vm4, %v9114_v25, 0.0  ;;  %9054 = vst.msk [vmem:[%s19665_s5 + $0x30] sm:$0xff] %vm877_vm4, %v8759_v14  ;;  %v8004_v42 = vld [vmem:[%s19663_s3 + $0x10] sm:$0xff]  ;;  %v11694_v23 = vpop.f32.mrf.mxu0 }
 0x2e1   :  { %v9180_v30 = vadd.f32 %v9179_v15, %v9178_v6  ;;  %v9117_v4 = vld [vmem:[%s19665_s5 + $0x28] sm:$0xff]  ;;  %v11792_v58 = vpop.f32.mrf.mxu1  ;;  %v8069_v33 = vsel %vm877_vm4, %v8004_v42, 0.0  ;;  %7944 = vst.msk [vmem:[%s19663_s3 + $0x30] sm:$0xff] %vm877_vm4, %v7880_v27  ;;  %v7883_v41 = vadd.f32 %v11694_v23, %v7819_v54 }
 0x2e2   :  { %9057 = vst.msk [vmem:[%s19665_s5 + $0x48] sm:$0xff] %vm877_vm4, %v11792_v58  ;;  %v8070_v55 = vadd.f32 %v8069_v33, %v8068_v16  ;;  %v7531_v46 = vpop.f32.mrf.mxu0  ;;  %v9185_v31 = vsel %vm877_vm4, %v9117_v4, 0.0  ;;  %v8007_v21 = vld [vmem:[%s19663_s3 + $0x28] sm:$0xff] }
 0x2e3   :  { %v9116_v43 = vld [vmem:[%s19665_s5 + $0x20] sm:$0xff]  ;;  %v9182_v24 = vadd.f32 %v9181_v61, %v9180_v30  ;;  %v8769_v8 = vpop.f32.mrf.mxu1  ;;  %7947 = vst.msk [vmem:[%s19663_s3 + $0x48] sm:$0xff] %vm877_vm4, %v7883_v41  ;;  %v7882_v0 = vadd.f32 %v7818_v36, %v7531_v46  ;;  %v8075_v56 = vsel %vm877_vm4, %v8007_v21, 0.0 }
 0x2e4   :  { %v9183_v12 = vsel %vm877_vm4, %v9116_v43, 0.0  ;;  %9056 = vst.msk [vmem:[%s19665_s5 + $0x40] sm:$0xff] %vm877_vm4, %v8769_v8  ;;  %v8006_v5 = vld [vmem:[%s19663_s3 + $0x20] sm:$0xff]  ;;  %v8072_v50 = vadd.f32 %v8071_v13, %v8070_v55  ;;  %v11697_v51 = vpop.f32.mrf.mxu0  ;;  %v7824_v43 = vld [vmem:[%s19663_s3 + $0x70] sm:$0xff]  ;;  %v7827_v13 = vld [vmem:[%s19663_s3 + $0x88] sm:$0xff] }
 0x2e5   :  { %v9184_v28 = vadd.f32 %v9183_v12, %v9182_v24  ;;  %v9119_v22 = vld [vmem:[%s19665_s5 + $0x38] sm:$0xff]  ;;  %v11795_v7 = vpop.f32.mrf.mxu1  ;;  %v8073_v11 = vsel %vm877_vm4, %v8006_v5, 0.0  ;;  %7946 = vst.msk [vmem:[%s19663_s3 + $0x40] sm:$0xff] %vm877_vm4, %v7882_v0  ;;  %v7885_v62 = vadd.f32 %v11697_v51, %v7821_v48 }
 0x2e6   :  { %9059 = vst.msk [vmem:[%s19665_s5 + $0x58] sm:$0xff] %vm877_vm4, %v11795_v7  ;;  %v8074_v1 = vadd.f32 %v8073_v11, %v8072_v50  ;;  %v7541_v39 = vpop.f32.mrf.mxu0  ;;  %v9189_v17 = vsel %vm877_vm4, %v9119_v22, 0.0  ;;  %v8009_v63 = vld [vmem:[%s19663_s3 + $0x38] sm:$0xff] }
 0x2e7   :  { %v9118_v59 = vld [vmem:[%s19665_s5 + $0x30] sm:$0xff]  ;;  %v9186_v34 = vadd.f32 %v9185_v31, %v9184_v28  ;;  %v8779_v53 = vpop.f32.mrf.mxu1  ;;  %7949 = vst.msk [vmem:[%s19663_s3 + $0x58] sm:$0xff] %vm877_vm4, %v7885_v62  ;;  %v7884_v20 = vadd.f32 %v7820_v9, %v7541_v39  ;;  %v8079_v25 = vsel %vm877_vm4, %v8009_v63, 0.0 }
 0x2e8   :  { %v9187_v60 = vsel %vm877_vm4, %v9118_v59, 0.0  ;;  %9058 = vst.msk [vmem:[%s19665_s5 + $0x50] sm:$0xff] %vm877_vm4, %v8779_v53  ;;  %v8008_v19 = vld [vmem:[%s19663_s3 + $0x30] sm:$0xff]  ;;  %v8076_v10 = vadd.f32 %v8075_v56, %v8074_v1  ;;  %v11700_v38 = vpop.f32.mrf.mxu0  ;;  %v7826_v59 = vld [vmem:[%s19663_s3 + $0x80] sm:$0xff]  ;;  %v7829_v56 = vld [vmem:[%s19663_s3 + $0x98] sm:$0xff] }
 0x2e9   :  { %v9188_v2 = vadd.f32 %v9187_v60, %v9186_v34  ;;  %v9121_v26 = vld [vmem:[%s19665_s5 + $0x48] sm:$0xff]  ;;  %v11798_v44 = vpop.f32.mrf.mxu1  ;;  %v8077_v3 = vsel %vm877_vm4, %v8008_v19, 0.0  ;;  %7948 = vst.msk [vmem:[%s19663_s3 + $0x50] sm:$0xff] %vm877_vm4, %v7884_v20  ;;  %v7887_v6 = vadd.f32 %v11700_v38, %v7823_v35 }
 0x2ea   :  { %9061 = vst.msk [vmem:[%s19665_s5 + $0x68] sm:$0xff] %vm877_vm4, %v11798_v44  ;;  %v8078_v52 = vadd.f32 %v8077_v3, %v8076_v10  ;;  %v7551_v45 = vpop.f32.mrf.mxu0  ;;  %v9193_v14 = vsel %vm877_vm4, %v9121_v26, 0.0  ;;  %v8011_v61 = vld [vmem:[%s19663_s3 + $0x48] sm:$0xff] }
 0x2eb   :  { %v9120_v32 = vld [vmem:[%s19665_s5 + $0x40] sm:$0xff]  ;;  %v9190_v18 = vadd.f32 %v9189_v17, %v9188_v2  ;;  %v8789_v29 = vpop.f32.mrf.mxu1  ;;  %7951 = vst.msk [vmem:[%s19663_s3 + $0x68] sm:$0xff] %vm877_vm4, %v7887_v6  ;;  %v7886_v49 = vadd.f32 %v7822_v57, %v7551_v45  ;;  %v8083_v24 = vsel %vm877_vm4, %v8011_v61, 0.0 }
 0x2ec   :  { %v9191_v37 = vsel %vm877_vm4, %v9120_v32, 0.0  ;;  %9060 = vst.msk [vmem:[%s19665_s5 + $0x60] sm:$0xff] %vm877_vm4, %v8789_v29  ;;  %v8010_v27 = vld [vmem:[%s19663_s3 + $0x40] sm:$0xff]  ;;  %v8080_v54 = vadd.f32 %v8079_v25, %v8078_v52  ;;  %v11703_v30 = vpop.f32.mrf.mxu0  ;;  %v7828_v32 = vld [vmem:[%s19663_s3 + $0x90] sm:$0xff]  ;;  %v7831_v25 = vld [vmem:[%s19663_s3 + $0xa8] sm:$0xff] }
 0x2ed   :  { %v9192_v15 = vadd.f32 %v9191_v37, %v9190_v18  ;;  %v9123_v16 = vld [vmem:[%s19665_s5 + $0x58] sm:$0xff]  ;;  %v11801_v40 = vpop.f32.mrf.mxu1  ;;  %v8081_v42 = vsel %vm877_vm4, %v8010_v27, 0.0  ;;  %7950 = vst.msk [vmem:[%s19663_s3 + $0x60] sm:$0xff] %vm877_vm4, %v7886_v49  ;;  %v7889_v4 = vadd.f32 %v11703_v30, %v7825_v47 }
 0x2ee   :  { %9063 = vst.msk [vmem:[%s19665_s5 + $0x78] sm:$0xff] %vm877_vm4, %v11801_v40  ;;  %v8082_v58 = vadd.f32 %v8081_v42, %v8080_v54  ;;  %v7561_v55 = vpop.f32.mrf.mxu0  ;;  %v9197_v8 = vsel %vm877_vm4, %v9123_v16, 0.0  ;;  %v8013_v31 = vld [vmem:[%s19663_s3 + $0x58] sm:$0xff] }
 0x2ef   :  { %v9122_v23 = vld [vmem:[%s19665_s5 + $0x50] sm:$0xff]  ;;  %v9194_v33 = vadd.f32 %v9193_v14, %v9192_v15  ;;  %v8799_v41 = vpop.f32.mrf.mxu1  ;;  %7953 = vst.msk [vmem:[%s19663_s3 + $0x78] sm:$0xff] %vm877_vm4, %v7889_v4  ;;  %v7888_v36 = vadd.f32 %v7824_v43, %v7561_v55  ;;  %v8087_v34 = vsel %vm877_vm4, %v8013_v31, 0.0 }
 0x2f0   :  { %v9195_v46 = vsel %vm877_vm4, %v9122_v23, 0.0  ;;  %9062 = vst.msk [vmem:[%s19665_s5 + $0x70] sm:$0xff] %vm877_vm4, %v8799_v41  ;;  %v8012_v0 = vld [vmem:[%s19663_s3 + $0x50] sm:$0xff]  ;;  %v8084_v48 = vadd.f32 %v8083_v24, %v8082_v58  ;;  %v11706_v5 = vpop.f32.mrf.mxu0  ;;  %v7830_v23 = vld [vmem:[%s19663_s3 + $0xa0] sm:$0xff]  ;;  %v7833_v24 = vld [vmem:[%s19663_s3 + $0xb8] sm:$0xff] }
 0x2f1   :  { %v9196_v12 = vadd.f32 %v9195_v46, %v9194_v33  ;;  %v9125_v21 = vld [vmem:[%s19665_s5 + $0x68] sm:$0xff]  ;;  %v11804_v28 = vpop.f32.mrf.mxu1  ;;  %v8085_v50 = vsel %vm877_vm4, %v8012_v0, 0.0  ;;  %7952 = vst.msk [vmem:[%s19663_s3 + $0x70] sm:$0xff] %vm877_vm4, %v7888_v36  ;;  %v7891_v22 = vadd.f32 %v11706_v5, %v7827_v13 }
 0x2f2   :  { %9065 = vst.msk [vmem:[%s19665_s5 + $0x88] sm:$0xff] %vm877_vm4, %v11804_v28  ;;  %v8086_v7 = vadd.f32 %v8085_v50, %v8084_v48  ;;  %v7571_v1 = vpop.f32.mrf.mxu0  ;;  %v9201_v53 = vsel %vm877_vm4, %v9125_v21, 0.0  ;;  %v8015_v17 = vld [vmem:[%s19663_s3 + $0x68] sm:$0xff] }
 0x2f3   :  { %v9124_v51 = vld [vmem:[%s19665_s5 + $0x60] sm:$0xff]  ;;  %v9198_v11 = vadd.f32 %v9197_v8, %v9196_v12  ;;  %v8809_v62 = vpop.f32.mrf.mxu1  ;;  %7955 = vst.msk [vmem:[%s19663_s3 + $0x88] sm:$0xff] %vm877_vm4, %v7891_v22  ;;  %v7890_v9 = vadd.f32 %v7826_v59, %v7571_v1  ;;  %v8091_v18 = vsel %vm877_vm4, %v8015_v17, 0.0 }
 0x2f4   :  { %v9199_v39 = vsel %vm877_vm4, %v9124_v51, 0.0  ;;  %9064 = vst.msk [vmem:[%s19665_s5 + $0x80] sm:$0xff] %vm877_vm4, %v8809_v62  ;;  %v8014_v20 = vld [vmem:[%s19663_s3 + $0x60] sm:$0xff]  ;;  %v8088_v35 = vadd.f32 %v8087_v34, %v8086_v7  ;;  %v11709_v19 = vpop.f32.mrf.mxu0  ;;  %v7832_v51 = vld [vmem:[%s19663_s3 + $0xb0] sm:$0xff]  ;;  %v7835_v34 = vld [vmem:[%s19663_s3 + $0xc8] sm:$0xff] }
 0x2f5   :  { %v9200_v60 = vadd.f32 %v9199_v39, %v9198_v11  ;;  %v9127_v63 = vld [vmem:[%s19665_s5 + $0x78] sm:$0xff]  ;;  %v11807_v2 = vpop.f32.mrf.mxu1  ;;  %v8089_v10 = vsel %vm877_vm4, %v8014_v20, 0.0  ;;  %7954 = vst.msk [vmem:[%s19663_s3 + $0x80] sm:$0xff] %vm877_vm4, %v7890_v9  ;;  %v7893_v26 = vadd.f32 %v11709_v19, %v7829_v56 }
 0x2f6   :  { %9067 = vst.msk [vmem:[%s19665_s5 + $0x98] sm:$0xff] %vm877_vm4, %v11807_v2  ;;  %v8090_v44 = vadd.f32 %v8089_v10, %v8088_v35  ;;  %v7581_v52 = vpop.f32.mrf.mxu0  ;;  %v9205_v29 = vsel %vm877_vm4, %v9127_v63, 0.0  ;;  %v8017_v14 = vld [vmem:[%s19663_s3 + $0x78] sm:$0xff] }
 0x2f7   :  { %v9126_v38 = vld [vmem:[%s19665_s5 + $0x70] sm:$0xff]  ;;  %v9202_v3 = vadd.f32 %v9201_v53, %v9200_v60  ;;  %v8819_v6 = vpop.f32.mrf.mxu1  ;;  %7957 = vst.msk [vmem:[%s19663_s3 + $0x98] sm:$0xff] %vm877_vm4, %v7893_v26  ;;  %v7892_v57 = vadd.f32 %v7828_v32, %v7581_v52  ;;  %v8095_v33 = vsel %vm877_vm4, %v8017_v14, 0.0 }
 0x2f8   :  { %v9203_v45 = vsel %vm877_vm4, %v9126_v38, 0.0  ;;  %9066 = vst.msk [vmem:[%s19665_s5 + $0x90] sm:$0xff] %vm877_vm4, %v8819_v6  ;;  %v8016_v49 = vld [vmem:[%s19663_s3 + $0x70] sm:$0xff]  ;;  %v8092_v47 = vadd.f32 %v8091_v18, %v8090_v44  ;;  %v11712_v27 = vpop.f32.mrf.mxu0  ;;  %v7834_v38 = vld [vmem:[%s19663_s3 + $0xc0] sm:$0xff]  ;;  %v7837_v18 = vld [vmem:[%s19663_s3 + $0xd8] sm:$0xff] }
 0x2f9   :  { %v9204_v37 = vadd.f32 %v9203_v45, %v9202_v3  ;;  %v9129_v61 = vld [vmem:[%s19665_s5 + $0x88] sm:$0xff]  ;;  %v11810_v15 = vpop.f32.mrf.mxu1  ;;  %v8093_v54 = vsel %vm877_vm4, %v8016_v49, 0.0  ;;  %7956 = vst.msk [vmem:[%s19663_s3 + $0x90] sm:$0xff] %vm877_vm4, %v7892_v57  ;;  %v7895_v16 = vadd.f32 %v11712_v27, %v7831_v25 }
 0x2fa   :  { %9069 = vst.msk [vmem:[%s19665_s5 + $0xa8] sm:$0xff] %vm877_vm4, %v11810_v15  ;;  %v8094_v40 = vadd.f32 %v8093_v54, %v8092_v47  ;;  %v7591_v58 = vpop.f32.mrf.mxu0  ;;  %v9209_v41 = vsel %vm877_vm4, %v9129_v61, 0.0  ;;  %v8019_v8 = vld [vmem:[%s19663_s3 + $0x88] sm:$0xff] }
 0x2fb   :  { %v9128_v30 = vld [vmem:[%s19665_s5 + $0x80] sm:$0xff]  ;;  %v9206_v42 = vadd.f32 %v9205_v29, %v9204_v37  ;;  %v8829_v4 = vpop.f32.mrf.mxu1  ;;  %7959 = vst.msk [vmem:[%s19663_s3 + $0xa8] sm:$0xff] %vm877_vm4, %v7895_v16  ;;  %v7894_v43 = vadd.f32 %v7830_v23, %v7591_v58  ;;  %v8099_v11 = vsel %vm877_vm4, %v8019_v8, 0.0 }
 0x2fc   :  { %v9207_v55 = vsel %vm877_vm4, %v9128_v30, 0.0  ;;  %9068 = vst.msk [vmem:[%s19665_s5 + $0xa0] sm:$0xff] %vm877_vm4, %v8829_v4  ;;  %v8018_v36 = vld [vmem:[%s19663_s3 + $0x80] sm:$0xff]  ;;  %v8096_v13 = vadd.f32 %v8095_v33, %v8094_v40  ;;  %v11715_v0 = vpop.f32.mrf.mxu0  ;;  %v7836_v30 = vld [vmem:[%s19663_s3 + $0xd0] sm:$0xff]  ;;  %v7839_v33 = vld [vmem:[%s19663_s3 + $0xe8] sm:$0xff] }
 0x2fd   :  { %v9208_v46 = vadd.f32 %v9207_v55, %v9206_v42  ;;  %v9131_v31 = vld [vmem:[%s19665_s5 + $0x98] sm:$0xff]  ;;  %v11813_v12 = vpop.f32.mrf.mxu1  ;;  %v8097_v48 = vsel %vm877_vm4, %v8018_v36, 0.0  ;;  %7958 = vst.msk [vmem:[%s19663_s3 + $0xa0] sm:$0xff] %vm877_vm4, %v7894_v43  ;;  %v7897_v21 = vadd.f32 %v11715_v0, %v7833_v24 }
 0x2fe   :  { %9071 = vst.msk [vmem:[%s19665_s5 + $0xb8] sm:$0xff] %vm877_vm4, %v11813_v12  ;;  %v8098_v28 = vadd.f32 %v8097_v48, %v8096_v13  ;;  %v7601_v7 = vpop.f32.mrf.mxu0  ;;  %v9213_v62 = vsel %vm877_vm4, %v9131_v31, 0.0  ;;  %v8021_v53 = vld [vmem:[%s19663_s3 + $0x98] sm:$0xff] }
 0x2ff   :  { %v9130_v5 = vld [vmem:[%s19665_s5 + $0x90] sm:$0xff]  ;;  %v9210_v50 = vadd.f32 %v9209_v41, %v9208_v46  ;;  %v8839_v22 = vpop.f32.mrf.mxu1  ;;  %7961 = vst.msk [vmem:[%s19663_s3 + $0xb8] sm:$0xff] %vm877_vm4, %v7897_v21  ;;  %v7896_v59 = vadd.f32 %v7832_v51, %v7601_v7  ;;  %v8103_v3 = vsel %vm877_vm4, %v8021_v53, 0.0 }
 0x300   :  { %v9211_v1 = vsel %vm877_vm4, %v9130_v5, 0.0  ;;  %9070 = vst.msk [vmem:[%s19665_s5 + $0xb0] sm:$0xff] %vm877_vm4, %v8839_v22  ;;  %v8020_v9 = vld [vmem:[%s19663_s3 + $0x90] sm:$0xff]  ;;  %v8100_v56 = vadd.f32 %v8099_v11, %v8098_v28  ;;  %v11718_v20 = vpop.f32.mrf.mxu0  ;;  %v7838_v5 = vld [vmem:[%s19663_s3 + $0xe0] sm:$0xff]  ;;  %v7841_v11 = vld [vmem:[%s19663_s3 + $0xf8] sm:$0xff] }
 0x301   :  { %v9212_v39 = vadd.f32 %v9211_v1, %v9210_v50  ;;  %v9133_v17 = vld [vmem:[%s19665_s5 + $0xa8] sm:$0xff]  ;;  %v11816_v60 = vpop.f32.mrf.mxu1  ;;  %v8101_v35 = vsel %vm877_vm4, %v8020_v9, 0.0  ;;  %7960 = vst.msk [vmem:[%s19663_s3 + $0xb0] sm:$0xff] %vm877_vm4, %v7896_v59  ;;  %v7899_v63 = vadd.f32 %v11718_v20, %v7835_v34 }
 0x302   :  { %9073 = vst.msk [vmem:[%s19665_s5 + $0xc8] sm:$0xff] %vm877_vm4, %v11816_v60  ;;  %v8102_v2 = vadd.f32 %v8101_v35, %v8100_v56  ;;  %v7611_v44 = vpop.f32.mrf.mxu0  ;;  %v9217_v6 = vsel %vm877_vm4, %v9133_v17, 0.0  ;;  %v8023_v29 = vld [vmem:[%s19663_s3 + $0xa8] sm:$0xff] }
 0x303   :  { %v9132_v19 = vld [vmem:[%s19665_s5 + $0xa0] sm:$0xff]  ;;  %v9214_v10 = vadd.f32 %v9213_v62, %v9212_v39  ;;  %v8849_v26 = vpop.f32.mrf.mxu1  ;;  %7963 = vst.msk [vmem:[%s19663_s3 + $0xc8] sm:$0xff] %vm877_vm4, %v7899_v63  ;;  %v7898_v32 = vadd.f32 %v7834_v38, %v7611_v44  ;;  %v8107_v42 = vsel %vm877_vm4, %v8023_v29, 0.0 }
 0x304   :  { %v9215_v52 = vsel %vm877_vm4, %v9132_v19, 0.0  ;;  %9072 = vst.msk [vmem:[%s19665_s5 + $0xc0] sm:$0xff] %vm877_vm4, %v8849_v26  ;;  %v8022_v57 = vld [vmem:[%s19663_s3 + $0xa0] sm:$0xff]  ;;  %v8104_v25 = vadd.f32 %v8103_v3, %v8102_v2  ;;  %v11721_v49 = vpop.f32.mrf.mxu0  ;;  %v7840_v19 = vld [vmem:[%s19663_s3 + $0xf0] sm:$0xff]  ;;  %v7843_v3 = vld [vmem:[%s19663_s3 + $0x108] sm:$0xff] }
 0x305   :  { %v9216_v45 = vadd.f32 %v9215_v52, %v9214_v10  ;;  %v9135_v14 = vld [vmem:[%s19665_s5 + $0xb8] sm:$0xff]  ;;  %v11819_v37 = vpop.f32.mrf.mxu1  ;;  %v8105_v47 = vsel %vm877_vm4, %v8022_v57, 0.0  ;;  %7962 = vst.msk [vmem:[%s19663_s3 + $0xc0] sm:$0xff] %vm877_vm4, %v7898_v32  ;;  %v7901_v61 = vadd.f32 %v11721_v49, %v7837_v18 }
 0x306   :  { %9075 = vst.msk [vmem:[%s19665_s5 + $0xd8] sm:$0xff] %vm877_vm4, %v11819_v37  ;;  %v8106_v15 = vadd.f32 %v8105_v47, %v8104_v25  ;;  %v7621_v40 = vpop.f32.mrf.mxu0  ;;  %v9221_v4 = vsel %vm877_vm4, %v9135_v14, 0.0  ;;  %v8025_v41 = vld [vmem:[%s19663_s3 + $0xb8] sm:$0xff] }
 0x307   :  { %v9134_v27 = vld [vmem:[%s19665_s5 + $0xb0] sm:$0xff]  ;;  %v9218_v54 = vadd.f32 %v9217_v6, %v9216_v45  ;;  %v8859_v16 = vpop.f32.mrf.mxu1  ;;  %7965 = vst.msk [vmem:[%s19663_s3 + $0xd8] sm:$0xff] %vm877_vm4, %v7901_v61  ;;  %v7900_v23 = vadd.f32 %v7836_v30, %v7621_v40  ;;  %v8111_v50 = vsel %vm877_vm4, %v8025_v41, 0.0 }
 0x308   :  { %v9219_v58 = vsel %vm877_vm4, %v9134_v27, 0.0  ;;  %9074 = vst.msk [vmem:[%s19665_s5 + $0xd0] sm:$0xff] %vm877_vm4, %v8859_v16  ;;  %v8024_v43 = vld [vmem:[%s19663_s3 + $0xb0] sm:$0xff]  ;;  %v8108_v24 = vadd.f32 %v8107_v42, %v8106_v15  ;;  %v11724_v36 = vpop.f32.mrf.mxu0  ;;  %v7842_v27 = vld [vmem:[%s19663_s3 + $0x100] sm:$0xff]  ;;  %v7845_v42 = vld [vmem:[%s19663_s3 + $0x118] sm:$0xff] }
 0x309   :  { %v9220_v55 = vadd.f32 %v9219_v58, %v9218_v54  ;;  %v9137_v8 = vld [vmem:[%s19665_s5 + $0xc8] sm:$0xff]  ;;  %v11822_v46 = vpop.f32.mrf.mxu1  ;;  %v8109_v13 = vsel %vm877_vm4, %v8024_v43, 0.0  ;;  %7964 = vst.msk [vmem:[%s19663_s3 + $0xd0] sm:$0xff] %vm877_vm4, %v7900_v23  ;;  %v7903_v31 = vadd.f32 %v11724_v36, %v7839_v33 }
 0x30a   :  { %9077 = vst.msk [vmem:[%s19665_s5 + $0xe8] sm:$0xff] %vm877_vm4, %v11822_v46  ;;  %v8110_v12 = vadd.f32 %v8109_v13, %v8108_v24  ;;  %v7631_v28 = vpop.f32.mrf.mxu0  ;;  %v9225_v22 = vsel %vm877_vm4, %v9137_v8, 0.0  ;;  %v8027_v62 = vld [vmem:[%s19663_s3 + $0xc8] sm:$0xff] }
 0x30b   :  { %v9136_v0 = vld [vmem:[%s19665_s5 + $0xc0] sm:$0xff]  ;;  %v9222_v48 = vadd.f32 %v9221_v4, %v9220_v55  ;;  %v8869_v21 = vpop.f32.mrf.mxu1  ;;  %7967 = vst.msk [vmem:[%s19663_s3 + $0xe8] sm:$0xff] %vm877_vm4, %v7903_v31  ;;  %v7902_v51 = vadd.f32 %v7838_v5, %v7631_v28  ;;  %v8115_v10 = vsel %vm877_vm4, %v8027_v62, 0.0 }
 0x30c   :  { %v9223_v7 = vsel %vm877_vm4, %v9136_v0, 0.0  ;;  %9076 = vst.msk [vmem:[%s19665_s5 + $0xe0] sm:$0xff] %vm877_vm4, %v8869_v21  ;;  %v8026_v59 = vld [vmem:[%s19663_s3 + $0xc0] sm:$0xff]  ;;  %v8112_v34 = vadd.f32 %v8111_v50, %v8110_v12  ;;  %v11727_v9 = vpop.f32.mrf.mxu0  ;;  %v7844_v0 = vld [vmem:[%s19663_s3 + $0x110] sm:$0xff] }
 0x30d   :  { %v9224_v1 = vadd.f32 %v9223_v7, %v9222_v48  ;;  %v9139_v53 = vld [vmem:[%s19665_s5 + $0xd8] sm:$0xff]  ;;  %v11825_v39 = vpop.f32.mrf.mxu1  ;;  %v8113_v56 = vsel %vm877_vm4, %v8026_v59, 0.0  ;;  %7966 = vst.msk [vmem:[%s19663_s3 + $0xe0] sm:$0xff] %vm877_vm4, %v7902_v51  ;;  %v7905_v17 = vadd.f32 %v11727_v9, %v7841_v11 }
 0x30e   :  { %9079 = vst.msk [vmem:[%s19665_s5 + $0xf8] sm:$0xff] %vm877_vm4, %v11825_v39  ;;  %v8114_v60 = vadd.f32 %v8113_v56, %v8112_v34  ;;  %v7641_v2 = vpop.f32.mrf.mxu0  ;;  %v9229_v26 = vsel %vm877_vm4, %v9139_v53, 0.0  ;;  %v8029_v6 = vld [vmem:[%s19663_s3 + $0xd8] sm:$0xff] }
 0x30f   :  { %v9138_v20 = vld [vmem:[%s19665_s5 + $0xd0] sm:$0xff]  ;;  %v9226_v35 = vadd.f32 %v9225_v22, %v9224_v1  ;;  %v8879_v63 = vpop.f32.mrf.mxu1  ;;  %7969 = vst.msk [vmem:[%s19663_s3 + $0xf8] sm:$0xff] %vm877_vm4, %v7905_v17  ;;  %v7904_v38 = vadd.f32 %v7840_v19, %v7641_v2  ;;  %v8119_v54 = vsel %vm877_vm4, %v8029_v6, 0.0  ;;  %v7847_v1 = vld [vmem:[%s19663_s3 + $0x128] sm:$0xff] }
 0x310   :  { %v9227_v44 = vsel %vm877_vm4, %v9138_v20, 0.0  ;;  %9078 = vst.msk [vmem:[%s19665_s5 + $0xf0] sm:$0xff] %vm877_vm4, %v8879_v63  ;;  %v8028_v32 = vld [vmem:[%s19663_s3 + $0xd0] sm:$0xff]  ;;  %v8116_v18 = vadd.f32 %v8115_v10, %v8114_v60  ;;  %v11730_v57 = vpop.f32.mrf.mxu0  ;;  %v7846_v20 = vld [vmem:[%s19663_s3 + $0x120] sm:$0xff] }
 0x311   :  { %v9228_v52 = vadd.f32 %v9227_v44, %v9226_v35  ;;  %v9141_v29 = vld [vmem:[%s19665_s5 + $0xe8] sm:$0xff]  ;;  %v11828_v45 = vpop.f32.mrf.mxu1  ;;  %v8117_v25 = vsel %vm877_vm4, %v8028_v32, 0.0  ;;  %7968 = vst.msk [vmem:[%s19663_s3 + $0xf0] sm:$0xff] %vm877_vm4, %v7904_v38  ;;  %v7907_v14 = vadd.f32 %v11730_v57, %v7843_v3 }
 0x312   :  { %9081 = vst.msk [vmem:[%s19665_s5 + $0x108] sm:$0xff] %vm877_vm4, %v11828_v45  ;;  %v8118_v37 = vadd.f32 %v8117_v25, %v8116_v18  ;;  %v7651_v15 = vpop.f32.mrf.mxu0  ;;  %v9233_v16 = vsel %vm877_vm4, %v9141_v29, 0.0  ;;  %v8031_v4 = vld [vmem:[%s19663_s3 + $0xe8] sm:$0xff] }
 0x313   :  { %v9140_v49 = vld [vmem:[%s19665_s5 + $0xe0] sm:$0xff]  ;;  %v9230_v47 = vadd.f32 %v9229_v26, %v9228_v52  ;;  %v8889_v61 = vpop.f32.mrf.mxu1  ;;  %7971 = vst.msk [vmem:[%s19663_s3 + $0x108] sm:$0xff] %vm877_vm4, %v7907_v14  ;;  %v7906_v30 = vadd.f32 %v7842_v27, %v7651_v15  ;;  %v8123_v48 = vsel %vm877_vm4, %v8031_v4, 0.0  ;;  %v7849_v52 = vld [vmem:[%s19663_s3 + $0x138] sm:$0xff]  ;;  %v7848_v14 = vld [vmem:[%s19663_s3 + $0x130] sm:$0xff] }
 0x314   :  { %v9231_v40 = vsel %vm877_vm4, %v9140_v49, 0.0  ;;  %9080 = vst.msk [vmem:[%s19665_s5 + $0x100] sm:$0xff] %vm877_vm4, %v8889_v61  ;;  %v8030_v23 = vld [vmem:[%s19663_s3 + $0xe0] sm:$0xff]  ;;  %v8120_v33 = vadd.f32 %v8119_v54, %v8118_v37  ;;  %v11733_v43 = vpop.f32.mrf.mxu0 }
 0x315   :  { %v9232_v58 = vadd.f32 %v9231_v40, %v9230_v47  ;;  %v9143_v41 = vld [vmem:[%s19665_s5 + $0xf8] sm:$0xff]  ;;  %v11831_v55 = vpop.f32.mrf.mxu1  ;;  %v8121_v24 = vsel %vm877_vm4, %v8030_v23, 0.0  ;;  %7970 = vst.msk [vmem:[%s19663_s3 + $0x100] sm:$0xff] %vm877_vm4, %v7906_v30  ;;  %v7909_v8 = vadd.f32 %v11733_v43, %v7845_v42  ;;  %v7851_v30 = vld [vmem:[%s19663_s3 + $0x148] sm:$0xff] }
 0x316   :  { %9083 = vst.msk [vmem:[%s19665_s5 + $0x118] sm:$0xff] %vm877_vm4, %v11831_v55  ;;  %v8122_v46 = vadd.f32 %v8121_v24, %v8120_v33  ;;  %v7661_v12 = vpop.f32.mrf.mxu0  ;;  %v9237_v21 = vsel %vm877_vm4, %v9143_v41, 0.0  ;;  %v8033_v50 = vld [vmem:[%s19663_s3 + $0xf8] sm:$0xff]  ;;  %v7850_v55 = vld [vmem:[%s19663_s3 + $0x140] sm:$0xff] }
 0x317   :  { %v9142_v36 = vld [vmem:[%s19665_s5 + $0xf0] sm:$0xff]  ;;  %v9234_v13 = vadd.f32 %v9233_v16, %v9232_v58  ;;  %v8899_v31 = vpop.f32.mrf.mxu1  ;;  %7973 = vst.msk [vmem:[%s19663_s3 + $0x118] sm:$0xff] %vm877_vm4, %v7909_v8  ;;  %v7908_v5 = vadd.f32 %v7844_v0, %v7661_v12  ;;  %v8127_v35 = vsel %vm877_vm4, %v8033_v50, 0.0 }
 0x318   :  { %v9235_v28 = vsel %vm877_vm4, %v9142_v36, 0.0  ;;  %9082 = vst.msk [vmem:[%s19665_s5 + $0x110] sm:$0xff] %vm877_vm4, %v8899_v31  ;;  %v8032_v7 = vld [vmem:[%s19663_s3 + $0xf0] sm:$0xff]  ;;  %v8124_v51 = vadd.f32 %v8123_v48, %v8122_v46  ;;  %v11736_v62 = vpop.f32.mrf.mxu0  ;;  %v7853_v48 = vld [vmem:[%s19663_s3 + $0x158] sm:$0xff] }
 0x319   :  { %v9236_v22 = vadd.f32 %v9235_v28, %v9234_v13  ;;  %v11834_v11 = vpop.f32.mrf.mxu1  ;;  %v8125_v59 = vsel %vm877_vm4, %v8032_v7, 0.0  ;;  %v9145_v34 = vld [vmem:[%s19665_s5 + $0x108] sm:$0xff]  ;;  %7972 = vst.msk [vmem:[%s19663_s3 + $0x110] sm:$0xff] %vm877_vm4, %v7908_v5  ;;  %v7911_v53 = vadd.f32 %v11736_v62, %v7847_v1 }
 0x31a   :  { %9085 = vst.msk [vmem:[%s19665_s5 + $0x128] sm:$0xff] %vm877_vm4, %v11834_v11  ;;  %v8126_v39 = vadd.f32 %v8125_v59, %v8124_v51  ;;  %v7671_v60 = vpop.f32.mrf.mxu0  ;;  %v9241_v19 = vsel %vm877_vm4, %v9145_v34, 0.0  ;;  %v18374_v10 = vld [vmem:[%s19663_s3 + $0x108] sm:$0xff]  ;;  %v7852_v51 = vld [vmem:[%s19663_s3 + $0x150] sm:$0xff] }
 0x31b   :  { %v9144_v9 = vld [vmem:[%s19665_s5 + $0x100] sm:$0xff]  ;;  %v9238_v56 = vadd.f32 %v9237_v21, %v9236_v22  ;;  %v8909_v17 = vpop.f32.mrf.mxu1  ;;  %7975 = vst.msk [vmem:[%s19663_s3 + $0x128] sm:$0xff] %vm877_vm4, %v7911_v53  ;;  %v7910_v2 = vadd.f32 %v7846_v20, %v7671_v60  ;;  %v8131_v37 = vsel %vm877_vm4, %v18374_v10, 0.0 }
 0x31c   :  { %v9239_v63 = vsel %vm877_vm4, %v9144_v9, 0.0  ;;  %9084 = vst.msk [vmem:[%s19665_s5 + $0x120] sm:$0xff] %vm877_vm4, %v8909_v17  ;;  %v18379_v44 = vld [vmem:[%s19663_s3 + $0x100] sm:$0xff]  ;;  %v8128_v38 = vadd.f32 %v8127_v35, %v8126_v39  ;;  %v11739_v6 = vpop.f32.mrf.mxu0  ;;  %v7855_v17 = vld [vmem:[%s19663_s3 + $0x168] sm:$0xff] }
 0x31d   :  { %v9240_v26 = vadd.f32 %v9239_v63, %v9238_v56  ;;  %v11837_v3 = vpop.f32.mrf.mxu1  ;;  %v8129_v32 = vsel %vm877_vm4, %v18379_v44, 0.0  ;;  %7974 = vst.msk [vmem:[%s19663_s3 + $0x120] sm:$0xff] %vm877_vm4, %v7910_v2  ;;  %v7913_v18 = vadd.f32 %v11739_v6, %v7849_v52  ;;  %v9147_v42 = vld [vmem:[%s19665_s5 + $0x118] sm:$0xff] }
 0x31e   :  { %9087 = vst.msk [vmem:[%s19665_s5 + $0x138] sm:$0xff] %vm877_vm4, %v11837_v3  ;;  %v8130_v29 = vadd.f32 %v8129_v32, %v8128_v38  ;;  %v7681_v25 = vpop.f32.mrf.mxu0  ;;  %v18413_v61 = vld [vmem:[%s19663_s3 + $0x118] sm:$0xff]  ;;  %v9245_v46 = vsel %vm877_vm4, %v9147_v42, 0.0 }
 0x31f   :  { %v9146_v45 = vld [vmem:[%s19665_s5 + $0x110] sm:$0xff]  ;;  %v8919_v57 = vpop.f32.mrf.mxu1  ;;  %v9242_v49 = vadd.f32 %v9241_v19, %v9240_v26  ;;  %7977 = vst.msk [vmem:[%s19663_s3 + $0x138] sm:$0xff] %vm877_vm4, %v7913_v18  ;;  %v7912_v47 = vadd.f32 %v7848_v14, %v7681_v25  ;;  %v8135_v43 = vsel %vm877_vm4, %v18413_v61, 0.0  ;;  %v7854_v26 = vld [vmem:[%s19663_s3 + $0x160] sm:$0xff]  ;;  %v7857_v25 = vld [vmem:[%s19663_s3 + $0x178] sm:$0xff] }
 0x320   :  { %9086 = vst.msk [vmem:[%s19665_s5 + $0x130] sm:$0xff] %vm877_vm4, %v8919_v57  ;;  %v9243_v15 = vsel %vm877_vm4, %v9146_v45, 0.0  ;;  %v18419_v27 = vld [vmem:[%s19663_s3 + $0x110] sm:$0xff]  ;;  %v8132_v54 = vadd.f32 %v8131_v37, %v8130_v29  ;;  %v11742_v40 = vpop.f32.mrf.mxu0 }
 0x321   :  { %v11840_v16 = vpop.f32.mrf.mxu1  ;;  %v8133_v4 = vsel %vm877_vm4, %v18419_v27, 0.0  ;;  %7976 = vst.msk [vmem:[%s19663_s3 + $0x130] sm:$0xff] %vm877_vm4, %v7912_v47  ;;  %v7915_v58 = vadd.f32 %v11742_v40, %v7851_v30  ;;  %v9244_v24 = vadd.f32 %v9243_v15, %v9242_v49  ;;  %v9149_v60 = vld [vmem:[%s19665_s5 + $0x128] sm:$0xff] }
 0x322   :  { %9089 = vst.msk [vmem:[%s19665_s5 + $0x148] sm:$0xff] %vm877_vm4, %v11840_v16  ;;  %v8134_v23 = vadd.f32 %v8133_v4, %v8132_v54  ;;  %v7691_v41 = vpop.f32.mrf.mxu0  ;;  %v18454_v36 = vld [vmem:[%s19663_s3 + $0x128] sm:$0xff]  ;;  %v9249_v52 = vsel %vm877_vm4, %v9149_v60, 0.0  ;;  %v7856_v16 = vld [vmem:[%s19663_s3 + $0x170] sm:$0xff] }
 0x323   :  { %v8929_v33 = vpop.f32.mrf.mxu1  ;;  %7979 = vst.msk [vmem:[%s19663_s3 + $0x148] sm:$0xff] %vm877_vm4, %v7915_v58  ;;  %v7914_v8 = vadd.f32 %v7850_v55, %v7691_v41  ;;  %v9148_v21 = vld [vmem:[%s19665_s5 + $0x120] sm:$0xff]  ;;  %v8139_v11 = vsel %vm877_vm4, %v18454_v36, 0.0  ;;  %v9246_v62 = vadd.f32 %v9245_v46, %v9244_v24 }
 0x324   :  { %9088 = vst.msk [vmem:[%s19665_s5 + $0x140] sm:$0xff] %vm877_vm4, %v8929_v33  ;;  %v18459_v13 = vld [vmem:[%s19663_s3 + $0x120] sm:$0xff]  ;;  %v8136_v31 = vadd.f32 %v8135_v43, %v8134_v23  ;;  %v11745_v0 = vpop.f32.mrf.mxu0  ;;  %v9247_v59 = vsel %vm877_vm4, %v9148_v21, 0.0  ;;  %v7859_v43 = vld [vmem:[%s19663_s3 + $0x188] sm:$0xff] }
 0x325   :  { %v11843_v12 = vpop.f32.mrf.mxu1  ;;  %v8137_v28 = vsel %vm877_vm4, %v18459_v13, 0.0  ;;  %7978 = vst.msk [vmem:[%s19663_s3 + $0x140] sm:$0xff] %vm877_vm4, %v7914_v8  ;;  %v7917_v5 = vadd.f32 %v11745_v0, %v7853_v48  ;;  %v9248_v38 = vadd.f32 %v9247_v59, %v9246_v62  ;;  %v9151_v24 = vld [vmem:[%s19665_s5 + $0x138] sm:$0xff]  ;;  %v7858_v48 = vld [vmem:[%s19663_s3 + $0x180] sm:$0xff] }
 0x326   :  { %9091 = vst.msk [vmem:[%s19665_s5 + $0x158] sm:$0xff] %vm877_vm4, %v11843_v12  ;;  %v8138_v50 = vadd.f32 %v8137_v28, %v8136_v31  ;;  %v7701_v7 = vpop.f32.mrf.mxu0  ;;  %v18494_v34 = vld [vmem:[%s19663_s3 + $0x138] sm:$0xff] }
 0x327   :  { %v8939_v22 = vpop.f32.mrf.mxu1  ;;  %7981 = vst.msk [vmem:[%s19663_s3 + $0x158] sm:$0xff] %vm877_vm4, %v7917_v5  ;;  %v7916_v1 = vadd.f32 %v7852_v51, %v7701_v7  ;;  %v8143_v3 = vsel %vm877_vm4, %v18494_v34, 0.0  ;;  %v9150_v14 = vld [vmem:[%s19665_s5 + $0x130] sm:$0xff]  ;;  %v9250_v40 = vadd.f32 %v9249_v52, %v9248_v38 }
 0x328   :  { %9090 = vst.msk [vmem:[%s19665_s5 + $0x150] sm:$0xff] %vm877_vm4, %v8939_v22  ;;  %v18499_v53 = vld [vmem:[%s19663_s3 + $0x130] sm:$0xff]  ;;  %v8140_v39 = vadd.f32 %v8139_v11, %v8138_v50  ;;  %v11748_v56 = vpop.f32.mrf.mxu0  ;;  %v9251_v4 = vsel %vm877_vm4, %v9150_v14, 0.0  ;;  %v9253_v50 = vsel %vm877_vm4, %v9151_v24, 0.0 }
 0x329   :  { %v11846_v9 = vpop.f32.mrf.mxu1  ;;  %v8141_v20 = vsel %vm877_vm4, %v18499_v53, 0.0  ;;  %7980 = vst.msk [vmem:[%s19663_s3 + $0x150] sm:$0xff] %vm877_vm4, %v7916_v1  ;;  %v7919_v35 = vadd.f32 %v11748_v56, %v7855_v17  ;;  %v9252_v21 = vadd.f32 %v9251_v4, %v9250_v40  ;;  %v7861_v1 = vld [vmem:[%s19663_s3 + $0x198] sm:$0xff] }
 0x32a   :  { %9093 = vst.msk [vmem:[%s19665_s5 + $0x168] sm:$0xff] %vm877_vm4, %v11846_v9  ;;  %v8142_v63 = vadd.f32 %v8141_v20, %v8140_v39  ;;  %v7711_v19 = vpop.f32.mrf.mxu0  ;;  %v18534_v32 = vld [vmem:[%s19663_s3 + $0x148] sm:$0xff]  ;;  %v7860_v20 = vld [vmem:[%s19663_s3 + $0x190] sm:$0xff] }
 0x32b   :  { %v8949_v2 = vpop.f32.mrf.mxu1  ;;  %7983 = vst.msk [vmem:[%s19663_s3 + $0x168] sm:$0xff] %vm877_vm4, %v7919_v35  ;;  %v7918_v6 = vadd.f32 %v7854_v26, %v7711_v19  ;;  %v8147_v30 = vsel %vm877_vm4, %v18534_v32, 0.0  ;;  %v9152_v59 = vld [vmem:[%s19665_s5 + $0x140] sm:$0xff]  ;;  %v9254_v35 = vadd.f32 %v9253_v50, %v9252_v21 }
 0x32c   :  { %9092 = vst.msk [vmem:[%s19665_s5 + $0x160] sm:$0xff] %vm877_vm4, %v8949_v2  ;;  %v18539_v18 = vld [vmem:[%s19663_s3 + $0x140] sm:$0xff]  ;;  %v8144_v29 = vadd.f32 %v8143_v3, %v8142_v63  ;;  %v11751_v57 = vpop.f32.mrf.mxu0  ;;  %v9255_v19 = vsel %vm877_vm4, %v9152_v59, 0.0  ;;  %v7867_v59 = vld [vmem:[%s19663_s3 + $0x1c8] sm:$0xff] }
 0x32d   :  { %v11849_v45 = vpop.f32.mrf.mxu1  ;;  %v8145_v37 = vsel %vm877_vm4, %v18539_v18, 0.0  ;;  %7982 = vst.msk [vmem:[%s19663_s3 + $0x160] sm:$0xff] %vm877_vm4, %v7918_v6  ;;  %v7921_v49 = vadd.f32 %v11751_v57, %v7857_v25 }
 0x32e   :  { %9095 = vst.msk [vmem:[%s19665_s5 + $0x178] sm:$0xff] %vm877_vm4, %v11849_v45  ;;  %v8146_v47 = vadd.f32 %v8145_v37, %v8144_v29  ;;  %v7721_v54 = vpop.f32.mrf.mxu0  ;;  %v18574_v58 = vld [vmem:[%s19663_s3 + $0x158] sm:$0xff]  ;;  %v7863_v29 = vld [vmem:[%s19663_s3 + $0x1a8] sm:$0xff] }
 0x32f   :  { %v8959_v15 = vpop.f32.mrf.mxu1  ;;  %7985 = vst.msk [vmem:[%s19663_s3 + $0x178] sm:$0xff] %vm877_vm4, %v7921_v49  ;;  %v7920_v42 = vadd.f32 %v7856_v16, %v7721_v54  ;;  %v8151_v28 = vsel %vm877_vm4, %v18574_v58, 0.0  ;;  %v9153_v45 = vld [vmem:[%s19665_s5 + $0x148] sm:$0xff] }
 0x330   :  { %9094 = vst.msk [vmem:[%s19665_s5 + $0x170] sm:$0xff] %vm877_vm4, %v8959_v15  ;;  %v18579_v23 = vld [vmem:[%s19663_s3 + $0x150] sm:$0xff]  ;;  %v8148_v33 = vadd.f32 %v8147_v30, %v8146_v47  ;;  %v11754_v55 = vpop.f32.mrf.mxu0  ;;  %v7862_v47 = vld [vmem:[%s19663_s3 + $0x1a0] sm:$0xff]  ;;  %v9256_v15 = vadd.f32 %v9255_v19, %v9254_v35  ;;  %v9257_v40 = vsel %vm877_vm4, %v9153_v45, 0.0 }
 0x331   :  { %v11852_v41 = vpop.f32.mrf.mxu1  ;;  %v8149_v8 = vsel %vm877_vm4, %v18579_v23, 0.0  ;;  %7984 = vst.msk [vmem:[%s19663_s3 + $0x170] sm:$0xff] %vm877_vm4, %v7920_v42  ;;  %v7923_v46 = vadd.f32 %v11754_v55, %v7859_v43  ;;  %v7865_v55 = vld [vmem:[%s19663_s3 + $0x1b8] sm:$0xff]  ;;  %v9154_v43 = vld [vmem:[%s19665_s5 + $0x150] sm:$0xff]  ;;  %v7866_v35 = vld [vmem:[%s19663_s3 + $0x1c0] sm:$0xff] }
 0x332   :  { %9097 = vst.msk [vmem:[%s19665_s5 + $0x188] sm:$0xff] %vm877_vm4, %v11852_v41  ;;  %v8150_v31 = vadd.f32 %v8149_v8, %v8148_v33  ;;  %v7731_v0 = vpop.f32.mrf.mxu0  ;;  %v18614_v22 = vld [vmem:[%s19663_s3 + $0x168] sm:$0xff] }
 0x333   :  { %v8969_v12 = vpop.f32.mrf.mxu1  ;;  %7987 = vst.msk [vmem:[%s19663_s3 + $0x188] sm:$0xff] %vm877_vm4, %v7923_v46  ;;  %v7922_v5 = vadd.f32 %v7858_v48, %v7731_v0  ;;  %v8155_v63 = vsel %vm877_vm4, %v18614_v22, 0.0  ;;  %v7864_v0 = vld [vmem:[%s19663_s3 + $0x1b0] sm:$0xff]  ;;  %v9258_v48 = vadd.f32 %v9257_v40, %v9256_v15 }
 0x334   :  { %9096 = vst.msk [vmem:[%s19665_s5 + $0x180] sm:$0xff] %vm877_vm4, %v8969_v12  ;;  %v18619_v7 = vld [vmem:[%s19663_s3 + $0x160] sm:$0xff]  ;;  %v8152_v51 = vadd.f32 %v8151_v28, %v8150_v31  ;;  %v11757_v62 = vpop.f32.mrf.mxu0 }
 0x335   :  { %v11855_v11 = vpop.f32.mrf.mxu1  ;;  %v8153_v39 = vsel %vm877_vm4, %v18619_v7, 0.0  ;;  %7986 = vst.msk [vmem:[%s19663_s3 + $0x180] sm:$0xff] %vm877_vm4, %v7922_v5  ;;  %v7925_v9 = vadd.f32 %v11757_v62, %v7861_v1  ;;  %v9259_v5 = vsel %vm877_vm4, %v9154_v43, 0.0 }
 0x336   :  { %9099 = vst.msk [vmem:[%s19665_s5 + $0x198] sm:$0xff] %vm877_vm4, %v11855_v11  ;;  %v8154_v56 = vadd.f32 %v8153_v39, %v8152_v51  ;;  %v7741_v60 = vpop.f32.mrf.mxu0  ;;  %v18654_v26 = vld [vmem:[%s19663_s3 + $0x178] sm:$0xff] }
 0x337   :  { %v8979_v17 = vpop.f32.mrf.mxu1  ;;  %7989 = vst.msk [vmem:[%s19663_s3 + $0x198] sm:$0xff] %vm877_vm4, %v7925_v9  ;;  %v7924_v2 = vadd.f32 %v7860_v20, %v7741_v60  ;;  %v8159_v54 = vsel %vm877_vm4, %v18654_v26, 0.0  ;;  %v9155_v39 = vld [vmem:[%s19665_s5 + $0x158] sm:$0xff] }
 0x338   :  { %9098 = vst.msk [vmem:[%s19665_s5 + $0x190] sm:$0xff] %vm877_vm4, %v8979_v17  ;;  %v18659_v38 = vld [vmem:[%s19663_s3 + $0x170] sm:$0xff]  ;;  %v8156_v3 = vadd.f32 %v8155_v63, %v8154_v56  ;;  %v11760_v52 = vpop.f32.mrf.mxu0  ;;  %v9260_v63 = vadd.f32 %v9259_v5, %v9258_v48  ;;  %v7870_v5 = vld [vmem:[%s19663_s3 + $0x1e0] sm:$0xff] }
 0x339   :  { %v11858_v6 = vpop.f32.mrf.mxu1  ;;  %v8157_v57 = vsel %vm877_vm4, %v18659_v38, 0.0  ;;  %7988 = vst.msk [vmem:[%s19663_s3 + $0x190] sm:$0xff] %vm877_vm4, %v7924_v2  ;;  %v7927_v25 = vadd.f32 %v11760_v52, %v7863_v29 }
 0x33a   :  { %9101 = vst.msk [vmem:[%s19665_s5 + $0x1a8] sm:$0xff] %vm877_vm4, %v11858_v6  ;;  %v8158_v14 = vadd.f32 %v8157_v57, %v8156_v3  ;;  %v7751_v49 = vpop.f32.mrf.mxu0  ;;  %v18694_v30 = vld [vmem:[%s19663_s3 + $0x188] sm:$0xff]  ;;  %v9261_v3 = vsel %vm877_vm4, %v9155_v39, 0.0  ;;  %v7869_v57 = vld [vmem:[%s19663_s3 + $0x1d8] sm:$0xff] }
 0x33b   :  { %v8989_v37 = vpop.f32.mrf.mxu1  ;;  %7991 = vst.msk [vmem:[%s19663_s3 + $0x1a8] sm:$0xff] %vm877_vm4, %v7927_v25  ;;  %v7926_v16 = vadd.f32 %v7862_v47, %v7751_v49  ;;  %v8163_v21 = vsel %vm877_vm4, %v18694_v30, 0.0  ;;  %v9262_v40 = vadd.f32 %v9261_v3, %v9260_v63  ;;  %v9158_v63 = vld [vmem:[%s19665_s5 + $0x170] sm:$0xff] }
 0x33c   :  { %9100 = vst.msk [vmem:[%s19665_s5 + $0x1a0] sm:$0xff] %vm877_vm4, %v8989_v37  ;;  %v18699_v42 = vld [vmem:[%s19663_s3 + $0x180] sm:$0xff]  ;;  %v8160_v4 = vadd.f32 %v8159_v54, %v8158_v14  ;;  %v11763_v41 = vpop.f32.mrf.mxu0 }
 0x33d   :  { %v11861_v33 = vpop.f32.mrf.mxu1  ;;  %v8161_v24 = vsel %vm877_vm4, %v18699_v42, 0.0  ;;  %7990 = vst.msk [vmem:[%s19663_s3 + $0x1a0] sm:$0xff] %vm877_vm4, %v7926_v16  ;;  %v7929_v8 = vadd.f32 %v11763_v41, %v7865_v55  ;;  %v9156_v14 = vld [vmem:[%s19665_s5 + $0x160] sm:$0xff]  ;;  %v7868_v16 = vld [vmem:[%s19663_s3 + $0x1d0] sm:$0xff] }
 0x33e   :  { %9103 = vst.msk [vmem:[%s19665_s5 + $0x1b8] sm:$0xff] %vm877_vm4, %v11861_v33  ;;  %v8162_v46 = vadd.f32 %v8161_v24, %v8160_v4  ;;  %v7761_v12 = vpop.f32.mrf.mxu0  ;;  %v18734_v50 = vld [vmem:[%s19663_s3 + $0x198] sm:$0xff]  ;;  %v9263_v41 = vsel %vm877_vm4, %v9156_v14, 0.0  ;;  %v7871_v24 = vld [vmem:[%s19663_s3 + $0x1e8] sm:$0xff] }
 0x33f   :  { %v8999_v31 = vpop.f32.mrf.mxu1  ;;  %7993 = vst.msk [vmem:[%s19663_s3 + $0x1b8] sm:$0xff] %vm877_vm4, %v7929_v8  ;;  %v7928_v28 = vadd.f32 %v7864_v0, %v7761_v12  ;;  %v8167_v2 = vsel %vm877_vm4, %v18734_v50, 0.0  ;;  %v9157_v12 = vld [vmem:[%s19665_s5 + $0x168] sm:$0xff] }
 0x340   :  { %9102 = vst.msk [vmem:[%s19665_s5 + $0x1b0] sm:$0xff] %vm877_vm4, %v8999_v31  ;;  %v18739_v51 = vld [vmem:[%s19663_s3 + $0x190] sm:$0xff]  ;;  %v8164_v11 = vadd.f32 %v8163_v21, %v8162_v46  ;;  %v11766_v1 = vpop.f32.mrf.mxu0  ;;  %v9265_v39 = vsel %vm877_vm4, %v9157_v12, 0.0  ;;  %v9160_v12 = vld [vmem:[%s19665_s5 + $0x180] sm:$0xff] }
 0x341   :  { %v11864_v62 = vpop.f32.mrf.mxu1  ;;  %v8165_v9 = vsel %vm877_vm4, %v18739_v51, 0.0  ;;  %7992 = vst.msk [vmem:[%s19663_s3 + $0x1b0] sm:$0xff] %vm877_vm4, %v7928_v28  ;;  %v7931_v56 = vadd.f32 %v11766_v1, %v7867_v59 }
 0x342   :  { %9105 = vst.msk [vmem:[%s19665_s5 + $0x1c8] sm:$0xff] %vm877_vm4, %v11864_v62  ;;  %v8166_v17 = vadd.f32 %v8165_v9, %v8164_v11  ;;  %v7771_v20 = vpop.f32.mrf.mxu0  ;;  %v18782_v25 = vld [vmem:[%s19663_s3 + $0x1a8] sm:$0xff]  ;;  %v9264_v62 = vadd.f32 %v9263_v41, %v9262_v40 }
 0x343   :  { %v9009_v60 = vpop.f32.mrf.mxu1  ;;  %7995 = vst.msk [vmem:[%s19663_s3 + $0x1c8] sm:$0xff] %vm877_vm4, %v7931_v56  ;;  %v7930_v19 = vadd.f32 %v7866_v35, %v7771_v20  ;;  %v8171_v33 = vsel %vm877_vm4, %v18782_v25, 0.0 }
 0x344   :  { %9104 = vst.msk [vmem:[%s19665_s5 + $0x1c0] sm:$0xff] %vm877_vm4, %v9009_v60  ;;  %v18774_v6 = vld [vmem:[%s19663_s3 + $0x1a0] sm:$0xff]  ;;  %v8168_v52 = vadd.f32 %v8167_v2, %v8166_v17  ;;  %v11769_v45 = vpop.f32.mrf.mxu0  ;;  %v7873_v17 = vld [vmem:[%s19663_s3 + $0x1f8] sm:$0xff] }
 0x345   :  { %v11867_v29 = vpop.f32.mrf.mxu1  ;;  %v8169_v37 = vsel %vm877_vm4, %v18774_v6, 0.0  ;;  %7994 = vst.msk [vmem:[%s19663_s3 + $0x1c0] sm:$0xff] %vm877_vm4, %v7930_v19  ;;  %v7933_v49 = vadd.f32 %v11769_v45, %v7869_v57  ;;  %v9266_v57 = vadd.f32 %v9265_v39, %v9264_v62 }
 0x346   :  { %9107 = vst.msk [vmem:[%s19665_s5 + $0x1d8] sm:$0xff] %vm877_vm4, %v11867_v29  ;;  %v8170_v47 = vadd.f32 %v8169_v37, %v8168_v52  ;;  %v7781_v54 = vpop.f32.mrf.mxu0  ;;  %v18822_v46 = vld [vmem:[%s19663_s3 + $0x1b8] sm:$0xff]  ;;  %v7872_v29 = vld [vmem:[%s19663_s3 + $0x1f0] sm:$0xff] }
 0x347   :  { %v9019_v15 = vpop.f32.mrf.mxu1  ;;  %7997 = vst.msk [vmem:[%s19663_s3 + $0x1d8] sm:$0xff] %vm877_vm4, %v7933_v49  ;;  %v7932_v4 = vadd.f32 %v7868_v16, %v7781_v54  ;;  %v8175_v59 = vsel %vm877_vm4, %v18822_v46, 0.0  ;;  %v9267_v49 = vsel %vm877_vm4, %v9158_v63, 0.0  ;;  %v9159_v16 = vld [vmem:[%s19665_s5 + $0x178] sm:$0xff] }
 0x348   :  { %9106 = vst.msk [vmem:[%s19665_s5 + $0x1d0] sm:$0xff] %vm877_vm4, %v9019_v15  ;;  %v11772_v43 = vpop.f32.mrf.mxu0  ;;  %v18817_v8 = vld [vmem:[%s19663_s3 + $0x1b0] sm:$0xff]  ;;  %v8172_v31 = vadd.f32 %v8171_v33, %v8170_v47  ;;  %v9268_v33 = vadd.f32 %v9267_v49, %v9266_v57  ;;  %v9164_v49 = vld [vmem:[%s19665_s5 + $0x1a0] sm:$0xff] }
 0x349   :  { %v11870_v55 = vpop.f32.mrf.mxu1  ;;  %7996 = vst.msk [vmem:[%s19663_s3 + $0x1d0] sm:$0xff] %vm877_vm4, %v7932_v4  ;;  %v7935_v0 = vadd.f32 %v11772_v43, %v7871_v24  ;;  %v8173_v48 = vsel %vm877_vm4, %v18817_v8, 0.0 }
 0x34a   :  { %9109 = vst.msk [vmem:[%s19665_s5 + $0x1e8] sm:$0xff] %vm877_vm4, %v11870_v55  ;;  %v7791_v28 = vpop.f32.mrf.mxu0  ;;  %v8174_v11 = vadd.f32 %v8173_v48, %v8172_v31  ;;  %v18862_v20 = vld [vmem:[%s19663_s3 + $0x1c8] sm:$0xff]  ;;  %v9269_v55 = vsel %vm877_vm4, %v9159_v16, 0.0 }
 0x34b   :  { %v9029_v21 = vpop.f32.mrf.mxu1  ;;  %7999 = vst.msk [vmem:[%s19663_s3 + $0x1e8] sm:$0xff] %vm877_vm4, %v7935_v0  ;;  %v7934_v1 = vadd.f32 %v7870_v5, %v7791_v28  ;;  %v8179_v37 = vsel %vm877_vm4, %v18862_v20, 0.0  ;;  %v9271_v5 = vsel %vm877_vm4, %v9160_v12, 0.0 }
 0x34c   :  { %9108 = vst.msk [vmem:[%s19665_s5 + $0x1e0] sm:$0xff] %vm877_vm4, %v9029_v21  ;;  %v11775_v56 = vpop.f32.mrf.mxu0  ;;  %v18857_v60 = vld [vmem:[%s19663_s3 + $0x1c0] sm:$0xff]  ;;  %v8176_v35 = vadd.f32 %v8175_v59, %v8174_v11  ;;  %v9270_v21 = vadd.f32 %v9269_v55, %v9268_v33  ;;  %v9161_v59 = vld [vmem:[%s19665_s5 + $0x188] sm:$0xff] }
 0x34d   :  { %v11873_v9 = vpop.f32.mrf.mxu1  ;;  %7998 = vst.msk [vmem:[%s19663_s3 + $0x1e0] sm:$0xff] %vm877_vm4, %v7934_v1  ;;  %v7937_v2 = vadd.f32 %v11775_v56, %v7873_v17  ;;  %v8177_v19 = vsel %vm877_vm4, %v18857_v60, 0.0 }
 0x34e   :  { %9111 = vst.msk [vmem:[%s19665_s5 + $0x1f8] sm:$0xff] %vm877_vm4, %v11873_v9  ;;  %v7801_v52 = vpop.f32.mrf.mxu0  ;;  %v8178_v45 = vadd.f32 %v8177_v19, %v8176_v35  ;;  %v18899_v15 = vld [vmem:[%s19663_s3 + $0x1d8] sm:$0xff]  ;;  %v9272_v56 = vadd.f32 %v9271_v5, %v9270_v21  ;;  %v9273_v35 = vsel %vm877_vm4, %v9161_v59, 0.0  ;;  %v9168_v59 = vld [vmem:[%s19665_s5 + $0x1c0] sm:$0xff] }
 0x34f   :  { %v9039_v3 = vpop.f32.mrf.mxu1  ;;  %8001 = vst.msk [vmem:[%s19663_s3 + $0x1f8] sm:$0xff] %vm877_vm4, %v7937_v2  ;;  %v7936_v14 = vadd.f32 %v7872_v29, %v7801_v52  ;;  %v8183_v41 = vsel %vm877_vm4, %v18899_v15, 0.0  ;;  %v9162_v2 = vld [vmem:[%s19665_s5 + $0x190] sm:$0xff]  ;;  %v9167_v21 = vld [vmem:[%s19665_s5 + $0x1b8] sm:$0xff] }
 0x350   :  { %9110 = vst.msk [vmem:[%s19665_s5 + $0x1f0] sm:$0xff] %vm877_vm4, %v9039_v3  ;;  %v18894_v47 = vld [vmem:[%s19663_s3 + $0x1d0] sm:$0xff]  ;;  %v8180_v54 = vadd.f32 %v8179_v37, %v8178_v45  ;;  %v9274_v3 = vadd.f32 %v9273_v35, %v9272_v56  ;;  %v9275_v52 = vsel %vm877_vm4, %v9162_v2, 0.0  ;;  %v9163_v45 = vld [vmem:[%s19665_s5 + $0x198] sm:$0xff] }
 0x351   :  { %8000 = vst.msk [vmem:[%s19663_s3 + $0x1f0] sm:$0xff] %vm877_vm4, %v7936_v14  ;;  %v8181_v40 = vsel %vm877_vm4, %v18894_v47, 0.0  ;;  %v9277_v37 = vsel %vm877_vm4, %v9163_v45, 0.0  ;;  %v11880_v45 = vld [vmem:[%s19663_s3 + $0x8] sm:$0xff] }
 0x352   :  { %v8182_v4 = vadd.f32 %v8181_v40, %v8180_v54  ;;  %v8063_v24 = vld [vmem:[%s19663_s3 + $0x1e8] sm:$0xff]  ;;  %v9276_v57 = vadd.f32 %v9275_v52, %v9274_v3  ;;  %v9279_v40 = vsel %vm877_vm4, %v9164_v49, 0.0  ;;  %v11879_v52 = vld [vmem:[%s19663_s3] sm:$0xff] }
 0x353   :  { %v8187_v28 = vsel %vm877_vm4, %v8063_v24, 0.0 }
 0x354   :  { %v8062_v43 = vld [vmem:[%s19663_s3 + $0x1e0] sm:$0xff]  ;;  %v8184_v31 = vadd.f32 %v8183_v41, %v8182_v4  ;;  %v9278_v54 = vadd.f32 %v9277_v37, %v9276_v57  ;;  %v9165_v4 = vld [vmem:[%s19665_s5 + $0x1a8] sm:$0xff]  ;;  %v11881_v37 = vld [vmem:[%s19663_s3 + $0x10] sm:$0xff] }
 0x355   :  { %v8185_v0 = vsel %vm877_vm4, %v8062_v43, 0.0  ;;  %v9281_v55 = vsel %vm877_vm4, %v9165_v4, 0.0 }
 0x356   :  { %v8186_v48 = vadd.f32 %v8185_v0, %v8184_v31  ;;  %v8065_v62 = vld [vmem:[%s19663_s3 + $0x1f8] sm:$0xff]  ;;  %v9280_v33 = vadd.f32 %v9279_v40, %v9278_v54  ;;  %v9166_v31 = vld [vmem:[%s19665_s5 + $0x1b0] sm:$0xff] }
 0x357   :  { %v8191_v17 = vsel %vm877_vm4, %v8065_v62, 0.0  ;;  %v11882_v40 = vld [vmem:[%s19663_s3 + $0x18] sm:$0xff] }
 0x358   :  { %v8064_v11 = vld [vmem:[%s19663_s3 + $0x1f0] sm:$0xff]  ;;  %v8188_v1 = vadd.f32 %v8187_v28, %v8186_v48  ;;  %v9282_v12 = vadd.f32 %v9281_v55, %v9280_v33  ;;  %v9283_v48 = vsel %vm877_vm4, %v9166_v31, 0.0  ;;  %v11883_v31 = vld [vmem:[%s19663_s3 + $0x20] sm:$0xff] }
 0x359   :  { %v8189_v39 = vsel %vm877_vm4, %v8064_v11, 0.0 }
 0x35a   :  { %v8190_v9 = vadd.f32 %v8189_v39, %v8188_v1  ;;  %v9284_v28 = vadd.f32 %v9283_v48, %v9282_v12  ;;  %v9285_v1 = vsel %vm877_vm4, %v9167_v21, 0.0  ;;  %v19086_v21 = vld [vmem:[%s19665_s5 + $0x1e8] sm:$0xff] }
 0x35c   :  { %v8192_v63 = vadd.f32 %v8191_v17, %v8190_v9  ;;  %v9286_v56 = vadd.f32 %v9285_v1, %v9284_v28  ;;  %v9287_v17 = vsel %vm877_vm4, %v9168_v59, 0.0  ;;  %v11884_v28 = vld [vmem:[%s19663_s3 + $0x28] sm:$0xff] }
 0x35e   :  { %v8193_v19 = vrot.slane %v8192_v63, 4  ;;  %v9288_v3 = vadd.f32 %v9287_v17, %v9286_v56 }
 0x360   :  { %v8194_v29 = vadd.f32 %v8193_v19, %v8192_v63 }
 0x362   :  { %v8195_v14 = vrot.slane %v8194_v29, 2 }
 0x364   :  { %v8196_v16 = vadd.f32 %v8195_v14, %v8194_v29 }
 0x366   :  { %v8197_v41 = vrot.slane %v8196_v16, 1 }
 0x368   :  { %v8198_v0 = vadd.f32 %v8197_v41, %v8196_v16  ;;  %v19071_v16 = vld [vmem:[%s19665_s5 + $0x1e0] sm:$0xff] }
 0x369   :  { %v9295_v48 = vsel %vm877_vm4, %v19071_v16, 0.0 }
 0x36a   :  { %v18960_v5 = vmul.f32 0.001953125, %v8198_v0 }
 0x36c   :  { %v18968_v39 = vsub.f32 %v18659_v38, %v18960_v5  ;;  %v18972_v9 = vsub.f32 %v18654_v26, %v18960_v5  ;;  %v18977_v35 = vsub.f32 %v18699_v42, %v18960_v5  ;;  %v18981_v63 = vsub.f32 %v18694_v30, %v18960_v5 }
 0x36d   :  { %v18985_v2 = vsub.f32 %v18739_v51, %v18960_v5  ;;  %v18989_v38 = vsub.f32 %v18734_v50, %v18960_v5  ;;  %v18993_v26 = vsub.f32 %v18774_v6, %v18960_v5  ;;  %v18997_v42 = vsub.f32 %v18782_v25, %v18960_v5 }
 0x36e   :  { %v19001_v30 = vsub.f32 %v18817_v8, %v18960_v5  ;;  %v19005_v51 = vsub.f32 %v18822_v46, %v18960_v5  ;;  %v19009_v50 = vsub.f32 %v18857_v60, %v18960_v5  ;;  %v19013_v6 = vsub.f32 %v18862_v20, %v18960_v5 }
 0x36f   :  { %v19017_v25 = vsub.f32 %v18894_v47, %v18960_v5  ;;  %v19021_v8 = vsub.f32 %v18899_v15, %v18960_v5  ;;  %v19024_v19 = vsub.f32 %v8062_v43, %v18960_v5  ;;  %v19027_v46 = vsub.f32 %v8063_v24, %v18960_v5  ;;  %v19038_v47 = vld [vmem:[%s19665_s5 + $0x1c8] sm:$0xff]  ;;  %v19045_v43 = vld [vmem:[%s19665_s5 + $0x1d0] sm:$0xff] }
 0x370   :  { %v19030_v60 = vsub.f32 %v8064_v11, %v18960_v5  ;;  %v19033_v20 = vsub.f32 %v8065_v62, %v18960_v5  ;;  %v9289_v15 = vsel %vm877_vm4, %v19038_v47, 0.0  ;;  %v9291_v11 = vsel %vm877_vm4, %v19045_v43, 0.0  ;;  %v19052_v62 = vld [vmem:[%s19665_s5 + $0x1d8] sm:$0xff] }
 0x371   :  { %v9290_v24 = vadd.f32 %v9289_v15, %v9288_v3  ;;  %v8201_v29 = vsub.f32 %v11879_v52, %v18960_v5  ;;  %v8202_v57 = vsub.f32 %v11880_v45, %v18960_v5  ;;  %v8203_v49 = vsub.f32 %v11881_v37, %v18960_v5  ;;  %v11886_v37 = vld [vmem:[%s19663_s3 + $0x38] sm:$0xff] }
 0x372   :  { %v9293_v54 = vsel %vm877_vm4, %v19052_v62, 0.0  ;;  %v8204_v4 = vsub.f32 %v11882_v40, %v18960_v5  ;;  %v8205_v12 = vsub.f32 %v11883_v31, %v18960_v5  ;;  %v8206_v1 = vsub.f32 %v11884_v28, %v18960_v5  ;;  %v19121_v28 = vld [vmem:[%s19665_s5 + $0x1f8] sm:$0xff] }
 0x373   :  { %v9292_v14 = vadd.f32 %v9291_v11, %v9290_v24  ;;  %v8265_v33 = vmul.f32 %v8201_v29, %v8201_v29  ;;  %v8266_v41 = vmul.f32 %v8202_v57, %v8202_v57  ;;  %v8267_v0 = vmul.f32 %v8203_v49, %v8203_v49  ;;  %v11885_v24 = vld [vmem:[%s19663_s3 + $0x30] sm:$0xff] }
 0x374   :  { %v8268_v59 = vmul.f32 %v8204_v4, %v8204_v4  ;;  %v8207_v11 = vsub.f32 %v11885_v24, %v18960_v5  ;;  %v8269_v52 = vmul.f32 %v8205_v12, %v8205_v12  ;;  %v9297_v45 = vsel %vm877_vm4, %v19086_v21, 0.0  ;;  %v11889_v24 = vld [vmem:[%s19663_s3 + $0x50] sm:$0xff] }
 0x375   :  { %v9294_v55 = vadd.f32 %v9293_v54, %v9292_v14  ;;  %v8329_v56 = vsel %vm877_vm4, %v8265_v33, 0.0  ;;  %v8330_v17 = vsel %vm877_vm4, %v8266_v41, 0.0  ;;  %v8332_v29 = vsel %vm877_vm4, %v8267_v0, 0.0  ;;  %v19104_v14 = vld [vmem:[%s19665_s5 + $0x1f0] sm:$0xff]  ;;  %v11887_v41 = vld [vmem:[%s19663_s3 + $0x40] sm:$0xff] }
 0x376   :  { %v8331_v3 = vadd.f32 %v8330_v17, %v8329_v56  ;;  %v8208_v49 = vsub.f32 %v11886_v37, %v18960_v5  ;;  %v8270_v54 = vmul.f32 %v8206_v1, %v8206_v1  ;;  %v8334_v40 = vsel %vm877_vm4, %v8268_v59, 0.0  ;;  %v11888_v1 = vld [vmem:[%s19663_s3 + $0x48] sm:$0xff]  ;;  %v11890_v37 = vld [vmem:[%s19663_s3 + $0x58] sm:$0xff] }
 0x377   :  { %v9296_v15 = vadd.f32 %v9295_v48, %v9294_v55  ;;  %v8209_v55 = vsub.f32 %v11887_v41, %v18960_v5  ;;  %v8271_v31 = vmul.f32 %v8207_v11, %v8207_v11  ;;  %v8336_v12 = vsel %vm877_vm4, %v8269_v52, 0.0  ;;  %v11891_v41 = vld [vmem:[%s19663_s3 + $0x60] sm:$0xff] }
 0x378   :  { %v8333_v57 = vadd.f32 %v8332_v29, %v8331_v3  ;;  %v9299_v0 = vsel %vm877_vm4, %v19104_v14, 0.0  ;;  %v8210_v59 = vsub.f32 %v11888_v1, %v18960_v5  ;;  %v8272_v56 = vmul.f32 %v8208_v49, %v8208_v49 }
 0x379   :  { %v9298_v33 = vadd.f32 %v9297_v45, %v9296_v15  ;;  %v8338_v17 = vsel %vm877_vm4, %v8270_v54, 0.0  ;;  %v8211_v11 = vsub.f32 %v11889_v24, %v18960_v5  ;;  %v8273_v52 = vmul.f32 %v8209_v55, %v8209_v55 }
 0x37a   :  { %v8335_v4 = vadd.f32 %v8334_v40, %v8333_v57  ;;  %v8340_v29 = vsel %vm877_vm4, %v8271_v31, 0.0  ;;  %v9301_v45 = vsel %vm877_vm4, %v19121_v28, 0.0  ;;  %v8212_v49 = vsub.f32 %v11890_v37, %v18960_v5 }
 0x37b   :  { %v9300_v15 = vadd.f32 %v9299_v0, %v9298_v33  ;;  %v8274_v54 = vmul.f32 %v8210_v59, %v8210_v59  ;;  %v8342_v40 = vsel %vm877_vm4, %v8272_v56, 0.0  ;;  %v8213_v55 = vsub.f32 %v11891_v41, %v18960_v5 }
 0x37c   :  { %v8337_v48 = vadd.f32 %v8336_v12, %v8335_v4  ;;  %v8275_v31 = vmul.f32 %v8211_v11, %v8211_v11  ;;  %v8344_v12 = vsel %vm877_vm4, %v8273_v52, 0.0  ;;  %v8276_v59 = vmul.f32 %v8212_v49, %v8212_v49 }
 0x37d   :  { %v9302_v33 = vadd.f32 %v9301_v45, %v9300_v15  ;;  %v8346_v56 = vsel %vm877_vm4, %v8274_v54, 0.0  ;;  %v11893_v15 = vld [vmem:[%s19663_s3 + $0x70] sm:$0xff]  ;;  %v8277_v11 = vmul.f32 %v8213_v55, %v8213_v55  ;;  %v11894_v45 = vld [vmem:[%s19663_s3 + $0x78] sm:$0xff] }
 0x37e   :  { %v8339_v3 = vadd.f32 %v8338_v17, %v8337_v48  ;;  %v11892_v48 = vld [vmem:[%s19663_s3 + $0x68] sm:$0xff]  ;;  %v8215_v24 = vsub.f32 %v11893_v15, %v18960_v5  ;;  %v8348_v52 = vsel %vm877_vm4, %v8275_v31, 0.0  ;;  %v8350_v49 = vsel %vm877_vm4, %v8276_v59, 0.0 }
 0x37f   :  { %v8214_v1 = vsub.f32 %v11892_v48, %v18960_v5  ;;  %v8352_v31 = vsel %vm877_vm4, %v8277_v11, 0.0 }
 0x380   :  { %v8341_v57 = vadd.f32 %v8340_v29, %v8339_v3  ;;  %v9303_v3 = vrot.slane %v9302_v33, 4  ;;  %v8279_v55 = vmul.f32 %v8215_v24, %v8215_v24 }
 0x381   :  { %v8278_v37 = vmul.f32 %v8214_v1, %v8214_v1 }
 0x382   :  { %v8343_v4 = vadd.f32 %v8342_v40, %v8341_v57  ;;  %v8216_v57 = vsub.f32 %v11894_v45, %v18960_v5  ;;  %v9304_v40 = vadd.f32 %v9303_v3, %v9302_v33  ;;  %v8356_v24 = vsel %vm877_vm4, %v8279_v55, 0.0 }
 0x383   :  { %v8354_v59 = vsel %vm877_vm4, %v8278_v37, 0.0 }
 0x384   :  { %v8345_v0 = vadd.f32 %v8344_v12, %v8343_v4  ;;  %v11895_v4 = vld [vmem:[%s19663_s3 + $0x80] sm:$0xff]  ;;  %v8280_v1 = vmul.f32 %v8216_v57, %v8216_v57 }
 0x385   :  { %v8217_v41 = vsub.f32 %v11895_v4, %v18960_v5 }
 0x386   :  { %v8347_v17 = vadd.f32 %v8346_v56, %v8345_v0  ;;  %v11896_v0 = vld [vmem:[%s19663_s3 + $0x88] sm:$0xff]  ;;  %v9305_v56 = vrot.slane %v9304_v40, 2  ;;  %v8358_v57 = vsel %vm877_vm4, %v8280_v1, 0.0 }
 0x387   :  { %v8218_v48 = vsub.f32 %v11896_v0, %v18960_v5  ;;  %v8281_v15 = vmul.f32 %v8217_v41, %v8217_v41 }
 0x388   :  { %v8349_v29 = vadd.f32 %v8348_v52, %v8347_v17  ;;  %v11897_v17 = vld [vmem:[%s19663_s3 + $0x90] sm:$0xff]  ;;  %v11898_v52 = vld [vmem:[%s19663_s3 + $0x98] sm:$0xff] }
 0x389   :  { %v8219_v3 = vsub.f32 %v11897_v17, %v18960_v5  ;;  %v8282_v45 = vmul.f32 %v8218_v48, %v8218_v48  ;;  %v8360_v55 = vsel %vm877_vm4, %v8281_v15, 0.0 }
 0x38a   :  { %v8351_v54 = vadd.f32 %v8350_v49, %v8349_v29  ;;  %v8220_v29 = vsub.f32 %v11898_v52, %v18960_v5  ;;  %v9306_v49 = vadd.f32 %v9305_v56, %v9304_v40 }
 0x38b   :  { %v8283_v41 = vmul.f32 %v8219_v3, %v8219_v3  ;;  %v8362_v1 = vsel %vm877_vm4, %v8282_v45, 0.0 }
 0x38c   :  { %v8353_v12 = vadd.f32 %v8352_v31, %v8351_v54  ;;  %v11899_v54 = vld [vmem:[%s19663_s3 + $0xa0] sm:$0xff]  ;;  %v8284_v48 = vmul.f32 %v8220_v29, %v8220_v29 }
 0x38d   :  { %v8221_v4 = vsub.f32 %v11899_v54, %v18960_v5  ;;  %v8364_v3 = vsel %vm877_vm4, %v8283_v41, 0.0 }
 0x38e   :  { %v8355_v33 = vadd.f32 %v8354_v59, %v8353_v12  ;;  %v11900_v12 = vld [vmem:[%s19663_s3 + $0xa8] sm:$0xff]  ;;  %v9307_v59 = vrot.slane %v9306_v49, 1  ;;  %v8366_v29 = vsel %vm877_vm4, %v8284_v48, 0.0 }
 0x38f   :  { %v8222_v0 = vsub.f32 %v11900_v12, %v18960_v5  ;;  %v8285_v17 = vmul.f32 %v8221_v4, %v8221_v4 }
 0x390   :  { %v8357_v11 = vadd.f32 %v8356_v24, %v8355_v33  ;;  %v11901_v33 = vld [vmem:[%s19663_s3 + $0xb0] sm:$0xff]  ;;  %v11902_v24 = vld [vmem:[%s19663_s3 + $0xb8] sm:$0xff] }
 0x391   :  { %v8223_v56 = vsub.f32 %v11901_v33, %v18960_v5  ;;  %v8286_v52 = vmul.f32 %v8222_v0, %v8222_v0  ;;  %v8368_v41 = vsel %vm877_vm4, %v8285_v17, 0.0 }
 0x392   :  { %v8359_v37 = vadd.f32 %v8358_v57, %v8357_v11  ;;  %v8224_v11 = vsub.f32 %v11902_v24, %v18960_v5  ;;  %v9308_v57 = vadd.f32 %v9307_v59, %v9306_v49 }
 0x393   :  { %v8287_v4 = vmul.f32 %v8223_v56, %v8223_v56  ;;  %v8370_v48 = vsel %vm877_vm4, %v8286_v52, 0.0 }
 0x394   :  { %v8361_v31 = vadd.f32 %v8360_v55, %v8359_v37  ;;  %v11903_v37 = vld [vmem:[%s19663_s3 + $0xc0] sm:$0xff]  ;;  %v8288_v0 = vmul.f32 %v8224_v11, %v8224_v11 }
 0x395   :  { %v8225_v54 = vsub.f32 %v11903_v37, %v18960_v5  ;;  %v8372_v56 = vsel %vm877_vm4, %v8287_v4, 0.0 }
 0x396   :  { %v8363_v40 = vadd.f32 %v8362_v1, %v8361_v31  ;;  %v11904_v31 = vld [vmem:[%s19663_s3 + $0xc8] sm:$0xff]  ;;  %v19210_v1 = vmul.f32 0.001953125, %v9308_v57  ;;  %v8374_v11 = vsel %vm877_vm4, %v8288_v0, 0.0  ;;  %v11908_v57 = vld [vmem:[%s19663_s3 + $0xe0] sm:$0xff] }
 0x397   :  { %v8226_v12 = vsub.f32 %v11904_v31, %v18960_v5  ;;  %v8289_v33 = vmul.f32 %v8225_v54, %v8225_v54  ;;  %v8229_v37 = vsub.f32 %v11908_v57, %v18960_v5 }
 0x398   :  { %v8365_v15 = vadd.f32 %v8364_v3, %v8363_v40  ;;  %v11905_v40 = vld [vmem:[%s19663_s3 + $0xd0] sm:$0xff]  ;;  %v11906_v3 = vld [vmem:[%s19663_s3 + $0xd8] sm:$0xff] }
 0x399   :  { %v8227_v59 = vsub.f32 %v11905_v40, %v18960_v5  ;;  %v8290_v24 = vmul.f32 %v8226_v12, %v8226_v12  ;;  %v8376_v4 = vsel %vm877_vm4, %v8289_v33, 0.0  ;;  %v11910_v12 = vld [vmem:[%s19663_s3 + $0xe8] sm:$0xff]  ;;  %v11911_v40 = vld [vmem:[%s19665_s5 + $0x10] sm:$0xff] }
 0x39a   :  { %v8367_v45 = vadd.f32 %v8366_v29, %v8365_v15  ;;  %v8228_v15 = vsub.f32 %v11906_v3, %v18960_v5  ;;  %v11907_v29 = vld [vmem:[%s19665_s5] sm:$0xff]  ;;  %v8230_v0 = vsub.f32 %v11910_v12, %v18960_v5 }
 0x39b   :  { %v8291_v54 = vmul.f32 %v8227_v59, %v8227_v59  ;;  %v9312_v59 = vsub.f32 %v11911_v40, %v19210_v1  ;;  %v11916_v40 = vld [vmem:[%s19665_s5 + $0x28] sm:$0xff] }
 0x39c   :  { %v8369_v55 = vadd.f32 %v8368_v41, %v8367_v45  ;;  %v9310_v45 = vsub.f32 %v11907_v29, %v19210_v1  ;;  %v11909_v41 = vld [vmem:[%s19665_s5 + $0x8] sm:$0xff]  ;;  %v8294_v12 = vmul.f32 %v8230_v0, %v8230_v0 }
 0x39e   :  { %v8371_v49 = vadd.f32 %v8370_v48, %v8369_v55  ;;  %v9311_v55 = vsub.f32 %v11909_v41, %v19210_v1  ;;  %v8292_v48 = vmul.f32 %v8228_v15, %v8228_v15  ;;  %v9374_v3 = vmul.f32 %v9310_v45, %v9310_v45  ;;  %v11913_v15 = vld [vmem:[%s19663_s3 + $0xf0] sm:$0xff]  ;;  %v11915_v45 = vld [vmem:[%s19663_s3 + $0xf8] sm:$0xff] }
 0x3a0   :  { %v8373_v17 = vadd.f32 %v8372_v56, %v8371_v49  ;;  %v8378_v49 = vsel %vm877_vm4, %v8290_v24, 0.0  ;;  %v11912_v56 = vld [vmem:[%s19665_s5 + $0x18] sm:$0xff]  ;;  %v8231_v24 = vsub.f32 %v11913_v15, %v18960_v5  ;;  %v9375_v29 = vmul.f32 %v9311_v55, %v9311_v55 }
 0x3a2   :  { %v8375_v52 = vadd.f32 %v8374_v11, %v8373_v17  ;;  %v9313_v17 = vsub.f32 %v11912_v56, %v19210_v1  ;;  %v8293_v11 = vmul.f32 %v8229_v37, %v8229_v37  ;;  %v9376_v37 = vmul.f32 %v9312_v59, %v9312_v59 }
 0x3a3   :  { %v9438_v56 = vsel %vm877_vm4, %v9374_v3, 0.0  ;;  %v8295_v15 = vmul.f32 %v8231_v24, %v8231_v24  ;;  %v9439_v0 = vsel %vm877_vm4, %v9375_v29, 0.0  ;;  %v8386_v3 = vsel %vm877_vm4, %v8294_v12, 0.0 }
 0x3a4   :  { %v8377_v31 = vadd.f32 %v8376_v4, %v8375_v52  ;;  %v8380_v52 = vsel %vm877_vm4, %v8291_v54, 0.0  ;;  %v11914_v4 = vld [vmem:[%s19665_s5 + $0x20] sm:$0xff]  ;;  %v8233_v54 = vsub.f32 %v18379_v44, %v18960_v5  ;;  %v11917_v44 = vld [vmem:[%s19665_s5 + $0x30] sm:$0xff] }
 0x3a5   :  { %v9314_v41 = vsub.f32 %v11914_v4, %v19210_v1  ;;  %v9377_v4 = vmul.f32 %v9313_v17, %v9313_v17  ;;  %v8235_v17 = vsub.f32 %v18419_v27, %v18960_v5 }
 0x3a6   :  { %v8379_v33 = vadd.f32 %v8378_v49, %v8377_v31  ;;  %v8232_v31 = vsub.f32 %v11915_v45, %v18960_v5  ;;  %v8382_v49 = vsel %vm877_vm4, %v8292_v48, 0.0  ;;  %v8234_v48 = vsub.f32 %v18374_v10, %v18960_v5 }
 0x3a7   :  { %v9440_v45 = vadd.f32 %v9439_v0, %v9438_v56  ;;  %v9378_v24 = vmul.f32 %v9314_v41, %v9314_v41  ;;  %v8297_v29 = vmul.f32 %v8233_v54, %v8233_v54  ;;  %v9443_v12 = vsel %vm877_vm4, %v9377_v4, 0.0 }
 0x3a8   :  { %v8381_v57 = vadd.f32 %v8380_v52, %v8379_v33  ;;  %v9315_v33 = vsub.f32 %v11916_v40, %v19210_v1  ;;  %v8384_v52 = vsel %vm877_vm4, %v8293_v11, 0.0  ;;  %v9441_v11 = vsel %vm877_vm4, %v9376_v37, 0.0 }
 0x3a9   :  { %v9442_v10 = vadd.f32 %v9441_v11, %v9440_v45  ;;  %v8236_v41 = vsub.f32 %v18413_v61, %v18960_v5  ;;  %v8298_v37 = vmul.f32 %v8234_v48, %v8234_v48  ;;  %v9445_v45 = vsel %vm877_vm4, %v9378_v24, 0.0 }
 0x3aa   :  { %v8383_v55 = vadd.f32 %v8382_v49, %v8381_v57  ;;  %v9316_v57 = vsub.f32 %v11917_v44, %v19210_v1  ;;  %v8296_v49 = vmul.f32 %v8232_v31, %v8232_v31  ;;  %v9379_v31 = vmul.f32 %v9315_v33, %v9315_v33 }
 0x3ab   :  { %v9444_v27 = vadd.f32 %v9443_v12, %v9442_v10  ;;  %v8237_v33 = vsub.f32 %v18459_v13, %v18960_v5  ;;  %v8299_v4 = vmul.f32 %v8235_v17, %v8235_v17  ;;  %v8392_v48 = vsel %vm877_vm4, %v8297_v29, 0.0  ;;  %v11921_v29 = vld [vmem:[%s19665_s5 + $0x50] sm:$0xff] }
 0x3ac   :  { %v8385_v59 = vadd.f32 %v8384_v52, %v8383_v55  ;;  %v8388_v55 = vsel %vm877_vm4, %v8295_v15, 0.0  ;;  %v11918_v52 = vld [vmem:[%s19665_s5 + $0x38] sm:$0xff]  ;;  %v8390_v54 = vsel %vm877_vm4, %v8296_v49, 0.0  ;;  %v11919_v15 = vld [vmem:[%s19665_s5 + $0x40] sm:$0xff]  ;;  %v9380_v44 = vmul.f32 %v9316_v57, %v9316_v57  ;;  %v11920_v49 = vld [vmem:[%s19665_s5 + $0x48] sm:$0xff] }
 0x3ad   :  { %v9317_v56 = vsub.f32 %v11918_v52, %v19210_v1  ;;  %v9446_v61 = vadd.f32 %v9445_v45, %v9444_v27  ;;  %v9319_v11 = vsub.f32 %v11920_v49, %v19210_v1  ;;  %v9447_v10 = vsel %vm877_vm4, %v9379_v31, 0.0 }
 0x3ae   :  { %v8387_v40 = vadd.f32 %v8386_v3, %v8385_v59  ;;  %v9318_v59 = vsub.f32 %v11919_v15, %v19210_v1  ;;  %v8238_v57 = vsub.f32 %v18454_v36, %v18960_v5  ;;  %v8300_v24 = vmul.f32 %v8236_v41, %v8236_v41 }
 0x3af   :  { %v9448_v13 = vadd.f32 %v9447_v10, %v9446_v61  ;;  %v8394_v17 = vsel %vm877_vm4, %v8298_v37, 0.0  ;;  %v9320_v52 = vsub.f32 %v11921_v29, %v19210_v1  ;;  %v8301_v31 = vmul.f32 %v8237_v33, %v8237_v33  ;;  %v11922_v37 = vld [vmem:[%s19665_s5 + $0x58] sm:$0xff] }
 0x3b0   :  { %v8389_v0 = vadd.f32 %v8388_v55, %v8387_v40  ;;  %v9381_v40 = vmul.f32 %v9317_v56, %v9317_v56  ;;  %v9382_v12 = vmul.f32 %v9318_v59, %v9318_v59  ;;  %v8239_v56 = vsub.f32 %v18499_v53, %v18960_v5 }
 0x3b1   :  { %v8396_v41 = vsel %vm877_vm4, %v8299_v4, 0.0  ;;  %v9383_v15 = vmul.f32 %v9319_v11, %v9319_v11  ;;  %v8240_v59 = vsub.f32 %v18494_v34, %v18960_v5  ;;  %v8398_v33 = vsel %vm877_vm4, %v8300_v24, 0.0  ;;  %v11923_v4 = vld [vmem:[%s19665_s5 + $0x60] sm:$0xff]  ;;  %v11924_v24 = vld [vmem:[%s19665_s5 + $0x68] sm:$0xff] }
 0x3b2   :  { %v8391_v3 = vadd.f32 %v8390_v54, %v8389_v0  ;;  %v9449_v0 = vsel %vm877_vm4, %v9380_v44, 0.0  ;;  %v9321_v54 = vsub.f32 %v11922_v37, %v19210_v1  ;;  %v9451_v45 = vsel %vm877_vm4, %v9381_v40, 0.0 }
 0x3b3   :  { %v9450_v36 = vadd.f32 %v9449_v0, %v9448_v13  ;;  %v8302_v44 = vmul.f32 %v8238_v57, %v8238_v57  ;;  %v9322_v61 = vsub.f32 %v11923_v4, %v19210_v1  ;;  %v9453_v49 = vsel %vm877_vm4, %v9382_v12, 0.0 }
 0x3b4   :  { %v8393_v55 = vadd.f32 %v8392_v48, %v8391_v3  ;;  %v9384_v48 = vmul.f32 %v9320_v52, %v9320_v52  ;;  %v8241_v11 = vsub.f32 %v18539_v18, %v18960_v5  ;;  %v8303_v40 = vmul.f32 %v8239_v56, %v8239_v56  ;;  %v11925_v56 = vld [vmem:[%s19665_s5 + $0x70] sm:$0xff] }
 0x3b5   :  { %v9452_v53 = vadd.f32 %v9451_v45, %v9450_v36  ;;  %v8400_v57 = vsel %vm877_vm4, %v8301_v31, 0.0  ;;  %v9385_v13 = vmul.f32 %v9321_v54, %v9321_v54  ;;  %v8242_v29 = vsub.f32 %v18534_v32, %v18960_v5  ;;  %v11926_v45 = vld [vmem:[%s19665_s5 + $0x78] sm:$0xff] }
 0x3b6   :  { %v8395_v27 = vadd.f32 %v8394_v17, %v8393_v55  ;;  %v9323_v55 = vsub.f32 %v11924_v24, %v19210_v1  ;;  %v9455_v17 = vsel %vm877_vm4, %v9383_v15, 0.0  ;;  %v8304_v52 = vmul.f32 %v8240_v59, %v8240_v59 }
 0x3b7   :  { %v9454_v34 = vadd.f32 %v9453_v49, %v9452_v53  ;;  %v8402_v0 = vsel %vm877_vm4, %v8302_v44, 0.0  ;;  %v9324_v31 = vsub.f32 %v11925_v56, %v19210_v1  ;;  %v9457_v36 = vsel %vm877_vm4, %v9384_v48, 0.0  ;;  %v11927_v48 = vld [vmem:[%s19665_s5 + $0x80] sm:$0xff]  ;;  %v11929_v56 = vld [vmem:[%s19665_s5 + $0x90] sm:$0xff] }
 0x3b8   :  { %v8397_v3 = vadd.f32 %v8396_v41, %v8395_v27  ;;  %v9386_v27 = vmul.f32 %v9322_v61, %v9322_v61  ;;  %v8243_v41 = vsub.f32 %v18579_v23, %v18960_v5  ;;  %v8305_v37 = vmul.f32 %v8241_v11, %v8241_v11 }
 0x3b9   :  { %v9456_v18 = vadd.f32 %v9455_v17, %v9454_v34  ;;  %v8404_v15 = vsel %vm877_vm4, %v8303_v40, 0.0  ;;  %v9325_v59 = vsub.f32 %v11926_v45, %v19210_v1  ;;  %v9387_v44 = vmul.f32 %v9323_v55, %v9323_v55  ;;  %v11928_v55 = vld [vmem:[%s19665_s5 + $0x88] sm:$0xff] }
 0x3ba   :  { %v8399_v10 = vadd.f32 %v8398_v33, %v8397_v3  ;;  %v9459_v3 = vsel %vm877_vm4, %v9385_v13, 0.0  ;;  %v8244_v53 = vsub.f32 %v18574_v58, %v18960_v5  ;;  %v8306_v33 = vmul.f32 %v8242_v29, %v8242_v29 }
 0x3bb   :  { %v9458_v32 = vadd.f32 %v9457_v36, %v9456_v18  ;;  %v8406_v61 = vsel %vm877_vm4, %v8304_v52, 0.0  ;;  %v9326_v49 = vsub.f32 %v11927_v48, %v19210_v1  ;;  %v9388_v11 = vmul.f32 %v9324_v31, %v9324_v31 }
 0x3bc   :  { %v8401_v12 = vadd.f32 %v8400_v57, %v8399_v10  ;;  %v9461_v40 = vsel %vm877_vm4, %v9386_v27, 0.0  ;;  %v8245_v10 = vsub.f32 %v18619_v7, %v18960_v5  ;;  %v8307_v34 = vmul.f32 %v8243_v41, %v8243_v41 }
 0x3bd   :  { %v9460_v23 = vadd.f32 %v9459_v3, %v9458_v32  ;;  %v8408_v24 = vsel %vm877_vm4, %v8305_v37, 0.0  ;;  %v9327_v13 = vsub.f32 %v11928_v55, %v19210_v1  ;;  %v9389_v17 = vmul.f32 %v9325_v59, %v9325_v59 }
 0x3be   :  { %v8403_v54 = vadd.f32 %v8402_v0, %v8401_v12  ;;  %v9463_v29 = vsel %vm877_vm4, %v9387_v44, 0.0  ;;  %v8246_v52 = vsub.f32 %v18614_v22, %v18960_v5  ;;  %v8308_v12 = vmul.f32 %v8244_v53, %v8244_v53  ;;  %v11930_v22 = vld [vmem:[%s19665_s5 + $0x98] sm:$0xff] }
 0x3bf   :  { %v9462_v58 = vadd.f32 %v9461_v40, %v9460_v23  ;;  %v8410_v0 = vsel %vm877_vm4, %v8306_v33, 0.0  ;;  %v9328_v31 = vsub.f32 %v11929_v56, %v19210_v1  ;;  %v9390_v27 = vmul.f32 %v9326_v49, %v9326_v49 }
 0x3c0   :  { %v8405_v4 = vadd.f32 %v8404_v15, %v8403_v54  ;;  %v9465_v36 = vsel %vm877_vm4, %v9388_v11, 0.0  ;;  %v8309_v41 = vmul.f32 %v8245_v10, %v8245_v10  ;;  %v8412_v32 = vsel %vm877_vm4, %v8307_v34, 0.0  ;;  %v11932_v34 = vld [vmem:[%s19665_s5 + $0xa8] sm:$0xff] }
 0x3c1   :  { %v9464_v7 = vadd.f32 %v9463_v29, %v9462_v58  ;;  %v9329_v15 = vsub.f32 %v11930_v22, %v19210_v1  ;;  %v9391_v45 = vmul.f32 %v9327_v13, %v9327_v13  ;;  %v9467_v59 = vsel %vm877_vm4, %v9389_v17, 0.0  ;;  %v11933_v29 = vld [vmem:[%s19665_s5 + $0xb0] sm:$0xff]  ;;  %v11935_v22 = vld [vmem:[%s19665_s5 + $0xc0] sm:$0xff] }
 0x3c2   :  { %v8407_v57 = vadd.f32 %v8406_v61, %v8405_v4  ;;  %v8310_v44 = vmul.f32 %v8246_v52, %v8246_v52  ;;  %v8414_v33 = vsel %vm877_vm4, %v8308_v12, 0.0  ;;  %v11931_v4 = vld [vmem:[%s19665_s5 + $0xa0] sm:$0xff]  ;;  %v9392_v61 = vmul.f32 %v9328_v31, %v9328_v31  ;;  %v11934_v31 = vld [vmem:[%s19665_s5 + $0xb8] sm:$0xff] }
 0x3c3   :  { %v9466_v54 = vadd.f32 %v9465_v36, %v9464_v7  ;;  %v9330_v23 = vsub.f32 %v11931_v4, %v19210_v1  ;;  %v9469_v48 = vsel %vm877_vm4, %v9390_v27, 0.0  ;;  %v8311_v49 = vmul.f32 %v18968_v39, %v18968_v39 }
 0x3c4   :  { %v8409_v18 = vadd.f32 %v8408_v24, %v8407_v57  ;;  %v8416_v10 = vsel %vm877_vm4, %v8309_v41, 0.0  ;;  %v9331_v57 = vsub.f32 %v11932_v34, %v19210_v1  ;;  %v9393_v58 = vmul.f32 %v9329_v15, %v9329_v15 }
 0x3c5   :  { %v9468_v53 = vadd.f32 %v9467_v59, %v9466_v54  ;;  %v9471_v24 = vsel %vm877_vm4, %v9391_v45, 0.0  ;;  %v8312_v55 = vmul.f32 %v18972_v9, %v18972_v9  ;;  %v8418_v39 = vsel %vm877_vm4, %v8310_v44, 0.0 }
 0x3c6   :  { %v8411_v37 = vadd.f32 %v8410_v0, %v8409_v18  ;;  %v9332_v52 = vsub.f32 %v11933_v29, %v19210_v1  ;;  %v9394_v12 = vmul.f32 %v9330_v23, %v9330_v23  ;;  %v9473_v18 = vsel %vm877_vm4, %v9392_v61, 0.0 }
 0x3c7   :  { %v9470_v40 = vadd.f32 %v9469_v48, %v9468_v53  ;;  %v8313_v7 = vmul.f32 %v18977_v35, %v18977_v35  ;;  %v8420_v9 = vsel %vm877_vm4, %v8311_v49, 0.0  ;;  %v9333_v27 = vsub.f32 %v11934_v31, %v19210_v1 }
 0x3c8   :  { %v8413_v3 = vadd.f32 %v8412_v32, %v8411_v37  ;;  %v9395_v36 = vmul.f32 %v9331_v57, %v9331_v57  ;;  %v9475_v41 = vsel %vm877_vm4, %v9393_v58, 0.0  ;;  %v8314_v37 = vmul.f32 %v18981_v63, %v18981_v63 }
 0x3c9   :  { %v9472_v17 = vadd.f32 %v9471_v24, %v9470_v40  ;;  %v8422_v35 = vsel %vm877_vm4, %v8312_v55, 0.0  ;;  %v9334_v15 = vsub.f32 %v11935_v22, %v19210_v1  ;;  %v9396_v45 = vmul.f32 %v9332_v52, %v9332_v52  ;;  %v11937_v40 = vld [vmem:[%s19665_s5 + $0xd0] sm:$0xff] }
 0x3ca   :  { %v8415_v11 = vadd.f32 %v8414_v33, %v8413_v3  ;;  %v9477_v59 = vsel %vm877_vm4, %v9394_v12, 0.0  ;;  %v8315_v44 = vmul.f32 %v18985_v2, %v18985_v2  ;;  %v8424_v63 = vsel %vm877_vm4, %v8313_v7, 0.0  ;;  %v11936_v33 = vld [vmem:[%s19665_s5 + $0xc8] sm:$0xff]  ;;  %v11939_v7 = vld [vmem:[%s19665_s5 + $0xe0] sm:$0xff] }
 0x3cb   :  { %v9474_v56 = vadd.f32 %v9473_v18, %v9472_v17  ;;  %v9335_v4 = vsub.f32 %v11936_v33, %v19210_v1  ;;  %v9397_v23 = vmul.f32 %v9333_v27, %v9333_v27  ;;  %v9479_v61 = vsel %vm877_vm4, %v9395_v36, 0.0 }
 0x3cc   :  { %v8417_v13 = vadd.f32 %v8416_v10, %v8415_v11  ;;  %v8316_v48 = vmul.f32 %v18989_v38, %v18989_v38  ;;  %v8426_v2 = vsel %vm877_vm4, %v8314_v37, 0.0  ;;  %v9336_v10 = vsub.f32 %v11937_v40, %v19210_v1  ;;  %v11943_v40 = vld [vmem:[%s19665_s5 + $0x100] sm:$0xff] }
 0x3cd   :  { %v9476_v32 = vadd.f32 %v9475_v41, %v9474_v56  ;;  %v9398_v34 = vmul.f32 %v9334_v15, %v9334_v15  ;;  %v9481_v57 = vsel %vm877_vm4, %v9396_v45, 0.0  ;;  %v8317_v58 = vmul.f32 %v18993_v26, %v18993_v26  ;;  %v11940_v41 = vld [vmem:[%s19665_s5 + $0xe8] sm:$0xff]  ;;  %v11941_v45 = vld [vmem:[%s19665_s5 + $0xf0] sm:$0xff] }
 0x3ce   :  { %v8419_v0 = vadd.f32 %v8418_v39, %v8417_v13  ;;  %v8428_v38 = vsel %vm877_vm4, %v8315_v44, 0.0  ;;  %v11938_v13 = vld [vmem:[%s19665_s5 + $0xd8] sm:$0xff]  ;;  %v9399_v39 = vmul.f32 %v9335_v4, %v9335_v4  ;;  %v9483_v29 = vsel %vm877_vm4, %v9397_v23, 0.0 }
 0x3cf   :  { %v9478_v53 = vadd.f32 %v9477_v59, %v9476_v32  ;;  %v9337_v17 = vsub.f32 %v11938_v13, %v19210_v1  ;;  %v8318_v52 = vmul.f32 %v18997_v42, %v18997_v42  ;;  %v8430_v26 = vsel %vm877_vm4, %v8316_v48, 0.0  ;;  %v11942_v4 = vld [vmem:[%s19665_s5 + $0xf8] sm:$0xff] }
 0x3d0   :  { %v8421_v54 = vadd.f32 %v8420_v9, %v8419_v0  ;;  %v9338_v0 = vsub.f32 %v11939_v7, %v19210_v1  ;;  %v9400_v56 = vmul.f32 %v9336_v10, %v9336_v10  ;;  %v9485_v9 = vsel %vm877_vm4, %v9398_v34, 0.0 }
 0x3d1   :  { %v9480_v11 = vadd.f32 %v9479_v61, %v9478_v53  ;;  %v8319_v31 = vmul.f32 %v19001_v30, %v19001_v30  ;;  %v8432_v42 = vsel %vm877_vm4, %v8317_v58, 0.0  ;;  %v9339_v37 = vsub.f32 %v11940_v41, %v19210_v1 }
 0x3d2   :  { %v8423_v3 = vadd.f32 %v8422_v35, %v8421_v54  ;;  %v9401_v54 = vmul.f32 %v9337_v17, %v9337_v17  ;;  %v9487_v32 = vsel %vm877_vm4, %v9399_v39, 0.0  ;;  %v8320_v35 = vmul.f32 %v19005_v51, %v19005_v51 }
 0x3d3   :  { %v9482_v55 = vadd.f32 %v9481_v57, %v9480_v11  ;;  %v8434_v30 = vsel %vm877_vm4, %v8318_v52, 0.0  ;;  %v9340_v59 = vsub.f32 %v11941_v45, %v19210_v1  ;;  %v9402_v44 = vmul.f32 %v9338_v0, %v9338_v0 }
 0x3d4   :  { %v8425_v49 = vadd.f32 %v8424_v63, %v8423_v3  ;;  %v9489_v3 = vsel %vm877_vm4, %v9400_v56, 0.0  ;;  %v8321_v53 = vmul.f32 %v19009_v50, %v19009_v50  ;;  %v8436_v51 = vsel %vm877_vm4, %v8319_v31, 0.0 }
 0x3d5   :  { %v9484_v18 = vadd.f32 %v9483_v29, %v9482_v55  ;;  %v9341_v23 = vsub.f32 %v11942_v4, %v19210_v1  ;;  %v9403_v61 = vmul.f32 %v9339_v37, %v9339_v37  ;;  %v9491_v48 = vsel %vm877_vm4, %v9401_v54, 0.0 }
 0x3d6   :  { %v8427_v24 = vadd.f32 %v8426_v2, %v8425_v49  ;;  %v8322_v49 = vmul.f32 %v19013_v6, %v19013_v6  ;;  %v8438_v50 = vsel %vm877_vm4, %v8320_v35, 0.0  ;;  %v9342_v10 = vsub.f32 %v11943_v40, %v19210_v1  ;;  %v11947_v35 = vld [vmem:[%s19665_s5 + $0x120] sm:$0xff] }
 0x3d7   :  { %v9486_v36 = vadd.f32 %v9485_v9, %v9484_v18  ;;  %v9404_v34 = vmul.f32 %v9340_v59, %v9340_v59  ;;  %v9493_v57 = vsel %vm877_vm4, %v9402_v44, 0.0  ;;  %v8323_v58 = vmul.f32 %v19017_v25, %v19017_v25  ;;  %v11945_v18 = vld [vmem:[%s19665_s5 + $0x110] sm:$0xff] }
 0x3d8   :  { %v8429_v12 = vadd.f32 %v8428_v38, %v8427_v24  ;;  %v8440_v6 = vsel %vm877_vm4, %v8321_v53, 0.0  ;;  %v11944_v38 = vld [vmem:[%s19665_s5 + $0x108] sm:$0xff]  ;;  %v9405_v17 = vmul.f32 %v9341_v23, %v9341_v23  ;;  %v9495_v39 = vsel %vm877_vm4, %v9403_v61, 0.0  ;;  %v11949_v61 = vld [vmem:[%s19665_s5 + $0x130] sm:$0xff] }
 0x3d9   :  { %v9488_v15 = vadd.f32 %v9487_v32, %v9486_v36  ;;  %v9343_v13 = vsub.f32 %v11944_v38, %v19210_v1  ;;  %v8324_v29 = vmul.f32 %v19021_v8, %v19021_v8  ;;  %v8442_v25 = vsel %vm877_vm4, %v8322_v49, 0.0 }
 0x3da   :  { %v8431_v27 = vadd.f32 %v8430_v26, %v8429_v12  ;;  %v9344_v26 = vsub.f32 %v11945_v18, %v19210_v1  ;;  %v9406_v7 = vmul.f32 %v9342_v10, %v9342_v10  ;;  %v9497_v0 = vsel %vm877_vm4, %v9404_v34, 0.0 }
 0x3db   :  { %v9490_v33 = vadd.f32 %v9489_v3, %v9488_v15  ;;  %v8325_v56 = vmul.f32 %v19024_v19, %v19024_v19  ;;  %v8444_v8 = vsel %vm877_vm4, %v8323_v58, 0.0  ;;  %v9499_v41 = vsel %vm877_vm4, %v9405_v17, 0.0  ;;  %v11948_v3 = vld [vmem:[%s19665_s5 + $0x128] sm:$0xff] }
 0x3dc   :  { %v8433_v22 = vadd.f32 %v8432_v42, %v8431_v27  ;;  %v11946_v27 = vld [vmem:[%s19665_s5 + $0x118] sm:$0xff]  ;;  %v9407_v42 = vmul.f32 %v9343_v13, %v9343_v13  ;;  %v8326_v37 = vmul.f32 %v19027_v46, %v19027_v46  ;;  %v8446_v19 = vsel %vm877_vm4, %v8324_v29, 0.0 }
 0x3dd   :  { %v9492_v2 = vadd.f32 %v9491_v48, %v9490_v33  ;;  %v9345_v36 = vsub.f32 %v11946_v27, %v19210_v1  ;;  %v9408_v15 = vmul.f32 %v9344_v26, %v9344_v26  ;;  %v8327_v45 = vmul.f32 %v19030_v60, %v19030_v60 }
 0x3de   :  { %v8435_v63 = vadd.f32 %v8434_v30, %v8433_v22  ;;  %v9346_v22 = vsub.f32 %v11947_v35, %v19210_v1  ;;  %v9501_v30 = vsel %vm877_vm4, %v9406_v7, 0.0  ;;  %v8448_v46 = vsel %vm877_vm4, %v8325_v56, 0.0 }
 0x3df   :  { %v9494_v55 = vadd.f32 %v9493_v57, %v9492_v2  ;;  %v9347_v53 = vsub.f32 %v11948_v3, %v19210_v1  ;;  %v9503_v33 = vsel %vm877_vm4, %v9407_v42, 0.0  ;;  %v8450_v60 = vsel %vm877_vm4, %v8326_v37, 0.0 }
 0x3e0   :  { %v8437_v11 = vadd.f32 %v8436_v51, %v8435_v63  ;;  %v9409_v63 = vmul.f32 %v9345_v36, %v9345_v36  ;;  %v8328_v51 = vmul.f32 %v19033_v20, %v19033_v20  ;;  %v9348_v48 = vsub.f32 %v11949_v61, %v19210_v1  ;;  %v11950_v20 = vld [vmem:[%s19665_s5 + $0x138] sm:$0xff] }
 0x3e1   :  { %v9496_v12 = vadd.f32 %v9495_v39, %v9494_v55  ;;  %v9410_v49 = vmul.f32 %v9346_v22, %v9346_v22  ;;  %v8452_v40 = vsel %vm877_vm4, %v8327_v45, 0.0  ;;  %v9349_v10 = vsub.f32 %v11950_v20, %v19210_v1  ;;  %v11954_v36 = vld [vmem:[%s19665_s5 + $0x158] sm:$0xff] }
 0x3e2   :  { %v8439_v24 = vadd.f32 %v8438_v50, %v8437_v11  ;;  %v9505_v11 = vsel %vm877_vm4, %v9408_v15, 0.0  ;;  %v9411_v34 = vmul.f32 %v9347_v53, %v9347_v53  ;;  %v9507_v57 = vsel %vm877_vm4, %v9409_v63, 0.0 }
 0x3e3   :  { %v9498_v31 = vadd.f32 %v9497_v0, %v9496_v12  ;;  %v8454_v55 = vsel %vm877_vm4, %v8328_v51, 0.0  ;;  %v9412_v13 = vmul.f32 %v9348_v48, %v9348_v48  ;;  %v9509_v17 = vsel %vm877_vm4, %v9410_v49, 0.0  ;;  %v11953_v0 = vld [vmem:[%s19665_s5 + $0x150] sm:$0xff]  ;;  %v11958_v49 = vld [vmem:[%s19665_s5 + $0x178] sm:$0xff] }
 0x3e4   :  { %v8441_v52 = vadd.f32 %v8440_v6, %v8439_v24  ;;  %v11951_v6 = vld [vmem:[%s19665_s5 + $0x140] sm:$0xff]  ;;  %v9511_v18 = vsel %vm877_vm4, %v9411_v34, 0.0  ;;  %v9352_v56 = vsub.f32 %v11953_v0, %v19210_v1  ;;  %v9353_v42 = vsub.f32 %v11954_v36, %v19210_v1 }
 0x3e5   :  { %v9500_v32 = vadd.f32 %v9499_v41, %v9498_v31  ;;  %v9350_v38 = vsub.f32 %v11951_v6, %v19210_v1  ;;  %v9513_v31 = vsel %vm877_vm4, %v9412_v13, 0.0  ;;  %v8462_v61 = vmul.f32 512.0, %v18960_v5  ;;  %v11959_v5 = vld [vmem:[%s19665_s5 + $0x180] sm:$0xff] }
 0x3e6   :  { %v8443_v9 = vadd.f32 %v8442_v25, %v8441_v52  ;;  %v11952_v52 = vld [vmem:[%s19665_s5 + $0x148] sm:$0xff]  ;;  %v9413_v25 = vmul.f32 %v9349_v10, %v9349_v10  ;;  %v9416_v22 = vmul.f32 %v9352_v56, %v9352_v56  ;;  %v9358_v10 = vsub.f32 %v11959_v5, %v19210_v1 }
 0x3e7   :  { %v9502_v44 = vadd.f32 %v9501_v30, %v9500_v32  ;;  %v9351_v12 = vsub.f32 %v11952_v52, %v19210_v1 }
 0x3e8   :  { %v8445_v54 = vadd.f32 %v8444_v8, %v8443_v9  ;;  %v9414_v9 = vmul.f32 %v9350_v38, %v9350_v38  ;;  %v9515_v37 = vsel %vm877_vm4, %v9413_v25, 0.0 }
 0x3e9   :  { %v9504_v23 = vadd.f32 %v9503_v33, %v9502_v44  ;;  %v9415_v41 = vmul.f32 %v9351_v12, %v9351_v12  ;;  %v11957_v33 = vld [vmem:[%s19665_s5 + $0x170] sm:$0xff] }
 0x3ea   :  { %v8447_v59 = vadd.f32 %v8446_v19, %v8445_v54  ;;  %v11955_v19 = vld [vmem:[%s19665_s5 + $0x160] sm:$0xff]  ;;  %v9517_v15 = vsel %vm877_vm4, %v9414_v9, 0.0  ;;  %v9356_v51 = vsub.f32 %v11957_v33, %v19210_v1 }
 0x3eb   :  { %v9506_v50 = vadd.f32 %v9505_v11, %v9504_v23  ;;  %v9354_v35 = vsub.f32 %v11955_v19, %v19210_v1  ;;  %v9519_v3 = vsel %vm877_vm4, %v9415_v41, 0.0  ;;  %v9521_v23 = vsel %vm877_vm4, %v9416_v22, 0.0 }
 0x3ec   :  { %v8449_v4 = vadd.f32 %v8448_v46, %v8447_v59  ;;  %v11956_v59 = vld [vmem:[%s19665_s5 + $0x168] sm:$0xff]  ;;  %v9417_v46 = vmul.f32 %v9353_v42, %v9353_v42  ;;  %v9357_v11 = vsub.f32 %v11958_v49, %v19210_v1  ;;  %v9420_v34 = vmul.f32 %v9356_v51, %v9356_v51 }
 0x3ed   :  { %v9508_v24 = vadd.f32 %v9507_v57, %v9506_v50  ;;  %v9355_v44 = vsub.f32 %v11956_v59, %v19210_v1 }
 0x3ee   :  { %v8451_v2 = vadd.f32 %v8450_v60, %v8449_v4  ;;  %v9418_v4 = vmul.f32 %v9354_v35, %v9354_v35  ;;  %v9523_v50 = vsel %vm877_vm4, %v9417_v46, 0.0 }
 0x3ef   :  { %v9510_v29 = vadd.f32 %v9509_v17, %v9508_v24 }
 0x3f0   :  { %v8453_v58 = vadd.f32 %v8452_v40, %v8451_v2  ;;  %v9419_v2 = vmul.f32 %v9355_v44, %v9355_v44  ;;  %v9525_v57 = vsel %vm877_vm4, %v9418_v4, 0.0 }
 0x3f1   :  { %v9512_v7 = vadd.f32 %v9511_v18, %v9510_v29 }
 0x3f2   :  { %v8455_v39 = vadd.f32 %v8454_v55, %v8453_v58 }
 0x3f3   :  { %v9514_v27 = vadd.f32 %v9513_v31, %v9512_v7 }
 0x3f4   :  { %v8456_v26 = vrot.slane %v8455_v39, 4 }
 0x3f5   :  { %v9516_v32 = vadd.f32 %v9515_v37, %v9514_v27 }
 0x3f6   :  { %v8457_v8 = vadd.f32 %v8456_v26, %v8455_v39 }
 0x3f7   :  { %v9518_v45 = vadd.f32 %v9517_v15, %v9516_v32 }
 0x3f8   :  { %v8458_v54 = vrot.slane %v8457_v8, 2 }
 0x3f9   :  { %v9520_v63 = vadd.f32 %v9519_v3, %v9518_v45 }
 0x3fa   :  { %v8459_v30 = vadd.f32 %v8458_v54, %v8457_v8 }
 0x3fb   :  { %v9522_v48 = vadd.f32 %v9521_v23, %v9520_v63 }
 0x3fc   :  { %v8460_v53 = vrot.slane %v8459_v30, 1 }
 0x3fd   :  { %v9524_v20 = vadd.f32 %v9523_v50, %v9522_v48 }
 0x3fe   :  { %v8461_v60 = vadd.f32 %v8460_v53, %v8459_v30 }
 0x400   :  { %v8464_v40 = vsel %vm8463_vm5, %v8462_v61, %v8461_v60 }
 0x401   :  { %8466 = vst.msk [vmem:[#allocation3] sm:$0x3] %vm8465_vm6, %v8464_v40 }
 0x402   :  { %11979 = shalt.err (!%p11976_p4)
}
 0x403   :  { %9585 = dma.vmem_to_hbm [thread:$0]  %s9583_s12, 32, %s19664_s4, [#allocation4]   ;;  %v9526_v58 = vadd.f32 %v9525_v57, %v9524_v20  ;;  %v11960_v24 = vld [vmem:[%s19665_s5 + $0x188] sm:$0xff]  ;;  %v9421_v6 = vmul.f32 %v9357_v11, %v9357_v11  ;;  %v9527_v38 = vsel %vm877_vm4, %v9419_v2, 0.0  ;;  %v11961_v17 = vld [vmem:[%s19665_s5 + $0x190] sm:$0xff]  ;;  %v9422_v29 = vmul.f32 %v9358_v10, %v9358_v10  ;;  %v11962_v25 = vld [vmem:[%s19665_s5 + $0x198] sm:$0xff] }
 0x404   :  { %v9359_v55 = vsub.f32 %v11960_v24, %v19210_v1  ;;  %v9360_v39 = vsub.f32 %v11961_v17, %v19210_v1  ;;  %v9529_v52 = vsel %vm877_vm4, %v9420_v34, 0.0  ;;  %v9361_v18 = vsub.f32 %v11962_v25, %v19210_v1  ;;  %v11963_v56 = vld [vmem:[%s19665_s5 + $0x1a0] sm:$0xff]  ;;  %v11964_v36 = vld [vmem:[%s19665_s5 + $0x1a8] sm:$0xff]  ;;  %v11965_v32 = vld [vmem:[%s19665_s5 + $0x1b0] sm:$0xff] }
 0x405   :  { %v9528_v13 = vadd.f32 %v9527_v38, %v9526_v58  ;;  %v9531_v7 = vsel %vm877_vm4, %v9421_v6, 0.0  ;;  %v9362_v9 = vsub.f32 %v11963_v56, %v19210_v1  ;;  %v9533_v8 = vsel %vm877_vm4, %v9422_v29, 0.0  ;;  %v11966_v30 = vld [vmem:[%s19665_s5 + $0x1b8] sm:$0xff]  ;;  %v11967_v3 = vld [vmem:[%s19665_s5 + $0x1c0] sm:$0xff]  ;;  %s12014_s5 = smov [#allocation5]  }
 0x406   :  { %v9423_v26 = vmul.f32 %v9359_v55, %v9359_v55  ;;  %v9424_v31 = vmul.f32 %v9360_v39, %v9360_v39  ;;  %v9363_v42 = vsub.f32 %v11964_v36, %v19210_v1  ;;  %v9425_v41 = vmul.f32 %v9361_v18, %v9361_v18  ;;  %s9594_s9 = sshll.u32 %s12014_s5, 4  ;;  %s9595_s9 = int_to_ptr.vmem [resolvable:$true] %s9594_s9 }
 0x407   :  { %v9530_v12 = vadd.f32 %v9529_v52, %v9528_v13  ;;  %v9364_v19 = vsub.f32 %v11965_v32, %v19210_v1  ;;  %v9426_v35 = vmul.f32 %v9362_v9, %v9362_v9  ;;  %v9365_v45 = vsub.f32 %v11966_v30, %v19210_v1  ;;  %s11988_s10 = scalar_lea.vmem %s9595_s9, 32  ;;  %p11993_p6 = scmp.lt.s32.totalorder %s9595_s9, %s9595_s9 }
 0x408   :  { %v9535_v37 = vsel %vm877_vm4, %v9423_v26, 0.0  ;;  %v9537_v22 = vsel %vm877_vm4, %v9424_v31, 0.0  ;;  %v9427_v59 = vmul.f32 %v9363_v42, %v9363_v42  ;;  %v9539_v44 = vsel %vm877_vm4, %v9425_v41, 0.0  ;;  %p11989_p5 = scmp.ne.s32.totalorder %s9595_s9, %s11988_s10  ;;  %p11994_p7 = scmp.lt.s32.totalorder %s11988_s10, %s11988_s10 }
 0x409   :  { %v9532_v0 = vadd.f32 %v9531_v7, %v9530_v12  ;;  %v9366_v53 = vsub.f32 %v11967_v3, %v19210_v1  ;;  %v9428_v63 = vmul.f32 %v9364_v19, %v9364_v19  ;;  %v9541_v33 = vsel %vm877_vm4, %v9426_v35, 0.0 }
 0x40a   :  { %v9367_v4 = vsub.f32 %v19038_v47, %v19210_v1  ;;  %v9429_v23 = vmul.f32 %v9365_v45, %v9365_v45  ;;  %v9543_v60 = vsel %vm877_vm4, %v9427_v59, 0.0  ;;  %v9368_v48 = vsub.f32 %v19045_v43, %v19210_v1  ;;  %p11995_p8 = por %p11994_p7, %p11993_p6 }
 0x40b   :  { %v9534_v27 = vadd.f32 %v9533_v8, %v9532_v0  ;;  %v9430_v49 = vmul.f32 %v9366_v53, %v9366_v53  ;;  %v9545_v11 = vsel %vm877_vm4, %v9428_v63, 0.0  ;;  %v9369_v50 = vsub.f32 %v19052_v62, %v19210_v1 }
 0x40c   :  { %v9431_v40 = vmul.f32 %v9367_v4, %v9367_v4  ;;  %v9547_v20 = vsel %vm877_vm4, %v9429_v23, 0.0  ;;  %v9370_v47 = vsub.f32 %v19071_v16, %v19210_v1  ;;  %v9432_v10 = vmul.f32 %v9368_v48, %v9368_v48  ;;  %p11996_p9 = pnand %p11995_p8, %p11989_p5 }
 0x40d   :  { %v9536_v54 = vadd.f32 %v9535_v37, %v9534_v27  ;;  %v9549_v34 = vsel %vm877_vm4, %v9430_v49, 0.0  ;;  %v9371_v43 = vsub.f32 %v19086_v21, %v19210_v1  ;;  %v9433_v58 = vmul.f32 %v9369_v50, %v9369_v50 }
 0x40e   :  { %v9551_v24 = vsel %vm877_vm4, %v9431_v40, 0.0  ;;  %v9372_v62 = vsub.f32 %v19104_v14, %v19210_v1  ;;  %v9434_v6 = vmul.f32 %v9370_v47, %v9370_v47  ;;  %v9553_v38 = vsel %vm877_vm4, %v9432_v10, 0.0 }
 0x40f   :  { %v9538_v15 = vadd.f32 %v9537_v22, %v9536_v54  ;;  %v9373_v16 = vsub.f32 %v19121_v28, %v19210_v1  ;;  %v9435_v17 = vmul.f32 %v9371_v43, %v9371_v43  ;;  %v9555_v39 = vsel %vm877_vm4, %v9433_v58, 0.0 }
 0x410   :  { %v9436_v52 = vmul.f32 %v9372_v62, %v9372_v62  ;;  %v9557_v21 = vsel %vm877_vm4, %v9434_v6, 0.0  ;;  %v9571_v42 = vmul.f32 512.0, %v19210_v1 }
 0x411   :  { %v9540_v46 = vadd.f32 %v9539_v44, %v9538_v15  ;;  %v9437_v25 = vmul.f32 %v9373_v16, %v9373_v16  ;;  %v9559_v18 = vsel %vm877_vm4, %v9435_v17, 0.0 }
 0x412   :  { %v9561_v14 = vsel %vm877_vm4, %v9436_v52, 0.0 }
 0x413   :  { %v9542_v51 = vadd.f32 %v9541_v33, %v9540_v46  ;;  %v9563_v0 = vsel %vm877_vm4, %v9437_v25, 0.0 }
 0x415   :  { %v9544_v61 = vadd.f32 %v9543_v60, %v9542_v51 }
 0x417   :  { %v9546_v2 = vadd.f32 %v9545_v11, %v9544_v61 }
 0x419   :  { %v9548_v5 = vadd.f32 %v9547_v20, %v9546_v2 }
 0x41b   :  { %v9550_v57 = vadd.f32 %v9549_v34, %v9548_v5 }
 0x41d   :  { %v9552_v55 = vadd.f32 %v9551_v24, %v9550_v57 }
 0x41f   :  { %v9554_v13 = vadd.f32 %v9553_v38, %v9552_v55 }
 0x421   :  { %v9556_v29 = vadd.f32 %v9555_v39, %v9554_v13 }
 0x423   :  { %v9558_v12 = vadd.f32 %v9557_v21, %v9556_v29 }
 0x425   :  { %v9560_v26 = vadd.f32 %v9559_v18, %v9558_v12 }
 0x427   :  { %v9562_v7 = vadd.f32 %v9561_v14, %v9560_v26 }
 0x429   :  { %v9564_v56 = vadd.f32 %v9563_v0, %v9562_v7 }
 0x42b   :  { %v9565_v9 = vrot.slane %v9564_v56, 4 }
 0x42d   :  { %v9566_v28 = vadd.f32 %v9565_v9, %v9564_v56 }
 0x42f   :  { %v9567_v31 = vrot.slane %v9566_v28, 2 }
 0x431   :  { %v9568_v8 = vadd.f32 %v9567_v31, %v9566_v28 }
 0x433   :  { %v9569_v27 = vrot.slane %v9568_v8, 1 }
 0x435   :  { %v9570_v36 = vadd.f32 %v9569_v27, %v9568_v8 }
 0x437   :  { %v9572_v41 = vsel %vm8463_vm5, %v9571_v42, %v9570_v36 }
 0x438   :  { %9573 = vst.msk [vmem:[#allocation5] sm:$0x3] %vm8465_vm6, %v9572_v41 }
 0x439   :  { %11999 = shalt.err (!%p11996_p9)
}
 0x43a   :  { %9597 = dma.vmem_to_hbm [thread:$0]  %s9595_s9, 32, %s19666_s6, [#allocation6]  }
 0x43b   :  { %12008 = dma.done.wait [#allocation4], 32  }
 0x43c   :  { %12009 = vsyncadd [#allocation4], 4294967264 }
 0x43d   :  { %12010 = dma.done.wait [#allocation6], 32  }
 0x43e   :  { %12011 = vsyncadd [#allocation6], 4294967264 }
 0x43f   :  { %9608 = vsyncpa [#allocation4], 1 }
 0x440   :  { %9609 = vsyncpa [#allocation6], 1 }

</bundles_post_ra>
